<compile_context>
chip_gen: v7x
topology: tpu7x:2x2x1
jax: 0.10.0
libtpu: 0.0.40
codegen_flags: <defaults>
</compile_context>

<pallas_src>
import functools
import numpy as np
import jax
import jax.numpy as jnp
from jax.experimental import pallas as pl
from jax.experimental.pallas import tpu as pltpu

LN_EPS = 1e-5  # nn.LayerNorm default eps


# ----------------------------------------------------------------------------
# tiling / VMEM helpers
# ----------------------------------------------------------------------------
@functools.lru_cache(maxsize=None)
def _vmem_limit_bytes():
    """Generation-gated scoped-VMEM limit: ~3/4 of physical, capped at 64 MiB.
    v5e/v6e (128 MiB physical) -> 64 MiB; v7x (64 MiB physical) -> 48 MiB."""
    try:
        cap = int(pltpu.get_tpu_info().vmem_capacity_bytes)
    except Exception:
        cap = 128 << 20
    return int(min(cap * 3 // 4, 64 << 20))


def _pick_tile(dim, cap, mults):
    """Largest tile <= cap that divides `dim` and is a multiple of the first
    mult in `mults` dividing `dim`; falls back to the full dim (always legal
    for Pallas block shapes)."""
    for mult in mults:
        if dim % mult == 0:
            t = min(cap, dim)
            t -= t % mult
            while t >= mult:
                if dim % t == 0:
                    return t
                t -= mult
    return dim


# ----------------------------------------------------------------------------
# Pallas kernels
# ----------------------------------------------------------------------------
def _linear_kernel(*refs, nk, activation, has_ln, has_residual):
    """o = [LN](x) @ w + b [+gelu] [+residual].
    nk==1: single MXU pass, written straight to o_ref (no scratch).
    nk>1 : K-tiled with an f32 VMEM accumulator, epilogue at k==nk-1."""
    idx = 0
    x_ref = refs[idx]; idx += 1
    w_ref = refs[idx]; idx += 1
    b_ref = refs[idx]; idx += 1
    if has_ln:
        g_ref = refs[idx]; idx += 1
        be_ref = refs[idx]; idx += 1
    if has_residual:
        r_ref = refs[idx]; idx += 1
    o_ref = refs[idx]; idx += 1
    acc_ref = refs[idx] if nk > 1 else None

    def load_x():
        if has_ln:
            # fused LayerNorm prologue (requires tk == K); stats kept in f32.
            x = x_ref[...].astype(jnp.float32)
            mean = jnp.mean(x, axis=-1, keepdims=True)
            xc = x - mean
            var = jnp.mean(xc * xc, axis=-1, keepdims=True)  # biased (torch LN)
            x = xc * jax.lax.rsqrt(var + LN_EPS) * g_ref[...] + be_ref[...]
            return x.astype(jnp.bfloat16)
        return x_ref[...].astype(jnp.bfloat16)

    def epilogue(acc):
        y = acc + b_ref[...].astype(jnp.float32)
        if activation == "gelu":
            # TODO(synk): exact erf-GELU has no guaranteed Mosaic lowering;
            # tanh-approx GELU used in-kernel (runs on EUP).
            c = jnp.float32(0.7978845608028654)  # sqrt(2/pi)
            y = 0.5 * y * (1.0 + jnp.tanh(c * (y + 0.044715 * y * y * y)))
        if has_residual:
            y = y + r_ref[...].astype(jnp.float32)
        o_ref[...] = y.astype(o_ref.dtype)

    if nk == 1:
        epilogue(jnp.dot(load_x(), w_ref[...].astype(jnp.bfloat16),
                         preferred_element_type=jnp.float32))
    else:
        k = pl.program_id(2)

        @pl.when(k == 0)
        def _():
            acc_ref[...] = jnp.zeros_like(acc_ref)

        acc_ref[...] += jnp.dot(load_x(), w_ref[...].astype(jnp.bfloat16),
                                preferred_element_type=jnp.float32)

        @pl.when(k == nk - 1)
        def _():
            epilogue(acc_ref[...])


def _attn_kernel(qkv_ref, o_ref, *, num_heads):
    """One batch element per grid step. qkv tile is (1, T, 3D) bf16, heads
    sliced in-kernel directly from the ref; each head's (T, dh) result is
    stored into its o_ref lane slice (no concat, bounded live set).
    The softmax scale is pre-folded into the q columns of qkv_w."""
    D = o_ref.shape[-1]
    dh = D // num_heads
    for h in range(num_heads):
        qh = qkv_ref[0, :, h * dh:(h + 1) * dh].astype(jnp.bfloat16)
        kh = qkv_ref[0, :, D + h * dh:D + (h + 1) * dh].astype(jnp.bfloat16)
        vh = qkv_ref[0, :, 2 * D + h * dh:2 * D + (h + 1) * dh].astype(jnp.bfloat16)
        # contract last dims directly (no explicit k.T transpose); f32 scores
        s = jax.lax.dot_general(qh, kh, (((1,), (1,)), ((), ())),
                                preferred_element_type=jnp.float32)
        s = s - jnp.max(s, axis=-1, keepdims=True)
        p = jnp.exp(s)
        p = p * pl.reciprocal(jnp.sum(p, axis=-1, keepdims=True), approx=True)
        oh = jnp.dot(p.astype(jnp.bfloat16), vh,
                     preferred_element_type=jnp.float32)
        o_ref[0, :, h * dh:(h + 1) * dh] = oh.astype(o_ref.dtype)


def _loss_kernel(p_ref, t_ref, m_ref, o_ref, num_ref, den_ref):
    i = pl.program_id(0)

    @pl.when(i == 0)
    def _():
        num_ref[...] = jnp.zeros_like(num_ref)
        den_ref[...] = jnp.zeros_like(den_ref)

    d = p_ref[...].astype(jnp.float32) - t_ref[...].astype(jnp.float32)
    per_patch = jnp.mean(d * d, axis=-1, keepdims=True)   # (tr, 1)
    m = m_ref[...].astype(jnp.float32)                     # (tr, 1)
    # per-row accumulation only; cross-lane reduce deferred to the epilogue
    num_ref[...] += per_patch * m
    den_ref[...] += m

    @pl.when(i == pl.num_programs(0) - 1)
    def _():
        num = jnp.sum(num_ref[...])
        den = jnp.sum(den_ref[...])
        o_ref[...] = jnp.reshape(num / den, (1, 1))


# ----------------------------------------------------------------------------
# Pallas wrappers
# ----------------------------------------------------------------------------
def linear(x2d, w, b, *, ln=None, activation=None, residual=None,
           out_dtype=jnp.bfloat16):
    """y = [LN](x) @ w + b [+gelu] [+residual], tiled for MXU + pipelining."""
    M, K = x2d.shape
    N = w.shape[1]
    tm = _pick_tile(M, 512, (16, 8))          # bf16 activations -> 16 sublanes
    tn = _pick_tile(N, 1024, (256, 128))      # prefer 256-wide MXU panels
    tk = K if ln is not None else _pick_tile(K, 512, (256, 128))  # LN: full rows
    nk = K // tk
    grid = (M // tm, N // tn, nk)

    in_specs = [
        pl.BlockSpec((tm, tk), lambda i, j, k: (i, k)),
        pl.BlockSpec((tk, tn), lambda i, j, k: (k, j)),
        pl.BlockSpec((1, tn), lambda i, j, k: (0, j)),
    ]
    args = [x2d, w, b.reshape(1, N)]
    if ln is not None:
        g, beta = ln
        in_specs += [pl.BlockSpec((1, K), lambda i, j, k: (0, 0)),
                     pl.BlockSpec((1, K), lambda i, j, k: (0, 0))]
        args += [g.reshape(1, K), beta.reshape(1, K)]
    if residual is not None:
        in_specs.append(pl.BlockSpec((tm, tn), lambda i, j, k: (i, j)))
        args.append(residual)

    scratch = [pltpu.VMEM((tm, tn), jnp.float32)] if nk > 1 else []
    kern = functools.partial(_linear_kernel, nk=nk, activation=activation,
                             has_ln=ln is not None,
                             has_residual=residual is not None)
    return pl.pallas_call(
        kern,
        out_shape=jax.ShapeDtypeStruct((M, N), out_dtype),
        grid=grid,
        in_specs=in_specs,
        out_specs=pl.BlockSpec((tm, tn), lambda i, j, k: (i, j)),
        scratch_shapes=scratch,
        compiler_params=pltpu.CompilerParams(
            dimension_semantics=("parallel", "parallel", "arbitrary"),
            vmem_limit_bytes=_vmem_limit_bytes()),
    )(*args)


def attention(qkv, num_heads):
    """qkv: (B, T, 3D) packed bf16 activation straight from the qkv linear.
    TODO(synk): for small/odd B on v7x (2 TCs), an extra head-group grid axis
    would improve megacore balance; B is the only grid axis here."""
    B, T, D3 = qkv.shape
    D = D3 // 3
    kern = functools.partial(_attn_kernel, num_heads=num_heads)
    return pl.pallas_call(
        kern,
        out_shape=jax.ShapeDtypeStruct((B, T, D), jnp.bfloat16),
        grid=(B,),
        in_specs=[pl.BlockSpec((1, T, D3), lambda b: (b, 0, 0))],
        out_specs=pl.BlockSpec((1, T, D), lambda b: (b, 0, 0)),
        compiler_params=pltpu.CompilerParams(
            dimension_semantics=("parallel",),
            vmem_limit_bytes=_vmem_limit_bytes()),
    )(qkv)


def masked_mse_loss(pred, target, mask):
    N, L, P = pred.shape
    R = N * L
    p2 = pred.reshape(R, P)
    t2 = target.reshape(R, P)
    m2 = mask.reshape(R, 1)
    tr = _pick_tile(R, 1024, (16, 8))
    out = pl.pallas_call(
        _loss_kernel,
        out_shape=jax.ShapeDtypeStruct((1, 1), jnp.float32),
        grid=(R // tr,),
        in_specs=[
            pl.BlockSpec((tr, P), lambda i: (i, 0)),
            pl.BlockSpec((tr, P), lambda i: (i, 0)),
            pl.BlockSpec((tr, 1), lambda i: (i, 0)),
        ],
        out_specs=pl.BlockSpec((1, 1), lambda i: (0, 0)),
        scratch_shapes=[pltpu.VMEM((tr, 1), jnp.float32),
                        pltpu.VMEM((tr, 1), jnp.float32)],
        compiler_params=pltpu.CompilerParams(
            dimension_semantics=("arbitrary",),
            vmem_limit_bytes=_vmem_limit_bytes()),
    )(p2, t2, m2)
    return out[0, 0]


# ----------------------------------------------------------------------------
# Plain-JAX glue: patch ops, pos-embed, parameter init
# ----------------------------------------------------------------------------
def extract_patches_cpp(imgs, p):
    """im2col ordered (C, pi, pj) — matches Conv2d(kernel=stride=p) flattening."""
    N, C, H, W = imgs.shape
    h, w = H // p, W // p
    x = imgs.reshape(N, C, h, p, w, p)
    x = jnp.transpose(x, (0, 2, 4, 1, 3, 5))  # N, h, w, C, p, p
    return x.reshape(N, h * w, C * p * p)


def patchify(imgs, p):
    """MAE patchify: (N,C,H,W) -> (N, L, p*p*C) ordered (pi, pj, C)."""
    N, C, H, W = imgs.shape
    h = w = H // p
    x = imgs.reshape(N, C, h, p, w, p)
    x = jnp.einsum("nchpwq->nhwpqc", x)
    return x.reshape(N, h * w, p * p * C)


def unpatchify(x, p, c):
    N, L, _ = x.shape
    h = w = int(round(L ** 0.5))
    x = x.reshape(N, h, w, p, p, c)
    x = jnp.einsum("nhwpqc->nchpwq", x)
    return x.reshape(N, c, h * p, w * p)


def _sincos_1d(embed_dim, pos):
    omega = np.arange(embed_dim // 2, dtype=np.float64)
    omega /= embed_dim / 2.0
    omega = 1.0 / 10000 ** omega
    out = np.einsum("m,d->md", pos.reshape(-1), omega)
    return np.concatenate([np.sin(out), np.cos(out)], axis=1)


def get_2d_sincos_pos_embed(embed_dim, grid_size, cls_token=False):
    grid_h = np.arange(grid_size, dtype=np.float32)
    grid_w = np.arange(grid_size, dtype=np.float32)
    grid = np.stack(np.meshgrid(grid_w, grid_h), axis=0).reshape(2, -1)
    emb_h = _sincos_1d(embed_dim // 2, grid[0])
    emb_w = _sincos_1d(embed_dim // 2, grid[1])
    pe = np.concatenate([emb_h, emb_w], axis=1)
    if cls_token:
        pe = np.concatenate([np.zeros([1, embed_dim]), pe], axis=0)
    return jnp.asarray(pe, dtype=jnp.float32)


def init_block_params(key, dim, num_heads, mlp_ratio):
    k0, k1, k2, k3 = jax.random.split(key, 4)
    hidden = int(dim * mlp_ratio)
    s = 0.02
    f32, bf16 = jnp.float32, jnp.bfloat16
    # fold the attention softmax scale (dh**-0.5) into the q columns of qkv
    scale = (dim // num_heads) ** -0.5
    qkv_w = s * jax.random.normal(k0, (dim, 3 * dim), f32)
    qkv_w = qkv_w.at[:, :dim].multiply(scale)
    qkv_b = jnp.zeros((3 * dim,), f32)  # zero bias: scaling is a no-op
    return {
        "ln1_g": jnp.ones((1, dim), f32), "ln1_b": jnp.zeros((1, dim), f32),
        "qkv_w": qkv_w.astype(bf16),
        "qkv_b": qkv_b,
        "proj_w": (s * jax.random.normal(k1, (dim, dim), f32)).astype(bf16),
        "proj_b": jnp.zeros((dim,), f32),
        "ln2_g": jnp.ones((1, dim), f32), "ln2_b": jnp.zeros((1, dim), f32),
        "fc1_w": (s * jax.random.normal(k2, (dim, hidden), f32)).astype(bf16),
        "fc1_b": jnp.zeros((hidden,), f32),
        "fc2_w": (s * jax.random.normal(k3, (hidden, dim), f32)).astype(bf16),
        "fc2_b": jnp.zeros((dim,), f32),
    }


def init_params(key, cfg):
    p, C = cfg["patch_size"], cfg["in_chans"]
    D, Dd = cfg["embed_dim"], cfg["decoder_embed_dim"]
    gs = cfg["img_size"] // p
    keys = jax.random.split(key, 6 + cfg["depth"] + cfg["decoder_depth"])
    s = 0.02
    f32, bf16 = jnp.float32, jnp.bfloat16
    ki = iter(keys)
    enc = {
        "patch_w": (s * jax.random.normal(next(ki), (C * p * p, D), f32)).astype(bf16),
        "patch_b": jnp.zeros((D,), f32),
        "cls_token": s * jax.random.normal(next(ki), (1, D), f32),
        "pos_embed": get_2d_sincos_pos_embed(D, gs, cls_token=True),   # fixed
        "blocks": [init_block_params(next(ki), D, cfg["num_heads"], cfg["mlp_ratio"])
                   for _ in range(cfg["depth"])],
        "norm_g": jnp.ones((1, D), f32), "norm_b": jnp.zeros((1, D), f32),
    }
    dec = {
        "embed_w": (s * jax.random.normal(next(ki), (D, Dd), f32)).astype(bf16),
        "embed_b": jnp.zeros((Dd,), f32),
        "mask_token": s * jax.random.normal(next(ki), (Dd,), f32),
        "pos_embed": get_2d_sincos_pos_embed(Dd, gs, cls_token=True),  # fixed
        "blocks": [init_block_params(next(ki), Dd, cfg["decoder_num_heads"],
                                     cfg["mlp_ratio"])
                   for _ in range(cfg["decoder_depth"])],
        "norm_g": jnp.ones((1, Dd), f32), "norm_b": jnp.zeros((1, Dd), f32),
        "pred_w": (s * jax.random.normal(next(ki), (Dd, p * p * C), f32)).astype(bf16),
        "pred_b": jnp.zeros((p * p * C,), f32),
    }
    return {"enc": enc, "dec": dec}


# ----------------------------------------------------------------------------
# Transformer / MAE forward (compute in Pallas kernels)
# ----------------------------------------------------------------------------
def block_forward(x, bp, num_heads):
    B, T, D = x.shape
    x2 = x.reshape(B * T, D)                                   # bf16 residual
    # attention: LN fused into the qkv matmul prologue; heads stay packed.
    qkv = linear(x2, bp["qkv_w"], bp["qkv_b"],
                 ln=(bp["ln1_g"], bp["ln1_b"])).reshape(B, T, 3 * D)
    attn_out = attention(qkv, num_heads)                       # (B, T, D)
    # projection with residual add fused into the epilogue
    x2 = linear(attn_out.reshape(B * T, D), bp["proj_w"], bp["proj_b"],
                residual=x2)
    # mlp: LN fused into fc1 prologue, GELU fused into fc1 epilogue,
    # residual fused into fc2 epilogue.
    h = linear(x2, bp["fc1_w"], bp["fc1_b"],
               ln=(bp["ln2_g"], bp["ln2_b"]), activation="gelu")
    x2 = linear(h, bp["fc2_w"], bp["fc2_b"], residual=x2)
    return x2.reshape(B, T, D)


def encoder_forward(params, imgs, mask_ratio, noise_key, cfg):
    e = params["enc"]
    p, D, H = cfg["patch_size"], cfg["embed_dim"], cfg["num_heads"]
    N = imgs.shape[0]
    patches = extract_patches_cpp(imgs, p)                     # (N, L, C*p*p)
    L = patches.shape[1]
    x = linear(patches.reshape(N * L, -1), e["patch_w"], e["patch_b"]).reshape(N, L, D)
    x = (x + e["pos_embed"][1:][None]).astype(jnp.bfloat16)
    # random masking (data-dependent shuffle; plain-JAX glue)
    len_keep = int(L * (1 - mask_ratio))
    noise = jax.random.uniform(noise_key, (N, L))
    ids_shuffle = jnp.argsort(noise, axis=1)
    ids_restore = jnp.argsort(ids_shuffle, axis=1)
    ids_keep = ids_shuffle[:, :len_keep]
    x_masked = jnp.take_along_axis(
        x, jnp.broadcast_to(ids_keep[:, :, None], (N, len_keep, D)), axis=1)
    mask = jnp.ones((N, L), jnp.float32).at[:, :len_keep].set(0.0)
    mask = jnp.take_along_axis(mask, ids_restore, axis=1)
    # prepend cls token
    cls = (e["cls_token"] + e["pos_embed"][:1]).astype(jnp.bfloat16)
    x = jnp.concatenate([jnp.broadcast_to(cls[None], (N, 1, D)), x_masked], axis=1)
    for bp in e["blocks"]:
        x = block_forward(x, bp, H)
    # NOTE: encoder final LayerNorm is fused into the decoder embed linear.
    return x, mask, ids_restore


def decoder_forward(params, latent, ids_restore, cfg):
    e = params["enc"]
    d = params["dec"]
    H = cfg["decoder_num_heads"]
    N, T, D = latent.shape
    Dd = d["embed_w"].shape[1]
    L = ids_restore.shape[1]
    # encoder final norm fused into the decoder embedding linear (prologue LN)
    x = linear(latent.reshape(N * T, D), d["embed_w"], d["embed_b"],
               ln=(e["norm_g"], e["norm_b"])).reshape(N, T, Dd)
    mask_tokens = jnp.broadcast_to(
        d["mask_token"].astype(jnp.bfloat16)[None, None, :], (N, L + 1 - T, Dd))
    x_ = jnp.concatenate([x[:, 1:, :], mask_tokens], axis=1)
    x_ = jnp.take_along_axis(
        x_, jnp.broadcast_to(ids_restore[:, :, None], (N, L, Dd)), axis=1)  # unshuffle
    x = jnp.concatenate([x[:, :1, :], x_], axis=1)
    x = (x + d["pos_embed"][None]).astype(jnp.bfloat16)
    for bp in d["blocks"]:
        x = block_forward(x, bp, H)
    Tf = x.shape[1]
    # decoder final norm fused into the prediction linear; f32 output for loss
    pred = linear(x.reshape(N * Tf, Dd), d["pred_w"], d["pred_b"],
                  ln=(d["norm_g"], d["norm_b"]),
                  out_dtype=jnp.float32).reshape(N, Tf, -1)
    return pred[:, 1:, :]


def mae_forward(params, imgs, mask_ratio, noise_key, cfg):
    latent, mask, ids_restore = encoder_forward(params, imgs, mask_ratio, noise_key, cfg)
    pred = decoder_forward(params, latent, ids_restore, cfg)
    # forward_loss (norm_pix_loss=False)
    target = patchify(imgs, cfg["patch_size"])
    loss = masked_mse_loss(pred, target, mask)
    pred_corrected = unpatchify(pred, cfg["patch_size"], cfg["in_chans"])
    return loss, pred_corrected, mask


# ----------------------------------------------------------------------------
if __name__ == "__main__":
    cfg = dict(
        img_size=16, patch_size=4, in_chans=3,
        embed_dim=32, depth=2, num_heads=4,
        decoder_embed_dim=32, decoder_depth=2, decoder_num_heads=4,
        mlp_ratio=4.0,
    )
    key = jax.random.PRNGKey(0)
    pkey, ikey, nkey = jax.random.split(key, 3)
    params = init_params(pkey, cfg)
    imgs = jax.random.normal(
        ikey, (2, cfg["in_chans"], cfg["img_size"], cfg["img_size"]), jnp.float32)

    fwd = jax.jit(lambda p, im, k: mae_forward(p, im, 0.75, k, cfg))
    loss, pred_corrected, mask = fwd(params, imgs, nkey)
    jax.block_until_ready((loss, pred_corrected, mask))

    L = (cfg["img_size"] // cfg["patch_size"]) ** 2
    assert pred_corrected.shape == imgs.shape
    assert mask.shape == (2, L)
    assert loss.shape == ()
    assert bool(jnp.isfinite(loss))
    print("KERNEL_OK")
</pallas_src>

<mosaic_0001>
module attributes {stable_mosaic.version = 11 : i64} {
  func.func @_linear_kernel(%arg0: i32, %arg1: i32, %arg2: i32, %arg3: memref<32x48xf32, #tpu.memory_space<vmem>>, %arg4: memref<48x32xbf16, #tpu.memory_space<vmem>>, %arg5: memref<1x32xf32, #tpu.memory_space<vmem>>, %arg6: memref<32x32xbf16, #tpu.memory_space<vmem>>) attributes {dimension_semantics = [#tpu.dimension_semantics<parallel>, #tpu.dimension_semantics<parallel>, #tpu.dimension_semantics<arbitrary>], iteration_bounds = array<i64: 1, 1, 1>, scalar_prefetch = 0 : i64, scratch_operands = 0 : i64, tpu.core_type = #tpu.core_type<tc>, window_params = [{transform_indices = @transform_0, window_bounds = array<i64: 32, 48>}, {transform_indices = @transform_1, window_bounds = array<i64: 48, 32>}, {transform_indices = @transform_2, window_bounds = array<i64: 1, 32>}, {transform_indices = @transform_3, window_bounds = array<i64: 32, 32>}]} {
    %c0 = arith.constant 0 : index
    %c0_0 = arith.constant 0 : index
    %0 = vector.load %arg3[%c0, %c0_0] : memref<32x48xf32, #tpu.memory_space<vmem>>, vector<32x48xf32>
    %1 = arith.truncf %0 : vector<32x48xf32> to vector<32x48xbf16>
    %c0_1 = arith.constant 0 : index
    %c0_2 = arith.constant 0 : index
    %2 = vector.load %arg4[%c0_1, %c0_2] : memref<48x32xbf16, #tpu.memory_space<vmem>>, vector<48x32xbf16>
    %cst = arith.constant dense<0.000000e+00> : vector<32x32xf32>
    %3 = tpu.matmul %1, %2, %cst {dimension_numbers = #tpu.dot_dimension_numbers<[1], [0], [0], [1], [0, 0, 1, 1], [], []>} : vector<32x48xbf16>, vector<48x32xbf16>, vector<32x32xf32> -> vector<32x32xf32>
    %c0_3 = arith.constant 0 : index
    %c0_4 = arith.constant 0 : index
    %4 = vector.load %arg5[%c0_3, %c0_4] : memref<1x32xf32, #tpu.memory_space<vmem>>, vector<1x32xf32>
    %5 = vector.broadcast %4 : vector<1x32xf32> to vector<32x32xf32>
    %6 = arith.addf %3, %5 : vector<32x32xf32>
    %7 = arith.truncf %6 : vector<32x32xf32> to vector<32x32xbf16>
    %c0_5 = arith.constant 0 : index
    %c0_6 = arith.constant 0 : index
    %8 = vector.load %arg6[%c0_5, %c0_6] : memref<32x32xbf16, #tpu.memory_space<vmem>>, vector<32x32xbf16>
    tpu.vector_store %arg6[%c0_5, %c0_6], %7 {strides = array<i32>} : memref<32x32xbf16, #tpu.memory_space<vmem>>, vector<32x32xbf16>,
    return
  }
  func.func @transform_0(%arg0: i32, %arg1: i32, %arg2: i32) -> (i32, i32) {
    %c0_i32 = arith.constant 0 : i32
    return %arg0, %arg2 : i32, i32
  }
  func.func @transform_1(%arg0: i32, %arg1: i32, %arg2: i32) -> (i32, i32) {
    %c0_i32 = arith.constant 0 : i32
    return %arg2, %arg1 : i32, i32
  }
  func.func @transform_2(%arg0: i32, %arg1: i32, %arg2: i32) -> (i32, i32) {
    %c0_i32 = arith.constant 0 : i32
    %c0_i32_0 = arith.constant 0 : i32
    return %c0_i32, %arg1 : i32, i32
  }
  func.func @transform_3(%arg0: i32, %arg1: i32, %arg2: i32) -> (i32, i32) {
    %c0_i32 = arith.constant 0 : i32
    return %arg0, %arg1 : i32, i32
  }
}

module attributes {stable_mosaic.version = 11 : i64} {
  func.func @_linear_kernel(%arg0: i32, %arg1: i32, %arg2: i32, %arg3: memref<10x32xbf16, #tpu.memory_space<vmem>>, %arg4: memref<32x96xbf16, #tpu.memory_space<vmem>>, %arg5: memref<1x96xf32, #tpu.memory_space<vmem>>, %arg6: memref<1x32xf32, #tpu.memory_space<vmem>>, %arg7: memref<1x32xf32, #tpu.memory_space<vmem>>, %arg8: memref<10x96xbf16, #tpu.memory_space<vmem>>) attributes {dimension_semantics = [#tpu.dimension_semantics<parallel>, #tpu.dimension_semantics<parallel>, #tpu.dimension_semantics<arbitrary>], iteration_bounds = array<i64: 1, 1, 1>, scalar_prefetch = 0 : i64, scratch_operands = 0 : i64, tpu.core_type = #tpu.core_type<tc>, window_params = [{transform_indices = @transform_0, window_bounds = array<i64: 10, 32>}, {transform_indices = @transform_1, window_bounds = array<i64: 32, 96>}, {transform_indices = @transform_2, window_bounds = array<i64: 1, 96>}, {pipeline_mode = #tpu.pipeline_mode<synchronous>, transform_indices = @transform_3, window_bounds = array<i64: 1, 32>}, {pipeline_mode = #tpu.pipeline_mode<synchronous>, transform_indices = @transform_4, window_bounds = array<i64: 1, 32>}, {transform_indices = @transform_5, window_bounds = array<i64: 10, 96>}]} {
    %c0 = arith.constant 0 : index
    %c0_0 = arith.constant 0 : index
    %0 = vector.load %arg3[%c0, %c0_0] : memref<10x32xbf16, #tpu.memory_space<vmem>>, vector<10x32xbf16>
    %1 = arith.extf %0 : vector<10x32xbf16> to vector<10x32xf32>
    %cst = arith.constant dense<0.000000e+00> : vector<10xf32>
    %2 = vector.multi_reduction <add>, %1, %cst [1] : vector<10x32xf32> to vector<10xf32>
    %3 = vector.shape_cast %2 : vector<10xf32> to vector<10x1xf32>
    %cst_1 = arith.constant 3.200000e+01 : f32
    %4 = vector.broadcast %cst_1 : f32 to vector<10x1xf32>
    %5 = arith.divf %3, %4 : vector<10x1xf32>
    %6 = vector.broadcast %5 : vector<10x1xf32> to vector<10x32xf32>
    %7 = arith.subf %1, %6 : vector<10x32xf32>
    %8 = arith.mulf %7, %7 : vector<10x32xf32>
    %cst_2 = arith.constant dense<0.000000e+00> : vector<10xf32>
    %9 = vector.multi_reduction <add>, %8, %cst_2 [1] : vector<10x32xf32> to vector<10xf32>
    %10 = vector.shape_cast %9 : vector<10xf32> to vector<10x1xf32>
    %cst_3 = arith.constant 3.200000e+01 : f32
    %11 = vector.broadcast %cst_3 : f32 to vector<10x1xf32>
    %12 = arith.divf %10, %11 : vector<10x1xf32>
    %cst_4 = arith.constant 9.99999974E-6 : f32
    %13 = vector.broadcast %cst_4 : f32 to vector<10x1xf32>
    %14 = arith.addf %12, %13 : vector<10x1xf32>
    %15 = math.rsqrt %14 : vector<10x1xf32>
    %16 = vector.broadcast %15 : vector<10x1xf32> to vector<10x32xf32>
    %17 = arith.mulf %7, %16 : vector<10x32xf32>
    %c0_5 = arith.constant 0 : index
    %c0_6 = arith.constant 0 : index
    %18 = vector.load %arg6[%c0_5, %c0_6] : memref<1x32xf32, #tpu.memory_space<vmem>>, vector<1x32xf32>
    %19 = vector.broadcast %18 : vector<1x32xf32> to vector<10x32xf32>
    %20 = arith.mulf %17, %19 : vector<10x32xf32>
    %c0_7 = arith.constant 0 : index
    %c0_8 = arith.constant 0 : index
    %21 = vector.load %arg7[%c0_7, %c0_8] : memref<1x32xf32, #tpu.memory_space<vmem>>, vector<1x32xf32>
    %22 = vector.broadcast %21 : vector<1x32xf32> to vector<10x32xf32>
    %23 = arith.addf %20, %22 : vector<10x32xf32>
    %24 = arith.truncf %23 : vector<10x32xf32> to vector<10x32xbf16>
    %c0_9 = arith.constant 0 : index
    %c0_10 = arith.constant 0 : index
    %25 = vector.load %arg4[%c0_9, %c0_10] : memref<32x96xbf16, #tpu.memory_space<vmem>>, vector<32x96xbf16>
    %cst_11 = arith.constant dense<0.000000e+00> : vector<10x96xf32>
    %26 = tpu.matmul %24, %25, %cst_11 {dimension_numbers = #tpu.dot_dimension_numbers<[1], [0], [0], [1], [0, 0, 1, 1], [], []>} : vector<10x32xbf16>, vector<32x96xbf16>, vector<10x96xf32> -> vector<10x96xf32>
    %c0_12 = arith.constant 0 : index
    %c0_13 = arith.constant 0 : index
    %27 = vector.load %arg5[%c0_12, %c0_13] : memref<1x96xf32, #tpu.memory_space<vmem>>, vector<1x96xf32>
    %28 = vector.broadcast %27 : vector<1x96xf32> to vector<10x96xf32>
    %29 = arith.addf %26, %28 : vector<10x96xf32>
    %30 = arith.truncf %29 : vector<10x96xf32> to vector<10x96xbf16>
    %c0_14 = arith.constant 0 : index
    %c0_15 = arith.constant 0 : index
    %31 = vector.load %arg8[%c0_14, %c0_15] : memref<10x96xbf16, #tpu.memory_space<vmem>>, vector<10x96xbf16>
    tpu.vector_store %arg8[%c0_14, %c0_15], %30 {strides = array<i32>} : memref<10x96xbf16, #tpu.memory_space<vmem>>, vector<10x96xbf16>,
    return
  }
  func.func @transform_0(%arg0: i32, %arg1: i32, %arg2: i32) -> (i32, i32) {
    %c0_i32 = arith.constant 0 : i32
    return %arg0, %arg2 : i32, i32
  }
  func.func @transform_1(%arg0: i32, %arg1: i32, %arg2: i32) -> (i32, i32) {
    %c0_i32 = arith.constant 0 : i32
    return %arg2, %arg1 : i32, i32
  }
  func.func @transform_2(%arg0: i32, %arg1: i32, %arg2: i32) -> (i32, i32) {
    %c0_i32 = arith.constant 0 : i32
    %c0_i32_0 = arith.constant 0 : i32
    return %c0_i32, %arg1 : i32, i32
  }
  func.func @transform_3(%arg0: i32, %arg1: i32, %arg2: i32) -> (i32, i32) {
    %c0_i32 = arith.constant 0 : i32
    %c0_i32_0 = arith.constant 0 : i32
    %c0_i32_1 = arith.constant 0 : i32
    return %c0_i32, %c0_i32_0 : i32, i32
  }
  func.func @transform_4(%arg0: i32, %arg1: i32, %arg2: i32) -> (i32, i32) {
    %c0_i32 = arith.constant 0 : i32
    %c0_i32_0 = arith.constant 0 : i32
    %c0_i32_1 = arith.constant 0 : i32
    return %c0_i32, %c0_i32_0 : i32, i32
  }
  func.func @transform_5(%arg0: i32, %arg1: i32, %arg2: i32) -> (i32, i32) {
    %c0_i32 = arith.constant 0 : i32
    return %arg0, %arg1 : i32, i32
  }
}

module attributes {stable_mosaic.version = 11 : i64} {
  func.func @_attn_kernel(%arg0: i32, %arg1: memref<1x5x96xbf16, #tpu.memory_space<vmem>>, %arg2: memref<1x5x32xbf16, #tpu.memory_space<vmem>>) attributes {dimension_semantics = [#tpu.dimension_semantics<parallel>], iteration_bounds = array<i64: 2>, scalar_prefetch = 0 : i64, scratch_operands = 0 : i64, tpu.core_type = #tpu.core_type<tc>, window_params = [{transform_indices = @transform_0, window_bounds = array<i64: 1, 5, 96>}, {transform_indices = @transform_1, window_bounds = array<i64: 1, 5, 32>}]} {
    %c0 = arith.constant 0 : index
    %c0_0 = arith.constant 0 : index
    %c0_1 = arith.constant 0 : index
    %0 = vector.load %arg1[%c0, %c0_0, %c0_1] : memref<1x5x96xbf16, #tpu.memory_space<vmem>>, vector<1x5x8xbf16>
    %1 = vector.shape_cast %0 : vector<1x5x8xbf16> to vector<5x8xbf16>
    %c0_2 = arith.constant 0 : index
    %c0_3 = arith.constant 0 : index
    %c32 = arith.constant 32 : index
    %2 = vector.load %arg1[%c0_2, %c0_3, %c32] : memref<1x5x96xbf16, #tpu.memory_space<vmem>>, vector<1x5x8xbf16>
    %3 = vector.shape_cast %2 : vector<1x5x8xbf16> to vector<5x8xbf16>
    %c0_4 = arith.constant 0 : index
    %c0_5 = arith.constant 0 : index
    %c64 = arith.constant 64 : index
    %4 = vector.load %arg1[%c0_4, %c0_5, %c64] : memref<1x5x96xbf16, #tpu.memory_space<vmem>>, vector<1x5x8xbf16>
    %5 = vector.shape_cast %4 : vector<1x5x8xbf16> to vector<5x8xbf16>
    %cst = arith.constant dense<0.000000e+00> : vector<5x5xf32>
    %6 = tpu.matmul %1, %3, %cst {dimension_numbers = #tpu.dot_dimension_numbers<[1], [1], [0], [0], [0, 0, 1, 0], [], []>} : vector<5x8xbf16>, vector<5x8xbf16>, vector<5x5xf32> -> vector<5x5xf32>
    %cst_6 = arith.constant dense<0xFF800000> : vector<5xf32>
    %7 = vector.multi_reduction <maximumf>, %6, %cst_6 [1] : vector<5x5xf32> to vector<5xf32>
    %8 = vector.shape_cast %7 : vector<5xf32> to vector<5x1xf32>
    %9 = vector.broadcast %8 : vector<5x1xf32> to vector<5x5xf32>
    %10 = arith.subf %6, %9 : vector<5x5xf32>
    %11 = math.exp %10 : vector<5x5xf32>
    %cst_7 = arith.constant dense<0.000000e+00> : vector<5xf32>
    %12 = vector.multi_reduction <add>, %11, %cst_7 [1] : vector<5x5xf32> to vector<5xf32>
    %13 = vector.shape_cast %12 : vector<5xf32> to vector<5x1xf32>
    %14 = tpu.reciprocal %13 {approx = true} : vector<5x1xf32> -> vector<5x1xf32>
    %15 = vector.broadcast %14 : vector<5x1xf32> to vector<5x5xf32>
    %16 = arith.mulf %11, %15 : vector<5x5xf32>
    %17 = arith.truncf %16 : vector<5x5xf32> to vector<5x5xbf16>
    %cst_8 = arith.constant dense<0.000000e+00> : vector<5x8xf32>
    %18 = tpu.matmul %17, %5, %cst_8 {dimension_numbers = #tpu.dot_dimension_numbers<[1], [0], [0], [1], [0, 0, 1, 1], [], []>} : vector<5x5xbf16>, vector<5x8xbf16>, vector<5x8xf32> -> vector<5x8xf32>
    %19 = arith.truncf %18 : vector<5x8xf32> to vector<5x8xbf16>
    %c0_9 = arith.constant 0 : index
    %c0_10 = arith.constant 0 : index
    %c0_11 = arith.constant 0 : index
    %20 = vector.load %arg2[%c0_9, %c0_10, %c0_11] : memref<1x5x32xbf16, #tpu.memory_space<vmem>>, vector<1x5x8xbf16>
    %21 = vector.shape_cast %20 : vector<1x5x8xbf16> to vector<5x8xbf16>
    %22 = vector.shape_cast %19 : vector<5x8xbf16> to vector<1x5x8xbf16>
    tpu.vector_store %arg2[%c0_9, %c0_10, %c0_11], %22 {strides = array<i32>} : memref<1x5x32xbf16, #tpu.memory_space<vmem>>, vector<1x5x8xbf16>,
    %c0_12 = arith.constant 0 : index
    %c0_13 = arith.constant 0 : index
    %c8 = arith.constant 8 : index
    %23 = vector.load %arg1[%c0_12, %c0_13, %c8] : memref<1x5x96xbf16, #tpu.memory_space<vmem>>, vector<1x5x8xbf16>
    %24 = vector.shape_cast %23 : vector<1x5x8xbf16> to vector<5x8xbf16>
    %c0_14 = arith.constant 0 : index
    %c0_15 = arith.constant 0 : index
    %c40 = arith.constant 40 : index
    %25 = vector.load %arg1[%c0_14, %c0_15, %c40] : memref<1x5x96xbf16, #tpu.memory_space<vmem>>, vector<1x5x8xbf16>
    %26 = vector.shape_cast %25 : vector<1x5x8xbf16> to vector<5x8xbf16>
    %c0_16 = arith.constant 0 : index
    %c0_17 = arith.constant 0 : index
    %c72 = arith.constant 72 : index
    %27 = vector.load %arg1[%c0_16, %c0_17, %c72] : memref<1x5x96xbf16, #tpu.memory_space<vmem>>, vector<1x5x8xbf16>
    %28 = vector.shape_cast %27 : vector<1x5x8xbf16> to vector<5x8xbf16>
    %cst_18 = arith.constant dense<0.000000e+00> : vector<5x5xf32>
    %29 = tpu.matmul %24, %26, %cst_18 {dimension_numbers = #tpu.dot_dimension_numbers<[1], [1], [0], [0], [0, 0, 1, 0], [], []>} : vector<5x8xbf16>, vector<5x8xbf16>, vector<5x5xf32> -> vector<5x5xf32>
    %cst_19 = arith.constant dense<0xFF800000> : vector<5xf32>
    %30 = vector.multi_reduction <maximumf>, %29, %cst_19 [1] : vector<5x5xf32> to vector<5xf32>
    %31 = vector.shape_cast %30 : vector<5xf32> to vector<5x1xf32>
    %32 = vector.broadcast %31 : vector<5x1xf32> to vector<5x5xf32>
    %33 = arith.subf %29, %32 : vector<5x5xf32>
    %34 = math.exp %33 : vector<5x5xf32>
    %cst_20 = arith.constant dense<0.000000e+00> : vector<5xf32>
    %35 = vector.multi_reduction <add>, %34, %cst_20 [1] : vector<5x5xf32> to vector<5xf32>
    %36 = vector.shape_cast %35 : vector<5xf32> to vector<5x1xf32>
    %37 = tpu.reciprocal %36 {approx = true} : vector<5x1xf32> -> vector<5x1xf32>
    %38 = vector.broadcast %37 : vector<5x1xf32> to vector<5x5xf32>
    %39 = arith.mulf %34, %38 : vector<5x5xf32>
    %40 = arith.truncf %39 : vector<5x5xf32> to vector<5x5xbf16>
    %cst_21 = arith.constant dense<0.000000e+00> : vector<5x8xf32>
    %41 = tpu.matmul %40, %28, %cst_21 {dimension_numbers = #tpu.dot_dimension_numbers<[1], [0], [0], [1], [0, 0, 1, 1], [], []>} : vector<5x5xbf16>, vector<5x8xbf16>, vector<5x8xf32> -> vector<5x8xf32>
    %42 = arith.truncf %41 : vector<5x8xf32> to vector<5x8xbf16>
    %c0_22 = arith.constant 0 : index
    %c0_23 = arith.constant 0 : index
    %c8_24 = arith.constant 8 : index
    %43 = vector.load %arg2[%c0_22, %c0_23, %c8_24] : memref<1x5x32xbf16, #tpu.memory_space<vmem>>, vector<1x5x8xbf16>
    %44 = vector.shape_cast %43 : vector<1x5x8xbf16> to vector<5x8xbf16>
    %45 = vector.shape_cast %42 : vector<5x8xbf16> to vector<1x5x8xbf16>
    tpu.vector_store %arg2[%c0_22, %c0_23, %c8_24], %45 {strides = array<i32>} : memref<1x5x32xbf16, #tpu.memory_space<vmem>>, vector<1x5x8xbf16>,
    %c0_25 = arith.constant 0 : index
    %c0_26 = arith.constant 0 : index
    %c16 = arith.constant 16 : index
    %46 = vector.load %arg1[%c0_25, %c0_26, %c16] : memref<1x5x96xbf16, #tpu.memory_space<vmem>>, vector<1x5x8xbf16>
    %47 = vector.shape_cast %46 : vector<1x5x8xbf16> to vector<5x8xbf16>
    %c0_27 = arith.constant 0 : index
    %c0_28 = arith.constant 0 : index
    %c48 = arith.constant 48 : index
    %48 = vector.load %arg1[%c0_27, %c0_28, %c48] : memref<1x5x96xbf16, #tpu.memory_space<vmem>>, vector<1x5x8xbf16>
    %49 = vector.shape_cast %48 : vector<1x5x8xbf16> to vector<5x8xbf16>
    %c0_29 = arith.constant 0 : index
    %c0_30 = arith.constant 0 : index
    %c80 = arith.constant 80 : index
    %50 = vector.load %arg1[%c0_29, %c0_30, %c80] : memref<1x5x96xbf16, #tpu.memory_space<vmem>>, vector<1x5x8xbf16>
    %51 = vector.shape_cast %50 : vector<1x5x8xbf16> to vector<5x8xbf16>
    %cst_31 = arith.constant dense<0.000000e+00> : vector<5x5xf32>
    %52 = tpu.matmul %47, %49, %cst_31 {dimension_numbers = #tpu.dot_dimension_numbers<[1], [1], [0], [0], [0, 0, 1, 0], [], []>} : vector<5x8xbf16>, vector<5x8xbf16>, vector<5x5xf32> -> vector<5x5xf32>
    %cst_32 = arith.constant dense<0xFF800000> : vector<5xf32>
    %53 = vector.multi_reduction <maximumf>, %52, %cst_32 [1] : vector<5x5xf32> to vector<5xf32>
    %54 = vector.shape_cast %53 : vector<5xf32> to vector<5x1xf32>
    %55 = vector.broadcast %54 : vector<5x1xf32> to vector<5x5xf32>
    %56 = arith.subf %52, %55 : vector<5x5xf32>
    %57 = math.exp %56 : vector<5x5xf32>
    %cst_33 = arith.constant dense<0.000000e+00> : vector<5xf32>
    %58 = vector.multi_reduction <add>, %57, %cst_33 [1] : vector<5x5xf32> to vector<5xf32>
    %59 = vector.shape_cast %58 : vector<5xf32> to vector<5x1xf32>
    %60 = tpu.reciprocal %59 {approx = true} : vector<5x1xf32> -> vector<5x1xf32>
    %61 = vector.broadcast %60 : vector<5x1xf32> to vector<5x5xf32>
    %62 = arith.mulf %57, %61 : vector<5x5xf32>
    %63 = arith.truncf %62 : vector<5x5xf32> to vector<5x5xbf16>
    %cst_34 = arith.constant dense<0.000000e+00> : vector<5x8xf32>
    %64 = tpu.matmul %63, %51, %cst_34 {dimension_numbers = #tpu.dot_dimension_numbers<[1], [0], [0], [1], [0, 0, 1, 1], [], []>} : vector<5x5xbf16>, vector<5x8xbf16>, vector<5x8xf32> -> vector<5x8xf32>
    %65 = arith.truncf %64 : vector<5x8xf32> to vector<5x8xbf16>
    %c0_35 = arith.constant 0 : index
    %c0_36 = arith.constant 0 : index
    %c16_37 = arith.constant 16 : index
    %66 = vector.load %arg2[%c0_35, %c0_36, %c16_37] : memref<1x5x32xbf16, #tpu.memory_space<vmem>>, vector<1x5x8xbf16>
    %67 = vector.shape_cast %66 : vector<1x5x8xbf16> to vector<5x8xbf16>
    %68 = vector.shape_cast %65 : vector<5x8xbf16> to vector<1x5x8xbf16>
    tpu.vector_store %arg2[%c0_35, %c0_36, %c16_37], %68 {strides = array<i32>} : memref<1x5x32xbf16, #tpu.memory_space<vmem>>, vector<1x5x8xbf16>,
    %c0_38 = arith.constant 0 : index
    %c0_39 = arith.constant 0 : index
    %c24 = arith.constant 24 : index
    %69 = vector.load %arg1[%c0_38, %c0_39, %c24] : memref<1x5x96xbf16, #tpu.memory_space<vmem>>, vector<1x5x8xbf16>
    %70 = vector.shape_cast %69 : vector<1x5x8xbf16> to vector<5x8xbf16>
    %c0_40 = arith.constant 0 : index
    %c0_41 = arith.constant 0 : index
    %c56 = arith.constant 56 : index
    %71 = vector.load %arg1[%c0_40, %c0_41, %c56] : memref<1x5x96xbf16, #tpu.memory_space<vmem>>, vector<1x5x8xbf16>
    %72 = vector.shape_cast %71 : vector<1x5x8xbf16> to vector<5x8xbf16>
    %c0_42 = arith.constant 0 : index
    %c0_43 = arith.constant 0 : index
    %c88 = arith.constant 88 : index
    %73 = vector.load %arg1[%c0_42, %c0_43, %c88] : memref<1x5x96xbf16, #tpu.memory_space<vmem>>, vector<1x5x8xbf16>
    %74 = vector.shape_cast %73 : vector<1x5x8xbf16> to vector<5x8xbf16>
    %cst_44 = arith.constant dense<0.000000e+00> : vector<5x5xf32>
    %75 = tpu.matmul %70, %72, %cst_44 {dimension_numbers = #tpu.dot_dimension_numbers<[1], [1], [0], [0], [0, 0, 1, 0], [], []>} : vector<5x8xbf16>, vector<5x8xbf16>, vector<5x5xf32> -> vector<5x5xf32>
    %cst_45 = arith.constant dense<0xFF800000> : vector<5xf32>
    %76 = vector.multi_reduction <maximumf>, %75, %cst_45 [1] : vector<5x5xf32> to vector<5xf32>
    %77 = vector.shape_cast %76 : vector<5xf32> to vector<5x1xf32>
    %78 = vector.broadcast %77 : vector<5x1xf32> to vector<5x5xf32>
    %79 = arith.subf %75, %78 : vector<5x5xf32>
    %80 = math.exp %79 : vector<5x5xf32>
    %cst_46 = arith.constant dense<0.000000e+00> : vector<5xf32>
    %81 = vector.multi_reduction <add>, %80, %cst_46 [1] : vector<5x5xf32> to vector<5xf32>
    %82 = vector.shape_cast %81 : vector<5xf32> to vector<5x1xf32>
    %83 = tpu.reciprocal %82 {approx = true} : vector<5x1xf32> -> vector<5x1xf32>
    %84 = vector.broadcast %83 : vector<5x1xf32> to vector<5x5xf32>
    %85 = arith.mulf %80, %84 : vector<5x5xf32>
    %86 = arith.truncf %85 : vector<5x5xf32> to vector<5x5xbf16>
    %cst_47 = arith.constant dense<0.000000e+00> : vector<5x8xf32>
    %87 = tpu.matmul %86, %74, %cst_47 {dimension_numbers = #tpu.dot_dimension_numbers<[1], [0], [0], [1], [0, 0, 1, 1], [], []>} : vector<5x5xbf16>, vector<5x8xbf16>, vector<5x8xf32> -> vector<5x8xf32>
    %88 = arith.truncf %87 : vector<5x8xf32> to vector<5x8xbf16>
    %c0_48 = arith.constant 0 : index
    %c0_49 = arith.constant 0 : index
    %c24_50 = arith.constant 24 : index
    %89 = vector.load %arg2[%c0_48, %c0_49, %c24_50] : memref<1x5x32xbf16, #tpu.memory_space<vmem>>, vector<1x5x8xbf16>
    %90 = vector.shape_cast %89 : vector<1x5x8xbf16> to vector<5x8xbf16>
    %91 = vector.shape_cast %88 : vector<5x8xbf16> to vector<1x5x8xbf16>
    tpu.vector_store %arg2[%c0_48, %c0_49, %c24_50], %91 {strides = array<i32>} : memref<1x5x32xbf16, #tpu.memory_space<vmem>>, vector<1x5x8xbf16>,
    return
  }
  func.func @transform_0(%arg0: i32) -> (i32, i32, i32) {
    %c0_i32 = arith.constant 0 : i32
    %c0_i32_0 = arith.constant 0 : i32
    %c0_i32_1 = arith.constant 0 : i32
    return %arg0, %c0_i32, %c0_i32_0 : i32, i32, i32
  }
  func.func @transform_1(%arg0: i32) -> (i32, i32, i32) {
    %c0_i32 = arith.constant 0 : i32
    %c0_i32_0 = arith.constant 0 : i32
    %c0_i32_1 = arith.constant 0 : i32
    return %arg0, %c0_i32, %c0_i32_0 : i32, i32, i32
  }
}

module attributes {stable_mosaic.version = 11 : i64} {
  func.func @_linear_kernel(%arg0: i32, %arg1: i32, %arg2: i32, %arg3: memref<10x32xbf16, #tpu.memory_space<vmem>>, %arg4: memref<32x32xbf16, #tpu.memory_space<vmem>>, %arg5: memref<1x32xf32, #tpu.memory_space<vmem>>, %arg6: memref<10x32xbf16, #tpu.memory_space<vmem>>, %arg7: memref<10x32xbf16, #tpu.memory_space<vmem>>) attributes {dimension_semantics = [#tpu.dimension_semantics<parallel>, #tpu.dimension_semantics<parallel>, #tpu.dimension_semantics<arbitrary>], iteration_bounds = array<i64: 1, 1, 1>, scalar_prefetch = 0 : i64, scratch_operands = 0 : i64, tpu.core_type = #tpu.core_type<tc>, window_params = [{transform_indices = @transform_0, window_bounds = array<i64: 10, 32>}, {transform_indices = @transform_1, window_bounds = array<i64: 32, 32>}, {transform_indices = @transform_2, window_bounds = array<i64: 1, 32>}, {transform_indices = @transform_3, window_bounds = array<i64: 10, 32>}, {transform_indices = @transform_4, window_bounds = array<i64: 10, 32>}]} {
    %c0 = arith.constant 0 : index
    %c0_0 = arith.constant 0 : index
    %0 = vector.load %arg3[%c0, %c0_0] : memref<10x32xbf16, #tpu.memory_space<vmem>>, vector<10x32xbf16>
    %c0_1 = arith.constant 0 : index
    %c0_2 = arith.constant 0 : index
    %1 = vector.load %arg4[%c0_1, %c0_2] : memref<32x32xbf16, #tpu.memory_space<vmem>>, vector<32x32xbf16>
    %cst = arith.constant dense<0.000000e+00> : vector<10x32xf32>
    %2 = tpu.matmul %0, %1, %cst {dimension_numbers = #tpu.dot_dimension_numbers<[1], [0], [0], [1], [0, 0, 1, 1], [], []>} : vector<10x32xbf16>, vector<32x32xbf16>, vector<10x32xf32> -> vector<10x32xf32>
    %c0_3 = arith.constant 0 : index
    %c0_4 = arith.constant 0 : index
    %3 = vector.load %arg5[%c0_3, %c0_4] : memref<1x32xf32, #tpu.memory_space<vmem>>, vector<1x32xf32>
    %4 = vector.broadcast %3 : vector<1x32xf32> to vector<10x32xf32>
    %5 = arith.addf %2, %4 : vector<10x32xf32>
    %c0_5 = arith.constant 0 : index
    %c0_6 = arith.constant 0 : index
    %6 = vector.load %arg6[%c0_5, %c0_6] : memref<10x32xbf16, #tpu.memory_space<vmem>>, vector<10x32xbf16>
    %7 = arith.extf %6 : vector<10x32xbf16> to vector<10x32xf32>
    %8 = arith.addf %5, %7 : vector<10x32xf32>
    %9 = arith.truncf %8 : vector<10x32xf32> to vector<10x32xbf16>
    %c0_7 = arith.constant 0 : index
    %c0_8 = arith.constant 0 : index
    %10 = vector.load %arg7[%c0_7, %c0_8] : memref<10x32xbf16, #tpu.memory_space<vmem>>, vector<10x32xbf16>
    tpu.vector_store %arg7[%c0_7, %c0_8], %9 {strides = array<i32>} : memref<10x32xbf16, #tpu.memory_space<vmem>>, vector<10x32xbf16>,
    return
  }
  func.func @transform_0(%arg0: i32, %arg1: i32, %arg2: i32) -> (i32, i32) {
    %c0_i32 = arith.constant 0 : i32
    return %arg0, %arg2 : i32, i32
  }
  func.func @transform_1(%arg0: i32, %arg1: i32, %arg2: i32) -> (i32, i32) {
    %c0_i32 = arith.constant 0 : i32
    return %arg2, %arg1 : i32, i32
  }
  func.func @transform_2(%arg0: i32, %arg1: i32, %arg2: i32) -> (i32, i32) {
    %c0_i32 = arith.constant 0 : i32
    %c0_i32_0 = arith.constant 0 : i32
    return %c0_i32, %arg1 : i32, i32
  }
  func.func @transform_3(%arg0: i32, %arg1: i32, %arg2: i32) -> (i32, i32) {
    %c0_i32 = arith.constant 0 : i32
    return %arg0, %arg1 : i32, i32
  }
  func.func @transform_4(%arg0: i32, %arg1: i32, %arg2: i32) -> (i32, i32) {
    %c0_i32 = arith.constant 0 : i32
    return %arg0, %arg1 : i32, i32
  }
}

module attributes {stable_mosaic.version = 11 : i64} {
  func.func @_linear_kernel(%arg0: i32, %arg1: i32, %arg2: i32, %arg3: memref<10x32xbf16, #tpu.memory_space<vmem>>, %arg4: memref<32x128xbf16, #tpu.memory_space<vmem>>, %arg5: memref<1x128xf32, #tpu.memory_space<vmem>>, %arg6: memref<1x32xf32, #tpu.memory_space<vmem>>, %arg7: memref<1x32xf32, #tpu.memory_space<vmem>>, %arg8: memref<10x128xbf16, #tpu.memory_space<vmem>>) attributes {dimension_semantics = [#tpu.dimension_semantics<parallel>, #tpu.dimension_semantics<parallel>, #tpu.dimension_semantics<arbitrary>], iteration_bounds = array<i64: 1, 1, 1>, scalar_prefetch = 0 : i64, scratch_operands = 0 : i64, tpu.core_type = #tpu.core_type<tc>, window_params = [{transform_indices = @transform_0, window_bounds = array<i64: 10, 32>}, {transform_indices = @transform_1, window_bounds = array<i64: 32, 128>}, {transform_indices = @transform_2, window_bounds = array<i64: 1, 128>}, {pipeline_mode = #tpu.pipeline_mode<synchronous>, transform_indices = @transform_3, window_bounds = array<i64: 1, 32>}, {pipeline_mode = #tpu.pipeline_mode<synchronous>, transform_indices = @transform_4, window_bounds = array<i64: 1, 32>}, {transform_indices = @transform_5, window_bounds = array<i64: 10, 128>}]} {
    %c0 = arith.constant 0 : index
    %c0_0 = arith.constant 0 : index
    %0 = vector.load %arg3[%c0, %c0_0] : memref<10x32xbf16, #tpu.memory_space<vmem>>, vector<10x32xbf16>
    %1 = arith.extf %0 : vector<10x32xbf16> to vector<10x32xf32>
    %cst = arith.constant dense<0.000000e+00> : vector<10xf32>
    %2 = vector.multi_reduction <add>, %1, %cst [1] : vector<10x32xf32> to vector<10xf32>
    %3 = vector.shape_cast %2 : vector<10xf32> to vector<10x1xf32>
    %cst_1 = arith.constant 3.200000e+01 : f32
    %4 = vector.broadcast %cst_1 : f32 to vector<10x1xf32>
    %5 = arith.divf %3, %4 : vector<10x1xf32>
    %6 = vector.broadcast %5 : vector<10x1xf32> to vector<10x32xf32>
    %7 = arith.subf %1, %6 : vector<10x32xf32>
    %8 = arith.mulf %7, %7 : vector<10x32xf32>
    %cst_2 = arith.constant dense<0.000000e+00> : vector<10xf32>
    %9 = vector.multi_reduction <add>, %8, %cst_2 [1] : vector<10x32xf32> to vector<10xf32>
    %10 = vector.shape_cast %9 : vector<10xf32> to vector<10x1xf32>
    %cst_3 = arith.constant 3.200000e+01 : f32
    %11 = vector.broadcast %cst_3 : f32 to vector<10x1xf32>
    %12 = arith.divf %10, %11 : vector<10x1xf32>
    %cst_4 = arith.constant 9.99999974E-6 : f32
    %13 = vector.broadcast %cst_4 : f32 to vector<10x1xf32>
    %14 = arith.addf %12, %13 : vector<10x1xf32>
    %15 = math.rsqrt %14 : vector<10x1xf32>
    %16 = vector.broadcast %15 : vector<10x1xf32> to vector<10x32xf32>
    %17 = arith.mulf %7, %16 : vector<10x32xf32>
    %c0_5 = arith.constant 0 : index
    %c0_6 = arith.constant 0 : index
    %18 = vector.load %arg6[%c0_5, %c0_6] : memref<1x32xf32, #tpu.memory_space<vmem>>, vector<1x32xf32>
    %19 = vector.broadcast %18 : vector<1x32xf32> to vector<10x32xf32>
    %20 = arith.mulf %17, %19 : vector<10x32xf32>
    %c0_7 = arith.constant 0 : index
    %c0_8 = arith.constant 0 : index
    %21 = vector.load %arg7[%c0_7, %c0_8] : memref<1x32xf32, #tpu.memory_space<vmem>>, vector<1x32xf32>
    %22 = vector.broadcast %21 : vector<1x32xf32> to vector<10x32xf32>
    %23 = arith.addf %20, %22 : vector<10x32xf32>
    %24 = arith.truncf %23 : vector<10x32xf32> to vector<10x32xbf16>
    %c0_9 = arith.constant 0 : index
    %c0_10 = arith.constant 0 : index
    %25 = vector.load %arg4[%c0_9, %c0_10] : memref<32x128xbf16, #tpu.memory_space<vmem>>, vector<32x128xbf16>
    %cst_11 = arith.constant dense<0.000000e+00> : vector<10x128xf32>
    %26 = tpu.matmul %24, %25, %cst_11 {dimension_numbers = #tpu.dot_dimension_numbers<[1], [0], [0], [1], [0, 0, 1, 1], [], []>} : vector<10x32xbf16>, vector<32x128xbf16>, vector<10x128xf32> -> vector<10x128xf32>
    %c0_12 = arith.constant 0 : index
    %c0_13 = arith.constant 0 : index
    %27 = vector.load %arg5[%c0_12, %c0_13] : memref<1x128xf32, #tpu.memory_space<vmem>>, vector<1x128xf32>
    %28 = vector.broadcast %27 : vector<1x128xf32> to vector<10x128xf32>
    %29 = arith.addf %26, %28 : vector<10x128xf32>
    %cst_14 = arith.constant 5.000000e-01 : f32
    %30 = vector.broadcast %cst_14 : f32 to vector<10x128xf32>
    %31 = arith.mulf %30, %29 : vector<10x128xf32>
    %cst_15 = arith.constant 4.471500e-02 : f32
    %32 = vector.broadcast %cst_15 : f32 to vector<10x128xf32>
    %33 = arith.mulf %32, %29 : vector<10x128xf32>
    %34 = arith.mulf %33, %29 : vector<10x128xf32>
    %35 = arith.mulf %34, %29 : vector<10x128xf32>
    %36 = arith.addf %29, %35 : vector<10x128xf32>
    %cst_16 = arith.constant 0.797884583 : f32
    %37 = vector.broadcast %cst_16 : f32 to vector<10x128xf32>
    %38 = arith.mulf %37, %36 : vector<10x128xf32>
    %39 = math.tanh %38 : vector<10x128xf32>
    %cst_17 = arith.constant 1.000000e+00 : f32
    %40 = vector.broadcast %cst_17 : f32 to vector<10x128xf32>
    %41 = arith.addf %40, %39 : vector<10x128xf32>
    %42 = arith.mulf %31, %41 : vector<10x128xf32>
    %43 = arith.truncf %42 : vector<10x128xf32> to vector<10x128xbf16>
    %c0_18 = arith.constant 0 : index
    %c0_19 = arith.constant 0 : index
    %44 = vector.load %arg8[%c0_18, %c0_19] : memref<10x128xbf16, #tpu.memory_space<vmem>>, vector<10x128xbf16>
    tpu.vector_store %arg8[%c0_18, %c0_19], %43 {strides = array<i32>} : memref<10x128xbf16, #tpu.memory_space<vmem>>, vector<10x128xbf16>,
    return
  }
  func.func @transform_0(%arg0: i32, %arg1: i32, %arg2: i32) -> (i32, i32) {
    %c0_i32 = arith.constant 0 : i32
    return %arg0, %arg2 : i32, i32
  }
  func.func @transform_1(%arg0: i32, %arg1: i32, %arg2: i32) -> (i32, i32) {
    %c0_i32 = arith.constant 0 : i32
    return %arg2, %arg1 : i32, i32
  }
  func.func @transform_2(%arg0: i32, %arg1: i32, %arg2: i32) -> (i32, i32) {
    %c0_i32 = arith.constant 0 : i32
    %c0_i32_0 = arith.constant 0 : i32
    return %c0_i32, %arg1 : i32, i32
  }
  func.func @transform_3(%arg0: i32, %arg1: i32, %arg2: i32) -> (i32, i32) {
    %c0_i32 = arith.constant 0 : i32
    %c0_i32_0 = arith.constant 0 : i32
    %c0_i32_1 = arith.constant 0 : i32
    return %c0_i32, %c0_i32_0 : i32, i32
  }
  func.func @transform_4(%arg0: i32, %arg1: i32, %arg2: i32) -> (i32, i32) {
    %c0_i32 = arith.constant 0 : i32
    %c0_i32_0 = arith.constant 0 : i32
    %c0_i32_1 = arith.constant 0 : i32
    return %c0_i32, %c0_i32_0 : i32, i32
  }
  func.func @transform_5(%arg0: i32, %arg1: i32, %arg2: i32) -> (i32, i32) {
    %c0_i32 = arith.constant 0 : i32
    return %arg0, %arg1 : i32, i32
  }
}

module attributes {stable_mosaic.version = 11 : i64} {
  func.func @_linear_kernel(%arg0: i32, %arg1: i32, %arg2: i32, %arg3: memref<10x128xbf16, #tpu.memory_space<vmem>>, %arg4: memref<128x32xbf16, #tpu.memory_space<vmem>>, %arg5: memref<1x32xf32, #tpu.memory_space<vmem>>, %arg6: memref<10x32xbf16, #tpu.memory_space<vmem>>, %arg7: memref<10x32xbf16, #tpu.memory_space<vmem>>) attributes {dimension_semantics = [#tpu.dimension_semantics<parallel>, #tpu.dimension_semantics<parallel>, #tpu.dimension_semantics<arbitrary>], iteration_bounds = array<i64: 1, 1, 1>, scalar_prefetch = 0 : i64, scratch_operands = 0 : i64, tpu.core_type = #tpu.core_type<tc>, window_params = [{transform_indices = @transform_0, window_bounds = array<i64: 10, 128>}, {transform_indices = @transform_1, window_bounds = array<i64: 128, 32>}, {transform_indices = @transform_2, window_bounds = array<i64: 1, 32>}, {transform_indices = @transform_3, window_bounds = array<i64: 10, 32>}, {transform_indices = @transform_4, window_bounds = array<i64: 10, 32>}]} {
    %c0 = arith.constant 0 : index
    %c0_0 = arith.constant 0 : index
    %0 = vector.load %arg3[%c0, %c0_0] : memref<10x128xbf16, #tpu.memory_space<vmem>>, vector<10x128xbf16>
    %c0_1 = arith.constant 0 : index
    %c0_2 = arith.constant 0 : index
    %1 = vector.load %arg4[%c0_1, %c0_2] : memref<128x32xbf16, #tpu.memory_space<vmem>>, vector<128x32xbf16>
    %cst = arith.constant dense<0.000000e+00> : vector<10x32xf32>
    %2 = tpu.matmul %0, %1, %cst {dimension_numbers = #tpu.dot_dimension_numbers<[1], [0], [0], [1], [0, 0, 1, 1], [], []>} : vector<10x128xbf16>, vector<128x32xbf16>, vector<10x32xf32> -> vector<10x32xf32>
    %c0_3 = arith.constant 0 : index
    %c0_4 = arith.constant 0 : index
    %3 = vector.load %arg5[%c0_3, %c0_4] : memref<1x32xf32, #tpu.memory_space<vmem>>, vector<1x32xf32>
    %4 = vector.broadcast %3 : vector<1x32xf32> to vector<10x32xf32>
    %5 = arith.addf %2, %4 : vector<10x32xf32>
    %c0_5 = arith.constant 0 : index
    %c0_6 = arith.constant 0 : index
    %6 = vector.load %arg6[%c0_5, %c0_6] : memref<10x32xbf16, #tpu.memory_space<vmem>>, vector<10x32xbf16>
    %7 = arith.extf %6 : vector<10x32xbf16> to vector<10x32xf32>
    %8 = arith.addf %5, %7 : vector<10x32xf32>
    %9 = arith.truncf %8 : vector<10x32xf32> to vector<10x32xbf16>
    %c0_7 = arith.constant 0 : index
    %c0_8 = arith.constant 0 : index
    %10 = vector.load %arg7[%c0_7, %c0_8] : memref<10x32xbf16, #tpu.memory_space<vmem>>, vector<10x32xbf16>
    tpu.vector_store %arg7[%c0_7, %c0_8], %9 {strides = array<i32>} : memref<10x32xbf16, #tpu.memory_space<vmem>>, vector<10x32xbf16>,
    return
  }
  func.func @transform_0(%arg0: i32, %arg1: i32, %arg2: i32) -> (i32, i32) {
    %c0_i32 = arith.constant 0 : i32
    return %arg0, %arg2 : i32, i32
  }
  func.func @transform_1(%arg0: i32, %arg1: i32, %arg2: i32) -> (i32, i32) {
    %c0_i32 = arith.constant 0 : i32
    return %arg2, %arg1 : i32, i32
  }
  func.func @transform_2(%arg0: i32, %arg1: i32, %arg2: i32) -> (i32, i32) {
    %c0_i32 = arith.constant 0 : i32
    %c0_i32_0 = arith.constant 0 : i32
    return %c0_i32, %arg1 : i32, i32
  }
  func.func @transform_3(%arg0: i32, %arg1: i32, %arg2: i32) -> (i32, i32) {
    %c0_i32 = arith.constant 0 : i32
    return %arg0, %arg1 : i32, i32
  }
  func.func @transform_4(%arg0: i32, %arg1: i32, %arg2: i32) -> (i32, i32) {
    %c0_i32 = arith.constant 0 : i32
    return %arg0, %arg1 : i32, i32
  }
}

module attributes {stable_mosaic.version = 11 : i64} {
  func.func @_linear_kernel(%arg0: i32, %arg1: i32, %arg2: i32, %arg3: memref<10x32xbf16, #tpu.memory_space<vmem>>, %arg4: memref<32x32xbf16, #tpu.memory_space<vmem>>, %arg5: memref<1x32xf32, #tpu.memory_space<vmem>>, %arg6: memref<1x32xf32, #tpu.memory_space<vmem>>, %arg7: memref<1x32xf32, #tpu.memory_space<vmem>>, %arg8: memref<10x32xbf16, #tpu.memory_space<vmem>>) attributes {dimension_semantics = [#tpu.dimension_semantics<parallel>, #tpu.dimension_semantics<parallel>, #tpu.dimension_semantics<arbitrary>], iteration_bounds = array<i64: 1, 1, 1>, scalar_prefetch = 0 : i64, scratch_operands = 0 : i64, tpu.core_type = #tpu.core_type<tc>, window_params = [{transform_indices = @transform_0, window_bounds = array<i64: 10, 32>}, {transform_indices = @transform_1, window_bounds = array<i64: 32, 32>}, {transform_indices = @transform_2, window_bounds = array<i64: 1, 32>}, {pipeline_mode = #tpu.pipeline_mode<synchronous>, transform_indices = @transform_3, window_bounds = array<i64: 1, 32>}, {pipeline_mode = #tpu.pipeline_mode<synchronous>, transform_indices = @transform_4, window_bounds = array<i64: 1, 32>}, {transform_indices = @transform_5, window_bounds = array<i64: 10, 32>}]} {
    %c0 = arith.constant 0 : index
    %c0_0 = arith.constant 0 : index
    %0 = vector.load %arg3[%c0, %c0_0] : memref<10x32xbf16, #tpu.memory_space<vmem>>, vector<10x32xbf16>
    %1 = arith.extf %0 : vector<10x32xbf16> to vector<10x32xf32>
    %cst = arith.constant dense<0.000000e+00> : vector<10xf32>
    %2 = vector.multi_reduction <add>, %1, %cst [1] : vector<10x32xf32> to vector<10xf32>
    %3 = vector.shape_cast %2 : vector<10xf32> to vector<10x1xf32>
    %cst_1 = arith.constant 3.200000e+01 : f32
    %4 = vector.broadcast %cst_1 : f32 to vector<10x1xf32>
    %5 = arith.divf %3, %4 : vector<10x1xf32>
    %6 = vector.broadcast %5 : vector<10x1xf32> to vector<10x32xf32>
    %7 = arith.subf %1, %6 : vector<10x32xf32>
    %8 = arith.mulf %7, %7 : vector<10x32xf32>
    %cst_2 = arith.constant dense<0.000000e+00> : vector<10xf32>
    %9 = vector.multi_reduction <add>, %8, %cst_2 [1] : vector<10x32xf32> to vector<10xf32>
    %10 = vector.shape_cast %9 : vector<10xf32> to vector<10x1xf32>
    %cst_3 = arith.constant 3.200000e+01 : f32
    %11 = vector.broadcast %cst_3 : f32 to vector<10x1xf32>
    %12 = arith.divf %10, %11 : vector<10x1xf32>
    %cst_4 = arith.constant 9.99999974E-6 : f32
    %13 = vector.broadcast %cst_4 : f32 to vector<10x1xf32>
    %14 = arith.addf %12, %13 : vector<10x1xf32>
    %15 = math.rsqrt %14 : vector<10x1xf32>
    %16 = vector.broadcast %15 : vector<10x1xf32> to vector<10x32xf32>
    %17 = arith.mulf %7, %16 : vector<10x32xf32>
    %c0_5 = arith.constant 0 : index
    %c0_6 = arith.constant 0 : index
    %18 = vector.load %arg6[%c0_5, %c0_6] : memref<1x32xf32, #tpu.memory_space<vmem>>, vector<1x32xf32>
    %19 = vector.broadcast %18 : vector<1x32xf32> to vector<10x32xf32>
    %20 = arith.mulf %17, %19 : vector<10x32xf32>
    %c0_7 = arith.constant 0 : index
    %c0_8 = arith.constant 0 : index
    %21 = vector.load %arg7[%c0_7, %c0_8] : memref<1x32xf32, #tpu.memory_space<vmem>>, vector<1x32xf32>
    %22 = vector.broadcast %21 : vector<1x32xf32> to vector<10x32xf32>
    %23 = arith.addf %20, %22 : vector<10x32xf32>
    %24 = arith.truncf %23 : vector<10x32xf32> to vector<10x32xbf16>
    %c0_9 = arith.constant 0 : index
    %c0_10 = arith.constant 0 : index
    %25 = vector.load %arg4[%c0_9, %c0_10] : memref<32x32xbf16, #tpu.memory_space<vmem>>, vector<32x32xbf16>
    %cst_11 = arith.constant dense<0.000000e+00> : vector<10x32xf32>
    %26 = tpu.matmul %24, %25, %cst_11 {dimension_numbers = #tpu.dot_dimension_numbers<[1], [0], [0], [1], [0, 0, 1, 1], [], []>} : vector<10x32xbf16>, vector<32x32xbf16>, vector<10x32xf32> -> vector<10x32xf32>
    %c0_12 = arith.constant 0 : index
    %c0_13 = arith.constant 0 : index
    %27 = vector.load %arg5[%c0_12, %c0_13] : memref<1x32xf32, #tpu.memory_space<vmem>>, vector<1x32xf32>
    %28 = vector.broadcast %27 : vector<1x32xf32> to vector<10x32xf32>
    %29 = arith.addf %26, %28 : vector<10x32xf32>
    %30 = arith.truncf %29 : vector<10x32xf32> to vector<10x32xbf16>
    %c0_14 = arith.constant 0 : index
    %c0_15 = arith.constant 0 : index
    %31 = vector.load %arg8[%c0_14, %c0_15] : memref<10x32xbf16, #tpu.memory_space<vmem>>, vector<10x32xbf16>
    tpu.vector_store %arg8[%c0_14, %c0_15], %30 {strides = array<i32>} : memref<10x32xbf16, #tpu.memory_space<vmem>>, vector<10x32xbf16>,
    return
  }
  func.func @transform_0(%arg0: i32, %arg1: i32, %arg2: i32) -> (i32, i32) {
    %c0_i32 = arith.constant 0 : i32
    return %arg0, %arg2 : i32, i32
  }
  func.func @transform_1(%arg0: i32, %arg1: i32, %arg2: i32) -> (i32, i32) {
    %c0_i32 = arith.constant 0 : i32
    return %arg2, %arg1 : i32, i32
  }
  func.func @transform_2(%arg0: i32, %arg1: i32, %arg2: i32) -> (i32, i32) {
    %c0_i32 = arith.constant 0 : i32
    %c0_i32_0 = arith.constant 0 : i32
    return %c0_i32, %arg1 : i32, i32
  }
  func.func @transform_3(%arg0: i32, %arg1: i32, %arg2: i32) -> (i32, i32) {
    %c0_i32 = arith.constant 0 : i32
    %c0_i32_0 = arith.constant 0 : i32
    %c0_i32_1 = arith.constant 0 : i32
    return %c0_i32, %c0_i32_0 : i32, i32
  }
  func.func @transform_4(%arg0: i32, %arg1: i32, %arg2: i32) -> (i32, i32) {
    %c0_i32 = arith.constant 0 : i32
    %c0_i32_0 = arith.constant 0 : i32
    %c0_i32_1 = arith.constant 0 : i32
    return %c0_i32, %c0_i32_0 : i32, i32
  }
  func.func @transform_5(%arg0: i32, %arg1: i32, %arg2: i32) -> (i32, i32) {
    %c0_i32 = arith.constant 0 : i32
    return %arg0, %arg1 : i32, i32
  }
}

module attributes {stable_mosaic.version = 11 : i64} {
  func.func @_attn_kernel(%arg0: i32, %arg1: memref<1x17x96xbf16, #tpu.memory_space<vmem>>, %arg2: memref<1x17x32xbf16, #tpu.memory_space<vmem>>) attributes {dimension_semantics = [#tpu.dimension_semantics<parallel>], iteration_bounds = array<i64: 2>, scalar_prefetch = 0 : i64, scratch_operands = 0 : i64, tpu.core_type = #tpu.core_type<tc>, window_params = [{transform_indices = @transform_0, window_bounds = array<i64: 1, 17, 96>}, {transform_indices = @transform_1, window_bounds = array<i64: 1, 17, 32>}]} {
    %c0 = arith.constant 0 : index
    %c0_0 = arith.constant 0 : index
    %c0_1 = arith.constant 0 : index
    %0 = vector.load %arg1[%c0, %c0_0, %c0_1] : memref<1x17x96xbf16, #tpu.memory_space<vmem>>, vector<1x17x8xbf16>
    %1 = vector.shape_cast %0 : vector<1x17x8xbf16> to vector<17x8xbf16>
    %c0_2 = arith.constant 0 : index
    %c0_3 = arith.constant 0 : index
    %c32 = arith.constant 32 : index
    %2 = vector.load %arg1[%c0_2, %c0_3, %c32] : memref<1x17x96xbf16, #tpu.memory_space<vmem>>, vector<1x17x8xbf16>
    %3 = vector.shape_cast %2 : vector<1x17x8xbf16> to vector<17x8xbf16>
    %c0_4 = arith.constant 0 : index
    %c0_5 = arith.constant 0 : index
    %c64 = arith.constant 64 : index
    %4 = vector.load %arg1[%c0_4, %c0_5, %c64] : memref<1x17x96xbf16, #tpu.memory_space<vmem>>, vector<1x17x8xbf16>
    %5 = vector.shape_cast %4 : vector<1x17x8xbf16> to vector<17x8xbf16>
    %cst = arith.constant dense<0.000000e+00> : vector<17x17xf32>
    %6 = tpu.matmul %1, %3, %cst {dimension_numbers = #tpu.dot_dimension_numbers<[1], [1], [0], [0], [0, 0, 1, 0], [], []>} : vector<17x8xbf16>, vector<17x8xbf16>, vector<17x17xf32> -> vector<17x17xf32>
    %cst_6 = arith.constant dense<0xFF800000> : vector<17xf32>
    %7 = vector.multi_reduction <maximumf>, %6, %cst_6 [1] : vector<17x17xf32> to vector<17xf32>
    %8 = vector.shape_cast %7 : vector<17xf32> to vector<17x1xf32>
    %9 = vector.broadcast %8 : vector<17x1xf32> to vector<17x17xf32>
    %10 = arith.subf %6, %9 : vector<17x17xf32>
    %11 = math.exp %10 : vector<17x17xf32>
    %cst_7 = arith.constant dense<0.000000e+00> : vector<17xf32>
    %12 = vector.multi_reduction <add>, %11, %cst_7 [1] : vector<17x17xf32> to vector<17xf32>
    %13 = vector.shape_cast %12 : vector<17xf32> to vector<17x1xf32>
    %14 = tpu.reciprocal %13 {approx = true} : vector<17x1xf32> -> vector<17x1xf32>
    %15 = vector.broadcast %14 : vector<17x1xf32> to vector<17x17xf32>
    %16 = arith.mulf %11, %15 : vector<17x17xf32>
    %17 = arith.truncf %16 : vector<17x17xf32> to vector<17x17xbf16>
    %cst_8 = arith.constant dense<0.000000e+00> : vector<17x8xf32>
    %18 = tpu.matmul %17, %5, %cst_8 {dimension_numbers = #tpu.dot_dimension_numbers<[1], [0], [0], [1], [0, 0, 1, 1], [], []>} : vector<17x17xbf16>, vector<17x8xbf16>, vector<17x8xf32> -> vector<17x8xf32>
    %19 = arith.truncf %18 : vector<17x8xf32> to vector<17x8xbf16>
    %c0_9 = arith.constant 0 : index
    %c0_10 = arith.constant 0 : index
    %c0_11 = arith.constant 0 : index
    %20 = vector.load %arg2[%c0_9, %c0_10, %c0_11] : memref<1x17x32xbf16, #tpu.memory_space<vmem>>, vector<1x17x8xbf16>
    %21 = vector.shape_cast %20 : vector<1x17x8xbf16> to vector<17x8xbf16>
    %22 = vector.shape_cast %19 : vector<17x8xbf16> to vector<1x17x8xbf16>
    tpu.vector_store %arg2[%c0_9, %c0_10, %c0_11], %22 {strides = array<i32>} : memref<1x17x32xbf16, #tpu.memory_space<vmem>>, vector<1x17x8xbf16>,
    %c0_12 = arith.constant 0 : index
    %c0_13 = arith.constant 0 : index
    %c8 = arith.constant 8 : index
    %23 = vector.load %arg1[%c0_12, %c0_13, %c8] : memref<1x17x96xbf16, #tpu.memory_space<vmem>>, vector<1x17x8xbf16>
    %24 = vector.shape_cast %23 : vector<1x17x8xbf16> to vector<17x8xbf16>
    %c0_14 = arith.constant 0 : index
    %c0_15 = arith.constant 0 : index
    %c40 = arith.constant 40 : index
    %25 = vector.load %arg1[%c0_14, %c0_15, %c40] : memref<1x17x96xbf16, #tpu.memory_space<vmem>>, vector<1x17x8xbf16>
    %26 = vector.shape_cast %25 : vector<1x17x8xbf16> to vector<17x8xbf16>
    %c0_16 = arith.constant 0 : index
    %c0_17 = arith.constant 0 : index
    %c72 = arith.constant 72 : index
    %27 = vector.load %arg1[%c0_16, %c0_17, %c72] : memref<1x17x96xbf16, #tpu.memory_space<vmem>>, vector<1x17x8xbf16>
    %28 = vector.shape_cast %27 : vector<1x17x8xbf16> to vector<17x8xbf16>
    %cst_18 = arith.constant dense<0.000000e+00> : vector<17x17xf32>
    %29 = tpu.matmul %24, %26, %cst_18 {dimension_numbers = #tpu.dot_dimension_numbers<[1], [1], [0], [0], [0, 0, 1, 0], [], []>} : vector<17x8xbf16>, vector<17x8xbf16>, vector<17x17xf32> -> vector<17x17xf32>
    %cst_19 = arith.constant dense<0xFF800000> : vector<17xf32>
    %30 = vector.multi_reduction <maximumf>, %29, %cst_19 [1] : vector<17x17xf32> to vector<17xf32>
    %31 = vector.shape_cast %30 : vector<17xf32> to vector<17x1xf32>
    %32 = vector.broadcast %31 : vector<17x1xf32> to vector<17x17xf32>
    %33 = arith.subf %29, %32 : vector<17x17xf32>
    %34 = math.exp %33 : vector<17x17xf32>
    %cst_20 = arith.constant dense<0.000000e+00> : vector<17xf32>
    %35 = vector.multi_reduction <add>, %34, %cst_20 [1] : vector<17x17xf32> to vector<17xf32>
    %36 = vector.shape_cast %35 : vector<17xf32> to vector<17x1xf32>
    %37 = tpu.reciprocal %36 {approx = true} : vector<17x1xf32> -> vector<17x1xf32>
    %38 = vector.broadcast %37 : vector<17x1xf32> to vector<17x17xf32>
    %39 = arith.mulf %34, %38 : vector<17x17xf32>
    %40 = arith.truncf %39 : vector<17x17xf32> to vector<17x17xbf16>
    %cst_21 = arith.constant dense<0.000000e+00> : vector<17x8xf32>
    %41 = tpu.matmul %40, %28, %cst_21 {dimension_numbers = #tpu.dot_dimension_numbers<[1], [0], [0], [1], [0, 0, 1, 1], [], []>} : vector<17x17xbf16>, vector<17x8xbf16>, vector<17x8xf32> -> vector<17x8xf32>
    %42 = arith.truncf %41 : vector<17x8xf32> to vector<17x8xbf16>
    %c0_22 = arith.constant 0 : index
    %c0_23 = arith.constant 0 : index
    %c8_24 = arith.constant 8 : index
    %43 = vector.load %arg2[%c0_22, %c0_23, %c8_24] : memref<1x17x32xbf16, #tpu.memory_space<vmem>>, vector<1x17x8xbf16>
    %44 = vector.shape_cast %43 : vector<1x17x8xbf16> to vector<17x8xbf16>
    %45 = vector.shape_cast %42 : vector<17x8xbf16> to vector<1x17x8xbf16>
    tpu.vector_store %arg2[%c0_22, %c0_23, %c8_24], %45 {strides = array<i32>} : memref<1x17x32xbf16, #tpu.memory_space<vmem>>, vector<1x17x8xbf16>,
    %c0_25 = arith.constant 0 : index
    %c0_26 = arith.constant 0 : index
    %c16 = arith.constant 16 : index
    %46 = vector.load %arg1[%c0_25, %c0_26, %c16] : memref<1x17x96xbf16, #tpu.memory_space<vmem>>, vector<1x17x8xbf16>
    %47 = vector.shape_cast %46 : vector<1x17x8xbf16> to vector<17x8xbf16>
    %c0_27 = arith.constant 0 : index
    %c0_28 = arith.constant 0 : index
    %c48 = arith.constant 48 : index
    %48 = vector.load %arg1[%c0_27, %c0_28, %c48] : memref<1x17x96xbf16, #tpu.memory_space<vmem>>, vector<1x17x8xbf16>
    %49 = vector.shape_cast %48 : vector<1x17x8xbf16> to vector<17x8xbf16>
    %c0_29 = arith.constant 0 : index
    %c0_30 = arith.constant 0 : index
    %c80 = arith.constant 80 : index
    %50 = vector.load %arg1[%c0_29, %c0_30, %c80] : memref<1x17x96xbf16, #tpu.memory_space<vmem>>, vector<1x17x8xbf16>
    %51 = vector.shape_cast %50 : vector<1x17x8xbf16> to vector<17x8xbf16>
    %cst_31 = arith.constant dense<0.000000e+00> : vector<17x17xf32>
    %52 = tpu.matmul %47, %49, %cst_31 {dimension_numbers = #tpu.dot_dimension_numbers<[1], [1], [0], [0], [0, 0, 1, 0], [], []>} : vector<17x8xbf16>, vector<17x8xbf16>, vector<17x17xf32> -> vector<17x17xf32>
    %cst_32 = arith.constant dense<0xFF800000> : vector<17xf32>
    %53 = vector.multi_reduction <maximumf>, %52, %cst_32 [1] : vector<17x17xf32> to vector<17xf32>
    %54 = vector.shape_cast %53 : vector<17xf32> to vector<17x1xf32>
    %55 = vector.broadcast %54 : vector<17x1xf32> to vector<17x17xf32>
    %56 = arith.subf %52, %55 : vector<17x17xf32>
    %57 = math.exp %56 : vector<17x17xf32>
    %cst_33 = arith.constant dense<0.000000e+00> : vector<17xf32>
    %58 = vector.multi_reduction <add>, %57, %cst_33 [1] : vector<17x17xf32> to vector<17xf32>
    %59 = vector.shape_cast %58 : vector<17xf32> to vector<17x1xf32>
    %60 = tpu.reciprocal %59 {approx = true} : vector<17x1xf32> -> vector<17x1xf32>
    %61 = vector.broadcast %60 : vector<17x1xf32> to vector<17x17xf32>
    %62 = arith.mulf %57, %61 : vector<17x17xf32>
    %63 = arith.truncf %62 : vector<17x17xf32> to vector<17x17xbf16>
    %cst_34 = arith.constant dense<0.000000e+00> : vector<17x8xf32>
    %64 = tpu.matmul %63, %51, %cst_34 {dimension_numbers = #tpu.dot_dimension_numbers<[1], [0], [0], [1], [0, 0, 1, 1], [], []>} : vector<17x17xbf16>, vector<17x8xbf16>, vector<17x8xf32> -> vector<17x8xf32>
    %65 = arith.truncf %64 : vector<17x8xf32> to vector<17x8xbf16>
    %c0_35 = arith.constant 0 : index
    %c0_36 = arith.constant 0 : index
    %c16_37 = arith.constant 16 : index
    %66 = vector.load %arg2[%c0_35, %c0_36, %c16_37] : memref<1x17x32xbf16, #tpu.memory_space<vmem>>, vector<1x17x8xbf16>
    %67 = vector.shape_cast %66 : vector<1x17x8xbf16> to vector<17x8xbf16>
    %68 = vector.shape_cast %65 : vector<17x8xbf16> to vector<1x17x8xbf16>
    tpu.vector_store %arg2[%c0_35, %c0_36, %c16_37], %68 {strides = array<i32>} : memref<1x17x32xbf16, #tpu.memory_space<vmem>>, vector<1x17x8xbf16>,
    %c0_38 = arith.constant 0 : index
    %c0_39 = arith.constant 0 : index
    %c24 = arith.constant 24 : index
    %69 = vector.load %arg1[%c0_38, %c0_39, %c24] : memref<1x17x96xbf16, #tpu.memory_space<vmem>>, vector<1x17x8xbf16>
    %70 = vector.shape_cast %69 : vector<1x17x8xbf16> to vector<17x8xbf16>
    %c0_40 = arith.constant 0 : index
    %c0_41 = arith.constant 0 : index
    %c56 = arith.constant 56 : index
    %71 = vector.load %arg1[%c0_40, %c0_41, %c56] : memref<1x17x96xbf16, #tpu.memory_space<vmem>>, vector<1x17x8xbf16>
    %72 = vector.shape_cast %71 : vector<1x17x8xbf16> to vector<17x8xbf16>
    %c0_42 = arith.constant 0 : index
    %c0_43 = arith.constant 0 : index
    %c88 = arith.constant 88 : index
    %73 = vector.load %arg1[%c0_42, %c0_43, %c88] : memref<1x17x96xbf16, #tpu.memory_space<vmem>>, vector<1x17x8xbf16>
    %74 = vector.shape_cast %73 : vector<1x17x8xbf16> to vector<17x8xbf16>
    %cst_44 = arith.constant dense<0.000000e+00> : vector<17x17xf32>
    %75 = tpu.matmul %70, %72, %cst_44 {dimension_numbers = #tpu.dot_dimension_numbers<[1], [1], [0], [0], [0, 0, 1, 0], [], []>} : vector<17x8xbf16>, vector<17x8xbf16>, vector<17x17xf32> -> vector<17x17xf32>
    %cst_45 = arith.constant dense<0xFF800000> : vector<17xf32>
    %76 = vector.multi_reduction <maximumf>, %75, %cst_45 [1] : vector<17x17xf32> to vector<17xf32>
    %77 = vector.shape_cast %76 : vector<17xf32> to vector<17x1xf32>
    %78 = vector.broadcast %77 : vector<17x1xf32> to vector<17x17xf32>
    %79 = arith.subf %75, %78 : vector<17x17xf32>
    %80 = math.exp %79 : vector<17x17xf32>
    %cst_46 = arith.constant dense<0.000000e+00> : vector<17xf32>
    %81 = vector.multi_reduction <add>, %80, %cst_46 [1] : vector<17x17xf32> to vector<17xf32>
    %82 = vector.shape_cast %81 : vector<17xf32> to vector<17x1xf32>
    %83 = tpu.reciprocal %82 {approx = true} : vector<17x1xf32> -> vector<17x1xf32>
    %84 = vector.broadcast %83 : vector<17x1xf32> to vector<17x17xf32>
    %85 = arith.mulf %80, %84 : vector<17x17xf32>
    %86 = arith.truncf %85 : vector<17x17xf32> to vector<17x17xbf16>
    %cst_47 = arith.constant dense<0.000000e+00> : vector<17x8xf32>
    %87 = tpu.matmul %86, %74, %cst_47 {dimension_numbers = #tpu.dot_dimension_numbers<[1], [0], [0], [1], [0, 0, 1, 1], [], []>} : vector<17x17xbf16>, vector<17x8xbf16>, vector<17x8xf32> -> vector<17x8xf32>
    %88 = arith.truncf %87 : vector<17x8xf32> to vector<17x8xbf16>
    %c0_48 = arith.constant 0 : index
    %c0_49 = arith.constant 0 : index
    %c24_50 = arith.constant 24 : index
    %89 = vector.load %arg2[%c0_48, %c0_49, %c24_50] : memref<1x17x32xbf16, #tpu.memory_space<vmem>>, vector<1x17x8xbf16>
    %90 = vector.shape_cast %89 : vector<1x17x8xbf16> to vector<17x8xbf16>
    %91 = vector.shape_cast %88 : vector<17x8xbf16> to vector<1x17x8xbf16>
    tpu.vector_store %arg2[%c0_48, %c0_49, %c24_50], %91 {strides = array<i32>} : memref<1x17x32xbf16, #tpu.memory_space<vmem>>, vector<1x17x8xbf16>,
    return
  }
  func.func @transform_0(%arg0: i32) -> (i32, i32, i32) {
    %c0_i32 = arith.constant 0 : i32
    %c0_i32_0 = arith.constant 0 : i32
    %c0_i32_1 = arith.constant 0 : i32
    return %arg0, %c0_i32, %c0_i32_0 : i32, i32, i32
  }
  func.func @transform_1(%arg0: i32) -> (i32, i32, i32) {
    %c0_i32 = arith.constant 0 : i32
    %c0_i32_0 = arith.constant 0 : i32
    %c0_i32_1 = arith.constant 0 : i32
    return %arg0, %c0_i32, %c0_i32_0 : i32, i32, i32
  }
}

module attributes {stable_mosaic.version = 11 : i64} {
  func.func @_linear_kernel(%arg0: i32, %arg1: i32, %arg2: i32, %arg3: memref<34x32xbf16, #tpu.memory_space<vmem>>, %arg4: memref<32x96xbf16, #tpu.memory_space<vmem>>, %arg5: memref<1x96xf32, #tpu.memory_space<vmem>>, %arg6: memref<1x32xf32, #tpu.memory_space<vmem>>, %arg7: memref<1x32xf32, #tpu.memory_space<vmem>>, %arg8: memref<34x96xbf16, #tpu.memory_space<vmem>>) attributes {dimension_semantics = [#tpu.dimension_semantics<parallel>, #tpu.dimension_semantics<parallel>, #tpu.dimension_semantics<arbitrary>], iteration_bounds = array<i64: 1, 1, 1>, scalar_prefetch = 0 : i64, scratch_operands = 0 : i64, tpu.core_type = #tpu.core_type<tc>, window_params = [{transform_indices = @transform_0, window_bounds = array<i64: 34, 32>}, {transform_indices = @transform_1, window_bounds = array<i64: 32, 96>}, {transform_indices = @transform_2, window_bounds = array<i64: 1, 96>}, {pipeline_mode = #tpu.pipeline_mode<synchronous>, transform_indices = @transform_3, window_bounds = array<i64: 1, 32>}, {pipeline_mode = #tpu.pipeline_mode<synchronous>, transform_indices = @transform_4, window_bounds = array<i64: 1, 32>}, {transform_indices = @transform_5, window_bounds = array<i64: 34, 96>}]} {
    %c0 = arith.constant 0 : index
    %c0_0 = arith.constant 0 : index
    %0 = vector.load %arg3[%c0, %c0_0] : memref<34x32xbf16, #tpu.memory_space<vmem>>, vector<34x32xbf16>
    %1 = arith.extf %0 : vector<34x32xbf16> to vector<34x32xf32>
    %cst = arith.constant dense<0.000000e+00> : vector<34xf32>
    %2 = vector.multi_reduction <add>, %1, %cst [1] : vector<34x32xf32> to vector<34xf32>
    %3 = vector.shape_cast %2 : vector<34xf32> to vector<34x1xf32>
    %cst_1 = arith.constant 3.200000e+01 : f32
    %4 = vector.broadcast %cst_1 : f32 to vector<34x1xf32>
    %5 = arith.divf %3, %4 : vector<34x1xf32>
    %6 = vector.broadcast %5 : vector<34x1xf32> to vector<34x32xf32>
    %7 = arith.subf %1, %6 : vector<34x32xf32>
    %8 = arith.mulf %7, %7 : vector<34x32xf32>
    %cst_2 = arith.constant dense<0.000000e+00> : vector<34xf32>
    %9 = vector.multi_reduction <add>, %8, %cst_2 [1] : vector<34x32xf32> to vector<34xf32>
    %10 = vector.shape_cast %9 : vector<34xf32> to vector<34x1xf32>
    %cst_3 = arith.constant 3.200000e+01 : f32
    %11 = vector.broadcast %cst_3 : f32 to vector<34x1xf32>
    %12 = arith.divf %10, %11 : vector<34x1xf32>
    %cst_4 = arith.constant 9.99999974E-6 : f32
    %13 = vector.broadcast %cst_4 : f32 to vector<34x1xf32>
    %14 = arith.addf %12, %13 : vector<34x1xf32>
    %15 = math.rsqrt %14 : vector<34x1xf32>
    %16 = vector.broadcast %15 : vector<34x1xf32> to vector<34x32xf32>
    %17 = arith.mulf %7, %16 : vector<34x32xf32>
    %c0_5 = arith.constant 0 : index
    %c0_6 = arith.constant 0 : index
    %18 = vector.load %arg6[%c0_5, %c0_6] : memref<1x32xf32, #tpu.memory_space<vmem>>, vector<1x32xf32>
    %19 = vector.broadcast %18 : vector<1x32xf32> to vector<34x32xf32>
    %20 = arith.mulf %17, %19 : vector<34x32xf32>
    %c0_7 = arith.constant 0 : index
    %c0_8 = arith.constant 0 : index
    %21 = vector.load %arg7[%c0_7, %c0_8] : memref<1x32xf32, #tpu.memory_space<vmem>>, vector<1x32xf32>
    %22 = vector.broadcast %21 : vector<1x32xf32> to vector<34x32xf32>
    %23 = arith.addf %20, %22 : vector<34x32xf32>
    %24 = arith.truncf %23 : vector<34x32xf32> to vector<34x32xbf16>
    %c0_9 = arith.constant 0 : index
    %c0_10 = arith.constant 0 : index
    %25 = vector.load %arg4[%c0_9, %c0_10] : memref<32x96xbf16, #tpu.memory_space<vmem>>, vector<32x96xbf16>
    %cst_11 = arith.constant dense<0.000000e+00> : vector<34x96xf32>
    %26 = tpu.matmul %24, %25, %cst_11 {dimension_numbers = #tpu.dot_dimension_numbers<[1], [0], [0], [1], [0, 0, 1, 1], [], []>} : vector<34x32xbf16>, vector<32x96xbf16>, vector<34x96xf32> -> vector<34x96xf32>
    %c0_12 = arith.constant 0 : index
    %c0_13 = arith.constant 0 : index
    %27 = vector.load %arg5[%c0_12, %c0_13] : memref<1x96xf32, #tpu.memory_space<vmem>>, vector<1x96xf32>
    %28 = vector.broadcast %27 : vector<1x96xf32> to vector<34x96xf32>
    %29 = arith.addf %26, %28 : vector<34x96xf32>
    %30 = arith.truncf %29 : vector<34x96xf32> to vector<34x96xbf16>
    %c0_14 = arith.constant 0 : index
    %c0_15 = arith.constant 0 : index
    %31 = vector.load %arg8[%c0_14, %c0_15] : memref<34x96xbf16, #tpu.memory_space<vmem>>, vector<34x96xbf16>
    tpu.vector_store %arg8[%c0_14, %c0_15], %30 {strides = array<i32>} : memref<34x96xbf16, #tpu.memory_space<vmem>>, vector<34x96xbf16>,
    return
  }
  func.func @transform_0(%arg0: i32, %arg1: i32, %arg2: i32) -> (i32, i32) {
    %c0_i32 = arith.constant 0 : i32
    return %arg0, %arg2 : i32, i32
  }
  func.func @transform_1(%arg0: i32, %arg1: i32, %arg2: i32) -> (i32, i32) {
    %c0_i32 = arith.constant 0 : i32
    return %arg2, %arg1 : i32, i32
  }
  func.func @transform_2(%arg0: i32, %arg1: i32, %arg2: i32) -> (i32, i32) {
    %c0_i32 = arith.constant 0 : i32
    %c0_i32_0 = arith.constant 0 : i32
    return %c0_i32, %arg1 : i32, i32
  }
  func.func @transform_3(%arg0: i32, %arg1: i32, %arg2: i32) -> (i32, i32) {
    %c0_i32 = arith.constant 0 : i32
    %c0_i32_0 = arith.constant 0 : i32
    %c0_i32_1 = arith.constant 0 : i32
    return %c0_i32, %c0_i32_0 : i32, i32
  }
  func.func @transform_4(%arg0: i32, %arg1: i32, %arg2: i32) -> (i32, i32) {
    %c0_i32 = arith.constant 0 : i32
    %c0_i32_0 = arith.constant 0 : i32
    %c0_i32_1 = arith.constant 0 : i32
    return %c0_i32, %c0_i32_0 : i32, i32
  }
  func.func @transform_5(%arg0: i32, %arg1: i32, %arg2: i32) -> (i32, i32) {
    %c0_i32 = arith.constant 0 : i32
    return %arg0, %arg1 : i32, i32
  }
}

module attributes {stable_mosaic.version = 11 : i64} {
  func.func @_linear_kernel(%arg0: i32, %arg1: i32, %arg2: i32, %arg3: memref<34x32xbf16, #tpu.memory_space<vmem>>, %arg4: memref<32x32xbf16, #tpu.memory_space<vmem>>, %arg5: memref<1x32xf32, #tpu.memory_space<vmem>>, %arg6: memref<34x32xbf16, #tpu.memory_space<vmem>>, %arg7: memref<34x32xbf16, #tpu.memory_space<vmem>>) attributes {dimension_semantics = [#tpu.dimension_semantics<parallel>, #tpu.dimension_semantics<parallel>, #tpu.dimension_semantics<arbitrary>], iteration_bounds = array<i64: 1, 1, 1>, scalar_prefetch = 0 : i64, scratch_operands = 0 : i64, tpu.core_type = #tpu.core_type<tc>, window_params = [{transform_indices = @transform_0, window_bounds = array<i64: 34, 32>}, {transform_indices = @transform_1, window_bounds = array<i64: 32, 32>}, {transform_indices = @transform_2, window_bounds = array<i64: 1, 32>}, {transform_indices = @transform_3, window_bounds = array<i64: 34, 32>}, {transform_indices = @transform_4, window_bounds = array<i64: 34, 32>}]} {
    %c0 = arith.constant 0 : index
    %c0_0 = arith.constant 0 : index
    %0 = vector.load %arg3[%c0, %c0_0] : memref<34x32xbf16, #tpu.memory_space<vmem>>, vector<34x32xbf16>
    %c0_1 = arith.constant 0 : index
    %c0_2 = arith.constant 0 : index
    %1 = vector.load %arg4[%c0_1, %c0_2] : memref<32x32xbf16, #tpu.memory_space<vmem>>, vector<32x32xbf16>
    %cst = arith.constant dense<0.000000e+00> : vector<34x32xf32>
    %2 = tpu.matmul %0, %1, %cst {dimension_numbers = #tpu.dot_dimension_numbers<[1], [0], [0], [1], [0, 0, 1, 1], [], []>} : vector<34x32xbf16>, vector<32x32xbf16>, vector<34x32xf32> -> vector<34x32xf32>
    %c0_3 = arith.constant 0 : index
    %c0_4 = arith.constant 0 : index
    %3 = vector.load %arg5[%c0_3, %c0_4] : memref<1x32xf32, #tpu.memory_space<vmem>>, vector<1x32xf32>
    %4 = vector.broadcast %3 : vector<1x32xf32> to vector<34x32xf32>
    %5 = arith.addf %2, %4 : vector<34x32xf32>
    %c0_5 = arith.constant 0 : index
    %c0_6 = arith.constant 0 : index
    %6 = vector.load %arg6[%c0_5, %c0_6] : memref<34x32xbf16, #tpu.memory_space<vmem>>, vector<34x32xbf16>
    %7 = arith.extf %6 : vector<34x32xbf16> to vector<34x32xf32>
    %8 = arith.addf %5, %7 : vector<34x32xf32>
    %9 = arith.truncf %8 : vector<34x32xf32> to vector<34x32xbf16>
    %c0_7 = arith.constant 0 : index
    %c0_8 = arith.constant 0 : index
    %10 = vector.load %arg7[%c0_7, %c0_8] : memref<34x32xbf16, #tpu.memory_space<vmem>>, vector<34x32xbf16>
    tpu.vector_store %arg7[%c0_7, %c0_8], %9 {strides = array<i32>} : memref<34x32xbf16, #tpu.memory_space<vmem>>, vector<34x32xbf16>,
    return
  }
  func.func @transform_0(%arg0: i32, %arg1: i32, %arg2: i32) -> (i32, i32) {
    %c0_i32 = arith.constant 0 : i32
    return %arg0, %arg2 : i32, i32
  }
  func.func @transform_1(%arg0: i32, %arg1: i32, %arg2: i32) -> (i32, i32) {
    %c0_i32 = arith.constant 0 : i32
    return %arg2, %arg1 : i32, i32
  }
  func.func @transform_2(%arg0: i32, %arg1: i32, %arg2: i32) -> (i32, i32) {
    %c0_i32 = arith.constant 0 : i32
    %c0_i32_0 = arith.constant 0 : i32
    return %c0_i32, %arg1 : i32, i32
  }
  func.func @transform_3(%arg0: i32, %arg1: i32, %arg2: i32) -> (i32, i32) {
    %c0_i32 = arith.constant 0 : i32
    return %arg0, %arg1 : i32, i32
  }
  func.func @transform_4(%arg0: i32, %arg1: i32, %arg2: i32) -> (i32, i32) {
    %c0_i32 = arith.constant 0 : i32
    return %arg0, %arg1 : i32, i32
  }
}

module attributes {stable_mosaic.version = 11 : i64} {
  func.func @_linear_kernel(%arg0: i32, %arg1: i32, %arg2: i32, %arg3: memref<34x32xbf16, #tpu.memory_space<vmem>>, %arg4: memref<32x128xbf16, #tpu.memory_space<vmem>>, %arg5: memref<1x128xf32, #tpu.memory_space<vmem>>, %arg6: memref<1x32xf32, #tpu.memory_space<vmem>>, %arg7: memref<1x32xf32, #tpu.memory_space<vmem>>, %arg8: memref<34x128xbf16, #tpu.memory_space<vmem>>) attributes {dimension_semantics = [#tpu.dimension_semantics<parallel>, #tpu.dimension_semantics<parallel>, #tpu.dimension_semantics<arbitrary>], iteration_bounds = array<i64: 1, 1, 1>, scalar_prefetch = 0 : i64, scratch_operands = 0 : i64, tpu.core_type = #tpu.core_type<tc>, window_params = [{transform_indices = @transform_0, window_bounds = array<i64: 34, 32>}, {transform_indices = @transform_1, window_bounds = array<i64: 32, 128>}, {transform_indices = @transform_2, window_bounds = array<i64: 1, 128>}, {pipeline_mode = #tpu.pipeline_mode<synchronous>, transform_indices = @transform_3, window_bounds = array<i64: 1, 32>}, {pipeline_mode = #tpu.pipeline_mode<synchronous>, transform_indices = @transform_4, window_bounds = array<i64: 1, 32>}, {transform_indices = @transform_5, window_bounds = array<i64: 34, 128>}]} {
    %c0 = arith.constant 0 : index
    %c0_0 = arith.constant 0 : index
    %0 = vector.load %arg3[%c0, %c0_0] : memref<34x32xbf16, #tpu.memory_space<vmem>>, vector<34x32xbf16>
    %1 = arith.extf %0 : vector<34x32xbf16> to vector<34x32xf32>
    %cst = arith.constant dense<0.000000e+00> : vector<34xf32>
    %2 = vector.multi_reduction <add>, %1, %cst [1] : vector<34x32xf32> to vector<34xf32>
    %3 = vector.shape_cast %2 : vector<34xf32> to vector<34x1xf32>
    %cst_1 = arith.constant 3.200000e+01 : f32
    %4 = vector.broadcast %cst_1 : f32 to vector<34x1xf32>
    %5 = arith.divf %3, %4 : vector<34x1xf32>
    %6 = vector.broadcast %5 : vector<34x1xf32> to vector<34x32xf32>
    %7 = arith.subf %1, %6 : vector<34x32xf32>
    %8 = arith.mulf %7, %7 : vector<34x32xf32>
    %cst_2 = arith.constant dense<0.000000e+00> : vector<34xf32>
    %9 = vector.multi_reduction <add>, %8, %cst_2 [1] : vector<34x32xf32> to vector<34xf32>
    %10 = vector.shape_cast %9 : vector<34xf32> to vector<34x1xf32>
    %cst_3 = arith.constant 3.200000e+01 : f32
    %11 = vector.broadcast %cst_3 : f32 to vector<34x1xf32>
    %12 = arith.divf %10, %11 : vector<34x1xf32>
    %cst_4 = arith.constant 9.99999974E-6 : f32
    %13 = vector.broadcast %cst_4 : f32 to vector<34x1xf32>
    %14 = arith.addf %12, %13 : vector<34x1xf32>
    %15 = math.rsqrt %14 : vector<34x1xf32>
    %16 = vector.broadcast %15 : vector<34x1xf32> to vector<34x32xf32>
    %17 = arith.mulf %7, %16 : vector<34x32xf32>
    %c0_5 = arith.constant 0 : index
    %c0_6 = arith.constant 0 : index
    %18 = vector.load %arg6[%c0_5, %c0_6] : memref<1x32xf32, #tpu.memory_space<vmem>>, vector<1x32xf32>
    %19 = vector.broadcast %18 : vector<1x32xf32> to vector<34x32xf32>
    %20 = arith.mulf %17, %19 : vector<34x32xf32>
    %c0_7 = arith.constant 0 : index
    %c0_8 = arith.constant 0 : index
    %21 = vector.load %arg7[%c0_7, %c0_8] : memref<1x32xf32, #tpu.memory_space<vmem>>, vector<1x32xf32>
    %22 = vector.broadcast %21 : vector<1x32xf32> to vector<34x32xf32>
    %23 = arith.addf %20, %22 : vector<34x32xf32>
    %24 = arith.truncf %23 : vector<34x32xf32> to vector<34x32xbf16>
    %c0_9 = arith.constant 0 : index
    %c0_10 = arith.constant 0 : index
    %25 = vector.load %arg4[%c0_9, %c0_10] : memref<32x128xbf16, #tpu.memory_space<vmem>>, vector<32x128xbf16>
    %cst_11 = arith.constant dense<0.000000e+00> : vector<34x128xf32>
    %26 = tpu.matmul %24, %25, %cst_11 {dimension_numbers = #tpu.dot_dimension_numbers<[1], [0], [0], [1], [0, 0, 1, 1], [], []>} : vector<34x32xbf16>, vector<32x128xbf16>, vector<34x128xf32> -> vector<34x128xf32>
    %c0_12 = arith.constant 0 : index
    %c0_13 = arith.constant 0 : index
    %27 = vector.load %arg5[%c0_12, %c0_13] : memref<1x128xf32, #tpu.memory_space<vmem>>, vector<1x128xf32>
    %28 = vector.broadcast %27 : vector<1x128xf32> to vector<34x128xf32>
    %29 = arith.addf %26, %28 : vector<34x128xf32>
    %cst_14 = arith.constant 5.000000e-01 : f32
    %30 = vector.broadcast %cst_14 : f32 to vector<34x128xf32>
    %31 = arith.mulf %30, %29 : vector<34x128xf32>
    %cst_15 = arith.constant 4.471500e-02 : f32
    %32 = vector.broadcast %cst_15 : f32 to vector<34x128xf32>
    %33 = arith.mulf %32, %29 : vector<34x128xf32>
    %34 = arith.mulf %33, %29 : vector<34x128xf32>
    %35 = arith.mulf %34, %29 : vector<34x128xf32>
    %36 = arith.addf %29, %35 : vector<34x128xf32>
    %cst_16 = arith.constant 0.797884583 : f32
    %37 = vector.broadcast %cst_16 : f32 to vector<34x128xf32>
    %38 = arith.mulf %37, %36 : vector<34x128xf32>
    %39 = math.tanh %38 : vector<34x128xf32>
    %cst_17 = arith.constant 1.000000e+00 : f32
    %40 = vector.broadcast %cst_17 : f32 to vector<34x128xf32>
    %41 = arith.addf %40, %39 : vector<34x128xf32>
    %42 = arith.mulf %31, %41 : vector<34x128xf32>
    %43 = arith.truncf %42 : vector<34x128xf32> to vector<34x128xbf16>
    %c0_18 = arith.constant 0 : index
    %c0_19 = arith.constant 0 : index
    %44 = vector.load %arg8[%c0_18, %c0_19] : memref<34x128xbf16, #tpu.memory_space<vmem>>, vector<34x128xbf16>
    tpu.vector_store %arg8[%c0_18, %c0_19], %43 {strides = array<i32>} : memref<34x128xbf16, #tpu.memory_space<vmem>>, vector<34x128xbf16>,
    return
  }
  func.func @transform_0(%arg0: i32, %arg1: i32, %arg2: i32) -> (i32, i32) {
    %c0_i32 = arith.constant 0 : i32
    return %arg0, %arg2 : i32, i32
  }
  func.func @transform_1(%arg0: i32, %arg1: i32, %arg2: i32) -> (i32, i32) {
    %c0_i32 = arith.constant 0 : i32
    return %arg2, %arg1 : i32, i32
  }
  func.func @transform_2(%arg0: i32, %arg1: i32, %arg2: i32) -> (i32, i32) {
    %c0_i32 = arith.constant 0 : i32
    %c0_i32_0 = arith.constant 0 : i32
    return %c0_i32, %arg1 : i32, i32
  }
  func.func @transform_3(%arg0: i32, %arg1: i32, %arg2: i32) -> (i32, i32) {
    %c0_i32 = arith.constant 0 : i32
    %c0_i32_0 = arith.constant 0 : i32
    %c0_i32_1 = arith.constant 0 : i32
    return %c0_i32, %c0_i32_0 : i32, i32
  }
  func.func @transform_4(%arg0: i32, %arg1: i32, %arg2: i32) -> (i32, i32) {
    %c0_i32 = arith.constant 0 : i32
    %c0_i32_0 = arith.constant 0 : i32
    %c0_i32_1 = arith.constant 0 : i32
    return %c0_i32, %c0_i32_0 : i32, i32
  }
  func.func @transform_5(%arg0: i32, %arg1: i32, %arg2: i32) -> (i32, i32) {
    %c0_i32 = arith.constant 0 : i32
    return %arg0, %arg1 : i32, i32
  }
}

module attributes {stable_mosaic.version = 11 : i64} {
  func.func @_linear_kernel(%arg0: i32, %arg1: i32, %arg2: i32, %arg3: memref<34x128xbf16, #tpu.memory_space<vmem>>, %arg4: memref<128x32xbf16, #tpu.memory_space<vmem>>, %arg5: memref<1x32xf32, #tpu.memory_space<vmem>>, %arg6: memref<34x32xbf16, #tpu.memory_space<vmem>>, %arg7: memref<34x32xbf16, #tpu.memory_space<vmem>>) attributes {dimension_semantics = [#tpu.dimension_semantics<parallel>, #tpu.dimension_semantics<parallel>, #tpu.dimension_semantics<arbitrary>], iteration_bounds = array<i64: 1, 1, 1>, scalar_prefetch = 0 : i64, scratch_operands = 0 : i64, tpu.core_type = #tpu.core_type<tc>, window_params = [{transform_indices = @transform_0, window_bounds = array<i64: 34, 128>}, {transform_indices = @transform_1, window_bounds = array<i64: 128, 32>}, {transform_indices = @transform_2, window_bounds = array<i64: 1, 32>}, {transform_indices = @transform_3, window_bounds = array<i64: 34, 32>}, {transform_indices = @transform_4, window_bounds = array<i64: 34, 32>}]} {
    %c0 = arith.constant 0 : index
    %c0_0 = arith.constant 0 : index
    %0 = vector.load %arg3[%c0, %c0_0] : memref<34x128xbf16, #tpu.memory_space<vmem>>, vector<34x128xbf16>
    %c0_1 = arith.constant 0 : index
    %c0_2 = arith.constant 0 : index
    %1 = vector.load %arg4[%c0_1, %c0_2] : memref<128x32xbf16, #tpu.memory_space<vmem>>, vector<128x32xbf16>
    %cst = arith.constant dense<0.000000e+00> : vector<34x32xf32>
    %2 = tpu.matmul %0, %1, %cst {dimension_numbers = #tpu.dot_dimension_numbers<[1], [0], [0], [1], [0, 0, 1, 1], [], []>} : vector<34x128xbf16>, vector<128x32xbf16>, vector<34x32xf32> -> vector<34x32xf32>
    %c0_3 = arith.constant 0 : index
    %c0_4 = arith.constant 0 : index
    %3 = vector.load %arg5[%c0_3, %c0_4] : memref<1x32xf32, #tpu.memory_space<vmem>>, vector<1x32xf32>
    %4 = vector.broadcast %3 : vector<1x32xf32> to vector<34x32xf32>
    %5 = arith.addf %2, %4 : vector<34x32xf32>
    %c0_5 = arith.constant 0 : index
    %c0_6 = arith.constant 0 : index
    %6 = vector.load %arg6[%c0_5, %c0_6] : memref<34x32xbf16, #tpu.memory_space<vmem>>, vector<34x32xbf16>
    %7 = arith.extf %6 : vector<34x32xbf16> to vector<34x32xf32>
    %8 = arith.addf %5, %7 : vector<34x32xf32>
    %9 = arith.truncf %8 : vector<34x32xf32> to vector<34x32xbf16>
    %c0_7 = arith.constant 0 : index
    %c0_8 = arith.constant 0 : index
    %10 = vector.load %arg7[%c0_7, %c0_8] : memref<34x32xbf16, #tpu.memory_space<vmem>>, vector<34x32xbf16>
    tpu.vector_store %arg7[%c0_7, %c0_8], %9 {strides = array<i32>} : memref<34x32xbf16, #tpu.memory_space<vmem>>, vector<34x32xbf16>,
    return
  }
  func.func @transform_0(%arg0: i32, %arg1: i32, %arg2: i32) -> (i32, i32) {
    %c0_i32 = arith.constant 0 : i32
    return %arg0, %arg2 : i32, i32
  }
  func.func @transform_1(%arg0: i32, %arg1: i32, %arg2: i32) -> (i32, i32) {
    %c0_i32 = arith.constant 0 : i32
    return %arg2, %arg1 : i32, i32
  }
  func.func @transform_2(%arg0: i32, %arg1: i32, %arg2: i32) -> (i32, i32) {
    %c0_i32 = arith.constant 0 : i32
    %c0_i32_0 = arith.constant 0 : i32
    return %c0_i32, %arg1 : i32, i32
  }
  func.func @transform_3(%arg0: i32, %arg1: i32, %arg2: i32) -> (i32, i32) {
    %c0_i32 = arith.constant 0 : i32
    return %arg0, %arg1 : i32, i32
  }
  func.func @transform_4(%arg0: i32, %arg1: i32, %arg2: i32) -> (i32, i32) {
    %c0_i32 = arith.constant 0 : i32
    return %arg0, %arg1 : i32, i32
  }
}

module attributes {stable_mosaic.version = 11 : i64} {
  func.func @_linear_kernel(%arg0: i32, %arg1: i32, %arg2: i32, %arg3: memref<34x32xbf16, #tpu.memory_space<vmem>>, %arg4: memref<32x48xbf16, #tpu.memory_space<vmem>>, %arg5: memref<1x48xf32, #tpu.memory_space<vmem>>, %arg6: memref<1x32xf32, #tpu.memory_space<vmem>>, %arg7: memref<1x32xf32, #tpu.memory_space<vmem>>, %arg8: memref<34x48xf32, #tpu.memory_space<vmem>>) attributes {dimension_semantics = [#tpu.dimension_semantics<parallel>, #tpu.dimension_semantics<parallel>, #tpu.dimension_semantics<arbitrary>], iteration_bounds = array<i64: 1, 1, 1>, scalar_prefetch = 0 : i64, scratch_operands = 0 : i64, tpu.core_type = #tpu.core_type<tc>, window_params = [{transform_indices = @transform_0, window_bounds = array<i64: 34, 32>}, {transform_indices = @transform_1, window_bounds = array<i64: 32, 48>}, {transform_indices = @transform_2, window_bounds = array<i64: 1, 48>}, {pipeline_mode = #tpu.pipeline_mode<synchronous>, transform_indices = @transform_3, window_bounds = array<i64: 1, 32>}, {pipeline_mode = #tpu.pipeline_mode<synchronous>, transform_indices = @transform_4, window_bounds = array<i64: 1, 32>}, {transform_indices = @transform_5, window_bounds = array<i64: 34, 48>}]} {
    %c0 = arith.constant 0 : index
    %c0_0 = arith.constant 0 : index
    %0 = vector.load %arg3[%c0, %c0_0] : memref<34x32xbf16, #tpu.memory_space<vmem>>, vector<34x32xbf16>
    %1 = arith.extf %0 : vector<34x32xbf16> to vector<34x32xf32>
    %cst = arith.constant dense<0.000000e+00> : vector<34xf32>
    %2 = vector.multi_reduction <add>, %1, %cst [1] : vector<34x32xf32> to vector<34xf32>
    %3 = vector.shape_cast %2 : vector<34xf32> to vector<34x1xf32>
    %cst_1 = arith.constant 3.200000e+01 : f32
    %4 = vector.broadcast %cst_1 : f32 to vector<34x1xf32>
    %5 = arith.divf %3, %4 : vector<34x1xf32>
    %6 = vector.broadcast %5 : vector<34x1xf32> to vector<34x32xf32>
    %7 = arith.subf %1, %6 : vector<34x32xf32>
    %8 = arith.mulf %7, %7 : vector<34x32xf32>
    %cst_2 = arith.constant dense<0.000000e+00> : vector<34xf32>
    %9 = vector.multi_reduction <add>, %8, %cst_2 [1] : vector<34x32xf32> to vector<34xf32>
    %10 = vector.shape_cast %9 : vector<34xf32> to vector<34x1xf32>
    %cst_3 = arith.constant 3.200000e+01 : f32
    %11 = vector.broadcast %cst_3 : f32 to vector<34x1xf32>
    %12 = arith.divf %10, %11 : vector<34x1xf32>
    %cst_4 = arith.constant 9.99999974E-6 : f32
    %13 = vector.broadcast %cst_4 : f32 to vector<34x1xf32>
    %14 = arith.addf %12, %13 : vector<34x1xf32>
    %15 = math.rsqrt %14 : vector<34x1xf32>
    %16 = vector.broadcast %15 : vector<34x1xf32> to vector<34x32xf32>
    %17 = arith.mulf %7, %16 : vector<34x32xf32>
    %c0_5 = arith.constant 0 : index
    %c0_6 = arith.constant 0 : index
    %18 = vector.load %arg6[%c0_5, %c0_6] : memref<1x32xf32, #tpu.memory_space<vmem>>, vector<1x32xf32>
    %19 = vector.broadcast %18 : vector<1x32xf32> to vector<34x32xf32>
    %20 = arith.mulf %17, %19 : vector<34x32xf32>
    %c0_7 = arith.constant 0 : index
    %c0_8 = arith.constant 0 : index
    %21 = vector.load %arg7[%c0_7, %c0_8] : memref<1x32xf32, #tpu.memory_space<vmem>>, vector<1x32xf32>
    %22 = vector.broadcast %21 : vector<1x32xf32> to vector<34x32xf32>
    %23 = arith.addf %20, %22 : vector<34x32xf32>
    %24 = arith.truncf %23 : vector<34x32xf32> to vector<34x32xbf16>
    %c0_9 = arith.constant 0 : index
    %c0_10 = arith.constant 0 : index
    %25 = vector.load %arg4[%c0_9, %c0_10] : memref<32x48xbf16, #tpu.memory_space<vmem>>, vector<32x48xbf16>
    %cst_11 = arith.constant dense<0.000000e+00> : vector<34x48xf32>
    %26 = tpu.matmul %24, %25, %cst_11 {dimension_numbers = #tpu.dot_dimension_numbers<[1], [0], [0], [1], [0, 0, 1, 1], [], []>} : vector<34x32xbf16>, vector<32x48xbf16>, vector<34x48xf32> -> vector<34x48xf32>
    %c0_12 = arith.constant 0 : index
    %c0_13 = arith.constant 0 : index
    %27 = vector.load %arg5[%c0_12, %c0_13] : memref<1x48xf32, #tpu.memory_space<vmem>>, vector<1x48xf32>
    %28 = vector.broadcast %27 : vector<1x48xf32> to vector<34x48xf32>
    %29 = arith.addf %26, %28 : vector<34x48xf32>
    %c0_14 = arith.constant 0 : index
    %c0_15 = arith.constant 0 : index
    %30 = vector.load %arg8[%c0_14, %c0_15] : memref<34x48xf32, #tpu.memory_space<vmem>>, vector<34x48xf32>
    tpu.vector_store %arg8[%c0_14, %c0_15], %29 {strides = array<i32>} : memref<34x48xf32, #tpu.memory_space<vmem>>, vector<34x48xf32>,
    return
  }
  func.func @transform_0(%arg0: i32, %arg1: i32, %arg2: i32) -> (i32, i32) {
    %c0_i32 = arith.constant 0 : i32
    return %arg0, %arg2 : i32, i32
  }
  func.func @transform_1(%arg0: i32, %arg1: i32, %arg2: i32) -> (i32, i32) {
    %c0_i32 = arith.constant 0 : i32
    return %arg2, %arg1 : i32, i32
  }
  func.func @transform_2(%arg0: i32, %arg1: i32, %arg2: i32) -> (i32, i32) {
    %c0_i32 = arith.constant 0 : i32
    %c0_i32_0 = arith.constant 0 : i32
    return %c0_i32, %arg1 : i32, i32
  }
  func.func @transform_3(%arg0: i32, %arg1: i32, %arg2: i32) -> (i32, i32) {
    %c0_i32 = arith.constant 0 : i32
    %c0_i32_0 = arith.constant 0 : i32
    %c0_i32_1 = arith.constant 0 : i32
    return %c0_i32, %c0_i32_0 : i32, i32
  }
  func.func @transform_4(%arg0: i32, %arg1: i32, %arg2: i32) -> (i32, i32) {
    %c0_i32 = arith.constant 0 : i32
    %c0_i32_0 = arith.constant 0 : i32
    %c0_i32_1 = arith.constant 0 : i32
    return %c0_i32, %c0_i32_0 : i32, i32
  }
  func.func @transform_5(%arg0: i32, %arg1: i32, %arg2: i32) -> (i32, i32) {
    %c0_i32 = arith.constant 0 : i32
    return %arg0, %arg1 : i32, i32
  }
}

module attributes {stable_mosaic.version = 11 : i64} {
  func.func @_loss_kernel(%arg0: i32, %arg1: memref<32x48xf32, #tpu.memory_space<vmem>>, %arg2: memref<32x48xf32, #tpu.memory_space<vmem>>, %arg3: memref<32x1xf32, #tpu.memory_space<vmem>>, %arg4: memref<1x1xf32, #tpu.memory_space<vmem>>, %arg5: memref<32x1xf32, #tpu.memory_space<vmem>>, %arg6: memref<32x1xf32, #tpu.memory_space<vmem>>) attributes {dimension_semantics = [#tpu.dimension_semantics<arbitrary>], iteration_bounds = array<i64: 1>, scalar_prefetch = 0 : i64, scratch_operands = 2 : i64, tpu.core_type = #tpu.core_type<tc>, window_params = [{transform_indices = @transform_0, window_bounds = array<i64: 32, 48>}, {transform_indices = @transform_1, window_bounds = array<i64: 32, 48>}, {transform_indices = @transform_2, window_bounds = array<i64: 32, 1>}, {pipeline_mode = #tpu.pipeline_mode<synchronous>, transform_indices = @transform_3, window_bounds = array<i64: 1, 1>}]} {
    %c0_i32 = arith.constant 0 : i32
    %0 = arith.cmpi eq, %arg0, %c0_i32 : i32
    %1 = arith.extui %0 : i1 to i32
    %c0_i32_0 = arith.constant 0 : i32
    %2 = arith.cmpi ne, %1, %c0_i32_0 : i32
    scf.if %2 {
      %cst_17 = arith.constant 0.000000e+00 : f32
      %22 = vector.broadcast %cst_17 : f32 to vector<32x1xf32>
      %c0_18 = arith.constant 0 : index
      %c0_19 = arith.constant 0 : index
      %23 = vector.load %arg5[%c0_18, %c0_19] : memref<32x1xf32, #tpu.memory_space<vmem>>, vector<32x1xf32>
      tpu.vector_store %arg5[%c0_18, %c0_19], %22 {strides = array<i32>} : memref<32x1xf32, #tpu.memory_space<vmem>>, vector<32x1xf32>,
      %cst_20 = arith.constant 0.000000e+00 : f32
      %24 = vector.broadcast %cst_20 : f32 to vector<32x1xf32>
      %c0_21 = arith.constant 0 : index
      %c0_22 = arith.constant 0 : index
      %25 = vector.load %arg6[%c0_21, %c0_22] : memref<32x1xf32, #tpu.memory_space<vmem>>, vector<32x1xf32>
      tpu.vector_store %arg6[%c0_21, %c0_22], %24 {strides = array<i32>} : memref<32x1xf32, #tpu.memory_space<vmem>>, vector<32x1xf32>,
    } else {
    }
    %c0 = arith.constant 0 : index
    %c0_1 = arith.constant 0 : index
    %3 = vector.load %arg1[%c0, %c0_1] : memref<32x48xf32, #tpu.memory_space<vmem>>, vector<32x48xf32>
    %c0_2 = arith.constant 0 : index
    %c0_3 = arith.constant 0 : index
    %4 = vector.load %arg2[%c0_2, %c0_3] : memref<32x48xf32, #tpu.memory_space<vmem>>, vector<32x48xf32>
    %5 = arith.subf %3, %4 : vector<32x48xf32>
    %6 = arith.mulf %5, %5 : vector<32x48xf32>
    %cst = arith.constant dense<0.000000e+00> : vector<32xf32>
    %7 = vector.multi_reduction <add>, %6, %cst [1] : vector<32x48xf32> to vector<32xf32>
    %8 = vector.shape_cast %7 : vector<32xf32> to vector<32x1xf32>
    %cst_4 = arith.constant 4.800000e+01 : f32
    %9 = vector.broadcast %cst_4 : f32 to vector<32x1xf32>
    %10 = arith.divf %8, %9 : vector<32x1xf32>
    %c0_5 = arith.constant 0 : index
    %c0_6 = arith.constant 0 : index
    %11 = vector.load %arg3[%c0_5, %c0_6] : memref<32x1xf32, #tpu.memory_space<vmem>>, vector<32x1xf32>
    %c0_7 = arith.constant 0 : index
    %c0_8 = arith.constant 0 : index
    %12 = vector.load %arg5[%c0_7, %c0_8] : memref<32x1xf32, #tpu.memory_space<vmem>>, vector<32x1xf32>
    %13 = arith.mulf %10, %11 : vector<32x1xf32>
    %14 = arith.addf %12, %13 : vector<32x1xf32>
    %c0_9 = arith.constant 0 : index
    %c0_10 = arith.constant 0 : index
    %15 = vector.load %arg5[%c0_9, %c0_10] : memref<32x1xf32, #tpu.memory_space<vmem>>, vector<32x1xf32>
    tpu.vector_store %arg5[%c0_9, %c0_10], %14 {strides = array<i32>} : memref<32x1xf32, #tpu.memory_space<vmem>>, vector<32x1xf32>,
    %c0_11 = arith.constant 0 : index
    %c0_12 = arith.constant 0 : index
    %16 = vector.load %arg6[%c0_11, %c0_12] : memref<32x1xf32, #tpu.memory_space<vmem>>, vector<32x1xf32>
    %17 = arith.addf %16, %11 : vector<32x1xf32>
    %c0_13 = arith.constant 0 : index
    %c0_14 = arith.constant 0 : index
    %18 = vector.load %arg6[%c0_13, %c0_14] : memref<32x1xf32, #tpu.memory_space<vmem>>, vector<32x1xf32>
    tpu.vector_store %arg6[%c0_13, %c0_14], %17 {strides = array<i32>} : memref<32x1xf32, #tpu.memory_space<vmem>>, vector<32x1xf32>,
    %c0_i32_15 = arith.constant 0 : i32
    %19 = arith.cmpi eq, %arg0, %c0_i32_15 : i32
    %20 = arith.extui %19 : i1 to i32
    %c0_i32_16 = arith.constant 0 : i32
    %21 = arith.cmpi ne, %20, %c0_i32_16 : i32
    scf.if %21 {
      %c0_17 = arith.constant 0 : index
      %c0_18 = arith.constant 0 : index
      %22 = vector.load %arg5[%c0_17, %c0_18] : memref<32x1xf32, #tpu.memory_space<vmem>>, vector<32x1xf32>
      %23 = vector.shape_cast %22 : vector<32x1xf32> to vector<1x32x1xf32>
      %cst_19 = arith.constant dense<0.000000e+00> : vector<1xf32>
      %24 = vector.multi_reduction <add>, %23, %cst_19 [1, 2] : vector<1x32x1xf32> to vector<1xf32>
      %25 = vector.shape_cast %24 : vector<1xf32> to vector<1x1x1xf32>
      %26 = vector.extract %25[0, 0, 0] : f32 from vector<1x1x1xf32>
      %c0_20 = arith.constant 0 : index
      %c0_21 = arith.constant 0 : index
      %27 = vector.load %arg6[%c0_20, %c0_21] : memref<32x1xf32, #tpu.memory_space<vmem>>, vector<32x1xf32>
      %28 = vector.shape_cast %27 : vector<32x1xf32> to vector<1x32x1xf32>
      %cst_22 = arith.constant dense<0.000000e+00> : vector<1xf32>
      %29 = vector.multi_reduction <add>, %28, %cst_22 [1, 2] : vector<1x32x1xf32> to vector<1xf32>
      %30 = vector.shape_cast %29 : vector<1xf32> to vector<1x1x1xf32>
      %31 = vector.extract %30[0, 0, 0] : f32 from vector<1x1x1xf32>
      %32 = arith.divf %26, %31 : f32
      %33 = vector.broadcast %32 : f32 to vector<1x1xf32>
      %c0_23 = arith.constant 0 : index
      %c0_24 = arith.constant 0 : index
      %34 = vector.load %arg4[%c0_23, %c0_24] : memref<1x1xf32, #tpu.memory_space<vmem>>, vector<1x1xf32>
      tpu.vector_store %arg4[%c0_23, %c0_24], %33 {strides = array<i32>} : memref<1x1xf32, #tpu.memory_space<vmem>>, vector<1x1xf32>,
    } else {
    }
    return
  }
  func.func @transform_0(%arg0: i32) -> (i32, i32) {
    %c0_i32 = arith.constant 0 : i32
    %c0_i32_0 = arith.constant 0 : i32
    return %arg0, %c0_i32 : i32, i32
  }
  func.func @transform_1(%arg0: i32) -> (i32, i32) {
    %c0_i32 = arith.constant 0 : i32
    %c0_i32_0 = arith.constant 0 : i32
    return %arg0, %c0_i32 : i32, i32
  }
  func.func @transform_2(%arg0: i32) -> (i32, i32) {
    %c0_i32 = arith.constant 0 : i32
    %c0_i32_0 = arith.constant 0 : i32
    return %arg0, %c0_i32 : i32, i32
  }
  func.func @transform_3(%arg0: i32) -> (i32, i32) {
    %c0_i32 = arith.constant 0 : i32
    %c0_i32_0 = arith.constant 0 : i32
    %c0_i32_1 = arith.constant 0 : i32
    return %c0_i32, %c0_i32_0 : i32, i32
  }
}

</mosaic_0001>

<bundles_post_ra>
// kernel: _lambda_.24
= control target key start
LH: loop header
LB: loop body
LE: loop exit
PB: predicated region body
PF: predicated region fallthrough
CT: control target
= control target key end

     0   :  { %8 = vsyncpa [#allocation3], 0  ;;  %s407_s0 = inlined_call_operand.hbm [shape: f32[32,48], index: 0, kind: input, shape index: {}]   ;;  %s408_s1 = inlined_call_operand.hbm [shape: bf16[48,32], index: 1, kind: input, shape index: {}]   ;;  %s409_s2 = inlined_call_operand.hbm [shape: f32[1,32], index: 2, kind: input, shape index: {}]   ;;  %s410_s3 = inlined_call_operand.hbm [shape: bf16[32,32], index: 3, kind: output, shape index: {}]  }
   0x1   :  { %9 = vsyncpa [#allocation6], 0 }
   0x2   :  { %10 = vsyncpa [#allocation4], 0  ;;  %s321_s12 = smov [#allocation5]   ;;  %s227_s16 = scalar_lea.hbm %s408_s1, 384 }
   0x3   :  { %s28_s13 = sshll.u32 %s321_s12, 4  ;;  %p228_p0 = scmp.ne.s32.totalorder %s408_s1, %s227_s16  ;;  %s29_s13 = int_to_ptr.vmem [resolvable:$true] %s28_s13 }
   0x4   :  { %p231_p1 = scmp.lt.u32.totalorder %s227_s16, %s408_s1 }
   0x6   :  { %p233_p2 = pnand %p231_p1, %p228_p0 }
   0x8   :  { %236 = shalt.err (!%p233_p2)
}
   0x9   :  { %s237_s21 = scalar_lea.vmem %s29_s13, 384  ;;  %p242_p4 = scmp.lt.s32.totalorder %s29_s13, %s29_s13 }
   0xa   :  { %p238_p3 = scmp.ne.s32.totalorder %s29_s13, %s237_s21  ;;  %p243_p5 = scmp.lt.s32.totalorder %s237_s21, %s237_s21 }
   0xc   :  { %p244_p6 = por %p243_p5, %p242_p4 }
   0xe   :  { %p245_p7 = pnand %p244_p6, %p238_p3 }
  0x10   :  { %248 = shalt.err (!%p245_p7)
}
  0x11   :  { %s322_s22 = smov 64   ;;  %s323_s23 = smov 4  }
  0x12   :  { %34 = dma.hbm_to_vmem [thread:$0]  %s408_s1, 384, %s29_s13, [#allocation6], %s322_s22, %s322_s22, %s323_s23  }
  0x13   :  { %s324_s26 = smov [#allocation2]   ;;  %s249_s30 = scalar_lea.hbm %s407_s0, 512 }
  0x14   :  { %s16_s27 = sshll.u32 %s324_s26, 4  ;;  %p250_p8 = scmp.ne.s32.totalorder %s407_s0, %s249_s30  ;;  %s17_s27 = int_to_ptr.vmem [resolvable:$true] %s16_s27 }
  0x15   :  { %p253_p9 = scmp.lt.u32.totalorder %s249_s30, %s407_s0 }
  0x17   :  { %p255_p10 = pnand %p253_p9, %p250_p8 }
  0x19   :  { %258 = shalt.err (!%p255_p10)
}
  0x1a   :  { %s259_s8 = scalar_lea.vmem %s17_s27, 512  ;;  %p264_p12 = scmp.lt.s32.totalorder %s17_s27, %s17_s27 }
  0x1b   :  { %p260_p11 = scmp.ne.s32.totalorder %s17_s27, %s259_s8  ;;  %p265_p13 = scmp.lt.s32.totalorder %s259_s8, %s259_s8 }
  0x1d   :  { %p266_p0 = por %p265_p13, %p264_p12 }
  0x1f   :  { %p267_p1 = pnand %p266_p0, %p260_p11 }
  0x21   :  { %270 = shalt.err (!%p267_p1)
}
  0x22   :  { %s325_s1 = smov 128   ;;  %s326_s9 = smov 8  }
  0x23   :  { %22 = dma.hbm_to_vmem [thread:$0]  %s407_s0, 512, %s17_s27, [#allocation3], %s325_s1, %s325_s1, %s326_s9  }
  0x24   :  { %s327_s12 = smov [#allocation7]   ;;  %s271_s16 = scalar_lea.hbm %s409_s2, 16 }
  0x25   :  { %s41_s13 = sshll.u32 %s327_s12, 4  ;;  %p272_p2 = scmp.ne.s32.totalorder %s409_s2, %s271_s16  ;;  %s42_s13 = int_to_ptr.vmem [resolvable:$true] %s41_s13 }
  0x26   :  { %p275_p3 = scmp.lt.u32.totalorder %s271_s16, %s409_s2 }
  0x28   :  { %p277_p4 = pnand %p275_p3, %p272_p2 }
  0x2a   :  { %280 = shalt.err (!%p277_p4)
}
  0x2b   :  { %s281_s21 = scalar_lea.vmem %s42_s13, 16  ;;  %s285_s0 = scalar_lea.vmem %s42_s13, 32 }
  0x2c   :  { %p282_p5 = scmp.ne.s32.totalorder %s42_s13, %s281_s21  ;;  %p286_p6 = scmp.lt.s32.totalorder %s42_s13, %s42_s13 }
  0x2d   :  { %p287_p7 = scmp.lt.s32.totalorder %s285_s0, %s281_s21 }
  0x2f   :  { %p288_p8 = por %p287_p7, %p286_p6 }
  0x31   :  { %p289_p9 = pnand %p288_p8, %p282_p5 }
  0x33   :  { %292 = shalt.err (!%p289_p9)
}
  0x34   :  { %44 = dma.hbm_to_vmem [thread:$0]  %s409_s2, 16, %s42_s13, [#allocation6]  }
  0x35   :  { %315 = dma.done.wait [#allocation3], 512  }
  0x36   :  { %316 = vsyncadd [#allocation3], 4294966784 }
  0x37   :  { %317 = dma.done.wait [#allocation6], 400  }
  0x38   :  { %318 = vsyncadd [#allocation6], 4294966896  ;;  %v224_v0 = vld [vmem:[#allocation5] sm:$0xff]   ;;  %v225_v1 = vld [vmem:[#allocation5 + $0x8] sm:$0xff]   ;;  %vm92_vm0 = vcmask 392192   ;;  %vm164_vm1 = vcmask 257024  }
  0x39   :  { %206 = vmatprep.subr.bf16.mxu0 %v224_v0  ;;  %v55_v2 = vld [vmem:[#allocation2] sm:$0xff]  ;;  %v56_v3 = vld [vmem:[#allocation2 + $0x8] sm:$0xff]  ;;  %v226_v4 = vld [vmem:[#allocation5 + $0x10] sm:$0xff]   ;;  %s328_s2 = smov [#allocation8]  }
  0x3a   :  { %207 = vmatpush3.bf16.msra.mxu0 %v224_v0  ;;  %v59_v5 = vpack.c.bf16 %v56_v3, %v55_v2  ;;  %v57_v6 = vld [vmem:[#allocation2 + $0x10] sm:$0xff]  ;;  %v58_v7 = vld [vmem:[#allocation2 + $0x18] sm:$0xff]  ;;  %s174_s26 = sshll.u32 %s328_s2, 4  ;;  %s175_s26 = int_to_ptr.vmem [resolvable:$true] %s174_s26 }
  0x3b   :  { %208 = vmatprep.subr.bf16.mxu0 %v225_v1  ;;  %v60_v8 = vpack.c.bf16 %v58_v7, %v57_v6  ;;  %v187_v9 = vld [vmem:[#allocation7] ss:$0 sm:$0xff]  ;;  %s293_s27 = scalar_lea.vmem %s175_s26, 256  ;;  %p298_p11 = scmp.lt.s32.totalorder %s175_s26, %s175_s26 }
  0x3c   :  { %212 = vmatprep.mubr.msk.bf16.mxu0 %vm92_vm0, %v59_v5  ;;  %p294_p10 = scmp.ne.s32.totalorder %s175_s26, %s293_s27  ;;  %p299_p12 = scmp.lt.s32.totalorder %s293_s27, %s293_s27 }
  0x3e   :  { %209 = vmatpush3.bf16.msra.mxu0 %v225_v1  ;;  %p300_p13 = por %p299_p12, %p298_p11 }
  0x3f   :  { %210 = vmatprep.subr.bf16.mxu0 %v226_v4 }
  0x40   :  { %p301_p0 = pnand %p300_p13, %p294_p10 }
  0x42   :  { %211 = vmatpush3.bf16.msra.mxu0 %v226_v4 }
  0x45   :  { %213 = vmatmul.mubr.msk.bf16.vlgmr.msra.gmra.mrb[0].mxu0 %vm92_vm0, %v60_v8 }
 0x118   :  { %v214_v10 = vpop.f32.mrb[0].mxu0 }
 0x119   :  { %v142_v11 = vadd.f32 %v214_v10, %v187_v9  ;;  %v133_v12 = vpop.f32.mrb[1].mxu0 }
 0x11a   :  { %v134_v13 = vadd.f32 %v187_v9, %v133_v12  ;;  %v215_v14 = vpop.f32.mrb[2].mxu0 }
 0x11b   :  { %v199_v15 = vpack.c.bf16 %v142_v11, %v142_v11  ;;  %v145_v16 = vadd.f32 %v215_v14, %v187_v9  ;;  %v136_v17 = vpop.f32.mrb[3].mxu0 }
 0x11c   :  { %v197_v18 = vpack.c.bf16 %v134_v13, %v134_v13  ;;  %v137_v19 = vadd.f32 %v187_v9, %v136_v17 }
 0x11d   :  { %167 = vst.msk [vmem:[#allocation8 + $0x8] sm:$0xf] %vm164_vm1, %v199_v15  ;;  %v200_v20 = vpack.c.bf16 %v145_v16, %v145_v16 }
 0x11e   :  { %165 = vst.msk [vmem:[#allocation8] sm:$0xf] %vm164_vm1, %v197_v18  ;;  %v198_v21 = vpack.c.bf16 %v137_v19, %v137_v19 }
 0x11f   :  { %168 = vst.msk [vmem:[#allocation8 + $0xc] sm:$0xf] %vm164_vm1, %v200_v20 }
 0x120   :  { %166 = vst.msk [vmem:[#allocation8 + $0x4] sm:$0xf] %vm164_vm1, %v198_v21 }
 0x121   :  { %304 = shalt.err (!%p301_p0)
}
 0x122   :  { %s305_s30 = scalar_lea.hbm %s410_s3, 256 }
 0x123   :  { %p306_p1 = scmp.ne.s32.totalorder %s410_s3, %s305_s30  ;;  %p309_p2 = scmp.lt.u32.totalorder %s305_s30, %s410_s3 }
 0x125   :  { %p311_p3 = pnand %p309_p2, %p306_p1 }
 0x127   :  { %314 = shalt.err (!%p311_p3)
}
 0x128   :  { %180 = dma.vmem_to_hbm [thread:$0]  %s175_s26, 256, %s410_s3, [#allocation4], %s322_s22, %s322_s22, %s323_s23  }
 0x129   :  { %319 = dma.done.wait [#allocation4], 256  }
 0x12a   :  { %320 = vsyncadd [#allocation4], 4294967040 }
 0x12b   :  { %184 = vsyncpa [#allocation3], 1 }
 0x12c   :  { %185 = vsyncpa [#allocation6], 1 }
 0x12d   :  { %186 = vsyncpa [#allocation4], 1 }

// kernel: _lambda_.25
= control target key start
LH: loop header
LB: loop body
LE: loop exit
PB: predicated region body
PF: predicated region fallthrough
CT: control target
= control target key end

     0   :  { %10 = vsyncpa [#allocation3], 0  ;;  %s543_s0 = inlined_call_operand.hbm [shape: bf16[10,32], index: 0, kind: input, shape index: {}]   ;;  %s544_s1 = inlined_call_operand.hbm [shape: bf16[32,96], index: 1, kind: input, shape index: {}]   ;;  %s545_s2 = inlined_call_operand.hbm [shape: f32[1,96], index: 2, kind: input, shape index: {}]   ;;  %s546_s3 = inlined_call_operand.hbm [shape: f32[1,32], index: 3, kind: input, shape index: {}]   ;;  %s547_s4 = inlined_call_operand.hbm [shape: f32[1,32], index: 4, kind: input, shape index: {}]   ;;  %s548_s5 = inlined_call_operand.hbm [shape: bf16[10,96], index: 5, kind: output, shape index: {}]  }
   0x1   :  { %11 = vsyncpa [#allocation6], 0 }
   0x2   :  { %12 = vsyncpa [#allocation9], 0 }
   0x3   :  { %13 = vsyncpa [#allocation4], 0  ;;  %s411_s18 = smov [#allocation5]   ;;  %s412_s20 = smov [#allocation8]  }
   0x4   :  { %s31_s19 = sshll.u32 %s411_s18, 4  ;;  %s54_s21 = sshll.u32 %s412_s20, 4  ;;  %s32_s19 = int_to_ptr.vmem [resolvable:$true] %s31_s19  ;;  %s451_s21 = int_to_ptr.vmem [resolvable:$true] %s54_s21 }
   0x5   :  { %s271_s24 = scalar_lea.hbm %s544_s1, 256 }
   0x6   :  { %p272_p0 = scmp.ne.s32.totalorder %s544_s1, %s271_s24  ;;  %p275_p1 = scmp.lt.u32.totalorder %s271_s24, %s544_s1 }
   0x8   :  { %p277_p2 = pnand %p275_p1, %p272_p0 }
   0xa   :  { %280 = shalt.err (!%p277_p2)
}
   0xb   :  { %s281_s29 = scalar_lea.vmem %s32_s19, 256  ;;  %p286_p4 = scmp.lt.s32.totalorder %s32_s19, %s32_s19 }
   0xc   :  { %p282_p3 = scmp.ne.s32.totalorder %s32_s19, %s281_s29  ;;  %p287_p5 = scmp.lt.s32.totalorder %s281_s29, %s281_s29 }
   0xe   :  { %p288_p6 = por %p287_p5, %p286_p4 }
  0x10   :  { %p289_p7 = pnand %p288_p6, %p282_p3 }
  0x12   :  { %292 = shalt.err (!%p289_p7)
}
  0x13   :  { %s413_s30 = smov 64   ;;  %s414_s6 = smov 4  }
  0x14   :  { %37 = dma.hbm_to_vmem [thread:$0]  %s544_s1, 256, %s32_s19, [#allocation6], %s413_s30, %s413_s30, %s414_s6  }
  0x15   :  { %s293_s11 = scalar_lea.hbm %s546_s3, 16 }
  0x16   :  { %p294_p8 = scmp.ne.s32.totalorder %s546_s3, %s293_s11  ;;  %p297_p9 = scmp.lt.u32.totalorder %s293_s11, %s546_s3 }
  0x18   :  { %p299_p10 = pnand %p297_p9, %p294_p8 }
  0x1a   :  { %302 = shalt.err (!%p299_p10)
}
  0x1b   :  { %s303_s16 = scalar_lea.vmem %s451_s21, 16  ;;  %s307_s1 = scalar_lea.vmem %s451_s21, 32 }
  0x1c   :  { %p304_p11 = scmp.ne.s32.totalorder %s451_s21, %s303_s16  ;;  %p308_p12 = scmp.lt.s32.totalorder %s451_s21, %s451_s21 }
  0x1d   :  { %p309_p13 = scmp.lt.s32.totalorder %s307_s1, %s303_s16 }
  0x1f   :  { %p310_p0 = por %p309_p13, %p308_p12 }
  0x21   :  { %p311_p1 = pnand %p310_p0, %p304_p11 }
  0x23   :  { %314 = shalt.err (!%p311_p1)
}
  0x24   :  { %57 = dma.hbm_to_vmem [thread:$0]  %s546_s3, 16, %s451_s21, [#allocation9]  }
  0x25   :  { %s415_s19 = smov [#allocation2]   ;;  %s416_s22 = smov [#allocation7]  }
  0x26   :  { %s19_s20 = sshll.u32 %s415_s19, 4  ;;  %s44_s23 = sshll.u32 %s416_s22, 4  ;;  %s20_s20 = int_to_ptr.vmem [resolvable:$true] %s19_s20  ;;  %s45_s23 = int_to_ptr.vmem [resolvable:$true] %s44_s23 }
  0x27   :  { %s315_s26 = scalar_lea.hbm %s543_s0, 128 }
  0x28   :  { %p316_p2 = scmp.ne.s32.totalorder %s543_s0, %s315_s26  ;;  %p319_p3 = scmp.lt.u32.totalorder %s315_s26, %s543_s0 }
  0x2a   :  { %p321_p4 = pnand %p319_p3, %p316_p2 }
  0x2c   :  { %324 = shalt.err (!%p321_p4)
}
  0x2d   :  { %s325_s3 = scalar_lea.vmem %s20_s20, 128  ;;  %p330_p6 = scmp.lt.s32.totalorder %s20_s20, %s20_s20 }
  0x2e   :  { %p326_p5 = scmp.ne.s32.totalorder %s20_s20, %s325_s3  ;;  %p331_p7 = scmp.lt.s32.totalorder %s325_s3, %s325_s3 }
  0x30   :  { %p332_p8 = por %p331_p7, %p330_p6 }
  0x32   :  { %p333_p9 = pnand %p332_p8, %p326_p5 }
  0x34   :  { %336 = shalt.err (!%p333_p9)
}
  0x35   :  { %25 = dma.hbm_to_vmem [thread:$0]  %s543_s0, 128, %s20_s20, [#allocation3], %s413_s30, %s413_s30, %s414_s6  }
  0x36   :  { %s337_s11 = scalar_lea.hbm %s545_s2, 16 }
  0x37   :  { %p338_p10 = scmp.ne.s32.totalorder %s545_s2, %s337_s11  ;;  %p341_p11 = scmp.lt.u32.totalorder %s337_s11, %s545_s2 }
  0x39   :  { %p343_p12 = pnand %p341_p11, %p338_p10 }
  0x3b   :  { %346 = shalt.err (!%p343_p12)
}
  0x3c   :  { %s347_s16 = scalar_lea.vmem %s45_s23, 16  ;;  %s351_s1 = scalar_lea.vmem %s45_s23, 32 }
  0x3d   :  { %p348_p13 = scmp.ne.s32.totalorder %s45_s23, %s347_s16  ;;  %p352_p0 = scmp.lt.s32.totalorder %s45_s23, %s45_s23 }
  0x3e   :  { %p353_p1 = scmp.lt.s32.totalorder %s351_s1, %s347_s16 }
  0x40   :  { %p354_p2 = por %p353_p1, %p352_p0 }
  0x42   :  { %p355_p3 = pnand %p354_p2, %p348_p13 }
  0x44   :  { %358 = shalt.err (!%p355_p3)
}
  0x45   :  { %47 = dma.hbm_to_vmem [thread:$0]  %s545_s2, 16, %s45_s23, [#allocation6]  }
  0x46   :  { %s417_s18 = smov [#allocation10]   ;;  %s359_s24 = scalar_lea.hbm %s547_s4, 16 }
  0x47   :  { %s64_s19 = sshll.u32 %s417_s18, 4  ;;  %p360_p4 = scmp.ne.s32.totalorder %s547_s4, %s359_s24  ;;  %s65_s19 = int_to_ptr.vmem [resolvable:$true] %s64_s19 }
  0x48   :  { %p363_p5 = scmp.lt.u32.totalorder %s359_s24, %s547_s4 }
  0x4a   :  { %p365_p6 = pnand %p363_p5, %p360_p4 }
  0x4c   :  { %368 = shalt.err (!%p365_p6)
}
  0x4d   :  { %s369_s29 = scalar_lea.vmem %s65_s19, 16  ;;  %s373_s2 = scalar_lea.vmem %s65_s19, 32 }
  0x4e   :  { %p370_p7 = scmp.ne.s32.totalorder %s65_s19, %s369_s29  ;;  %p374_p8 = scmp.lt.s32.totalorder %s65_s19, %s65_s19 }
  0x4f   :  { %p375_p9 = scmp.lt.s32.totalorder %s373_s2, %s369_s29 }
  0x51   :  { %p376_p10 = por %p375_p9, %p374_p8 }
  0x53   :  { %p377_p11 = pnand %p376_p10, %p370_p7 }
  0x55   :  { %380 = shalt.err (!%p377_p11)
}
  0x56   :  { %67 = dma.hbm_to_vmem [thread:$0]  %s547_s4, 16, %s65_s19, [#allocation9]  }
  0x57   :  { %403 = dma.done.wait [#allocation3], 128  }
  0x58   :  { %404 = vsyncadd [#allocation3], 4294967168 }
  0x59   :  { %405 = dma.done.wait [#allocation6], 272  }
  0x5a   :  { %406 = vsyncadd [#allocation6], 4294967024 }
  0x5b   :  { %407 = dma.done.wait [#allocation9], 32  }
  0x5c   :  { %408 = vsyncadd [#allocation9], 4294967264  ;;  %vm88_vm0 = vcmask 261120   ;;  %v84_v0 = vld [vmem:[#allocation2] sm:$0xf]  ;;  %vm92_vm1 = vcmask 254976  }
  0x5d   :  { %v85_v1 = vld [vmem:[#allocation2 + $0x4] sm:$0x1]  ;;  %v86_v2 = vunpack.c.l.bf16 %v84_v0  ;;  %v265_v16 = vld [vmem:[#allocation5] sm:$0xff]   ;;  %v418_v17 = vmov 0.0   ;;  %v266_v18 = vld [vmem:[#allocation5 + $0x8] sm:$0xff]   ;;  %vm419_vm2 = vmmov 0  }
  0x5e   :  { %v87_v3 = vunpack.c.l.bf16 %v85_v1  ;;  %247 = vmatprep.subr.bf16.mxu0 %v418_v17  ;;  %251 = vmatprep.mubr.msk.bf16.mxu0 %vm419_vm2, %v418_v17  ;;  %v234_v27 = vld [vmem:[#allocation8] ss:$0 sm:$0xff]  ;;  %v235_v31 = vld [vmem:[#allocation10] ss:$0 sm:$0xff]  ;;  %v236_v36 = vld [vmem:[#allocation7] ss:$0 sm:$0xff] }
  0x5f   :  { %v89_v4 = vsel %vm88_vm0, %v86_v2, 0.0  ;;  %248 = vmatpush3.bf16.msra.mxu0 %v265_v16  ;;  %vm211_vm3 = vcmask 781312   ;;  %s420_s4 = smov [#allocation11]   ;;  %vm213_vm4 = vcmask 778240  }
  0x60   :  { %90 = vadd.xlane.f32.xlu0 %v89_v4  ;;  %v93_v5 = vsel %vm92_vm1, %v87_v3, 0.0  ;;  %249 = vmatprep.subr.bf16.mxu0 %v418_v17  ;;  %s220_s3 = sshll.u32 %s420_s4, 4  ;;  %s221_s3 = int_to_ptr.vmem [resolvable:$true] %s220_s3 }
  0x61   :  { %s381_s21 = scalar_lea.vmem %s221_s3, 128  ;;  %p386_p13 = scmp.lt.s32.totalorder %s221_s3, %s221_s3 }
  0x62   :  { %p382_p12 = scmp.ne.s32.totalorder %s221_s3, %s381_s21  ;;  %p387_p0 = scmp.lt.s32.totalorder %s381_s21, %s381_s21 }
  0x63   :  { %250 = vmatpush3.bf16.msra.mxu0 %v266_v18 }
  0x64   :  { %94 = vadd.xlane.f32.xlu0 %v93_v5  ;;  %p388_p1 = por %p387_p0, %p386_p13 }
  0x66   :  { %p389_p2 = pnand %p388_p1, %p382_p12 }
  0xed   :  { %v91_v6 = vpop.xlane.xlu0 %90 }
  0xee   :  { %v97_v7 = vmul.f32 0.03125, %v91_v6 }
  0xf0   :  { %v99_v8 = vsub.f32 %v86_v2, %v97_v7 }
  0xf1   :  { %v95_v9 = vpop.xlane.xlu0 %94 }
  0xf2   :  { %v98_v10 = vmul.f32 0.03125, %v95_v9  ;;  %v101_v11 = vmul.f32 %v99_v8, %v99_v8 }
  0xf4   :  { %v100_v12 = vsub.f32 %v87_v3, %v98_v10  ;;  %v103_v13 = vsel %vm88_vm0, %v101_v11, 0.0 }
  0xf5   :  { %104 = vadd.xlane.f32.xlu1 %v103_v13 }
  0xf6   :  { %v102_v14 = vmul.f32 %v100_v12, %v100_v12 }
  0xf8   :  { %v106_v15 = vsel %vm92_vm1, %v102_v14, 0.0 }
  0xf9   :  { %107 = vadd.xlane.f32.xlu1 %v106_v15 }
 0x182   :  { %v105_v19 = vpop.xlane.xlu1 %104 }
 0x183   :  { %v109_v20 = vmul.f32 0.03125, %v105_v19 }
 0x185   :  { %v111_v21 = vadd.f32 1e-05, %v109_v20 }
 0x186   :  { %v108_v22 = vpop.xlane.xlu1 %107 }
 0x187   :  { %267 = vrsqrt.f32 %v111_v21  ;;  %v110_v23 = vmul.f32 0.03125, %v108_v22 }
 0x189   :  { %v112_v24 = vadd.f32 1e-05, %v110_v23 }
 0x18b   :  { %269 = vrsqrt.f32 %v112_v24 }
 0x191   :  { %v268_v25 = vpop.eup %267 }
 0x192   :  { %v115_v26 = vmul.f32 %v268_v25, %v99_v8 }
 0x194   :  { %v124_v30 = vmul.f32 %v234_v27, %v115_v26 }
 0x195   :  { %v270_v28 = vpop.eup %269 }
 0x196   :  { %v116_v29 = vmul.f32 %v270_v28, %v100_v12  ;;  %v133_v33 = vadd.f32 %v235_v31, %v124_v30 }
 0x198   :  { %v125_v32 = vmul.f32 %v234_v27, %v116_v29 }
 0x19a   :  { %v134_v34 = vadd.f32 %v235_v31, %v125_v32 }
 0x19c   :  { %v135_v35 = vpack.c.bf16 %v134_v34, %v133_v33 }
 0x19e   :  { %252 = vmatmul.mubr.msk.bf16.vlgmr.msra.gmra.mrb[0].mxu0 %vm88_vm0, %v135_v35 }
 0x271   :  { %v196_v37 = vpop.f32.mrb[0].mxu0 }
 0x272   :  { %v197_v38 = vadd.f32 %v236_v36, %v196_v37  ;;  %v253_v39 = vpop.f32.mrb[1].mxu0 }
 0x273   :  { %v199_v40 = vpop.f32.mrb[2].mxu0 }
 0x274   :  { %v242_v41 = vpack.c.bf16 %v197_v38, %v197_v38  ;;  %v200_v42 = vadd.f32 %v236_v36, %v199_v40  ;;  %v254_v43 = vpop.f32.mrb[3].mxu0 }
 0x276   :  { %v243_v44 = vpack.c.bf16 %v200_v42, %v200_v42  ;;  %212 = vst.msk [vmem:[#allocation11] sm:$0xf] %vm211_vm3, %v242_v41 }
 0x278   :  { %214 = vst.msk [vmem:[#allocation11 + $0x4] sm:$0x1] %vm213_vm4, %v243_v44 }
 0x279   :  { %392 = shalt.err (!%p389_p2)
}
 0x27a   :  { %s393_s10 = scalar_lea.hbm %s548_s5, 128 }
 0x27b   :  { %p394_p3 = scmp.ne.s32.totalorder %s548_s5, %s393_s10  ;;  %p397_p4 = scmp.lt.u32.totalorder %s393_s10, %s548_s5 }
 0x27d   :  { %p399_p5 = pnand %p397_p4, %p394_p3 }
 0x27f   :  { %402 = shalt.err (!%p399_p5)
}
 0x280   :  { %226 = dma.vmem_to_hbm [thread:$0]  %s221_s3, 128, %s548_s5, [#allocation4], %s413_s30, %s413_s30, %s414_s6  }
 0x281   :  { %409 = dma.done.wait [#allocation4], 128  }
 0x282   :  { %410 = vsyncadd [#allocation4], 4294967168 }
 0x283   :  { %230 = vsyncpa [#allocation3], 1 }
 0x284   :  { %231 = vsyncpa [#allocation6], 1 }
 0x285   :  { %232 = vsyncpa [#allocation9], 1 }
 0x286   :  { %233 = vsyncpa [#allocation4], 1 }

// kernel: _lambda_.26
= control target key start
LH: loop header
LB: loop body
LE: loop exit
PB: predicated region body
PF: predicated region fallthrough
CT: control target
= control target key end

     0   :  { %6 = vsyncpa [#allocation3], 0  ;;  %s1276_s0 = inlined_call_operand.hbm [shape: bf16[2,5,96], index: 0, kind: input, shape index: {}]   ;;  %s1277_s1 = inlined_call_operand.hbm [shape: bf16[2,5,32], index: 1, kind: output, shape index: {}]  }
   0x1   :  { %8 = vsyncpa [#allocation3 + $0x1], 0 }
   0x2   :  { %9 = vsyncpa [#allocation4], 0 }
   0x3   :  { %11 = vsyncpa [#allocation4 + $0x1], 0  ;;  %s1025_s6 = smov 0   ;;  %s1027_s7 = smov 0  }
   0x4   :  { %s1029_s8 = smov 0   ;;  %s1031_s9 = smov 0  }
   0x5 LB: > { %s1046_s10 = sadd.s32 4294967295, %s994_s9   ;;  %s721_s11 = sadd.s32 4294967294, %s994_s9   ;;  %s994_s9 = sphi %s1031_s9, %s1292_s9   ;;  %s990_s8 = sphi %s1029_s8, %s1291_s8   ;;  %s986_s7 = sphi %s1027_s7, %s1290_s7   ;;  %s982_s6 = sphi %s1025_s6, %s1289_s6  }
   0x6   : > { %s1050_s12 = sadd.s32 1, %s994_s9   ;;  %s24_s13 = sadd.s32 1, %s990_s8 }
   0x7   : > { %s21_s14 = ssub.s32 %s994_s9, %s1050_s12  ;;  %p31_p0 = scmp.ne.s32.totalorder %s990_s8, %s986_s7 }
   0x8   : > { %p22_p1 = scmp.eq.s32.totalorder %s21_s14, 0  ;;  %p32_p2 = scmp.eq.s32.totalorder %s994_s9, 0 }
   0x9   : > { %p37_p3 = scmp.ne.s32.totalorder %s986_s7, %s982_s6  ;;  %p38_p4 = scmp.eq.s32.totalorder %s1046_s10, 0 }
   0xa   : > { %s1062_s15 = scalar_select %p22_p1, %s990_s8, %s24_s13  }
   0xb   : > { %p1064_p5 = por %p32_p2, %p31_p0  ;;  %p1068_p6 = por %p38_p4, %p37_p3 }
   0xc   : > { %p61_p7 = scmp.eq.s32.totalorder %s1046_s10, 1  ;;  %p67_p8 = scmp.eq.s32.totalorder %s721_s11, 1 }
   0xd   : > { %p827_p10 = scmp.lt.s32.totalorder %s994_s9, 2  ;;  %s87_s20 = sand.u32 1, %s990_s8  }
   0xe   : > { %p1075_p11 = por %p61_p7, %p31_p0  ;;  %p1079_p12 = por %p67_p8, %p37_p3 }
   0xf   : > { %s725_s21 = sshll.u32 %s994_s9, 6  ;;  %s724_s22 = sshll.u32 %s87_s20, 2 }
  0x10   : > { %s1281_s18 = scalar_select %p1075_p11, 1, 0 }
  0x11   : > { %s1282_s19 = scalar_select %p1079_p12, 1, 0 }
  0x12   : > { %s1088_s25 = scalar_lea.hbm %s1276_s0, %s725_s21  ;;  %s91_s26 = scalar_lea.vmem [#allocation2], %s724_s22 }
  0x13   : > { %s98_s27 = sshll.u32 %s91_s26, 4  ;;  %p1092_p13 = pnand %p827_p10, %p1064_p5  ;;  %s1096_s27 = int_to_ptr.vmem [resolvable:$true] %s98_s27 }
  0x14   : > { %s88_s29 = scalar_lea.sflag [#allocation3], %s87_s20  ;;  %s898_s30 = scalar_lea.hbm %s1088_s25, 64 }
  0x15   : > { %p899_p2 = scmp.ne.s32.totalorder %s1088_s25, %s898_s30  ;;  %p900_p3 = pneg %p1092_p13 }
  0x16   : > { %s903_s4 = scalar_lea.hbm %s1276_s0, 128  ;;  %p904_p5 = scmp.lt.u32.totalorder %s1088_s25, %s1276_s0 }
  0x17   : > { %p901_p4 = pnand %p900_p3, %p899_p2  ;;  %p905_p8 = scmp.lt.u32.totalorder %s903_s4, %s898_s30 }
  0x18   : > { %p907_p9 = scmp.lt.u32.totalorder %s898_s30, %s1088_s25 }
  0x19   : > { %p902_p7 = pneg %p901_p4  ;;  %p906_p10 = por %p905_p8, %p904_p5 }
  0x1b   : > { %p908_p0 = por %p907_p9, %p906_p10 }
  0x1d   : > { %p909_p1 = pnand %p908_p0, %p902_p7 }
  0x1f   : > { %912 = shalt.err (!%p909_p1)
}
  0x20   : > { %s913_s13 = scalar_lea.vmem %s1096_s27, 64  ;;  %s996_s14 = smov [#allocation2]  }
  0x21   : > { %p914_p2 = scmp.ne.s32.totalorder %s1096_s27, %s913_s13  ;;  %s918_s16 = sshll.u32 %s996_s14, 4  ;;  %s919_s16 = int_to_ptr.vmem [resolvable:$false] %s918_s16 }
  0x22   : > { %s920_s20 = scalar_lea.vmem %s919_s16, 128  ;;  %p921_p11 = scmp.lt.s32.totalorder %s1096_s27, %s919_s16 }
  0x23   : > { %p916_p4 = pnand %p914_p2, %p900_p3  ;;  %p922_p5 = scmp.lt.s32.totalorder %s920_s20, %s913_s13 }
  0x25   : > { %p917_p12 = pneg %p916_p4  ;;  %p923_p8 = por %p922_p5, %p921_p11 }
  0x27   : > { %p924_p9 = pnand %p923_p8, %p917_p12 }
  0x29   : > { %927 = shalt.err (!%p924_p9)
}
  0x2a   : > { %822 = dma.hbm_to_vmem [thread:$0]  (!%p1092_p13), %s1088_s25, 64, %s1096_s27, %s88_s29  }
  0x2b   : > { %p1284_p0 = scmp.lt.s32.totalorder %s994_s9, 3  ;;  %p1285_p1 = scmp.ge.s32.totalorder %s994_s9, 1 }
  0x2d   : > { %p104_p3 = pnand %p1285_p1, %p1284_p0 }
  0x2e   : > { %s1130_s21 = sand.u32 (!%p104_p3), 1, %s986_s7  }
  0x2f   : > { %107 = sbr.rel (%p104_p3) target bundleno = 1651 (0x673), region = 24  ;;  %s727_s22 = sshll.u32 (!%p104_p3), %s1130_s21, 2 }
  0x30   : > { %s110_s23 = scalar_lea.sflag (!%p104_p3), [#allocation3], %s1130_s21  ;;  %s1136_s24 = scalar_lea.vmem (!%p104_p3), [#allocation2], %s727_s22 }
  0x36   : > { %973 = dma.done.wait (%p1068_p6), %s110_s23, 64  }
  0x37   : > { %975 = vsyncadd (%p1068_p6), %s110_s23, 4294967232  ;;  %v997_v0 = vmov 0.0   ;;  %vm998_vm0 = vmmov 0   ;;  %v133_v1 = vld [vmem:[%s1136_s24] sm:$0x7]  ;;  %s999_s25 = smov 96  }
  0x38   : > { %767 = vmatprep.subr.bf16.mxu0 %v997_v0  ;;  %769 = vmatprep.mubr.msk.bf16.mxu0 %vm998_vm0, %v997_v0  ;;  %v729_v2 = vcombine.low %v133_v1, %v133_v1  ;;  %vm139_vm1 = vcmask 64512   ;;  %s1000_s17 = smov 64   ;;  %v1155_v5 = vld [vmem:[%s1136_s24] ss:$0 sps:$4 sm:$0x77]   ;;  %s1001_s26 = smov 88  }
  0x39   : > { %773 = vmatprep.subr.bf16.mxu1 %v997_v0  ;;  %775 = vmatprep.mubr.msk.bf16.mxu1 %vm998_vm0, %v997_v0  ;;  %vm186_vm2 = vcmask 36864   ;;  %v1160_v11 = vld [vmem:[%s1136_s24] ss:$0 sps:$4 sm:$0x77]   ;;  %s1002_s27 = smov 72   ;;  %vm205_vm3 = vcmask 1041408  }
  0x3a   : > { %137 = vrot.lane.b32.xlu0 %v729_v2, %s999_s25  ;;  %199 = vrot.lane.b32.xlu1 %v729_v2, %s1000_s17  ;;  %vm206_vm4 = vcmask 1042432   ;;  %v1003_v13 = vmov 65535   ;;  %s1004_s28 = smov 120   ;;  %v1170_v22 = vld [vmem:[%s1136_s24] ss:$0 sps:$4 sm:$0x77]  }
  0x3b   : > { %v207_v14 = vsel %vm205_vm3, 4294967295, %v1003_v13  ;;  %s1005_s29 = smov 80   ;;  %s1006_s30 = smov 112   ;;  %vm201_vm5 = vcmask 39936   ;;  %vm253_vm6 = vcmask 59392   ;;  %vm380_vm9 = vcmask 124992  }
  0x3c   : > { %v1163_v15 = vsel %vm206_vm4, %v207_v14, 0  ;;  %s1007_s2 = smov 104   ;;  %vm254_vm7 = vsmask.f32 2304  ;;  %s1193_s3 = scalar_lea.vmem [#allocation5], %s727_s22  ;;  %vm506_vm11 = vcmask 190592  }
  0x3d   : > { %vm255_vm8 = vmand %vm253_vm6, %vm254_vm7  ;;  %v256_v37 = vld [vmem:[%s1193_s3] sm:$0x7]  ;;  %s1008_s4 = smov 56   ;;  %s1009_s5 = smov 48   ;;  %vm632_vm13 = vcmask 256192  }
  0x3e   : > { %265 = vrot.lane.b32.xlu1 %v1155_v5, %s1001_s26  ;;  %s1010_s11 = smov 40   ;;  %s1011_s13 = smov 8   ;;  %vm381_vm10 = vmand %vm380_vm9, %vm254_vm7 }
  0x3f   : > { %s1012_s14 = smov 16   ;;  %s1013_s16 = smov 24   ;;  %vm507_vm12 = vmand %vm506_vm11, %vm254_vm7 }
  0x40   : > { %s745_s20 = sshll.u32 %s1046_s10, 6  ;;  %s651_s22 = sshll.u32 %s1193_s3, 4  ;;  %vm633_vm14 = vmand %vm632_vm13, %vm254_vm7  ;;  %s1233_s22 = int_to_ptr.vmem [resolvable:$true] %s651_s22 }
  0x41   : > { %s1231_s25 = scalar_lea.hbm %s1277_s1, %s745_s20  ;;  %s638_s17 = scalar_lea.sflag [#allocation4], %s1130_s21 }
  0x42   : > { %s928_s26 = scalar_lea.vmem %s1233_s22, 64  ;;  %p1286_p11 = scmp.ne.s32.totalorder %s1281_s18, 0 }
  0x43   : > { %p929_p6 = scmp.ne.s32.totalorder %s1233_s22, %s928_s26  ;;  %s1014_s10 = smov [#allocation5]  }
  0x45   : > { %p930_p12 = pnand %p929_p6, %p1286_p11 }
  0x47   : > { %p931_p13 = pneg %p930_p12 }
  0xac   : > { %v138_v3 = vpop.permute.xlu0 %137  ;;  %v200_v12 = vpop.permute.xlu1 %199 }
  0xad   : > { %v144_v4 = vsel %vm139_vm1, %v138_v3, 0  ;;  %v210_v16 = vand.u32 %v1163_v15, %v200_v12 }
  0xae   : > { %768 = vmatpush3.bf16.xpose.msra.mxu0 %v144_v4 }
  0xaf   : > { %785 = vmatprep.subr.bf16.mxu0 %v997_v0  ;;  %774 = vmatpush3.bf16.msra.mxu1 %v210_v16 }
  0xb0   : > { %779 = vmatprep.subr.bf16.mxu1 %v997_v0  ;;  %v266_v23 = vpop.permute.xlu1 %265 }
  0xb1   : > { %v271_v29 = vsel %vm139_vm1, %v266_v23, 0 }
  0xb5   : > { %770 = vmatmul.mubr.msk.bf16.vlgmr.msra.gmra.mrb[0].mxu0 %vm139_vm1, %v133_v1 }
  0xb6   : > { %787 = vmatprep.mubr.msk.bf16.mxu0 %vm998_vm0, %v997_v0 }
 0x188   : > { %v180_v6 = vpop.f32.mrb[0].mxu0 }
 0x189   : > { %v771_v7 = vpop.f32.mrb[1].mxu0  ;;  %v187_v8 = vsel %vm186_vm2, %v180_v6, -inf }
 0x18a   : > { %188 = vmax.xlane.f32.xlu0 %v187_v8  ;;  %v183_v9 = vpop.f32.mrb[2].mxu0 }
 0x18b   : > { %v772_v10 = vpop.f32.mrb[3].mxu0 }
 0x1a0   : > { %517 = vrot.lane.b32.xlu0 %v1160_v11, %s1002_s27  ;;  %s932_s27 = sshll.u32 %s1014_s10, 4  ;;  %s933_s27 = int_to_ptr.vmem [resolvable:$false] %s932_s27 }
 0x1a1   : > { %p935_p7 = scmp.lt.s32.totalorder %s1233_s22, %s933_s27 }
 0x217   : > { %v189_v17 = vpop.xlane.xlu0 %188 }
 0x218   : > { %v190_v18 = vsub.f32 %v180_v6, %v189_v17 }
 0x21a   : > { %v191_v19 = vmul.f32 1.442695, %v190_v18 }
 0x21b   : > { %v518_v32 = vpop.permute.xlu0 %517 }
 0x21c   : > { %882 = vpow2.f32 %v191_v19  ;;  %v523_v34 = vsel %vm139_vm1, %v518_v32, 0 }
 0x226   : > { %v883_v20 = vpop.eup %882 }
 0x227   : > { %v193_v21 = vsel %vm186_vm2, %v883_v20, 0.0 }
 0x228   : > { %194 = vadd.xlane.f32.xlu1 %v193_v21 }
 0x239   : > { %263 = vrot.lane.b32.xlu1 %v1155_v5, %s1004_s28  ;;  %s934_s28 = scalar_lea.vmem %s933_s27, 128 }
 0x23a   : > { %p936_p10 = scmp.lt.s32.totalorder %s934_s28, %s928_s26 }
 0x23c   : > { %p937_p2 = por %p936_p10, %p935_p7 }
 0x23d   : > { %391 = vrot.lane.b32.xlu1 %v1170_v22, %s1005_s29 }
 0x23e   : > { %p938_p4 = pnand %p937_p2, %p931_p13 }
 0x241   : > { %389 = vrot.lane.b32.xlu1 %v1170_v22, %s1006_s30 }
 0x245   : > { %515 = vrot.lane.b32.xlu1 %v1160_v11, %s1007_s2 }
 0x2b5   : > { %v195_v24 = vpop.xlane.xlu1 %194 }
 0x2b6   : > { %884 = vrcp.f32 %v195_v24 }
 0x2b9   : > { %v264_v27 = vpop.permute.xlu1 %263 }
 0x2bd   : > { %v392_v30 = vpop.permute.xlu1 %391 }
 0x2be   : > { %v397_v31 = vsel %vm139_vm1, %v392_v30, 0 }
 0x2c0   : > { %v885_v25 = vpop.eup %884 }
 0x2c1   : > { %v197_v26 = vmul.f32 %v885_v25, %v883_v20  ;;  %v390_v33 = vpop.permute.xlu1 %389 }
 0x2c3   : > { %v198_v28 = vpack.c.bf16 %v197_v26, %v197_v26 }
 0x2c5   : > { %776 = vmatmul.mubr.msk.bf16.vlgmr.msra.gmra.mrb[0].mxu1 %vm201_vm5, %v198_v28  ;;  %v516_v35 = vpop.permute.xlu1 %515 }
 0x2c6   : > { %780 = vmatpush3.bf16.xpose.msra.mxu1 %v271_v29  ;;  %781 = vmatprep.mubr.msk.bf16.mxu1 %vm998_vm0, %v997_v0 }
 0x2c7   : > { %791 = vmatprep.subr.bf16.mxu1 %v997_v0 }
 0x2cd   : > { %782 = vmatmul.mubr.msk.bf16.vlgmr.msra.gmra.mrb[4].mxu1 %vm139_vm1, %v264_v27 }
 0x2ce   : > { %792 = vmatpush3.bf16.xpose.msra.mxu1 %v397_v31  ;;  %793 = vmatprep.mubr.msk.bf16.mxu1 %vm998_vm0, %v997_v0 }
 0x2cf   : > { %803 = vmatprep.subr.bf16.mxu1 %v997_v0 }
 0x2d5   : > { %794 = vmatmul.mubr.msk.bf16.vlgmr.msra.gmra.mrb[8].mxu1 %vm139_vm1, %v390_v33 }
 0x2d6   : > { %804 = vmatpush3.bf16.xpose.msra.mxu1 %v523_v34  ;;  %805 = vmatprep.mubr.msk.bf16.mxu1 %vm998_vm0, %v997_v0 }
 0x2dd   : > { %806 = vmatmul.mubr.msk.bf16.vlgmr.msra.gmra.mrb[12].mxu1 %vm139_vm1, %v516_v35 }
 0x398   : > { %v246_v36 = vpop.f32.mrb[0].mxu1 }
 0x399   : > { %v252_v38 = vpack.c.bf16 %v246_v36, %v246_v36  ;;  %v777_v39 = vpop.f32.mrb[1].mxu1 }
 0x39a   : > { %v249_v40 = vpop.f32.mrb[2].mxu1 }
 0x39b   : > { %v257_v41 = vsel %vm255_vm8, %v252_v38, %v256_v37  ;;  %v778_v42 = vpop.f32.mrb[3].mxu1 }
 0x39c   : > { %258 = vst [vmem:[%s1193_s3] sm:$0x7] %v257_v41 }
 0x3a0   : > { %v307_v43 = vpop.f32.mrb[4].mxu1 }
 0x3a1   : > { %v783_v44 = vpop.f32.mrb[5].mxu1  ;;  %v313_v45 = vsel %vm186_vm2, %v307_v43, -inf }
 0x3a2   : > { %314 = vmax.xlane.f32.xlu1 %v313_v45  ;;  %v310_v46 = vpop.f32.mrb[6].mxu1 }
 0x3a3   : > { %v784_v47 = vpop.f32.mrb[7].mxu1  ;;  %v382_v42 = vld [vmem:[%s1193_s3] sm:$0x7] }
 0x3a8   : > { %v433_v48 = vpop.f32.mrb[8].mxu1 }
 0x3a9   : > { %v439_v49 = vsel %vm186_vm2, %v433_v48, -inf  ;;  %v795_v50 = vpop.f32.mrb[9].mxu1 }
 0x3aa   : > { %440 = vmax.xlane.f32.xlu0 %v439_v49  ;;  %v436_v51 = vpop.f32.mrb[10].mxu1 }
 0x3ab   : > { %v796_v52 = vpop.f32.mrb[11].mxu1 }
 0x3b0   : > { %v559_v53 = vpop.f32.mrb[12].mxu1 }
 0x3b1   : > { %v565_v54 = vsel %vm186_vm2, %v559_v53, -inf  ;;  %v807_v55 = vpop.f32.mrb[13].mxu1 }
 0x3b2   : > { %566 = vmax.xlane.f32.xlu1 %v565_v54  ;;  %v562_v56 = vpop.f32.mrb[14].mxu1 }
 0x3b3   : > { %v808_v57 = vpop.f32.mrb[15].mxu1 }
 0x42f   : > { %v315_v58 = vpop.xlane.xlu1 %314 }
 0x430   : > { %v316_v59 = vsub.f32 %v307_v43, %v315_v58 }
 0x432   : > { %v317_v60 = vmul.f32 1.442695, %v316_v59 }
 0x434   : > { %886 = vpow2.f32 %v317_v60 }
 0x437   : > { %v441_v6 = vpop.xlane.xlu0 %440 }
 0x438   : > { %v442_v7 = vsub.f32 %v433_v48, %v441_v6 }
 0x43a   : > { %v443_v8 = vmul.f32 1.442695, %v442_v7 }
 0x43e   : > { %v887_v61 = vpop.eup %886 }
 0x43f   : > { %v567_v62 = vpop.xlane.xlu1 %566  ;;  %v319_v63 = vsel %vm186_vm2, %v887_v61, 0.0 }
 0x440   : > { %v568_v1 = vsub.f32 %v559_v53, %v567_v62  ;;  %320 = vadd.xlane.f32.xlu1 %v319_v63 }
 0x442   : > { %v569_v2 = vmul.f32 1.442695, %v568_v1 }
 0x444   : > { %888 = vpow2.f32 %v569_v2 }
 0x445   : > { %890 = vpow2.f32 %v443_v8 }
 0x44e   : > { %v889_v3 = vpop.eup %888 }
 0x44f   : > { %v571_v4 = vsel %vm186_vm2, %v889_v3, 0.0  ;;  %v891_v9 = vpop.eup %890 }
 0x450   : > { %572 = vadd.xlane.f32.xlu0 %v571_v4  ;;  %v445_v10 = vsel %vm186_vm2, %v891_v9, 0.0 }
 0x451   : > { %325 = vrot.lane.b32.xlu1 %v1155_v5, %s1008_s4 }
 0x466   : > { %451 = vrot.lane.b32.xlu0 %v1170_v22, %s1009_s5 }
 0x475   : > { %446 = vadd.xlane.f32.xlu1 %v445_v10 }
 0x486   : > { %577 = vrot.lane.b32.xlu1 %v1160_v11, %s1010_s11 }
 0x4cd   : > { %v321_v12 = vpop.xlane.xlu1 %320 }
 0x4ce   : > { %892 = vrcp.f32 %v321_v12 }
 0x4d1   : > { %v326_v13 = vpop.permute.xlu1 %325 }
 0x4d2   : > { %v331_v14 = vand.u32 %v326_v13, %v1163_v15 }
 0x4d4   : > { %786 = vmatpush3.bf16.msra.mxu0 %v331_v14 }
 0x4d5   : > { %797 = vmatprep.subr.bf16.mxu0 %v997_v0 }
 0x4d8   : > { %v893_v5 = vpop.eup %892 }
 0x4d9   : > { %v323_v16 = vmul.f32 %v893_v5, %v887_v61 }
 0x4db   : > { %v324_v17 = vpack.c.bf16 %v323_v16, %v323_v16 }
 0x4dd   : > { %788 = vmatmul.mubr.msk.bf16.vlgmr.msra.gmra.mrb[4].mxu0 %vm201_vm5, %v324_v17  ;;  %v573_v18 = vpop.xlane.xlu0 %572 }
 0x4de   : > { %799 = vmatprep.mubr.msk.bf16.mxu0 %vm998_vm0, %v997_v0 }
 0x4e1   : > { %v452_v19 = vpop.permute.xlu0 %451 }
 0x4e2   : > { %v457_v11 = vand.u32 %v452_v19, %v1163_v15 }
 0x4e4   : > { %798 = vmatpush3.bf16.msra.mxu0 %v457_v11 }
 0x4e5   : > { %809 = vmatprep.subr.bf16.mxu0 %v997_v0 }
 0x502   : > { %v447_v20 = vpop.xlane.xlu1 %446 }
 0x503   : > { %894 = vrcp.f32 %v447_v20 }
 0x504   : > { %896 = vrcp.f32 %v573_v18 }
 0x506   : > { %v578_v21 = vpop.permute.xlu1 %577 }
 0x507   : > { %v583_v24 = vand.u32 %v578_v21, %v1163_v15 }
 0x50d   : > { %v895_v22 = vpop.eup %894 }
 0x50e   : > { %v449_v23 = vmul.f32 %v895_v22, %v891_v9  ;;  %v897_v26 = vpop.eup %896 }
 0x50f   : > { %v575_v27 = vmul.f32 %v897_v26, %v889_v3 }
 0x510   : > { %v450_v25 = vpack.c.bf16 %v449_v23, %v449_v23 }
 0x511   : > { %v576_v28 = vpack.c.bf16 %v575_v27, %v575_v27 }
 0x512   : > { %800 = vmatmul.mubr.msk.bf16.vlgmr.msra.gmra.mrb[8].mxu0 %vm201_vm5, %v450_v25 }
 0x513   : > { %810 = vmatpush3.bf16.msra.mxu0 %v583_v24  ;;  %811 = vmatprep.mubr.msk.bf16.mxu0 %vm998_vm0, %v997_v0 }
 0x51a   : > { %812 = vmatmul.mubr.msk.bf16.vlgmr.msra.gmra.mrb[12].mxu0 %vm201_vm5, %v576_v28 }
 0x5b0   : > { %v367_v29 = vpop.f32.mrb[4].mxu0 }
 0x5b1   : > { %v748_v30 = vpack.c.bf16 %v367_v29, %v367_v29  ;;  %v789_v31 = vpop.f32.mrb[5].mxu0 }
 0x5b2   : > { %v370_v32 = vpop.f32.mrb[6].mxu0 }
 0x5b3   : > { %377 = vrot.lane.b32.xlu1 %v748_v30, %s1011_s13  ;;  %v790_v33 = vpop.f32.mrb[7].mxu0 }
 0x5e5   : > { %v493_v15 = vpop.f32.mrb[8].mxu0 }
 0x5e6   : > { %v749_v34 = vpack.c.bf16 %v493_v15, %v493_v15  ;;  %v801_v35 = vpop.f32.mrb[9].mxu0 }
 0x5e7   : > { %v496_v36 = vpop.f32.mrb[10].mxu0 }
 0x5e8   : > { %503 = vrot.lane.b32.xlu0 %v749_v34, %s1012_s14  ;;  %v802_v0 = vpop.f32.mrb[11].mxu0 }
 0x5ed   : > { %v619_v37 = vpop.f32.mrb[12].mxu0 }
 0x5ee   : > { %v750_v38 = vpack.c.bf16 %v619_v37, %v619_v37  ;;  %v813_v39 = vpop.f32.mrb[13].mxu0 }
 0x5ef   : > { %v622_v40 = vpop.f32.mrb[14].mxu0 }
 0x5f0   : > { %629 = vrot.lane.b32.xlu1 %v750_v38, %s1013_s16  ;;  %v814_v41 = vpop.f32.mrb[15].mxu0 }
 0x625   : > { %v378_v43 = vpop.permute.xlu1 %377 }
 0x626   : > { %v383_v44 = vsel %vm381_vm10, %v378_v43, %v382_v42 }
 0x627   : > { %384 = vst [vmem:[%s1193_s3] sm:$0x7] %v383_v44 }
 0x62e   : > { %v508_v45 = vld [vmem:[%s1193_s3] sm:$0x7] }
 0x65a   : > { %v504_v46 = vpop.permute.xlu0 %503 }
 0x65b   : > { %v509_v47 = vsel %vm507_vm12, %v504_v46, %v508_v45 }
 0x65c   : > { %510 = vst [vmem:[%s1193_s3] sm:$0x7] %v509_v47 }
 0x662   : > { %v630_v48 = vpop.permute.xlu1 %629 }
 0x663   : > { %v634_v49 = vld [vmem:[%s1193_s3] sm:$0x7] }
 0x664   : > { %v635_v50 = vsel %vm633_vm14, %v630_v48, %v634_v49 }
 0x665   : > { %636 = vst [vmem:[%s1193_s3] sm:$0x7] %v635_v50 }
 0x666   : > { %941 = shalt.err (!%p938_p4)
}
 0x667   : > { %s942_s21 = scalar_lea.hbm %s1231_s25, 64  ;;  %s946_s2 = scalar_lea.hbm %s1277_s1, 128 }
 0x668   : > { %p943_p5 = scmp.ne.s32.totalorder %s1231_s25, %s942_s21  ;;  %p947_p0 = scmp.lt.u32.totalorder %s1231_s25, %s1277_s1 }
 0x669   : > { %p948_p1 = scmp.lt.u32.totalorder %s946_s2, %s942_s21  ;;  %p950_p6 = scmp.lt.u32.totalorder %s942_s21, %s1231_s25 }
 0x66a   : > { %p944_p8 = pnand %p943_p5, %p1286_p11 }
 0x66b   : > { %p949_p3 = por %p948_p1, %p947_p0 }
 0x66c   : > { %p945_p9 = pneg %p944_p8 }
 0x66d   : > { %p951_p12 = por %p950_p6, %p949_p3 }
 0x66f   : > { %p952_p13 = pnand %p951_p12, %p945_p9 }
 0x671   : > { %955 = shalt.err (!%p952_p13)
}
 0x672   : > { %817 = dma.vmem_to_hbm [thread:$0]  (%p1286_p11), %s1233_s22, 64, %s1231_s25, %s638_s17  }
 0x673 PF: > { %s663_s5 = sand.u32 1, %s982_s6   ;;  %p1287_p7 = scmp.ne.s32.totalorder %s1282_s19, 0 }
 0x674   : > { %p1288_p10 = scmp.ge.s32.totalorder %s994_s9, 2  ;;  %s664_s11 = scalar_lea.sflag [#allocation4], %s663_s5 }
 0x676   : > { %p824_p2 = pnand %p1288_p10, %p1287_p7 }
 0x678   : > { %977 = dma.done.wait (!%p824_p2), %s664_s11, 64  }
 0x679   : > { %979 = vsyncadd (!%p824_p2), %s664_s11, 4294967232  ;;  %p14_p4 = scmp.ge.s32.totalorder %s1050_s12, 4   ;;  %s1289_s6 = smov %s986_s7 }
 0x67a   : > { %s1290_s7 = smov %s990_s8  ;;  %s1291_s8 = smov %s1062_s15 }
 0x67b   : > { %s1292_s9 = smov %s1050_s12  ;;  %16 = sbr.rel (!%p14_p4) target bundleno = 5 (0x5), region = 69 }
 0x682   :  { %669 = vsyncpa [#allocation3], 1 }
 0x683   :  { %671 = vsyncpa [#allocation3 + $0x1], 1 }
 0x684   :  { %672 = vsyncpa [#allocation4], 1 }
 0x685   :  { %674 = vsyncpa [#allocation4 + $0x1], 1 }

// kernel: _lambda_.27
= control target key start
LH: loop header
LB: loop body
LE: loop exit
PB: predicated region body
PF: predicated region fallthrough
CT: control target
= control target key end

     0   :  { %9 = vsyncpa [#allocation3], 0  ;;  %s454_s0 = inlined_call_operand.hbm [shape: bf16[10,32], index: 0, kind: input, shape index: {}]   ;;  %s455_s1 = inlined_call_operand.hbm [shape: bf16[32,32], index: 1, kind: input, shape index: {}]   ;;  %s456_s2 = inlined_call_operand.hbm [shape: f32[1,32], index: 2, kind: input, shape index: {}]   ;;  %s457_s3 = inlined_call_operand.hbm [shape: bf16[10,32], index: 3, kind: input, shape index: {}]   ;;  %s458_s4 = inlined_call_operand.hbm [shape: bf16[10,32], index: 4, kind: output, shape index: {}]  }
   0x1   :  { %10 = vsyncpa [#allocation6], 0 }
   0x2   :  { %11 = vsyncpa [#allocation9], 0 }
   0x3   :  { %12 = vsyncpa [#allocation4], 0  ;;  %s334_s15 = smov [#allocation5]   ;;  %s335_s17 = smov [#allocation2]  }
   0x4   :  { %s30_s16 = sshll.u32 %s334_s15, 4  ;;  %s18_s18 = sshll.u32 %s335_s17, 4  ;;  %s31_s16 = int_to_ptr.vmem [resolvable:$true] %s30_s16  ;;  %s368_s18 = int_to_ptr.vmem [resolvable:$true] %s18_s18 }
   0x5   :  { %s216_s21 = scalar_lea.hbm %s455_s1, 256 }
   0x6   :  { %p217_p0 = scmp.ne.s32.totalorder %s455_s1, %s216_s21  ;;  %p220_p1 = scmp.lt.u32.totalorder %s216_s21, %s455_s1 }
   0x8   :  { %p222_p2 = pnand %p220_p1, %p217_p0 }
   0xa   :  { %225 = shalt.err (!%p222_p2)
}
   0xb   :  { %s226_s26 = scalar_lea.vmem %s31_s16, 256  ;;  %p231_p4 = scmp.lt.s32.totalorder %s31_s16, %s31_s16 }
   0xc   :  { %p227_p3 = scmp.ne.s32.totalorder %s31_s16, %s226_s26  ;;  %p232_p5 = scmp.lt.s32.totalorder %s226_s26, %s226_s26 }
   0xe   :  { %p233_p6 = por %p232_p5, %p231_p4 }
  0x10   :  { %p234_p7 = pnand %p233_p6, %p227_p3 }
  0x12   :  { %237 = shalt.err (!%p234_p7)
}
  0x13   :  { %s336_s27 = smov 64   ;;  %s337_s28 = smov 4  }
  0x14   :  { %36 = dma.hbm_to_vmem [thread:$0]  %s455_s1, 256, %s31_s16, [#allocation6], %s336_s27, %s336_s27, %s337_s28  }
  0x15   :  { %s238_s7 = scalar_lea.hbm %s454_s0, 128 }
  0x16   :  { %p239_p8 = scmp.ne.s32.totalorder %s454_s0, %s238_s7  ;;  %p242_p9 = scmp.lt.u32.totalorder %s238_s7, %s454_s0 }
  0x18   :  { %p244_p10 = pnand %p242_p9, %p239_p8 }
  0x1a   :  { %247 = shalt.err (!%p244_p10)
}
  0x1b   :  { %s248_s12 = scalar_lea.vmem %s368_s18, 128  ;;  %p253_p12 = scmp.lt.s32.totalorder %s368_s18, %s368_s18 }
  0x1c   :  { %p249_p11 = scmp.ne.s32.totalorder %s368_s18, %s248_s12  ;;  %p254_p13 = scmp.lt.s32.totalorder %s248_s12, %s248_s12 }
  0x1e   :  { %p255_p0 = por %p254_p13, %p253_p12 }
  0x20   :  { %p256_p1 = pnand %p255_p0, %p249_p11 }
  0x22   :  { %259 = shalt.err (!%p256_p1)
}
  0x23   :  { %24 = dma.hbm_to_vmem [thread:$0]  %s454_s0, 128, %s368_s18, [#allocation3], %s336_s27, %s336_s27, %s337_s28  }
  0x24   :  { %s338_s14 = smov [#allocation7]   ;;  %s339_s16 = smov [#allocation8]  }
  0x25   :  { %s43_s15 = sshll.u32 %s338_s14, 4  ;;  %s52_s17 = sshll.u32 %s339_s16, 4  ;;  %s44_s15 = int_to_ptr.vmem [resolvable:$true] %s43_s15  ;;  %s405_s17 = int_to_ptr.vmem [resolvable:$true] %s52_s17 }
  0x26   :  { %s260_s21 = scalar_lea.hbm %s456_s2, 16 }
  0x27   :  { %p261_p2 = scmp.ne.s32.totalorder %s456_s2, %s260_s21  ;;  %p264_p3 = scmp.lt.u32.totalorder %s260_s21, %s456_s2 }
  0x29   :  { %p266_p4 = pnand %p264_p3, %p261_p2 }
  0x2b   :  { %269 = shalt.err (!%p266_p4)
}
  0x2c   :  { %s270_s0 = scalar_lea.vmem %s44_s15, 16  ;;  %s274_s18 = scalar_lea.vmem %s44_s15, 32 }
  0x2d   :  { %p271_p5 = scmp.ne.s32.totalorder %s44_s15, %s270_s0  ;;  %p275_p6 = scmp.lt.s32.totalorder %s44_s15, %s44_s15 }
  0x2e   :  { %p276_p7 = scmp.lt.s32.totalorder %s274_s18, %s270_s0 }
  0x30   :  { %p277_p8 = por %p276_p7, %p275_p6 }
  0x32   :  { %p278_p9 = pnand %p277_p8, %p271_p5 }
  0x34   :  { %281 = shalt.err (!%p278_p9)
}
  0x35   :  { %46 = dma.hbm_to_vmem [thread:$0]  %s456_s2, 16, %s44_s15, [#allocation6]  }
  0x36   :  { %s282_s6 = scalar_lea.hbm %s457_s3, 128 }
  0x37   :  { %p283_p10 = scmp.ne.s32.totalorder %s457_s3, %s282_s6  ;;  %p286_p11 = scmp.lt.u32.totalorder %s282_s6, %s457_s3 }
  0x39   :  { %p288_p12 = pnand %p286_p11, %p283_p10 }
  0x3b   :  { %291 = shalt.err (!%p288_p12)
}
  0x3c   :  { %s292_s11 = scalar_lea.vmem %s405_s17, 128  ;;  %p297_p0 = scmp.lt.s32.totalorder %s405_s17, %s405_s17 }
  0x3d   :  { %p293_p13 = scmp.ne.s32.totalorder %s405_s17, %s292_s11  ;;  %p298_p1 = scmp.lt.s32.totalorder %s292_s11, %s292_s11 }
  0x3f   :  { %p299_p2 = por %p298_p1, %p297_p0 }
  0x41   :  { %p300_p3 = pnand %p299_p2, %p293_p13 }
  0x43   :  { %303 = shalt.err (!%p300_p3)
}
  0x44   :  { %58 = dma.hbm_to_vmem [thread:$0]  %s457_s3, 128, %s405_s17, [#allocation9], %s336_s27, %s336_s27, %s337_s28  }
  0x45   :  { %326 = dma.done.wait [#allocation3], 128  }
  0x46   :  { %327 = vsyncadd [#allocation3], 4294967168 }
  0x47   :  { %328 = dma.done.wait [#allocation6], 272  }
  0x48   :  { %329 = vsyncadd [#allocation6], 4294967024 }
  0x49   :  { %330 = dma.done.wait [#allocation9], 128  }
  0x4a   :  { %331 = vsyncadd [#allocation9], 4294967168  ;;  %v340_v0 = vmov 0.0   ;;  %vm341_vm0 = vmmov 0   ;;  %v213_v1 = vld [vmem:[#allocation5] sm:$0xff]   ;;  %v214_v2 = vld [vmem:[#allocation5 + $0x8] sm:$0xff]  }
  0x4b   :  { %196 = vmatprep.subr.bf16.mxu0 %v340_v0  ;;  %200 = vmatprep.mubr.msk.bf16.mxu0 %vm341_vm0, %v340_v0  ;;  %v215_v3 = vld [vmem:[#allocation2] sm:$0x1f]   ;;  %vm102_vm1 = vcmask 261120   ;;  %v147_v4 = vld [vmem:[#allocation8] sm:$0xf]  ;;  %vm161_vm2 = vcmask 257024  }
  0x4c   :  { %197 = vmatpush3.bf16.msra.mxu0 %v213_v1  ;;  %v184_v5 = vld [vmem:[#allocation7] ss:$0 sm:$0xff]  ;;  %v148_v6 = vld [vmem:[#allocation8 + $0x4] sm:$0x1]  ;;  %v149_v7 = vunpack.c.l.bf16 %v147_v4  ;;  %s342_s3 = smov [#allocation10]   ;;  %vm163_vm3 = vcmask 253952  }
  0x4d   :  { %198 = vmatprep.subr.bf16.mxu0 %v340_v0  ;;  %v150_v11 = vunpack.c.l.bf16 %v148_v6  ;;  %s170_s1 = sshll.u32 %s342_s3, 4  ;;  %s171_s1 = int_to_ptr.vmem [resolvable:$true] %s170_s1 }
  0x4e   :  { %s304_s13 = scalar_lea.vmem %s171_s1, 128  ;;  %p309_p5 = scmp.lt.s32.totalorder %s171_s1, %s171_s1 }
  0x4f   :  { %p305_p4 = scmp.ne.s32.totalorder %s171_s1, %s304_s13  ;;  %p310_p6 = scmp.lt.s32.totalorder %s304_s13, %s304_s13 }
  0x50   :  { %199 = vmatpush3.bf16.msra.mxu0 %v214_v2 }
  0x51   :  { %p311_p7 = por %p310_p6, %p309_p5 }
  0x53   :  { %201 = vmatmul.mubr.msk.bf16.vlgmr.msra.gmra.mrb[0].mxu0 %vm102_vm1, %v215_v3  ;;  %p312_p8 = pnand %p311_p7, %p305_p4 }
 0x126   :  { %v140_v8 = vpop.f32.mrb[0].mxu0 }
 0x127   :  { %v141_v9 = vadd.f32 %v184_v5, %v140_v8  ;;  %v202_v10 = vpop.f32.mrb[1].mxu0 }
 0x128   :  { %v143_v12 = vpop.f32.mrb[2].mxu0 }
 0x129   :  { %v151_v13 = vadd.f32 %v149_v7, %v141_v9  ;;  %v144_v14 = vadd.f32 %v184_v5, %v143_v12  ;;  %v203_v15 = vpop.f32.mrb[3].mxu0 }
 0x12b   :  { %v191_v16 = vpack.c.bf16 %v151_v13, %v151_v13  ;;  %v152_v17 = vadd.f32 %v150_v11, %v144_v14 }
 0x12d   :  { %v192_v18 = vpack.c.bf16 %v152_v17, %v152_v17  ;;  %162 = vst.msk [vmem:[#allocation10] sm:$0xf] %vm161_vm2, %v191_v16 }
 0x12f   :  { %164 = vst.msk [vmem:[#allocation10 + $0x4] sm:$0x1] %vm163_vm3, %v192_v18 }
 0x130   :  { %315 = shalt.err (!%p312_p8)
}
 0x131   :  { %s316_s16 = scalar_lea.hbm %s458_s4, 128 }
 0x132   :  { %p317_p9 = scmp.ne.s32.totalorder %s458_s4, %s316_s16  ;;  %p320_p10 = scmp.lt.u32.totalorder %s316_s16, %s458_s4 }
 0x134   :  { %p322_p11 = pnand %p320_p10, %p317_p9 }
 0x136   :  { %325 = shalt.err (!%p322_p11)
}
 0x137   :  { %176 = dma.vmem_to_hbm [thread:$0]  %s171_s1, 128, %s458_s4, [#allocation4], %s336_s27, %s336_s27, %s337_s28  }
 0x138   :  { %332 = dma.done.wait [#allocation4], 128  }
 0x139   :  { %333 = vsyncadd [#allocation4], 4294967168 }
 0x13a   :  { %180 = vsyncpa [#allocation3], 1 }
 0x13b   :  { %181 = vsyncpa [#allocation6], 1 }
 0x13c   :  { %182 = vsyncpa [#allocation9], 1 }
 0x13d   :  { %183 = vsyncpa [#allocation4], 1 }

// kernel: _lambda_.28
= control target key start
LH: loop header
LB: loop body
LE: loop exit
PB: predicated region body
PF: predicated region fallthrough
CT: control target
= control target key end

     0   :  { %10 = vsyncpa [#allocation3], 0  ;;  %s563_s0 = inlined_call_operand.hbm [shape: bf16[10,32], index: 0, kind: input, shape index: {}]   ;;  %s564_s1 = inlined_call_operand.hbm [shape: bf16[32,128], index: 1, kind: input, shape index: {}]   ;;  %s565_s2 = inlined_call_operand.hbm [shape: f32[1,128], index: 2, kind: input, shape index: {}]   ;;  %s566_s3 = inlined_call_operand.hbm [shape: f32[1,32], index: 3, kind: input, shape index: {}]   ;;  %s567_s4 = inlined_call_operand.hbm [shape: f32[1,32], index: 4, kind: input, shape index: {}]   ;;  %s568_s5 = inlined_call_operand.hbm [shape: bf16[10,128], index: 5, kind: output, shape index: {}]  }
   0x1   :  { %11 = vsyncpa [#allocation6], 0 }
   0x2   :  { %12 = vsyncpa [#allocation9], 0 }
   0x3   :  { %13 = vsyncpa [#allocation4], 0  ;;  %s431_s18 = smov [#allocation5]   ;;  %s432_s20 = smov [#allocation8]  }
   0x4   :  { %s31_s19 = sshll.u32 %s431_s18, 4  ;;  %s54_s21 = sshll.u32 %s432_s20, 4  ;;  %s32_s19 = int_to_ptr.vmem [resolvable:$true] %s31_s19  ;;  %s471_s21 = int_to_ptr.vmem [resolvable:$true] %s54_s21 }
   0x5   :  { %s291_s24 = scalar_lea.hbm %s564_s1, 256 }
   0x6   :  { %p292_p0 = scmp.ne.s32.totalorder %s564_s1, %s291_s24  ;;  %p295_p1 = scmp.lt.u32.totalorder %s291_s24, %s564_s1 }
   0x8   :  { %p297_p2 = pnand %p295_p1, %p292_p0 }
   0xa   :  { %300 = shalt.err (!%p297_p2)
}
   0xb   :  { %s301_s29 = scalar_lea.vmem %s32_s19, 256  ;;  %p306_p4 = scmp.lt.s32.totalorder %s32_s19, %s32_s19 }
   0xc   :  { %p302_p3 = scmp.ne.s32.totalorder %s32_s19, %s301_s29  ;;  %p307_p5 = scmp.lt.s32.totalorder %s301_s29, %s301_s29 }
   0xe   :  { %p308_p6 = por %p307_p5, %p306_p4 }
  0x10   :  { %p309_p7 = pnand %p308_p6, %p302_p3 }
  0x12   :  { %312 = shalt.err (!%p309_p7)
}
  0x13   :  { %s433_s30 = smov 64   ;;  %s434_s6 = smov 4  }
  0x14   :  { %37 = dma.hbm_to_vmem [thread:$0]  %s564_s1, 256, %s32_s19, [#allocation6], %s433_s30, %s433_s30, %s434_s6  }
  0x15   :  { %s313_s11 = scalar_lea.hbm %s566_s3, 16 }
  0x16   :  { %p314_p8 = scmp.ne.s32.totalorder %s566_s3, %s313_s11  ;;  %p317_p9 = scmp.lt.u32.totalorder %s313_s11, %s566_s3 }
  0x18   :  { %p319_p10 = pnand %p317_p9, %p314_p8 }
  0x1a   :  { %322 = shalt.err (!%p319_p10)
}
  0x1b   :  { %s323_s16 = scalar_lea.vmem %s471_s21, 16  ;;  %s327_s1 = scalar_lea.vmem %s471_s21, 32 }
  0x1c   :  { %p324_p11 = scmp.ne.s32.totalorder %s471_s21, %s323_s16  ;;  %p328_p12 = scmp.lt.s32.totalorder %s471_s21, %s471_s21 }
  0x1d   :  { %p329_p13 = scmp.lt.s32.totalorder %s327_s1, %s323_s16 }
  0x1f   :  { %p330_p0 = por %p329_p13, %p328_p12 }
  0x21   :  { %p331_p1 = pnand %p330_p0, %p324_p11 }
  0x23   :  { %334 = shalt.err (!%p331_p1)
}
  0x24   :  { %57 = dma.hbm_to_vmem [thread:$0]  %s566_s3, 16, %s471_s21, [#allocation9]  }
  0x25   :  { %s435_s19 = smov [#allocation2]   ;;  %s436_s22 = smov [#allocation7]  }
  0x26   :  { %s19_s20 = sshll.u32 %s435_s19, 4  ;;  %s44_s23 = sshll.u32 %s436_s22, 4  ;;  %s20_s20 = int_to_ptr.vmem [resolvable:$true] %s19_s20  ;;  %s45_s23 = int_to_ptr.vmem [resolvable:$true] %s44_s23 }
  0x27   :  { %s335_s26 = scalar_lea.hbm %s563_s0, 128 }
  0x28   :  { %p336_p2 = scmp.ne.s32.totalorder %s563_s0, %s335_s26  ;;  %p339_p3 = scmp.lt.u32.totalorder %s335_s26, %s563_s0 }
  0x2a   :  { %p341_p4 = pnand %p339_p3, %p336_p2 }
  0x2c   :  { %344 = shalt.err (!%p341_p4)
}
  0x2d   :  { %s345_s3 = scalar_lea.vmem %s20_s20, 128  ;;  %p350_p6 = scmp.lt.s32.totalorder %s20_s20, %s20_s20 }
  0x2e   :  { %p346_p5 = scmp.ne.s32.totalorder %s20_s20, %s345_s3  ;;  %p351_p7 = scmp.lt.s32.totalorder %s345_s3, %s345_s3 }
  0x30   :  { %p352_p8 = por %p351_p7, %p350_p6 }
  0x32   :  { %p353_p9 = pnand %p352_p8, %p346_p5 }
  0x34   :  { %356 = shalt.err (!%p353_p9)
}
  0x35   :  { %25 = dma.hbm_to_vmem [thread:$0]  %s563_s0, 128, %s20_s20, [#allocation3], %s433_s30, %s433_s30, %s434_s6  }
  0x36   :  { %s357_s11 = scalar_lea.hbm %s565_s2, 16 }
  0x37   :  { %p358_p10 = scmp.ne.s32.totalorder %s565_s2, %s357_s11  ;;  %p361_p11 = scmp.lt.u32.totalorder %s357_s11, %s565_s2 }
  0x39   :  { %p363_p12 = pnand %p361_p11, %p358_p10 }
  0x3b   :  { %366 = shalt.err (!%p363_p12)
}
  0x3c   :  { %s367_s16 = scalar_lea.vmem %s45_s23, 16  ;;  %s371_s1 = scalar_lea.vmem %s45_s23, 32 }
  0x3d   :  { %p368_p13 = scmp.ne.s32.totalorder %s45_s23, %s367_s16  ;;  %p372_p0 = scmp.lt.s32.totalorder %s45_s23, %s45_s23 }
  0x3e   :  { %p373_p1 = scmp.lt.s32.totalorder %s371_s1, %s367_s16 }
  0x40   :  { %p374_p2 = por %p373_p1, %p372_p0 }
  0x42   :  { %p375_p3 = pnand %p374_p2, %p368_p13 }
  0x44   :  { %378 = shalt.err (!%p375_p3)
}
  0x45   :  { %47 = dma.hbm_to_vmem [thread:$0]  %s565_s2, 16, %s45_s23, [#allocation6]  }
  0x46   :  { %s437_s18 = smov [#allocation10]   ;;  %s379_s24 = scalar_lea.hbm %s567_s4, 16 }
  0x47   :  { %s64_s19 = sshll.u32 %s437_s18, 4  ;;  %p380_p4 = scmp.ne.s32.totalorder %s567_s4, %s379_s24  ;;  %s65_s19 = int_to_ptr.vmem [resolvable:$true] %s64_s19 }
  0x48   :  { %p383_p5 = scmp.lt.u32.totalorder %s379_s24, %s567_s4 }
  0x4a   :  { %p385_p6 = pnand %p383_p5, %p380_p4 }
  0x4c   :  { %388 = shalt.err (!%p385_p6)
}
  0x4d   :  { %s389_s29 = scalar_lea.vmem %s65_s19, 16  ;;  %s393_s2 = scalar_lea.vmem %s65_s19, 32 }
  0x4e   :  { %p390_p7 = scmp.ne.s32.totalorder %s65_s19, %s389_s29  ;;  %p394_p8 = scmp.lt.s32.totalorder %s65_s19, %s65_s19 }
  0x4f   :  { %p395_p9 = scmp.lt.s32.totalorder %s393_s2, %s389_s29 }
  0x51   :  { %p396_p10 = por %p395_p9, %p394_p8 }
  0x53   :  { %p397_p11 = pnand %p396_p10, %p390_p7 }
  0x55   :  { %400 = shalt.err (!%p397_p11)
}
  0x56   :  { %67 = dma.hbm_to_vmem [thread:$0]  %s567_s4, 16, %s65_s19, [#allocation9]  }
  0x57   :  { %423 = dma.done.wait [#allocation3], 128  }
  0x58   :  { %424 = vsyncadd [#allocation3], 4294967168 }
  0x59   :  { %425 = dma.done.wait [#allocation6], 272  }
  0x5a   :  { %426 = vsyncadd [#allocation6], 4294967024 }
  0x5b   :  { %427 = dma.done.wait [#allocation9], 32  }
  0x5c   :  { %428 = vsyncadd [#allocation9], 4294967264  ;;  %vm88_vm0 = vcmask 261120   ;;  %v84_v0 = vld [vmem:[#allocation2] sm:$0xf]  ;;  %vm92_vm1 = vcmask 254976  }
  0x5d   :  { %v85_v1 = vld [vmem:[#allocation2 + $0x4] sm:$0x1]  ;;  %v86_v2 = vunpack.c.l.bf16 %v84_v0  ;;  %v281_v16 = vld [vmem:[#allocation5] sm:$0xff]   ;;  %v438_v17 = vmov 0.0   ;;  %v282_v18 = vld [vmem:[#allocation5 + $0x8] sm:$0xff]   ;;  %vm439_vm2 = vmmov 0  }
  0x5e   :  { %v87_v3 = vunpack.c.l.bf16 %v85_v1  ;;  %263 = vmatprep.subr.bf16.mxu0 %v438_v17  ;;  %267 = vmatprep.mubr.msk.bf16.mxu0 %vm439_vm2, %v438_v17  ;;  %v250_v27 = vld [vmem:[#allocation8] ss:$0 sm:$0xff]  ;;  %v251_v31 = vld [vmem:[#allocation10] ss:$0 sm:$0xff]  ;;  %v252_v36 = vld [vmem:[#allocation7] ss:$0 sm:$0xff] }
  0x5f   :  { %v89_v4 = vsel %vm88_vm0, %v86_v2, 0.0  ;;  %264 = vmatpush3.bf16.msra.mxu0 %v281_v16  ;;  %s440_s4 = smov [#allocation11]  }
  0x60   :  { %90 = vadd.xlane.f32.xlu0 %v89_v4  ;;  %v93_v5 = vsel %vm92_vm1, %v87_v3, 0.0  ;;  %265 = vmatprep.subr.bf16.mxu0 %v438_v17  ;;  %s236_s3 = sshll.u32 %s440_s4, 4  ;;  %s237_s3 = int_to_ptr.vmem [resolvable:$true] %s236_s3 }
  0x61   :  { %s401_s21 = scalar_lea.vmem %s237_s3, 128  ;;  %p406_p13 = scmp.lt.s32.totalorder %s237_s3, %s237_s3 }
  0x62   :  { %p402_p12 = scmp.ne.s32.totalorder %s237_s3, %s401_s21  ;;  %p407_p0 = scmp.lt.s32.totalorder %s401_s21, %s401_s21 }
  0x63   :  { %266 = vmatpush3.bf16.msra.mxu0 %v282_v18 }
  0x64   :  { %94 = vadd.xlane.f32.xlu0 %v93_v5  ;;  %p408_p1 = por %p407_p0, %p406_p13 }
  0x66   :  { %p409_p2 = pnand %p408_p1, %p402_p12 }
  0xed   :  { %v91_v6 = vpop.xlane.xlu0 %90 }
  0xee   :  { %v97_v7 = vmul.f32 0.03125, %v91_v6 }
  0xf0   :  { %v99_v8 = vsub.f32 %v86_v2, %v97_v7 }
  0xf1   :  { %v95_v9 = vpop.xlane.xlu0 %94 }
  0xf2   :  { %v98_v10 = vmul.f32 0.03125, %v95_v9  ;;  %v101_v11 = vmul.f32 %v99_v8, %v99_v8 }
  0xf4   :  { %v100_v12 = vsub.f32 %v87_v3, %v98_v10  ;;  %v103_v13 = vsel %vm88_vm0, %v101_v11, 0.0 }
  0xf5   :  { %104 = vadd.xlane.f32.xlu1 %v103_v13 }
  0xf6   :  { %v102_v14 = vmul.f32 %v100_v12, %v100_v12 }
  0xf8   :  { %v106_v15 = vsel %vm92_vm1, %v102_v14, 0.0 }
  0xf9   :  { %107 = vadd.xlane.f32.xlu1 %v106_v15 }
 0x182   :  { %v105_v19 = vpop.xlane.xlu1 %104 }
 0x183   :  { %v109_v20 = vmul.f32 0.03125, %v105_v19 }
 0x185   :  { %v111_v21 = vadd.f32 1e-05, %v109_v20 }
 0x186   :  { %v108_v22 = vpop.xlane.xlu1 %107 }
 0x187   :  { %283 = vrsqrt.f32 %v111_v21  ;;  %v110_v23 = vmul.f32 0.03125, %v108_v22 }
 0x189   :  { %v112_v24 = vadd.f32 1e-05, %v110_v23 }
 0x18b   :  { %285 = vrsqrt.f32 %v112_v24 }
 0x191   :  { %v284_v25 = vpop.eup %283 }
 0x192   :  { %v115_v26 = vmul.f32 %v284_v25, %v99_v8 }
 0x194   :  { %v124_v30 = vmul.f32 %v250_v27, %v115_v26 }
 0x195   :  { %v286_v28 = vpop.eup %285 }
 0x196   :  { %v116_v29 = vmul.f32 %v286_v28, %v100_v12  ;;  %v133_v33 = vadd.f32 %v251_v31, %v124_v30 }
 0x198   :  { %v125_v32 = vmul.f32 %v250_v27, %v116_v29 }
 0x19a   :  { %v134_v34 = vadd.f32 %v251_v31, %v125_v32 }
 0x19c   :  { %v135_v35 = vpack.c.bf16 %v134_v34, %v133_v33 }
 0x19e   :  { %268 = vmatmul.mubr.msk.bf16.vlgmr.msra.gmra.mrb[0].mxu0 %vm88_vm0, %v135_v35 }
 0x271   :  { %v196_v37 = vpop.f32.mrb[0].mxu0 }
 0x272   :  { %v197_v38 = vadd.f32 %v252_v36, %v196_v37  ;;  %v269_v39 = vpop.f32.mrb[1].mxu0 }
 0x273   :  { %v199_v40 = vpop.f32.mrb[2].mxu0 }
 0x274   :  { %v205_v41 = vmul.f32 0.044715, %v197_v38  ;;  %v200_v42 = vadd.f32 %v252_v36, %v199_v40  ;;  %v270_v43 = vpop.f32.mrb[3].mxu0  ;;  %v203_v54 = vmul.f32 0.5, %v197_v38 }
 0x276   :  { %v207_v44 = vmul.f32 %v205_v41, %v197_v38  ;;  %v206_v45 = vmul.f32 0.044715, %v200_v42  ;;  %v204_v57 = vmul.f32 0.5, %v200_v42 }
 0x278   :  { %v209_v46 = vmul.f32 %v207_v44, %v197_v38  ;;  %v208_v47 = vmul.f32 %v206_v45, %v200_v42 }
 0x27a   :  { %v210_v48 = vmul.f32 %v208_v47, %v200_v42  ;;  %v211_v49 = vadd.f32 %v209_v46, %v197_v38 }
 0x27c   :  { %v212_v50 = vadd.f32 %v210_v48, %v200_v42  ;;  %v213_v51 = vmul.f32 0.7978846, %v211_v49 }
 0x27e   :  { %v214_v52 = vmul.f32 0.7978846, %v212_v50  ;;  %287 = vtanh.f32 %v213_v51 }
 0x280   :  { %289 = vtanh.f32 %v214_v52 }
 0x288   :  { %v288_v53 = vpop.eup %287 }
 0x289   :  { %v217_v55 = vadd.f32 1.0, %v288_v53 }
 0x28a   :  { %v290_v56 = vpop.eup %289 }
 0x28b   :  { %v218_v58 = vadd.f32 1.0, %v290_v56  ;;  %v219_v59 = vmul.f32 %v217_v55, %v203_v54 }
 0x28d   :  { %v220_v60 = vmul.f32 %v218_v58, %v204_v57  ;;  %v258_v61 = vpack.c.bf16 %v219_v59, %v219_v59 }
 0x28f   :  { %v259_v62 = vpack.c.bf16 %v220_v60, %v220_v60  ;;  %229 = vst [vmem:[#allocation11] sm:$0xf] %v258_v61 }
 0x291   :  { %230 = vst [vmem:[#allocation11 + $0x4] sm:$0x1] %v259_v62 }
 0x292   :  { %412 = shalt.err (!%p409_p2)
}
 0x293   :  { %s413_s10 = scalar_lea.hbm %s568_s5, 128 }
 0x294   :  { %p414_p3 = scmp.ne.s32.totalorder %s568_s5, %s413_s10  ;;  %p417_p4 = scmp.lt.u32.totalorder %s413_s10, %s568_s5 }
 0x296   :  { %p419_p5 = pnand %p417_p4, %p414_p3 }
 0x298   :  { %422 = shalt.err (!%p419_p5)
}
 0x299   :  { %242 = dma.vmem_to_hbm [thread:$0]  %s237_s3, 128, %s568_s5, [#allocation4], %s433_s30, %s433_s30, %s434_s6  }
 0x29a   :  { %429 = dma.done.wait [#allocation4], 128  }
 0x29b   :  { %430 = vsyncadd [#allocation4], 4294967168 }
 0x29c   :  { %246 = vsyncpa [#allocation3], 1 }
 0x29d   :  { %247 = vsyncpa [#allocation6], 1 }
 0x29e   :  { %248 = vsyncpa [#allocation9], 1 }
 0x29f   :  { %249 = vsyncpa [#allocation4], 1 }

// kernel: _lambda_.29
= control target key start
LH: loop header
LB: loop body
LE: loop exit
PB: predicated region body
PF: predicated region fallthrough
CT: control target
= control target key end

     0   :  { %9 = vsyncpa [#allocation3], 0  ;;  %s528_s0 = inlined_call_operand.hbm [shape: bf16[10,128], index: 0, kind: input, shape index: {}]   ;;  %s529_s1 = inlined_call_operand.hbm [shape: bf16[128,32], index: 1, kind: input, shape index: {}]   ;;  %s530_s2 = inlined_call_operand.hbm [shape: f32[1,32], index: 2, kind: input, shape index: {}]   ;;  %s531_s3 = inlined_call_operand.hbm [shape: bf16[10,32], index: 3, kind: input, shape index: {}]   ;;  %s532_s4 = inlined_call_operand.hbm [shape: bf16[10,32], index: 4, kind: output, shape index: {}]  }
   0x1   :  { %10 = vsyncpa [#allocation6], 0 }
   0x2   :  { %11 = vsyncpa [#allocation9], 0 }
   0x3   :  { %12 = vsyncpa [#allocation4], 0  ;;  %s408_s15 = smov [#allocation5]   ;;  %s409_s17 = smov [#allocation2]  }
   0x4   :  { %s30_s16 = sshll.u32 %s408_s15, 4  ;;  %s18_s18 = sshll.u32 %s409_s17, 4  ;;  %s31_s16 = int_to_ptr.vmem [resolvable:$true] %s30_s16  ;;  %s442_s18 = int_to_ptr.vmem [resolvable:$true] %s18_s18 }
   0x5   :  { %s290_s21 = scalar_lea.hbm %s529_s1, 1024 }
   0x6   :  { %p291_p0 = scmp.ne.s32.totalorder %s529_s1, %s290_s21  ;;  %p294_p1 = scmp.lt.u32.totalorder %s290_s21, %s529_s1 }
   0x8   :  { %p296_p2 = pnand %p294_p1, %p291_p0 }
   0xa   :  { %299 = shalt.err (!%p296_p2)
}
   0xb   :  { %s300_s26 = scalar_lea.vmem %s31_s16, 1024  ;;  %p305_p4 = scmp.lt.s32.totalorder %s31_s16, %s31_s16 }
   0xc   :  { %p301_p3 = scmp.ne.s32.totalorder %s31_s16, %s300_s26  ;;  %p306_p5 = scmp.lt.s32.totalorder %s300_s26, %s300_s26 }
   0xe   :  { %p307_p6 = por %p306_p5, %p305_p4 }
  0x10   :  { %p308_p7 = pnand %p307_p6, %p301_p3 }
  0x12   :  { %311 = shalt.err (!%p308_p7)
}
  0x13   :  { %s410_s27 = smov 64   ;;  %s411_s28 = smov 4  }
  0x14   :  { %36 = dma.hbm_to_vmem [thread:$0]  %s529_s1, 1024, %s31_s16, [#allocation6], %s410_s27, %s410_s27, %s411_s28  }
  0x15   :  { %s312_s7 = scalar_lea.hbm %s528_s0, 128 }
  0x16   :  { %p313_p8 = scmp.ne.s32.totalorder %s528_s0, %s312_s7  ;;  %p316_p9 = scmp.lt.u32.totalorder %s312_s7, %s528_s0 }
  0x18   :  { %p318_p10 = pnand %p316_p9, %p313_p8 }
  0x1a   :  { %321 = shalt.err (!%p318_p10)
}
  0x1b   :  { %s322_s12 = scalar_lea.vmem %s442_s18, 128  ;;  %p327_p12 = scmp.lt.s32.totalorder %s442_s18, %s442_s18 }
  0x1c   :  { %p323_p11 = scmp.ne.s32.totalorder %s442_s18, %s322_s12  ;;  %p328_p13 = scmp.lt.s32.totalorder %s322_s12, %s322_s12 }
  0x1e   :  { %p329_p0 = por %p328_p13, %p327_p12 }
  0x20   :  { %p330_p1 = pnand %p329_p0, %p323_p11 }
  0x22   :  { %333 = shalt.err (!%p330_p1)
}
  0x23   :  { %24 = dma.hbm_to_vmem [thread:$0]  %s528_s0, 128, %s442_s18, [#allocation3], %s410_s27, %s410_s27, %s411_s28  }
  0x24   :  { %s412_s14 = smov [#allocation7]   ;;  %s413_s16 = smov [#allocation8]  }
  0x25   :  { %s43_s15 = sshll.u32 %s412_s14, 4  ;;  %s52_s17 = sshll.u32 %s413_s16, 4  ;;  %s44_s15 = int_to_ptr.vmem [resolvable:$true] %s43_s15  ;;  %s479_s17 = int_to_ptr.vmem [resolvable:$true] %s52_s17 }
  0x26   :  { %s334_s21 = scalar_lea.hbm %s530_s2, 16 }
  0x27   :  { %p335_p2 = scmp.ne.s32.totalorder %s530_s2, %s334_s21  ;;  %p338_p3 = scmp.lt.u32.totalorder %s334_s21, %s530_s2 }
  0x29   :  { %p340_p4 = pnand %p338_p3, %p335_p2 }
  0x2b   :  { %343 = shalt.err (!%p340_p4)
}
  0x2c   :  { %s344_s0 = scalar_lea.vmem %s44_s15, 16  ;;  %s348_s18 = scalar_lea.vmem %s44_s15, 32 }
  0x2d   :  { %p345_p5 = scmp.ne.s32.totalorder %s44_s15, %s344_s0  ;;  %p349_p6 = scmp.lt.s32.totalorder %s44_s15, %s44_s15 }
  0x2e   :  { %p350_p7 = scmp.lt.s32.totalorder %s348_s18, %s344_s0 }
  0x30   :  { %p351_p8 = por %p350_p7, %p349_p6 }
  0x32   :  { %p352_p9 = pnand %p351_p8, %p345_p5 }
  0x34   :  { %355 = shalt.err (!%p352_p9)
}
  0x35   :  { %46 = dma.hbm_to_vmem [thread:$0]  %s530_s2, 16, %s44_s15, [#allocation6]  }
  0x36   :  { %s356_s6 = scalar_lea.hbm %s531_s3, 128 }
  0x37   :  { %p357_p10 = scmp.ne.s32.totalorder %s531_s3, %s356_s6  ;;  %p360_p11 = scmp.lt.u32.totalorder %s356_s6, %s531_s3 }
  0x39   :  { %p362_p12 = pnand %p360_p11, %p357_p10 }
  0x3b   :  { %365 = shalt.err (!%p362_p12)
}
  0x3c   :  { %s366_s11 = scalar_lea.vmem %s479_s17, 128  ;;  %p371_p0 = scmp.lt.s32.totalorder %s479_s17, %s479_s17 }
  0x3d   :  { %p367_p13 = scmp.ne.s32.totalorder %s479_s17, %s366_s11  ;;  %p372_p1 = scmp.lt.s32.totalorder %s366_s11, %s366_s11 }
  0x3f   :  { %p373_p2 = por %p372_p1, %p371_p0 }
  0x41   :  { %p374_p3 = pnand %p373_p2, %p367_p13 }
  0x43   :  { %377 = shalt.err (!%p374_p3)
}
  0x44   :  { %58 = dma.hbm_to_vmem [thread:$0]  %s531_s3, 128, %s479_s17, [#allocation9], %s410_s27, %s410_s27, %s411_s28  }
  0x45   :  { %400 = dma.done.wait [#allocation3], 128  }
  0x46   :  { %401 = vsyncadd [#allocation3], 4294967168 }
  0x47   :  { %402 = dma.done.wait [#allocation6], 1040  }
  0x48   :  { %403 = vsyncadd [#allocation6], 4294966256 }
  0x49   :  { %404 = dma.done.wait [#allocation9], 128  }
  0x4a   :  { %405 = vsyncadd [#allocation9], 4294967168  ;;  %v414_v0 = vmov 0.0   ;;  %vm415_vm0 = vmmov 0   ;;  %v281_v1 = vld [vmem:[#allocation5] sm:$0xff]   ;;  %v282_v2 = vld [vmem:[#allocation5 + $0x8] sm:$0xff]  }
  0x4b   :  { %252 = vmatprep.subr.bf16.mxu0 %v414_v0  ;;  %268 = vmatprep.mubr.msk.bf16.mxu0 %vm415_vm0, %v414_v0  ;;  %v283_v3 = vld [vmem:[#allocation5 + $0x10] sm:$0xff]   ;;  %v284_v4 = vld [vmem:[#allocation5 + $0x18] sm:$0xff]   ;;  %v285_v5 = vld [vmem:[#allocation5 + $0x20] sm:$0xff]   ;;  %vm206_vm1 = vcmask 257024   ;;  %s416_s3 = smov [#allocation10]   ;;  %vm208_vm2 = vcmask 253952  }
  0x4c   :  { %253 = vmatpush3.bf16.msra.mxu0 %v281_v1  ;;  %v286_v6 = vld [vmem:[#allocation5 + $0x28] sm:$0xff]   ;;  %v287_v7 = vld [vmem:[#allocation5 + $0x30] sm:$0xff]   ;;  %v288_v8 = vld [vmem:[#allocation5 + $0x38] sm:$0xff]   ;;  %s215_s1 = sshll.u32 %s416_s3, 4  ;;  %s216_s1 = int_to_ptr.vmem [resolvable:$true] %s215_s1 }
  0x4d   :  { %254 = vmatprep.subr.bf16.mxu0 %v414_v0  ;;  %v289_v9 = vld [vmem:[#allocation2] sm:$0x1f]   ;;  %v192_v10 = vld [vmem:[#allocation8] sm:$0xf]  ;;  %v229_v11 = vld [vmem:[#allocation7] ss:$0 sm:$0xff]  ;;  %p383_p5 = scmp.lt.s32.totalorder %s216_s1, %s216_s1 }
  0x4e   :  { %v193_v12 = vld [vmem:[#allocation8 + $0x4] sm:$0x1]  ;;  %v194_v13 = vunpack.c.l.bf16 %v192_v10  ;;  %s378_s13 = scalar_lea.vmem %s216_s1, 128 }
  0x4f   :  { %v195_v17 = vunpack.c.l.bf16 %v193_v12  ;;  %p379_p4 = scmp.ne.s32.totalorder %s216_s1, %s378_s13  ;;  %p384_p6 = scmp.lt.s32.totalorder %s378_s13, %s378_s13 }
  0x50   :  { %255 = vmatpush3.bf16.msra.mxu0 %v282_v2 }
  0x51   :  { %256 = vmatprep.subr.bf16.mxu0 %v414_v0  ;;  %p385_p7 = por %p384_p6, %p383_p5 }
  0x53   :  { %p386_p8 = pnand %p385_p7, %p379_p4 }
  0x54   :  { %257 = vmatpush3.bf16.msra.mxu0 %v283_v3 }
  0x55   :  { %258 = vmatprep.subr.bf16.mxu0 %v414_v0 }
  0x58   :  { %259 = vmatpush3.bf16.msra.mxu0 %v284_v4 }
  0x59   :  { %260 = vmatprep.subr.bf16.mxu0 %v414_v0 }
  0x5c   :  { %261 = vmatpush3.bf16.msra.mxu0 %v285_v5 }
  0x5d   :  { %262 = vmatprep.subr.bf16.mxu0 %v414_v0 }
  0x60   :  { %263 = vmatpush3.bf16.msra.mxu0 %v286_v6 }
  0x61   :  { %264 = vmatprep.subr.bf16.mxu0 %v414_v0 }
  0x64   :  { %265 = vmatpush3.bf16.msra.mxu0 %v287_v7 }
  0x65   :  { %266 = vmatprep.subr.bf16.mxu0 %v414_v0 }
  0x68   :  { %267 = vmatpush3.bf16.msra.mxu0 %v288_v8 }
  0x6b   :  { %269 = vmatmul.mubr.bf16.vlgmr.msra.gmra.mrb[0].mxu0 %v289_v9 }
 0x13e   :  { %v185_v14 = vpop.f32.mrb[0].mxu0 }
 0x13f   :  { %v186_v15 = vadd.f32 %v229_v11, %v185_v14  ;;  %v270_v16 = vpop.f32.mrb[1].mxu0 }
 0x140   :  { %v188_v18 = vpop.f32.mrb[2].mxu0 }
 0x141   :  { %v196_v19 = vadd.f32 %v194_v13, %v186_v15  ;;  %v189_v20 = vadd.f32 %v229_v11, %v188_v18  ;;  %v271_v21 = vpop.f32.mrb[3].mxu0 }
 0x143   :  { %v241_v22 = vpack.c.bf16 %v196_v19, %v196_v19  ;;  %v197_v23 = vadd.f32 %v195_v17, %v189_v20 }
 0x145   :  { %v242_v24 = vpack.c.bf16 %v197_v23, %v197_v23  ;;  %207 = vst.msk [vmem:[#allocation10] sm:$0xf] %vm206_vm1, %v241_v22 }
 0x147   :  { %209 = vst.msk [vmem:[#allocation10 + $0x4] sm:$0x1] %vm208_vm2, %v242_v24 }
 0x148   :  { %389 = shalt.err (!%p386_p8)
}
 0x149   :  { %s390_s16 = scalar_lea.hbm %s532_s4, 128 }
 0x14a   :  { %p391_p9 = scmp.ne.s32.totalorder %s532_s4, %s390_s16  ;;  %p394_p10 = scmp.lt.u32.totalorder %s390_s16, %s532_s4 }
 0x14c   :  { %p396_p11 = pnand %p394_p10, %p391_p9 }
 0x14e   :  { %399 = shalt.err (!%p396_p11)
}
 0x14f   :  { %221 = dma.vmem_to_hbm [thread:$0]  %s216_s1, 128, %s532_s4, [#allocation4], %s410_s27, %s410_s27, %s411_s28  }
 0x150   :  { %406 = dma.done.wait [#allocation4], 128  }
 0x151   :  { %407 = vsyncadd [#allocation4], 4294967168 }
 0x152   :  { %225 = vsyncpa [#allocation3], 1 }
 0x153   :  { %226 = vsyncpa [#allocation6], 1 }
 0x154   :  { %227 = vsyncpa [#allocation9], 1 }
 0x155   :  { %228 = vsyncpa [#allocation4], 1 }

// kernel: _lambda_.35
= control target key start
LH: loop header
LB: loop body
LE: loop exit
PB: predicated region body
PF: predicated region fallthrough
CT: control target
= control target key end

     0   :  { %10 = vsyncpa [#allocation3], 0  ;;  %s543_s0 = inlined_call_operand.hbm [shape: bf16[10,32], index: 0, kind: input, shape index: {}]   ;;  %s544_s1 = inlined_call_operand.hbm [shape: bf16[32,32], index: 1, kind: input, shape index: {}]   ;;  %s545_s2 = inlined_call_operand.hbm [shape: f32[1,32], index: 2, kind: input, shape index: {}]   ;;  %s546_s3 = inlined_call_operand.hbm [shape: f32[1,32], index: 3, kind: input, shape index: {}]   ;;  %s547_s4 = inlined_call_operand.hbm [shape: f32[1,32], index: 4, kind: input, shape index: {}]   ;;  %s548_s5 = inlined_call_operand.hbm [shape: bf16[10,32], index: 5, kind: output, shape index: {}]  }
   0x1   :  { %11 = vsyncpa [#allocation6], 0 }
   0x2   :  { %12 = vsyncpa [#allocation9], 0 }
   0x3   :  { %13 = vsyncpa [#allocation4], 0  ;;  %s411_s18 = smov [#allocation5]   ;;  %s412_s20 = smov [#allocation8]  }
   0x4   :  { %s31_s19 = sshll.u32 %s411_s18, 4  ;;  %s54_s21 = sshll.u32 %s412_s20, 4  ;;  %s32_s19 = int_to_ptr.vmem [resolvable:$true] %s31_s19  ;;  %s451_s21 = int_to_ptr.vmem [resolvable:$true] %s54_s21 }
   0x5   :  { %s271_s24 = scalar_lea.hbm %s544_s1, 256 }
   0x6   :  { %p272_p0 = scmp.ne.s32.totalorder %s544_s1, %s271_s24  ;;  %p275_p1 = scmp.lt.u32.totalorder %s271_s24, %s544_s1 }
   0x8   :  { %p277_p2 = pnand %p275_p1, %p272_p0 }
   0xa   :  { %280 = shalt.err (!%p277_p2)
}
   0xb   :  { %s281_s29 = scalar_lea.vmem %s32_s19, 256  ;;  %p286_p4 = scmp.lt.s32.totalorder %s32_s19, %s32_s19 }
   0xc   :  { %p282_p3 = scmp.ne.s32.totalorder %s32_s19, %s281_s29  ;;  %p287_p5 = scmp.lt.s32.totalorder %s281_s29, %s281_s29 }
   0xe   :  { %p288_p6 = por %p287_p5, %p286_p4 }
  0x10   :  { %p289_p7 = pnand %p288_p6, %p282_p3 }
  0x12   :  { %292 = shalt.err (!%p289_p7)
}
  0x13   :  { %s413_s30 = smov 64   ;;  %s414_s6 = smov 4  }
  0x14   :  { %37 = dma.hbm_to_vmem [thread:$0]  %s544_s1, 256, %s32_s19, [#allocation6], %s413_s30, %s413_s30, %s414_s6  }
  0x15   :  { %s293_s11 = scalar_lea.hbm %s546_s3, 16 }
  0x16   :  { %p294_p8 = scmp.ne.s32.totalorder %s546_s3, %s293_s11  ;;  %p297_p9 = scmp.lt.u32.totalorder %s293_s11, %s546_s3 }
  0x18   :  { %p299_p10 = pnand %p297_p9, %p294_p8 }
  0x1a   :  { %302 = shalt.err (!%p299_p10)
}
  0x1b   :  { %s303_s16 = scalar_lea.vmem %s451_s21, 16  ;;  %s307_s1 = scalar_lea.vmem %s451_s21, 32 }
  0x1c   :  { %p304_p11 = scmp.ne.s32.totalorder %s451_s21, %s303_s16  ;;  %p308_p12 = scmp.lt.s32.totalorder %s451_s21, %s451_s21 }
  0x1d   :  { %p309_p13 = scmp.lt.s32.totalorder %s307_s1, %s303_s16 }
  0x1f   :  { %p310_p0 = por %p309_p13, %p308_p12 }
  0x21   :  { %p311_p1 = pnand %p310_p0, %p304_p11 }
  0x23   :  { %314 = shalt.err (!%p311_p1)
}
  0x24   :  { %57 = dma.hbm_to_vmem [thread:$0]  %s546_s3, 16, %s451_s21, [#allocation9]  }
  0x25   :  { %s415_s19 = smov [#allocation2]   ;;  %s416_s22 = smov [#allocation7]  }
  0x26   :  { %s19_s20 = sshll.u32 %s415_s19, 4  ;;  %s44_s23 = sshll.u32 %s416_s22, 4  ;;  %s20_s20 = int_to_ptr.vmem [resolvable:$true] %s19_s20  ;;  %s45_s23 = int_to_ptr.vmem [resolvable:$true] %s44_s23 }
  0x27   :  { %s315_s26 = scalar_lea.hbm %s543_s0, 128 }
  0x28   :  { %p316_p2 = scmp.ne.s32.totalorder %s543_s0, %s315_s26  ;;  %p319_p3 = scmp.lt.u32.totalorder %s315_s26, %s543_s0 }
  0x2a   :  { %p321_p4 = pnand %p319_p3, %p316_p2 }
  0x2c   :  { %324 = shalt.err (!%p321_p4)
}
  0x2d   :  { %s325_s3 = scalar_lea.vmem %s20_s20, 128  ;;  %p330_p6 = scmp.lt.s32.totalorder %s20_s20, %s20_s20 }
  0x2e   :  { %p326_p5 = scmp.ne.s32.totalorder %s20_s20, %s325_s3  ;;  %p331_p7 = scmp.lt.s32.totalorder %s325_s3, %s325_s3 }
  0x30   :  { %p332_p8 = por %p331_p7, %p330_p6 }
  0x32   :  { %p333_p9 = pnand %p332_p8, %p326_p5 }
  0x34   :  { %336 = shalt.err (!%p333_p9)
}
  0x35   :  { %25 = dma.hbm_to_vmem [thread:$0]  %s543_s0, 128, %s20_s20, [#allocation3], %s413_s30, %s413_s30, %s414_s6  }
  0x36   :  { %s337_s11 = scalar_lea.hbm %s545_s2, 16 }
  0x37   :  { %p338_p10 = scmp.ne.s32.totalorder %s545_s2, %s337_s11  ;;  %p341_p11 = scmp.lt.u32.totalorder %s337_s11, %s545_s2 }
  0x39   :  { %p343_p12 = pnand %p341_p11, %p338_p10 }
  0x3b   :  { %346 = shalt.err (!%p343_p12)
}
  0x3c   :  { %s347_s16 = scalar_lea.vmem %s45_s23, 16  ;;  %s351_s1 = scalar_lea.vmem %s45_s23, 32 }
  0x3d   :  { %p348_p13 = scmp.ne.s32.totalorder %s45_s23, %s347_s16  ;;  %p352_p0 = scmp.lt.s32.totalorder %s45_s23, %s45_s23 }
  0x3e   :  { %p353_p1 = scmp.lt.s32.totalorder %s351_s1, %s347_s16 }
  0x40   :  { %p354_p2 = por %p353_p1, %p352_p0 }
  0x42   :  { %p355_p3 = pnand %p354_p2, %p348_p13 }
  0x44   :  { %358 = shalt.err (!%p355_p3)
}
  0x45   :  { %47 = dma.hbm_to_vmem [thread:$0]  %s545_s2, 16, %s45_s23, [#allocation6]  }
  0x46   :  { %s417_s18 = smov [#allocation10]   ;;  %s359_s24 = scalar_lea.hbm %s547_s4, 16 }
  0x47   :  { %s64_s19 = sshll.u32 %s417_s18, 4  ;;  %p360_p4 = scmp.ne.s32.totalorder %s547_s4, %s359_s24  ;;  %s65_s19 = int_to_ptr.vmem [resolvable:$true] %s64_s19 }
  0x48   :  { %p363_p5 = scmp.lt.u32.totalorder %s359_s24, %s547_s4 }
  0x4a   :  { %p365_p6 = pnand %p363_p5, %p360_p4 }
  0x4c   :  { %368 = shalt.err (!%p365_p6)
}
  0x4d   :  { %s369_s29 = scalar_lea.vmem %s65_s19, 16  ;;  %s373_s2 = scalar_lea.vmem %s65_s19, 32 }
  0x4e   :  { %p370_p7 = scmp.ne.s32.totalorder %s65_s19, %s369_s29  ;;  %p374_p8 = scmp.lt.s32.totalorder %s65_s19, %s65_s19 }
  0x4f   :  { %p375_p9 = scmp.lt.s32.totalorder %s373_s2, %s369_s29 }
  0x51   :  { %p376_p10 = por %p375_p9, %p374_p8 }
  0x53   :  { %p377_p11 = pnand %p376_p10, %p370_p7 }
  0x55   :  { %380 = shalt.err (!%p377_p11)
}
  0x56   :  { %67 = dma.hbm_to_vmem [thread:$0]  %s547_s4, 16, %s65_s19, [#allocation9]  }
  0x57   :  { %403 = dma.done.wait [#allocation3], 128  }
  0x58   :  { %404 = vsyncadd [#allocation3], 4294967168 }
  0x59   :  { %405 = dma.done.wait [#allocation6], 272  }
  0x5a   :  { %406 = vsyncadd [#allocation6], 4294967024 }
  0x5b   :  { %407 = dma.done.wait [#allocation9], 32  }
  0x5c   :  { %408 = vsyncadd [#allocation9], 4294967264  ;;  %vm88_vm0 = vcmask 261120   ;;  %v84_v0 = vld [vmem:[#allocation2] sm:$0xf]  ;;  %vm92_vm1 = vcmask 254976  }
  0x5d   :  { %v85_v1 = vld [vmem:[#allocation2 + $0x4] sm:$0x1]  ;;  %v86_v2 = vunpack.c.l.bf16 %v84_v0  ;;  %v265_v16 = vld [vmem:[#allocation5] sm:$0xff]   ;;  %v418_v17 = vmov 0.0   ;;  %v266_v18 = vld [vmem:[#allocation5 + $0x8] sm:$0xff]   ;;  %vm419_vm2 = vmmov 0  }
  0x5e   :  { %v87_v3 = vunpack.c.l.bf16 %v85_v1  ;;  %247 = vmatprep.subr.bf16.mxu0 %v418_v17  ;;  %251 = vmatprep.mubr.msk.bf16.mxu0 %vm419_vm2, %v418_v17  ;;  %v234_v27 = vld [vmem:[#allocation8] ss:$0 sm:$0xff]  ;;  %v235_v31 = vld [vmem:[#allocation10] ss:$0 sm:$0xff]  ;;  %v236_v36 = vld [vmem:[#allocation7] ss:$0 sm:$0xff] }
  0x5f   :  { %v89_v4 = vsel %vm88_vm0, %v86_v2, 0.0  ;;  %248 = vmatpush3.bf16.msra.mxu0 %v265_v16  ;;  %vm211_vm3 = vcmask 257024   ;;  %s420_s4 = smov [#allocation11]   ;;  %vm213_vm4 = vcmask 253952  }
  0x60   :  { %90 = vadd.xlane.f32.xlu0 %v89_v4  ;;  %v93_v5 = vsel %vm92_vm1, %v87_v3, 0.0  ;;  %249 = vmatprep.subr.bf16.mxu0 %v418_v17  ;;  %s220_s3 = sshll.u32 %s420_s4, 4  ;;  %s221_s3 = int_to_ptr.vmem [resolvable:$true] %s220_s3 }
  0x61   :  { %s381_s21 = scalar_lea.vmem %s221_s3, 128  ;;  %p386_p13 = scmp.lt.s32.totalorder %s221_s3, %s221_s3 }
  0x62   :  { %p382_p12 = scmp.ne.s32.totalorder %s221_s3, %s381_s21  ;;  %p387_p0 = scmp.lt.s32.totalorder %s381_s21, %s381_s21 }
  0x63   :  { %250 = vmatpush3.bf16.msra.mxu0 %v266_v18 }
  0x64   :  { %94 = vadd.xlane.f32.xlu0 %v93_v5  ;;  %p388_p1 = por %p387_p0, %p386_p13 }
  0x66   :  { %p389_p2 = pnand %p388_p1, %p382_p12 }
  0xed   :  { %v91_v6 = vpop.xlane.xlu0 %90 }
  0xee   :  { %v97_v7 = vmul.f32 0.03125, %v91_v6 }
  0xf0   :  { %v99_v8 = vsub.f32 %v86_v2, %v97_v7 }
  0xf1   :  { %v95_v9 = vpop.xlane.xlu0 %94 }
  0xf2   :  { %v98_v10 = vmul.f32 0.03125, %v95_v9  ;;  %v101_v11 = vmul.f32 %v99_v8, %v99_v8 }
  0xf4   :  { %v100_v12 = vsub.f32 %v87_v3, %v98_v10  ;;  %v103_v13 = vsel %vm88_vm0, %v101_v11, 0.0 }
  0xf5   :  { %104 = vadd.xlane.f32.xlu1 %v103_v13 }
  0xf6   :  { %v102_v14 = vmul.f32 %v100_v12, %v100_v12 }
  0xf8   :  { %v106_v15 = vsel %vm92_vm1, %v102_v14, 0.0 }
  0xf9   :  { %107 = vadd.xlane.f32.xlu1 %v106_v15 }
 0x182   :  { %v105_v19 = vpop.xlane.xlu1 %104 }
 0x183   :  { %v109_v20 = vmul.f32 0.03125, %v105_v19 }
 0x185   :  { %v111_v21 = vadd.f32 1e-05, %v109_v20 }
 0x186   :  { %v108_v22 = vpop.xlane.xlu1 %107 }
 0x187   :  { %267 = vrsqrt.f32 %v111_v21  ;;  %v110_v23 = vmul.f32 0.03125, %v108_v22 }
 0x189   :  { %v112_v24 = vadd.f32 1e-05, %v110_v23 }
 0x18b   :  { %269 = vrsqrt.f32 %v112_v24 }
 0x191   :  { %v268_v25 = vpop.eup %267 }
 0x192   :  { %v115_v26 = vmul.f32 %v268_v25, %v99_v8 }
 0x194   :  { %v124_v30 = vmul.f32 %v234_v27, %v115_v26 }
 0x195   :  { %v270_v28 = vpop.eup %269 }
 0x196   :  { %v116_v29 = vmul.f32 %v270_v28, %v100_v12  ;;  %v133_v33 = vadd.f32 %v235_v31, %v124_v30 }
 0x198   :  { %v125_v32 = vmul.f32 %v234_v27, %v116_v29 }
 0x19a   :  { %v134_v34 = vadd.f32 %v235_v31, %v125_v32 }
 0x19c   :  { %v135_v35 = vpack.c.bf16 %v134_v34, %v133_v33 }
 0x19e   :  { %252 = vmatmul.mubr.msk.bf16.vlgmr.msra.gmra.mrb[0].mxu0 %vm88_vm0, %v135_v35 }
 0x271   :  { %v196_v37 = vpop.f32.mrb[0].mxu0 }
 0x272   :  { %v197_v38 = vadd.f32 %v236_v36, %v196_v37  ;;  %v253_v39 = vpop.f32.mrb[1].mxu0 }
 0x273   :  { %v199_v40 = vpop.f32.mrb[2].mxu0 }
 0x274   :  { %v242_v41 = vpack.c.bf16 %v197_v38, %v197_v38  ;;  %v200_v42 = vadd.f32 %v236_v36, %v199_v40  ;;  %v254_v43 = vpop.f32.mrb[3].mxu0 }
 0x276   :  { %v243_v44 = vpack.c.bf16 %v200_v42, %v200_v42  ;;  %212 = vst.msk [vmem:[#allocation11] sm:$0xf] %vm211_vm3, %v242_v41 }
 0x278   :  { %214 = vst.msk [vmem:[#allocation11 + $0x4] sm:$0x1] %vm213_vm4, %v243_v44 }
 0x279   :  { %392 = shalt.err (!%p389_p2)
}
 0x27a   :  { %s393_s10 = scalar_lea.hbm %s548_s5, 128 }
 0x27b   :  { %p394_p3 = scmp.ne.s32.totalorder %s548_s5, %s393_s10  ;;  %p397_p4 = scmp.lt.u32.totalorder %s393_s10, %s548_s5 }
 0x27d   :  { %p399_p5 = pnand %p397_p4, %p394_p3 }
 0x27f   :  { %402 = shalt.err (!%p399_p5)
}
 0x280   :  { %226 = dma.vmem_to_hbm [thread:$0]  %s221_s3, 128, %s548_s5, [#allocation4], %s413_s30, %s413_s30, %s414_s6  }
 0x281   :  { %409 = dma.done.wait [#allocation4], 128  }
 0x282   :  { %410 = vsyncadd [#allocation4], 4294967168 }
 0x283   :  { %230 = vsyncpa [#allocation3], 1 }
 0x284   :  { %231 = vsyncpa [#allocation6], 1 }
 0x285   :  { %232 = vsyncpa [#allocation9], 1 }
 0x286   :  { %233 = vsyncpa [#allocation4], 1 }

// kernel: _lambda_.36
= control target key start
LH: loop header
LB: loop body
LE: loop exit
PB: predicated region body
PF: predicated region fallthrough
CT: control target
= control target key end

     0   :  { %10 = vsyncpa [#allocation3], 0  ;;  %s692_s0 = inlined_call_operand.hbm [shape: bf16[34,32], index: 0, kind: input, shape index: {}]   ;;  %s693_s1 = inlined_call_operand.hbm [shape: bf16[32,96], index: 1, kind: input, shape index: {}]   ;;  %s694_s2 = inlined_call_operand.hbm [shape: f32[1,96], index: 2, kind: input, shape index: {}]   ;;  %s695_s3 = inlined_call_operand.hbm [shape: f32[1,32], index: 3, kind: input, shape index: {}]   ;;  %s696_s4 = inlined_call_operand.hbm [shape: f32[1,32], index: 4, kind: input, shape index: {}]   ;;  %s697_s5 = inlined_call_operand.hbm [shape: bf16[34,96], index: 5, kind: output, shape index: {}]  }
   0x1   :  { %11 = vsyncpa [#allocation6], 0 }
   0x2   :  { %12 = vsyncpa [#allocation9], 0 }
   0x3   :  { %13 = vsyncpa [#allocation4], 0  ;;  %s538_s18 = smov [#allocation5]   ;;  %s539_s20 = smov [#allocation8]  }
   0x4   :  { %s31_s19 = sshll.u32 %s538_s18, 4  ;;  %s54_s21 = sshll.u32 %s539_s20, 4  ;;  %s32_s19 = int_to_ptr.vmem [resolvable:$true] %s31_s19  ;;  %s578_s21 = int_to_ptr.vmem [resolvable:$true] %s54_s21 }
   0x5   :  { %s398_s24 = scalar_lea.hbm %s693_s1, 256 }
   0x6   :  { %p399_p0 = scmp.ne.s32.totalorder %s693_s1, %s398_s24  ;;  %p402_p1 = scmp.lt.u32.totalorder %s398_s24, %s693_s1 }
   0x8   :  { %p404_p2 = pnand %p402_p1, %p399_p0 }
   0xa   :  { %407 = shalt.err (!%p404_p2)
}
   0xb   :  { %s408_s29 = scalar_lea.vmem %s32_s19, 256  ;;  %p413_p4 = scmp.lt.s32.totalorder %s32_s19, %s32_s19 }
   0xc   :  { %p409_p3 = scmp.ne.s32.totalorder %s32_s19, %s408_s29  ;;  %p414_p5 = scmp.lt.s32.totalorder %s408_s29, %s408_s29 }
   0xe   :  { %p415_p6 = por %p414_p5, %p413_p4 }
  0x10   :  { %p416_p7 = pnand %p415_p6, %p409_p3 }
  0x12   :  { %419 = shalt.err (!%p416_p7)
}
  0x13   :  { %s540_s30 = smov 64   ;;  %s541_s6 = smov 4  }
  0x14   :  { %37 = dma.hbm_to_vmem [thread:$0]  %s693_s1, 256, %s32_s19, [#allocation6], %s540_s30, %s540_s30, %s541_s6  }
  0x15   :  { %s420_s11 = scalar_lea.hbm %s695_s3, 16 }
  0x16   :  { %p421_p8 = scmp.ne.s32.totalorder %s695_s3, %s420_s11  ;;  %p424_p9 = scmp.lt.u32.totalorder %s420_s11, %s695_s3 }
  0x18   :  { %p426_p10 = pnand %p424_p9, %p421_p8 }
  0x1a   :  { %429 = shalt.err (!%p426_p10)
}
  0x1b   :  { %s430_s16 = scalar_lea.vmem %s578_s21, 16  ;;  %s434_s1 = scalar_lea.vmem %s578_s21, 32 }
  0x1c   :  { %p431_p11 = scmp.ne.s32.totalorder %s578_s21, %s430_s16  ;;  %p435_p12 = scmp.lt.s32.totalorder %s578_s21, %s578_s21 }
  0x1d   :  { %p436_p13 = scmp.lt.s32.totalorder %s434_s1, %s430_s16 }
  0x1f   :  { %p437_p0 = por %p436_p13, %p435_p12 }
  0x21   :  { %p438_p1 = pnand %p437_p0, %p431_p11 }
  0x23   :  { %441 = shalt.err (!%p438_p1)
}
  0x24   :  { %57 = dma.hbm_to_vmem [thread:$0]  %s695_s3, 16, %s578_s21, [#allocation9]  }
  0x25   :  { %s542_s19 = smov [#allocation2]   ;;  %s543_s22 = smov [#allocation7]  }
  0x26   :  { %s19_s20 = sshll.u32 %s542_s19, 4  ;;  %s44_s23 = sshll.u32 %s543_s22, 4  ;;  %s20_s20 = int_to_ptr.vmem [resolvable:$true] %s19_s20  ;;  %s45_s23 = int_to_ptr.vmem [resolvable:$true] %s44_s23 }
  0x27   :  { %s442_s26 = scalar_lea.hbm %s692_s0, 320 }
  0x28   :  { %p443_p2 = scmp.ne.s32.totalorder %s692_s0, %s442_s26  ;;  %p446_p3 = scmp.lt.u32.totalorder %s442_s26, %s692_s0 }
  0x2a   :  { %p448_p4 = pnand %p446_p3, %p443_p2 }
  0x2c   :  { %451 = shalt.err (!%p448_p4)
}
  0x2d   :  { %s452_s3 = scalar_lea.vmem %s20_s20, 320  ;;  %p457_p6 = scmp.lt.s32.totalorder %s20_s20, %s20_s20 }
  0x2e   :  { %p453_p5 = scmp.ne.s32.totalorder %s20_s20, %s452_s3  ;;  %p458_p7 = scmp.lt.s32.totalorder %s452_s3, %s452_s3 }
  0x30   :  { %p459_p8 = por %p458_p7, %p457_p6 }
  0x32   :  { %p460_p9 = pnand %p459_p8, %p453_p5 }
  0x34   :  { %463 = shalt.err (!%p460_p9)
}
  0x35   :  { %25 = dma.hbm_to_vmem [thread:$0]  %s692_s0, 320, %s20_s20, [#allocation3], %s540_s30, %s540_s30, %s541_s6  }
  0x36   :  { %s464_s11 = scalar_lea.hbm %s694_s2, 16 }
  0x37   :  { %p465_p10 = scmp.ne.s32.totalorder %s694_s2, %s464_s11  ;;  %p468_p11 = scmp.lt.u32.totalorder %s464_s11, %s694_s2 }
  0x39   :  { %p470_p12 = pnand %p468_p11, %p465_p10 }
  0x3b   :  { %473 = shalt.err (!%p470_p12)
}
  0x3c   :  { %s474_s16 = scalar_lea.vmem %s45_s23, 16  ;;  %s478_s1 = scalar_lea.vmem %s45_s23, 32 }
  0x3d   :  { %p475_p13 = scmp.ne.s32.totalorder %s45_s23, %s474_s16  ;;  %p479_p0 = scmp.lt.s32.totalorder %s45_s23, %s45_s23 }
  0x3e   :  { %p480_p1 = scmp.lt.s32.totalorder %s478_s1, %s474_s16 }
  0x40   :  { %p481_p2 = por %p480_p1, %p479_p0 }
  0x42   :  { %p482_p3 = pnand %p481_p2, %p475_p13 }
  0x44   :  { %485 = shalt.err (!%p482_p3)
}
  0x45   :  { %47 = dma.hbm_to_vmem [thread:$0]  %s694_s2, 16, %s45_s23, [#allocation6]  }
  0x46   :  { %s544_s18 = smov [#allocation10]   ;;  %s486_s24 = scalar_lea.hbm %s696_s4, 16 }
  0x47   :  { %s64_s19 = sshll.u32 %s544_s18, 4  ;;  %p487_p4 = scmp.ne.s32.totalorder %s696_s4, %s486_s24  ;;  %s65_s19 = int_to_ptr.vmem [resolvable:$true] %s64_s19 }
  0x48   :  { %p490_p5 = scmp.lt.u32.totalorder %s486_s24, %s696_s4 }
  0x4a   :  { %p492_p6 = pnand %p490_p5, %p487_p4 }
  0x4c   :  { %495 = shalt.err (!%p492_p6)
}
  0x4d   :  { %s496_s29 = scalar_lea.vmem %s65_s19, 16  ;;  %s500_s2 = scalar_lea.vmem %s65_s19, 32 }
  0x4e   :  { %p497_p7 = scmp.ne.s32.totalorder %s65_s19, %s496_s29  ;;  %p501_p8 = scmp.lt.s32.totalorder %s65_s19, %s65_s19 }
  0x4f   :  { %p502_p9 = scmp.lt.s32.totalorder %s500_s2, %s496_s29 }
  0x51   :  { %p503_p10 = por %p502_p9, %p501_p8 }
  0x53   :  { %p504_p11 = pnand %p503_p10, %p497_p7 }
  0x55   :  { %507 = shalt.err (!%p504_p11)
}
  0x56   :  { %67 = dma.hbm_to_vmem [thread:$0]  %s696_s4, 16, %s65_s19, [#allocation9]  }
  0x57   :  { %530 = dma.done.wait [#allocation3], 320  }
  0x58   :  { %531 = vsyncadd [#allocation3], 4294966976 }
  0x59   :  { %532 = dma.done.wait [#allocation6], 272  }
  0x5a   :  { %533 = vsyncadd [#allocation6], 4294967024 }
  0x5b   :  { %534 = dma.done.wait [#allocation9], 32  }
  0x5c   :  { %535 = vsyncadd [#allocation9], 4294967264  ;;  %v350_v0 = vld [vmem:[#allocation2 + $0x8] sm:$0xff]   ;;  %vm94_vm0 = vcmask 261120   ;;  %v343_v1 = vld [vmem:[#allocation2] sm:$0xff]   ;;  %vm107_vm1 = vcmask 254976  }
  0x5d   :  { %v348_v2 = vunpack.c.l.bf16 %v350_v0  ;;  %v349_v3 = vunpack.c.h.bf16 %v350_v0  ;;  %v344_v4 = vunpack.c.l.bf16 %v343_v1  ;;  %v88_v5 = vld [vmem:[#allocation2 + $0x10] sm:$0x1]  ;;  %v345_v6 = vunpack.c.h.bf16 %v343_v1  ;;  %v386_v38 = vld [vmem:[#allocation5] sm:$0xff]   ;;  %v387_v40 = vld [vmem:[#allocation5 + $0x8] sm:$0xff]   ;;  %s547_s4 = smov [#allocation11]  }
  0x5e   :  { %v93_v10 = vunpack.c.l.bf16 %v88_v5  ;;  %v545_v39 = vmov 0.0   ;;  %vm546_vm2 = vmmov 0   ;;  %v324_v58 = vld [vmem:[#allocation8] ss:$0 sm:$0xff]  ;;  %v325_v0 = vld [vmem:[#allocation10] ss:$0 sm:$0xff] }
  0x5f   :  { %v101_v7 = vsel %vm94_vm0, %v348_v2, 0.0  ;;  %v95_v8 = vsel %vm94_vm0, %v344_v4, 0.0  ;;  %v104_v9 = vsel %vm94_vm0, %v349_v3, 0.0  ;;  %v98_v11 = vsel %vm94_vm0, %v345_v6, 0.0  ;;  %372 = vmatprep.subr.bf16.mxu1 %v545_v39  ;;  %356 = vmatprep.subr.bf16.mxu0 %v545_v39  ;;  %s310_s3 = sshll.u32 %s547_s4, 4  ;;  %s311_s3 = int_to_ptr.vmem [resolvable:$true] %s310_s3 }
  0x60   :  { %102 = vadd.xlane.f32.xlu0 %v101_v7  ;;  %96 = vadd.xlane.f32.xlu1 %v95_v8  ;;  %v108_v12 = vsel %vm107_vm1, %v93_v10, 0.0  ;;  %vm298_vm3 = vcmask 781312   ;;  %vm303_vm4 = vcmask 778240   ;;  %s508_s21 = scalar_lea.vmem %s311_s3, 320  ;;  %p513_p13 = scmp.lt.s32.totalorder %s311_s3, %s311_s3 }
  0x61   :  { %374 = vmatpush3.bf16.msra.mxu1 %v386_v38  ;;  %357 = vmatpush3.bf16.msra.mxu0 %v386_v38  ;;  %p509_p12 = scmp.ne.s32.totalorder %s311_s3, %s508_s21  ;;  %p514_p0 = scmp.lt.s32.totalorder %s508_s21, %s508_s21 }
  0x62   :  { %373 = vmatprep.subr.bf16.mxu1 %v545_v39  ;;  %358 = vmatprep.subr.bf16.mxu0 %v545_v39 }
  0x63   :  { %364 = vmatprep.mubr.msk.bf16.mxu1 %vm546_vm2, %v545_v39  ;;  %360 = vmatprep.mubr.msk.bf16.mxu0 %vm546_vm2, %v545_v39  ;;  %p515_p1 = por %p514_p0, %p513_p13 }
  0x64   :  { %105 = vadd.xlane.f32.xlu0 %v104_v9  ;;  %99 = vadd.xlane.f32.xlu1 %v98_v11 }
  0x65   :  { %375 = vmatpush3.bf16.msra.mxu1 %v387_v40  ;;  %359 = vmatpush3.bf16.msra.mxu0 %v387_v40  ;;  %p516_p2 = pnand %p515_p1, %p509_p12 }
  0x68   :  { %109 = vadd.xlane.f32.xlu0 %v108_v12 }
  0xed   :  { %v103_v13 = vpop.xlane.xlu0 %102  ;;  %v97_v14 = vpop.xlane.xlu1 %96 }
  0xee   :  { %v114_v15 = vmul.f32 0.03125, %v103_v13  ;;  %v112_v16 = vmul.f32 0.03125, %v97_v14 }
  0xf0   :  { %v119_v17 = vsub.f32 %v348_v2, %v114_v15  ;;  %v657_v18 = vsub.f32 %v344_v4, %v112_v16 }
  0xf1   :  { %v106_v19 = vpop.xlane.xlu0 %105  ;;  %v100_v20 = vpop.xlane.xlu1 %99 }
  0xf2   :  { %v115_v21 = vmul.f32 0.03125, %v106_v19  ;;  %v124_v22 = vmul.f32 %v119_v17, %v119_v17  ;;  %v113_v23 = vmul.f32 0.03125, %v100_v20  ;;  %v122_v24 = vmul.f32 %v657_v18, %v657_v18 }
  0xf4   :  { %v120_v25 = vsub.f32 %v349_v3, %v115_v21  ;;  %v133_v26 = vsel %vm94_vm0, %v124_v22, 0.0  ;;  %v118_v27 = vsub.f32 %v345_v6, %v113_v23  ;;  %v127_v31 = vsel %vm94_vm0, %v122_v24, 0.0 }
  0xf5   :  { %v110_v28 = vpop.xlane.xlu0 %109  ;;  %134 = vadd.xlane.f32.xlu1 %v133_v26 }
  0xf6   :  { %v116_v29 = vmul.f32 0.03125, %v110_v28  ;;  %v125_v30 = vmul.f32 %v120_v25, %v120_v25  ;;  %v123_v32 = vmul.f32 %v118_v27, %v118_v27 }
  0xf8   :  { %v121_v33 = vsub.f32 %v93_v10, %v116_v29  ;;  %v136_v34 = vsel %vm94_vm0, %v125_v30, 0.0  ;;  %v130_v36 = vsel %vm94_vm0, %v123_v32, 0.0 }
  0xf9   :  { %137 = vadd.xlane.f32.xlu0 %v136_v34  ;;  %128 = vadd.xlane.f32.xlu1 %v127_v31 }
  0xfa   :  { %v126_v35 = vmul.f32 %v121_v33, %v121_v33 }
  0xfc   :  { %v139_v37 = vsel %vm107_vm1, %v126_v35, 0.0 }
  0xfd   :  { %140 = vadd.xlane.f32.xlu1 %v139_v37  ;;  %131 = vadd.xlane.f32.xlu0 %v130_v36 }
 0x182   :  { %v135_v41 = vpop.xlane.xlu1 %134 }
 0x183   :  { %v144_v42 = vmul.f32 0.03125, %v135_v41 }
 0x185   :  { %v149_v43 = vadd.f32 1e-05, %v144_v42 }
 0x186   :  { %v138_v44 = vpop.xlane.xlu0 %137  ;;  %v129_v45 = vpop.xlane.xlu1 %128 }
 0x187   :  { %388 = vrsqrt.f32 %v149_v43  ;;  %v145_v46 = vmul.f32 0.03125, %v138_v44  ;;  %v142_v47 = vmul.f32 0.03125, %v129_v45 }
 0x189   :  { %v150_v48 = vadd.f32 1e-05, %v145_v46  ;;  %v147_v49 = vadd.f32 1e-05, %v142_v47 }
 0x18a   :  { %v132_v50 = vpop.xlane.xlu0 %131  ;;  %v141_v51 = vpop.xlane.xlu1 %140 }
 0x18b   :  { %390 = vrsqrt.f32 %v150_v48  ;;  %v143_v52 = vmul.f32 0.03125, %v132_v50  ;;  %v146_v53 = vmul.f32 0.03125, %v141_v51 }
 0x18c   :  { %392 = vrsqrt.f32 %v147_v49 }
 0x18d   :  { %v148_v54 = vadd.f32 1e-05, %v143_v52  ;;  %v151_v55 = vadd.f32 1e-05, %v146_v53 }
 0x18f   :  { %394 = vrsqrt.f32 %v148_v54 }
 0x190   :  { %396 = vrsqrt.f32 %v151_v55 }
 0x191   :  { %v389_v56 = vpop.eup %388 }
 0x192   :  { %v159_v57 = vmul.f32 %v389_v56, %v119_v17  ;;  %v326_v17 = vld [vmem:[#allocation7] ss:$0 sm:$0xff] }
 0x194   :  { %v171_v62 = vmul.f32 %v324_v58, %v159_v57 }
 0x195   :  { %v391_v59 = vpop.eup %390 }
 0x196   :  { %v393_v60 = vpop.eup %392  ;;  %v160_v61 = vmul.f32 %v391_v59, %v120_v25  ;;  %v183_v5 = vadd.f32 %v325_v0, %v171_v62 }
 0x197   :  { %v157_v63 = vmul.f32 %v393_v60, %v657_v18 }
 0x198   :  { %v172_v1 = vmul.f32 %v324_v58, %v160_v61 }
 0x199   :  { %v395_v2 = vpop.eup %394  ;;  %v169_v7 = vmul.f32 %v324_v58, %v157_v63 }
 0x19a   :  { %v397_v3 = vpop.eup %396  ;;  %v158_v4 = vmul.f32 %v395_v2, %v118_v27  ;;  %v184_v6 = vadd.f32 %v325_v0, %v172_v1 }
 0x19b   :  { %v161_v8 = vmul.f32 %v397_v3, %v121_v33  ;;  %v181_v12 = vadd.f32 %v325_v0, %v169_v7 }
 0x19c   :  { %v187_v9 = vpack.c.bf16 %v184_v6, %v183_v5  ;;  %v170_v10 = vmul.f32 %v324_v58, %v158_v4 }
 0x19d   :  { %v173_v11 = vmul.f32 %v324_v58, %v161_v8 }
 0x19e   :  { %365 = vmatmul.mubr.msk.bf16.vlgmr.msra.gmra.mrb[0].mxu1 %vm94_vm0, %v187_v9  ;;  %v182_v13 = vadd.f32 %v325_v0, %v170_v10 }
 0x19f   :  { %368 = vmatprep.mubr.msk.bf16.mxu1 %vm546_vm2, %v545_v39  ;;  %v185_v15 = vadd.f32 %v325_v0, %v173_v11 }
 0x1a0   :  { %v186_v14 = vpack.c.bf16 %v182_v13, %v181_v12 }
 0x1a1   :  { %v188_v16 = vpack.c.bf16 %v185_v15, %v185_v15 }
 0x1a2   :  { %361 = vmatmul.mubr.msk.bf16.vlgmr.msra.gmra.mrb[0].mxu0 %vm94_vm0, %v186_v14 }
 0x1a6   :  { %369 = vmatmul.mubr.msk.bf16.gmra.mrb[4].mxu1 %vm94_vm0, %v188_v16 }
 0x271   :  { %v263_v18 = vpop.f32.mrb[0].mxu1 }
 0x272   :  { %v264_v19 = vadd.f32 %v326_v17, %v263_v18  ;;  %v366_v20 = vpop.f32.mrb[1].mxu1 }
 0x273   :  { %v266_v21 = vpop.f32.mrb[2].mxu1 }
 0x274   :  { %v339_v22 = vpack.c.bf16 %v264_v19, %v264_v19  ;;  %v267_v23 = vadd.f32 %v326_v17, %v266_v21  ;;  %v367_v24 = vpop.f32.mrb[3].mxu1 }
 0x275   :  { %v255_v25 = vpop.f32.mrb[0].mxu0 }
 0x276   :  { %301 = vst.msk [vmem:[#allocation11 + $0x8] sm:$0xf] %vm298_vm3, %v339_v22  ;;  %v340_v26 = vpack.c.bf16 %v267_v23, %v267_v23  ;;  %v256_v27 = vadd.f32 %v326_v17, %v255_v25  ;;  %v362_v28 = vpop.f32.mrb[1].mxu0 }
 0x277   :  { %v258_v29 = vpop.f32.mrb[2].mxu0 }
 0x278   :  { %302 = vst.msk [vmem:[#allocation11 + $0xc] sm:$0xf] %vm298_vm3, %v340_v26  ;;  %v337_v30 = vpack.c.bf16 %v256_v27, %v256_v27  ;;  %v259_v31 = vadd.f32 %v326_v17, %v258_v29  ;;  %v363_v32 = vpop.f32.mrb[3].mxu0 }
 0x279   :  { %v271_v33 = vpop.f32.mrb[4].mxu1 }
 0x27a   :  { %299 = vst.msk [vmem:[#allocation11] sm:$0xf] %vm298_vm3, %v337_v30  ;;  %v338_v34 = vpack.c.bf16 %v259_v31, %v259_v31  ;;  %v272_v35 = vadd.f32 %v326_v17, %v271_v33  ;;  %v370_v36 = vpop.f32.mrb[5].mxu1 }
 0x27b   :  { %v274_v37 = vpop.f32.mrb[6].mxu1 }
 0x27c   :  { %300 = vst.msk [vmem:[#allocation11 + $0x4] sm:$0xf] %vm298_vm3, %v338_v34  ;;  %v341_v38 = vpack.c.bf16 %v272_v35, %v272_v35  ;;  %v371_v39 = vpop.f32.mrb[7].mxu1 }
 0x27e   :  { %304 = vst.msk [vmem:[#allocation11 + $0x10] sm:$0x1] %vm303_vm4, %v341_v38 }
 0x27f   :  { %519 = shalt.err (!%p516_p2)
}
 0x280   :  { %s520_s10 = scalar_lea.hbm %s697_s5, 320 }
 0x281   :  { %p521_p3 = scmp.ne.s32.totalorder %s697_s5, %s520_s10  ;;  %p524_p4 = scmp.lt.u32.totalorder %s520_s10, %s697_s5 }
 0x283   :  { %p526_p5 = pnand %p524_p4, %p521_p3 }
 0x285   :  { %529 = shalt.err (!%p526_p5)
}
 0x286   :  { %316 = dma.vmem_to_hbm [thread:$0]  %s311_s3, 320, %s697_s5, [#allocation4], %s540_s30, %s540_s30, %s541_s6  }
 0x287   :  { %536 = dma.done.wait [#allocation4], 320  }
 0x288   :  { %537 = vsyncadd [#allocation4], 4294966976 }
 0x289   :  { %320 = vsyncpa [#allocation3], 1 }
 0x28a   :  { %321 = vsyncpa [#allocation6], 1 }
 0x28b   :  { %322 = vsyncpa [#allocation9], 1 }
 0x28c   :  { %323 = vsyncpa [#allocation4], 1 }

// kernel: _lambda_.38
= control target key start
LH: loop header
LB: loop body
LE: loop exit
PB: predicated region body
PF: predicated region fallthrough
CT: control target
= control target key end

     0   :  { %9 = vsyncpa [#allocation3], 0  ;;  %s549_s0 = inlined_call_operand.hbm [shape: bf16[34,32], index: 0, kind: input, shape index: {}]   ;;  %s550_s1 = inlined_call_operand.hbm [shape: bf16[32,32], index: 1, kind: input, shape index: {}]   ;;  %s551_s2 = inlined_call_operand.hbm [shape: f32[1,32], index: 2, kind: input, shape index: {}]   ;;  %s552_s3 = inlined_call_operand.hbm [shape: bf16[34,32], index: 3, kind: input, shape index: {}]   ;;  %s553_s4 = inlined_call_operand.hbm [shape: bf16[34,32], index: 4, kind: output, shape index: {}]  }
   0x1   :  { %10 = vsyncpa [#allocation6], 0 }
   0x2   :  { %11 = vsyncpa [#allocation9], 0 }
   0x3   :  { %12 = vsyncpa [#allocation4], 0  ;;  %s426_s15 = smov [#allocation5]   ;;  %s427_s17 = smov [#allocation2]  }
   0x4   :  { %s30_s16 = sshll.u32 %s426_s15, 4  ;;  %s18_s18 = sshll.u32 %s427_s17, 4  ;;  %s31_s16 = int_to_ptr.vmem [resolvable:$true] %s30_s16  ;;  %s460_s18 = int_to_ptr.vmem [resolvable:$true] %s18_s18 }
   0x5   :  { %s308_s21 = scalar_lea.hbm %s550_s1, 256 }
   0x6   :  { %p309_p0 = scmp.ne.s32.totalorder %s550_s1, %s308_s21  ;;  %p312_p1 = scmp.lt.u32.totalorder %s308_s21, %s550_s1 }
   0x8   :  { %p314_p2 = pnand %p312_p1, %p309_p0 }
   0xa   :  { %317 = shalt.err (!%p314_p2)
}
   0xb   :  { %s318_s26 = scalar_lea.vmem %s31_s16, 256  ;;  %p323_p4 = scmp.lt.s32.totalorder %s31_s16, %s31_s16 }
   0xc   :  { %p319_p3 = scmp.ne.s32.totalorder %s31_s16, %s318_s26  ;;  %p324_p5 = scmp.lt.s32.totalorder %s318_s26, %s318_s26 }
   0xe   :  { %p325_p6 = por %p324_p5, %p323_p4 }
  0x10   :  { %p326_p7 = pnand %p325_p6, %p319_p3 }
  0x12   :  { %329 = shalt.err (!%p326_p7)
}
  0x13   :  { %s428_s27 = smov 64   ;;  %s429_s28 = smov 4  }
  0x14   :  { %36 = dma.hbm_to_vmem [thread:$0]  %s550_s1, 256, %s31_s16, [#allocation6], %s428_s27, %s428_s27, %s429_s28  }
  0x15   :  { %s330_s7 = scalar_lea.hbm %s549_s0, 320 }
  0x16   :  { %p331_p8 = scmp.ne.s32.totalorder %s549_s0, %s330_s7  ;;  %p334_p9 = scmp.lt.u32.totalorder %s330_s7, %s549_s0 }
  0x18   :  { %p336_p10 = pnand %p334_p9, %p331_p8 }
  0x1a   :  { %339 = shalt.err (!%p336_p10)
}
  0x1b   :  { %s340_s12 = scalar_lea.vmem %s460_s18, 320  ;;  %p345_p12 = scmp.lt.s32.totalorder %s460_s18, %s460_s18 }
  0x1c   :  { %p341_p11 = scmp.ne.s32.totalorder %s460_s18, %s340_s12  ;;  %p346_p13 = scmp.lt.s32.totalorder %s340_s12, %s340_s12 }
  0x1e   :  { %p347_p0 = por %p346_p13, %p345_p12 }
  0x20   :  { %p348_p1 = pnand %p347_p0, %p341_p11 }
  0x22   :  { %351 = shalt.err (!%p348_p1)
}
  0x23   :  { %24 = dma.hbm_to_vmem [thread:$0]  %s549_s0, 320, %s460_s18, [#allocation3], %s428_s27, %s428_s27, %s429_s28  }
  0x24   :  { %s430_s14 = smov [#allocation7]   ;;  %s431_s16 = smov [#allocation8]  }
  0x25   :  { %s43_s15 = sshll.u32 %s430_s14, 4  ;;  %s52_s17 = sshll.u32 %s431_s16, 4  ;;  %s44_s15 = int_to_ptr.vmem [resolvable:$true] %s43_s15  ;;  %s497_s17 = int_to_ptr.vmem [resolvable:$true] %s52_s17 }
  0x26   :  { %s352_s21 = scalar_lea.hbm %s551_s2, 16 }
  0x27   :  { %p353_p2 = scmp.ne.s32.totalorder %s551_s2, %s352_s21  ;;  %p356_p3 = scmp.lt.u32.totalorder %s352_s21, %s551_s2 }
  0x29   :  { %p358_p4 = pnand %p356_p3, %p353_p2 }
  0x2b   :  { %361 = shalt.err (!%p358_p4)
}
  0x2c   :  { %s362_s0 = scalar_lea.vmem %s44_s15, 16  ;;  %s366_s18 = scalar_lea.vmem %s44_s15, 32 }
  0x2d   :  { %p363_p5 = scmp.ne.s32.totalorder %s44_s15, %s362_s0  ;;  %p367_p6 = scmp.lt.s32.totalorder %s44_s15, %s44_s15 }
  0x2e   :  { %p368_p7 = scmp.lt.s32.totalorder %s366_s18, %s362_s0 }
  0x30   :  { %p369_p8 = por %p368_p7, %p367_p6 }
  0x32   :  { %p370_p9 = pnand %p369_p8, %p363_p5 }
  0x34   :  { %373 = shalt.err (!%p370_p9)
}
  0x35   :  { %46 = dma.hbm_to_vmem [thread:$0]  %s551_s2, 16, %s44_s15, [#allocation6]  }
  0x36   :  { %s374_s6 = scalar_lea.hbm %s552_s3, 320 }
  0x37   :  { %p375_p10 = scmp.ne.s32.totalorder %s552_s3, %s374_s6  ;;  %p378_p11 = scmp.lt.u32.totalorder %s374_s6, %s552_s3 }
  0x39   :  { %p380_p12 = pnand %p378_p11, %p375_p10 }
  0x3b   :  { %383 = shalt.err (!%p380_p12)
}
  0x3c   :  { %s384_s11 = scalar_lea.vmem %s497_s17, 320  ;;  %p389_p0 = scmp.lt.s32.totalorder %s497_s17, %s497_s17 }
  0x3d   :  { %p385_p13 = scmp.ne.s32.totalorder %s497_s17, %s384_s11  ;;  %p390_p1 = scmp.lt.s32.totalorder %s384_s11, %s384_s11 }
  0x3f   :  { %p391_p2 = por %p390_p1, %p389_p0 }
  0x41   :  { %p392_p3 = pnand %p391_p2, %p385_p13 }
  0x43   :  { %395 = shalt.err (!%p392_p3)
}
  0x44   :  { %58 = dma.hbm_to_vmem [thread:$0]  %s552_s3, 320, %s497_s17, [#allocation9], %s428_s27, %s428_s27, %s429_s28  }
  0x45   :  { %418 = dma.done.wait [#allocation3], 320  }
  0x46   :  { %419 = vsyncadd [#allocation3], 4294966976 }
  0x47   :  { %420 = dma.done.wait [#allocation6], 272  }
  0x48   :  { %421 = vsyncadd [#allocation6], 4294967024 }
  0x49   :  { %422 = dma.done.wait [#allocation9], 320  }
  0x4a   :  { %423 = vsyncadd [#allocation9], 4294966976  ;;  %v432_v0 = vmov 0.0   ;;  %vm433_vm0 = vmmov 0   ;;  %v303_v1 = vld [vmem:[#allocation5] sm:$0xff]   ;;  %v304_v2 = vld [vmem:[#allocation5 + $0x8] sm:$0xff]  }
  0x4b   :  { %290 = vmatprep.subr.bf16.mxu1 %v432_v0  ;;  %274 = vmatprep.subr.bf16.mxu0 %v432_v0  ;;  %v305_v3 = vld [vmem:[#allocation2 + $0x8] sm:$0xff]   ;;  %v306_v4 = vld [vmem:[#allocation2] sm:$0xff]   ;;  %vm113_vm1 = vcmask 261120   ;;  %v307_v5 = vld [vmem:[#allocation2 + $0x10] ss:$0 sps:$4 sm:$0x11]  }
  0x4c   :  { %282 = vmatprep.mubr.msk.bf16.mxu1 %vm433_vm0, %v432_v0  ;;  %278 = vmatprep.mubr.msk.bf16.mxu0 %vm433_vm0, %v432_v0  ;;  %v268_v6 = vld [vmem:[#allocation8 + $0x8] sm:$0xff]   ;;  %v261_v7 = vld [vmem:[#allocation8] sm:$0xff]   ;;  %v241_v8 = vld [vmem:[#allocation7] ss:$0 sm:$0xff]  ;;  %vm215_vm2 = vcmask 257024   ;;  %s434_s3 = smov [#allocation10]  }
  0x4d   :  { %292 = vmatpush3.bf16.msra.mxu1 %v303_v1  ;;  %275 = vmatpush3.bf16.msra.mxu0 %v303_v1  ;;  %v266_v9 = vunpack.c.l.bf16 %v268_v6  ;;  %v262_v10 = vunpack.c.l.bf16 %v261_v7  ;;  %v267_v15 = vunpack.c.h.bf16 %v268_v6  ;;  %v263_v18 = vunpack.c.h.bf16 %v261_v7  ;;  %v183_v27 = vld [vmem:[#allocation8 + $0x10] sm:$0x1]  ;;  %s227_s1 = sshll.u32 %s434_s3, 4  ;;  %s228_s1 = int_to_ptr.vmem [resolvable:$true] %s227_s1 }
  0x4e   :  { %291 = vmatprep.subr.bf16.mxu1 %v432_v0  ;;  %276 = vmatprep.subr.bf16.mxu0 %v432_v0  ;;  %v188_v34 = vunpack.c.l.bf16 %v183_v27  ;;  %vm220_vm3 = vcmask 253952   ;;  %s396_s13 = scalar_lea.vmem %s228_s1, 320  ;;  %p401_p5 = scmp.lt.s32.totalorder %s228_s1, %s228_s1 }
  0x4f   :  { %p397_p4 = scmp.ne.s32.totalorder %s228_s1, %s396_s13  ;;  %p402_p6 = scmp.lt.s32.totalorder %s396_s13, %s396_s13 }
  0x51   :  { %293 = vmatpush3.bf16.msra.mxu1 %v304_v2  ;;  %277 = vmatpush3.bf16.msra.mxu0 %v304_v2  ;;  %p403_p7 = por %p402_p6, %p401_p5 }
  0x53   :  { %p404_p8 = pnand %p403_p7, %p397_p4 }
  0x54   :  { %283 = vmatmul.mubr.msk.bf16.vlgmr.msra.gmra.mrb[0].mxu1 %vm113_vm1, %v305_v3  ;;  %279 = vmatmul.mubr.msk.bf16.vlgmr.msra.gmra.mrb[0].mxu0 %vm113_vm1, %v306_v4 }
  0x55   :  { %286 = vmatprep.mubr.msk.bf16.mxu1 %vm433_vm0, %v432_v0 }
  0x5c   :  { %287 = vmatmul.mubr.msk.bf16.gmra.mrb[4].mxu1 %vm113_vm1, %v307_v5 }
 0x127   :  { %v165_v11 = vpop.f32.mrb[0].mxu1  ;;  %v157_v12 = vpop.f32.mrb[0].mxu0 }
 0x128   :  { %v166_v13 = vadd.f32 %v241_v8, %v165_v11  ;;  %v284_v14 = vpop.f32.mrb[1].mxu1  ;;  %v158_v16 = vadd.f32 %v241_v8, %v157_v12  ;;  %v280_v17 = vpop.f32.mrb[1].mxu0 }
 0x129   :  { %v168_v19 = vpop.f32.mrb[2].mxu1  ;;  %v160_v20 = vpop.f32.mrb[2].mxu0 }
 0x12a   :  { %v191_v21 = vadd.f32 %v266_v9, %v166_v13  ;;  %v169_v22 = vadd.f32 %v241_v8, %v168_v19  ;;  %v189_v23 = vadd.f32 %v262_v10, %v158_v16  ;;  %v285_v24 = vpop.f32.mrb[3].mxu1  ;;  %v161_v25 = vadd.f32 %v241_v8, %v160_v20  ;;  %v281_v26 = vpop.f32.mrb[3].mxu0 }
 0x12c   :  { %v257_v28 = vpack.c.bf16 %v191_v21, %v191_v21  ;;  %v192_v29 = vadd.f32 %v267_v15, %v169_v22  ;;  %v255_v30 = vpack.c.bf16 %v189_v23, %v189_v23  ;;  %v190_v31 = vadd.f32 %v263_v18, %v161_v25 }
 0x12e   :  { %218 = vst.msk [vmem:[#allocation10 + $0x8] sm:$0xf] %vm215_vm2, %v257_v28  ;;  %v258_v32 = vpack.c.bf16 %v192_v29, %v192_v29  ;;  %216 = vst.msk [vmem:[#allocation10] sm:$0xf] %vm215_vm2, %v255_v30  ;;  %v256_v33 = vpack.c.bf16 %v190_v31, %v190_v31 }
 0x12f   :  { %v173_v35 = vpop.f32.mrb[4].mxu1 }
 0x130   :  { %219 = vst.msk [vmem:[#allocation10 + $0xc] sm:$0xf] %vm215_vm2, %v258_v32  ;;  %217 = vst.msk [vmem:[#allocation10 + $0x4] sm:$0xf] %vm215_vm2, %v256_v33  ;;  %v174_v36 = vadd.f32 %v241_v8, %v173_v35  ;;  %v288_v37 = vpop.f32.mrb[5].mxu1 }
 0x131   :  { %v176_v38 = vpop.f32.mrb[6].mxu1 }
 0x132   :  { %v193_v39 = vadd.f32 %v188_v34, %v174_v36  ;;  %v289_v40 = vpop.f32.mrb[7].mxu1 }
 0x134   :  { %v259_v41 = vpack.c.bf16 %v193_v39, %v193_v39 }
 0x136   :  { %221 = vst.msk [vmem:[#allocation10 + $0x10] sm:$0x1] %vm220_vm3, %v259_v41 }
 0x137   :  { %407 = shalt.err (!%p404_p8)
}
 0x138   :  { %s408_s16 = scalar_lea.hbm %s553_s4, 320 }
 0x139   :  { %p409_p9 = scmp.ne.s32.totalorder %s553_s4, %s408_s16  ;;  %p412_p10 = scmp.lt.u32.totalorder %s408_s16, %s553_s4 }
 0x13b   :  { %p414_p11 = pnand %p412_p10, %p409_p9 }
 0x13d   :  { %417 = shalt.err (!%p414_p11)
}
 0x13e   :  { %233 = dma.vmem_to_hbm [thread:$0]  %s228_s1, 320, %s553_s4, [#allocation4], %s428_s27, %s428_s27, %s429_s28  }
 0x13f   :  { %424 = dma.done.wait [#allocation4], 320  }
 0x140   :  { %425 = vsyncadd [#allocation4], 4294966976 }
 0x141   :  { %237 = vsyncpa [#allocation3], 1 }
 0x142   :  { %238 = vsyncpa [#allocation6], 1 }
 0x143   :  { %239 = vsyncpa [#allocation9], 1 }
 0x144   :  { %240 = vsyncpa [#allocation4], 1 }

// kernel: _lambda_.37
= control target key start
LH: loop header
LB: loop body
LE: loop exit
PB: predicated region body
PF: predicated region fallthrough
CT: control target
= control target key end

     0   :  { %6 = vsyncpa [#allocation3], 0  ;;  %s1744_s0 = inlined_call_operand.hbm [shape: bf16[2,17,96], index: 0, kind: input, shape index: {}]   ;;  %s1745_s1 = inlined_call_operand.hbm [shape: bf16[2,17,32], index: 1, kind: output, shape index: {}]  }
   0x1   :  { %8 = vsyncpa [#allocation3 + $0x1], 0 }
   0x2   :  { %9 = vsyncpa [#allocation4], 0 }
   0x3   :  { %11 = vsyncpa [#allocation4 + $0x1], 0  ;;  %s1444_s6 = smov 0   ;;  %s1446_s7 = smov 0  }
   0x4   :  { %s1448_s8 = smov 0   ;;  %s1450_s9 = smov 0  }
   0x5 LB: > { %s1465_s10 = sadd.s32 4294967295, %s1412_s9   ;;  %s1032_s11 = sadd.s32 4294967294, %s1412_s9   ;;  %s1412_s9 = sphi %s1450_s9, %s1757_s9   ;;  %s1408_s8 = sphi %s1448_s8, %s1756_s8   ;;  %s1404_s7 = sphi %s1446_s7, %s1755_s7   ;;  %s1400_s6 = sphi %s1444_s6, %s1754_s6  }
   0x6   : > { %s1469_s12 = sadd.s32 1, %s1412_s9   ;;  %s24_s13 = sadd.s32 1, %s1408_s8 }
   0x7   : > { %s21_s14 = ssub.s32 %s1412_s9, %s1469_s12  ;;  %p31_p0 = scmp.ne.s32.totalorder %s1408_s8, %s1404_s7 }
   0x8   : > { %p22_p1 = scmp.eq.s32.totalorder %s21_s14, 0  ;;  %p32_p2 = scmp.eq.s32.totalorder %s1412_s9, 0 }
   0x9   : > { %p37_p3 = scmp.ne.s32.totalorder %s1404_s7, %s1400_s6  ;;  %p38_p4 = scmp.eq.s32.totalorder %s1465_s10, 0 }
   0xa   : > { %s1481_s15 = scalar_select %p22_p1, %s1408_s8, %s24_s13  }
   0xb   : > { %p33_p5 = por %p32_p2, %p31_p0  ;;  %p1483_p6 = por %p38_p4, %p37_p3 }
   0xc   : > { %p61_p7 = scmp.eq.s32.totalorder %s1465_s10, 1  ;;  %p67_p8 = scmp.eq.s32.totalorder %s1032_s11, 1 }
   0xd   : > { %p1208_p10 = scmp.lt.s32.totalorder %s1412_s9, 2  ;;  %s87_s19 = sand.u32 1, %s1408_s8  }
   0xe   : > { %p1490_p11 = por %p61_p7, %p31_p0  ;;  %p1494_p12 = por %p67_p8, %p37_p3 }
   0xf   : > { %s1193_s20 = smul.u32 192, %s1412_s9  ;;  %p1505_p13 = pnand %p1208_p10, %p33_p5 }
  0x10   : > { %s1748_s17 = scalar_select %p1490_p11, 1, 0 }
  0x11   : > { %s1749_s18 = scalar_select %p1494_p12, 1, 0 }
  0x12   : > { %s1192_s21 = smul.u32 12, %s87_s19  ;;  %s1503_s24 = scalar_lea.hbm %s1744_s0, %s1193_s20 }
  0x13   : > { %s1511_s28 = scalar_lea.sflag [#allocation3], %s87_s19  ;;  %s1316_s29 = scalar_lea.hbm %s1503_s24, 192 }
  0x14   : > { %s91_s26 = scalar_lea.vmem [#allocation2], %s1192_s21  ;;  %p1317_p0 = scmp.ne.s32.totalorder %s1503_s24, %s1316_s29 }
  0x15   : > { %s98_s27 = sshll.u32 %s91_s26, 4  ;;  %p1318_p1 = pneg %p1505_p13  ;;  %s1509_s27 = int_to_ptr.vmem [resolvable:$true] %s98_s27 }
  0x16   : > { %s1321_s3 = scalar_lea.hbm %s1744_s0, 384  ;;  %p1322_p4 = scmp.lt.u32.totalorder %s1503_s24, %s1744_s0 }
  0x17   : > { %p1319_p2 = pnand %p1318_p1, %p1317_p0  ;;  %p1323_p5 = scmp.lt.u32.totalorder %s1321_s3, %s1316_s29 }
  0x18   : > { %p1325_p8 = scmp.lt.u32.totalorder %s1316_s29, %s1503_s24 }
  0x19   : > { %p1320_p3 = pneg %p1319_p2  ;;  %p1324_p7 = por %p1323_p5, %p1322_p4 }
  0x1b   : > { %p1326_p10 = por %p1325_p8, %p1324_p7 }
  0x1d   : > { %p1327_p9 = pnand %p1326_p10, %p1320_p3 }
  0x1f   : > { %1330 = shalt.err (!%p1327_p9)
}
  0x20   : > { %s1331_s11 = scalar_lea.vmem %s1509_s27, 192  ;;  %s1414_s13 = smov [#allocation2]  }
  0x21   : > { %p1332_p0 = scmp.ne.s32.totalorder %s1509_s27, %s1331_s11  ;;  %s1336_s14 = sshll.u32 %s1414_s13, 4  ;;  %s1337_s14 = int_to_ptr.vmem [resolvable:$false] %s1336_s14 }
  0x22   : > { %s1338_s19 = scalar_lea.vmem %s1337_s14, 384  ;;  %p1339_p11 = scmp.lt.s32.totalorder %s1509_s27, %s1337_s14 }
  0x23   : > { %p1334_p2 = pnand %p1332_p0, %p1318_p1  ;;  %p1340_p4 = scmp.lt.s32.totalorder %s1338_s19, %s1331_s11 }
  0x25   : > { %p1335_p12 = pneg %p1334_p2  ;;  %p1341_p5 = por %p1340_p4, %p1339_p11 }
  0x27   : > { %p1342_p7 = pnand %p1341_p5, %p1335_p12 }
  0x29   : > { %1345 = shalt.err (!%p1342_p7)
}
  0x2a   : > { %s1415_s20 = smov 64   ;;  %s1416_s21 = smov 4  }
  0x2b   : > { %1203 = dma.hbm_to_vmem [thread:$0]  (!%p1505_p13), %s1503_s24, 192, %s1509_s27, %s1511_s28, %s1415_s20, %s1415_s20, %s1416_s21  }
  0x2c   : > { %p1036_p9 = scmp.ge.s32.totalorder %s1412_s9, 1  ;;  %p106_p1 = scmp.lt.s32.totalorder %s1412_s9, 3 }
  0x2e   : > { %p107_p3 = pnand %p1036_p9, %p106_p1 }
  0x2f   : > { %s1542_s22 = sand.u32 (!%p107_p3), 1, %s1404_s7  }
  0x30   : > { %110 = sbr.rel (%p107_p3) target bundleno = 2736 (0xab0), region = 24  ;;  %s113_s26 = scalar_lea.sflag (!%p107_p3), [#allocation3], %s1542_s22 }
  0x31   : > { %s1194_s23 = smul.u32 (!%p107_p3), 12, %s1542_s22 }
  0x33   : > { %s1548_s29 = scalar_lea.vmem (!%p107_p3), [#allocation2], %s1194_s23 }
  0x37   : > { %1391 = dma.done.wait (%p1483_p6), %s113_s26, 192  }
  0x38   : > { %1393 = vsyncadd (%p1483_p6), %s113_s26, 4294967104  ;;  %v1260_v0 = vld [vmem:[%s1548_s29] sm:$0xff]   ;;  %v1261_v1 = vld [vmem:[%s1548_s29 + $0x8] ss:$0 sps:$4 sm:$0x11]   ;;  %vm151_vm0 = vcmask 64512  }
  0x39   : > { %s1417_s24 = smov 96   ;;  %1124 = vmatprep.mubr.msk.bf16.mxu0 %vm151_vm0, %v1260_v0  ;;  %vm219_vm1 = vcmask 131072   ;;  %vm212_vm2 = vcmask 138240   ;;  %s1418_s16 = smov 64   ;;  %v1567_v13 = vld [vmem:[%s1548_s29] sm:$0xff]   ;;  %vm260_vm3 = vcmask 1040384  }
  0x3a   : > { %147 = vrot.lane.b32.xlu0 %v1260_v0, %s1417_s24  ;;  %s1419_s25 = smov 88   ;;  %v1575_v30 = vld [vmem:[%s1548_s29 + $0x8] ss:$0 sps:$4 sm:$0x11]   ;;  %s1420_s27 = smov 120   ;;  %v1421_v34 = vmov 0  }
  0x3b   : > { %v1580_v35 = vsel %vm260_vm3, 65535, %v1421_v34  ;;  %vm330_vm4 = vcmask 57344   ;;  %vm331_vm5 = vsmask.f32 256  ;;  %s1594_s28 = scalar_lea.vmem [#allocation5], %s1194_s23  ;;  %vm327_vm7 = vcmask 60416  }
  0x3c   : > { %vm332_vm6 = vmand %vm330_vm4, %vm331_vm5  ;;  %v333_v53 = vld [vmem:[%s1594_s28 + $0x8] sm:$0x1]  ;;  %s1422_s30 = smov 56   ;;  %s1423_s2 = smov 80   ;;  %vm534_vm8 = vcmask 122944   ;;  %vm737_vm10 = vcmask 188544  }
  0x3d   : > { %s1424_s3 = smov 112   ;;  %s1425_s4 = smov 48   ;;  %vm535_vm9 = vmand %vm534_vm8, %vm331_vm5  ;;  %vm531_vm11 = vcmask 126016   ;;  %vm734_vm13 = vcmask 191616   ;;  %vm940_vm14 = vcmask 254144  }
  0x3e   : > { %149 = vrot.lane.b32.xlu0 %v1261_v1, %s1417_s24  ;;  %s1426_s5 = smov 72   ;;  %s1427_s11 = smov 104   ;;  %vm738_vm12 = vmand %vm737_vm10, %vm331_vm5 }
  0x3f   : > { %s1428_s13 = smov 40   ;;  %s1429_s14 = smov 8   ;;  %vm941_vm15 = vmand %vm940_vm14, %vm331_vm5 }
  0x40   : > { %s1430_s19 = smov 16   ;;  %s1431_s20 = smov 24  }
  0x41   : > { %s1195_s21 = smul.u32 192, %s1465_s10  ;;  %s959_s23 = sshll.u32 %s1594_s28, 4  ;;  %s1697_s23 = int_to_ptr.vmem [resolvable:$true] %s959_s23 }
  0x42   : > { %s946_s10 = scalar_lea.sflag [#allocation4], %s1542_s22  ;;  %p1751_p11 = scmp.ne.s32.totalorder %s1748_s17, 0 }
  0x43   : > { %s1695_s24 = scalar_lea.hbm %s1745_s1, %s1195_s21 }
  0xac   : > { %v148_v2 = vpop.permute.xlu0 %147 }
  0xad   : > { %1184 = vmatprep.subr.msk.bf16.mxu0 %vm151_vm0, %v148_v2  ;;  %v159_v3 = vsel %vm151_vm0, %v148_v2, 0 }
  0xae   : > { %1121 = vmatpush3.bf16.xpose.msra.mxu0 %v159_v3 }
  0xb0   : > { %v150_v4 = vpop.permute.xlu0 %149 }
  0xb1   : > { %1185 = vmatprep.subr.msk.bf16.mxu0 %vm151_vm0, %v150_v4  ;;  %v162_v5 = vsel %vm151_vm0, %v150_v4, 0 }
  0xb6   : > { %1123 = vmatpush3.bf16.xpose.msra.mxu0 %v162_v5 }
  0xbd   : > { %1125 = vmatmul.mubr.msk.bf16.vlgmr.msra.gmra.mrb[0].mxu0 %vm151_vm0, %v1261_v1 }
 0x190   : > { %v1126_v6 = vpop.f32.mrb[0].mxu0 }
 0x191   : > { %v198_v7 = vpop.f32.mrb[1].mxu0  ;;  %v220_v8 = vsel %vm219_vm1, %v1126_v6, -inf }
 0x192   : > { %221 = vmax.xlane.f32.xlu0 %v220_v8  ;;  %v1127_v9 = vpop.f32.mrb[2].mxu0  ;;  %v213_v10 = vsel %vm212_vm2, %v198_v7, -inf }
 0x193   : > { %214 = vmax.xlane.f32.xlu1 %v213_v10  ;;  %v201_v11 = vpop.f32.mrb[3].mxu0 }
 0x194   : > { %v216_v12 = vsel %vm212_vm2, %v201_v11, -inf }
 0x197   : > { %217 = vmax.xlane.f32.xlu1 %v216_v12 }
 0x1a8   : > { %249 = vrot.lane.b32.xlu1 %v1260_v0, %s1418_s16  ;;  %351 = vrot.lane.b32.xlu0 %v1567_v13, %s1419_s25 }
 0x21f   : > { %v222_v14 = vpop.xlane.xlu0 %221 }
 0x220   : > { %v225_v15 = vsub.f32 %v1126_v6, %v222_v14  ;;  %v215_v16 = vpop.xlane.xlu1 %214 }
 0x221   : > { %v223_v17 = vsub.f32 %v198_v7, %v215_v16 }
 0x222   : > { %v230_v18 = vmul.f32 1.442695, %v225_v15 }
 0x223   : > { %v226_v19 = vmul.f32 1.442695, %v223_v17  ;;  %v352_v38 = vpop.permute.xlu0 %351 }
 0x224   : > { %1268 = vpow2.f32 %v230_v18  ;;  %v218_v20 = vpop.xlane.xlu1 %217  ;;  %v362_v47 = vsel %vm151_vm0, %v352_v38, 0 }
 0x225   : > { %v224_v21 = vsub.f32 %v201_v11, %v218_v20  ;;  %1270 = vpow2.f32 %v226_v19  ;;  %v1264_v20 = vld [vmem:[%s1548_s29] sm:$0xff]  }
 0x227   : > { %v228_v22 = vmul.f32 1.442695, %v224_v21  ;;  %v1610_v21 = vld [vmem:[%s1548_s29 + $0x8] ss:$0 sps:$4 sm:$0x11]  }
 0x228   : > { %v250_v23 = vpop.permute.xlu1 %249 }
 0x229   : > { %1128 = vmatprep.subr.bf16.mxu1 %v250_v23  ;;  %1272 = vpow2.f32 %v228_v22 }
 0x22a   : > { %1129 = vmatpush3.bf16.msra.mxu1 %v250_v23 }
 0x22e   : > { %v1269_v24 = vpop.eup %1268 }
 0x22f   : > { %v238_v25 = vsel %vm219_vm1, %v1269_v24, 0.0  ;;  %v1271_v26 = vpop.eup %1270 }
 0x230   : > { %239 = vadd.xlane.f32.xlu1 %v238_v25  ;;  %v232_v27 = vsel %vm212_vm2, %v1271_v26, 0.0 }
 0x233   : > { %v1273_v28 = vpop.eup %1272 }
 0x234   : > { %233 = vadd.xlane.f32.xlu1 %v232_v27  ;;  %v235_v29 = vsel %vm212_vm2, %v1273_v28, 0.0 }
 0x238   : > { %236 = vadd.xlane.f32.xlu1 %v235_v29 }
 0x249   : > { %251 = vrot.lane.b32.xlu1 %v1261_v1, %s1418_s16 }
 0x24d   : > { %353 = vrot.lane.b32.xlu1 %v1575_v30, %s1419_s25  ;;  %s1346_s25 = scalar_lea.vmem %s1697_s23, 192 }
 0x24e   : > { %p1347_p6 = scmp.ne.s32.totalorder %s1697_s23, %s1346_s25 }
 0x250   : > { %p1348_p12 = pnand %p1347_p6, %p1751_p11 }
 0x251   : > { %347 = vrot.lane.b32.xlu1 %v1567_v13, %s1420_s27 }
 0x252   : > { %p1349_p13 = pneg %p1348_p12 }
 0x255   : > { %349 = vrot.lane.b32.xlu1 %v1575_v30, %s1420_s27  ;;  %s1432_s27 = smov [#allocation5]  }
 0x2bd   : > { %v240_v31 = vpop.xlane.xlu1 %239 }
 0x2be   : > { %1274 = vrcp.f32 %v240_v31 }
 0x2c1   : > { %v234_v32 = vpop.xlane.xlu1 %233 }
 0x2c2   : > { %1276 = vrcp.f32 %v234_v32 }
 0x2c5   : > { %v237_v33 = vpop.xlane.xlu1 %236 }
 0x2c6   : > { %1278 = vrcp.f32 %v237_v33 }
 0x2c8   : > { %v1275_v39 = vpop.eup %1274 }
 0x2c9   : > { %v252_v36 = vpop.permute.xlu1 %251  ;;  %v246_v43 = vmul.f32 %v1275_v39, %v1269_v24 }
 0x2ca   : > { %v264_v37 = vand.u32 %v1580_v35, %v252_v36 }
 0x2cb   : > { %v248_v48 = vpack.c.bf16 %v246_v43, %v246_v43 }
 0x2cc   : > { %1130 = vmatprep.subr.bf16.mxu1 %v264_v37  ;;  %v1277_v40 = vpop.eup %1276 }
 0x2cd   : > { %1131 = vmatpush3.bf16.msra.mxu1 %v264_v37  ;;  %v354_v41 = vpop.permute.xlu1 %353  ;;  %v244_v44 = vmul.f32 %v1277_v40, %v1271_v26 }
 0x2ce   : > { %1186 = vmatprep.subr.msk.bf16.mxu1 %vm151_vm0, %v352_v38  ;;  %v365_v50 = vsel %vm151_vm0, %v354_v41, 0 }
 0x2d0   : > { %v1279_v42 = vpop.eup %1278 }
 0x2d1   : > { %v245_v45 = vmul.f32 %v1279_v42, %v1273_v28  ;;  %v348_v49 = vpop.permute.xlu1 %347 }
 0x2d3   : > { %v247_v46 = vpack.c.bf16 %v245_v45, %v244_v44 }
 0x2d5   : > { %1132 = vmatprep.mubr.msk.bf16.mxu1 %vm212_vm2, %v247_v46  ;;  %v350_v51 = vpop.permute.xlu1 %349 }
 0x2d6   : > { %1133 = vmatmul.mubr.msk.bf16.vlgmr.msra.gmra.mrb[0].mxu1 %vm212_vm2, %v248_v48 }
 0x2d7   : > { %1137 = vmatpush3.bf16.xpose.msra.mxu1 %v362_v47  ;;  %1140 = vmatprep.mubr.msk.bf16.mxu1 %vm151_vm0, %v348_v49 }
 0x2d8   : > { %1187 = vmatprep.subr.msk.bf16.mxu1 %vm151_vm0, %v354_v41 }
 0x2df   : > { %1139 = vmatpush3.bf16.xpose.msra.mxu1 %v365_v50 }
 0x2e6   : > { %1141 = vmatmul.mubr.msk.bf16.vlgmr.msra.gmra.mrb[4].mxu1 %vm151_vm0, %v350_v51 }
 0x3a9   : > { %v1134_v52 = vpop.f32.mrb[0].mxu1 }
 0x3aa   : > { %v1078_v54 = vpack.c.bf16 %v1134_v52, %v1134_v52  ;;  %v300_v55 = vpop.f32.mrb[1].mxu1 }
 0x3ab   : > { %v1076_v56 = vpack.c.bf16 %v300_v55, %v300_v55  ;;  %v1135_v57 = vpop.f32.mrb[2].mxu1 }
 0x3ac   : > { %v334_v58 = vsel %vm332_vm6, %v1078_v54, %v333_v53  ;;  %v303_v59 = vpop.f32.mrb[3].mxu1 }
 0x3ad   : > { %335 = vst [vmem:[%s1594_s28 + $0x8] sm:$0x1] %v334_v58  ;;  %328 = vst.msk [vmem:[%s1594_s28] sm:$0xf] %vm327_vm7, %v1076_v56  ;;  %v1077_v60 = vpack.c.bf16 %v303_v59, %v303_v59 }
 0x3af   : > { %329 = vst.msk [vmem:[%s1594_s28 + $0x4] sm:$0xf] %vm327_vm7, %v1077_v60 }
 0x3b9   : > { %v1142_v61 = vpop.f32.mrb[4].mxu1 }
 0x3ba   : > { %v401_v62 = vpop.f32.mrb[5].mxu1  ;;  %v421_v3 = vsel %vm219_vm1, %v1142_v61, -inf }
 0x3bb   : > { %v1143_v63 = vpop.f32.mrb[6].mxu1  ;;  %v415_v0 = vsel %vm212_vm2, %v401_v62, -inf }
 0x3bc   : > { %416 = vmax.xlane.f32.xlu1 %v415_v0  ;;  %v404_v1 = vpop.f32.mrb[7].mxu1 }
 0x3bd   : > { %v418_v2 = vsel %vm212_vm2, %v404_v1, -inf }
 0x3be   : > { %419 = vmax.xlane.f32.xlu0 %v418_v2 }
 0x3c0   : > { %422 = vmax.xlane.f32.xlu1 %v421_v3 }
 0x3d1   : > { %450 = vrot.lane.b32.xlu1 %v1567_v13, %s1422_s30 }
 0x449   : > { %v417_v4 = vpop.xlane.xlu1 %416 }
 0x44a   : > { %v424_v6 = vsub.f32 %v401_v62, %v417_v4 }
 0x44b   : > { %v420_v5 = vpop.xlane.xlu0 %419 }
 0x44c   : > { %v425_v7 = vsub.f32 %v404_v1, %v420_v5  ;;  %v427_v11 = vmul.f32 1.442695, %v424_v6  ;;  %v1639_v5 = vld [vmem:[%s1548_s29] sm:$0xff]   ;;  %v1643_v6 = vld [vmem:[%s1548_s29 + $0x8] ss:$0 sps:$4 sm:$0x11]  }
 0x44d   : > { %v423_v8 = vpop.xlane.xlu1 %422 }
 0x44e   : > { %v429_v9 = vmul.f32 1.442695, %v425_v7  ;;  %v426_v10 = vsub.f32 %v1142_v61, %v423_v8 }
 0x450   : > { %1280 = vpow2.f32 %v429_v9  ;;  %v431_v12 = vmul.f32 1.442695, %v426_v10 }
 0x451   : > { %v451_v14 = vpop.permute.xlu1 %450 }
 0x452   : > { %1282 = vpow2.f32 %v431_v12  ;;  %1144 = vmatprep.subr.bf16.mxu0 %v451_v14 }
 0x453   : > { %1145 = vmatpush3.bf16.msra.mxu0 %v451_v14  ;;  %1284 = vpow2.f32 %v427_v11 }
 0x45a   : > { %v1281_v15 = vpop.eup %1280 }
 0x45b   : > { %v436_v13 = vsel %vm212_vm2, %v1281_v15, 0.0 }
 0x45c   : > { %v1283_v16 = vpop.eup %1282  ;;  %437 = vadd.xlane.f32.xlu1 %v436_v13 }
 0x45d   : > { %v439_v17 = vsel %vm219_vm1, %v1283_v16, 0.0  ;;  %v1285_v18 = vpop.eup %1284 }
 0x45e   : > { %440 = vadd.xlane.f32.xlu0 %v439_v17  ;;  %v433_v19 = vsel %vm212_vm2, %v1285_v18, 0.0 }
 0x462   : > { %434 = vadd.xlane.f32.xlu0 %v433_v19 }
 0x46d   : > { %554 = vrot.lane.b32.xlu1 %v1264_v20, %s1423_s2 }
 0x471   : > { %556 = vrot.lane.b32.xlu1 %v1610_v21, %s1423_s2 }
 0x475   : > { %552 = vrot.lane.b32.xlu1 %v1610_v21, %s1424_s3 }
 0x478   : > { %452 = vrot.lane.b32.xlu0 %v1575_v30, %s1422_s30  ;;  %s1350_s30 = sshll.u32 %s1432_s27, 4  ;;  %s1351_s30 = int_to_ptr.vmem [resolvable:$false] %s1350_s30 }
 0x479   : > { %s1352_s2 = scalar_lea.vmem %s1351_s30, 384  ;;  %p1353_p8 = scmp.lt.s32.totalorder %s1697_s23, %s1351_s30 }
 0x47a   : > { %p1354_p10 = scmp.lt.s32.totalorder %s1352_s2, %s1346_s25 }
 0x47c   : > { %550 = vrot.lane.b32.xlu0 %v1264_v20, %s1424_s3  ;;  %p1355_p0 = por %p1354_p10, %p1353_p8 }
 0x47e   : > { %p1356_p2 = pnand %p1355_p0, %p1349_p13 }
 0x4e9   : > { %v438_v22 = vpop.xlane.xlu1 %437 }
 0x4eb   : > { %v441_v23 = vpop.xlane.xlu0 %440 }
 0x4ec   : > { %1286 = vrcp.f32 %v441_v23 }
 0x4ed   : > { %1288 = vrcp.f32 %v438_v22  ;;  %v555_v27 = vpop.permute.xlu1 %554 }
 0x4ee   : > { %v565_v36 = vsel %vm151_vm0, %v555_v27, 0 }
 0x4ef   : > { %v435_v24 = vpop.xlane.xlu0 %434 }
 0x4f0   : > { %1290 = vrcp.f32 %v435_v24 }
 0x4f1   : > { %v557_v39 = vpop.permute.xlu1 %556 }
 0x4f2   : > { %v568_v40 = vsel %vm151_vm0, %v557_v39, 0 }
 0x4f3   : > { %v453_v25 = vpop.permute.xlu0 %452 }
 0x4f4   : > { %v462_v26 = vand.u32 %v453_v25, %v1580_v35 }
 0x4f5   : > { %v553_v41 = vpop.permute.xlu1 %552 }
 0x4f6   : > { %1146 = vmatprep.subr.bf16.mxu0 %v462_v26  ;;  %v1287_v28 = vpop.eup %1286 }
 0x4f7   : > { %1147 = vmatpush3.bf16.msra.mxu0 %v462_v26  ;;  %v1289_v29 = vpop.eup %1288  ;;  %v447_v32 = vmul.f32 %v1287_v28, %v1283_v16  ;;  %v551_v38 = vpop.permute.xlu0 %550 }
 0x4f8   : > { %1188 = vmatprep.subr.msk.bf16.mxu0 %vm151_vm0, %v555_v27  ;;  %v446_v33 = vmul.f32 %v1289_v29, %v1281_v15 }
 0x4f9   : > { %v449_v37 = vpack.c.bf16 %v447_v32, %v447_v32 }
 0x4fa   : > { %v1291_v31 = vpop.eup %1290 }
 0x4fb   : > { %v445_v30 = vmul.f32 %v1291_v31, %v1285_v18 }
 0x4fd   : > { %v448_v34 = vpack.c.bf16 %v446_v33, %v445_v30 }
 0x4ff   : > { %1148 = vmatprep.mubr.msk.bf16.mxu0 %vm212_vm2, %v448_v34 }
 0x500   : > { %1149 = vmatmul.mubr.msk.bf16.vlgmr.msra.gmra.mrb[4].mxu0 %vm212_vm2, %v449_v37 }
 0x501   : > { %1153 = vmatpush3.bf16.xpose.msra.mxu0 %v565_v36  ;;  %1156 = vmatprep.mubr.msk.bf16.mxu0 %vm151_vm0, %v551_v38 }
 0x502   : > { %1189 = vmatprep.subr.msk.bf16.mxu0 %vm151_vm0, %v557_v39 }
 0x509   : > { %1155 = vmatpush3.bf16.xpose.msra.mxu0 %v568_v40 }
 0x510   : > { %1157 = vmatmul.mubr.msk.bf16.vlgmr.msra.gmra.mrb[8].mxu0 %vm151_vm0, %v553_v41 }
 0x5d3   : > { %v1625_v42 = vpop.f32.mrb[4].mxu0 }
 0x5d4   : > { %v1627_v43 = vpop.f32.mrb[5].mxu0 }
 0x5d5   : > { %v1151_v44 = vpop.f32.mrb[6].mxu0 }
 0x5d6   : > { %v1629_v45 = vpop.f32.mrb[7].mxu0 }
 0x5e3   : > { %v1158_v46 = vpop.f32.mrb[8].mxu0 }
 0x5e4   : > { %v604_v47 = vpop.f32.mrb[9].mxu0  ;;  %v624_v52 = vsel %vm219_vm1, %v1158_v46, -inf }
 0x5e5   : > { %v1159_v48 = vpop.f32.mrb[10].mxu0  ;;  %v618_v49 = vsel %vm212_vm2, %v604_v47, -inf }
 0x5e6   : > { %619 = vmax.xlane.f32.xlu0 %v618_v49  ;;  %v607_v50 = vpop.f32.mrb[11].mxu0 }
 0x5e7   : > { %v621_v51 = vsel %vm212_vm2, %v607_v50, -inf }
 0x5e8   : > { %622 = vmax.xlane.f32.xlu1 %v621_v51 }
 0x5ea   : > { %625 = vmax.xlane.f32.xlu0 %v624_v52 }
 0x5f9   : > { %653 = vrot.lane.b32.xlu1 %v1264_v20, %s1425_s4 }
 0x673   : > { %v620_v53 = vpop.xlane.xlu0 %619 }
 0x674   : > { %v627_v55 = vsub.f32 %v604_v47, %v620_v53 }
 0x675   : > { %v623_v54 = vpop.xlane.xlu1 %622 }
 0x676   : > { %v628_v56 = vsub.f32 %v607_v50, %v623_v54  ;;  %v630_v61 = vmul.f32 1.442695, %v627_v55 }
 0x677   : > { %v626_v57 = vpop.xlane.xlu0 %625 }
 0x678   : > { %v632_v58 = vmul.f32 1.442695, %v628_v56  ;;  %v629_v59 = vsub.f32 %v1158_v46, %v626_v57  ;;  %v1081_v56 = vpack.c.bf16 %v1625_v42, %v1625_v42 }
 0x679   : > { %v654_v60 = vpop.permute.xlu1 %653 }
 0x67a   : > { %1292 = vpow2.f32 %v632_v58  ;;  %v634_v62 = vmul.f32 1.442695, %v629_v59  ;;  %1160 = vmatprep.subr.bf16.mxu1 %v654_v60  ;;  %v1080_v58 = vpack.c.bf16 %v1629_v45, %v1629_v45  ;;  %v1079_v59 = vpack.c.bf16 %v1627_v43, %v1627_v43  ;;  %v536_v43 = vld [vmem:[%s1594_s28 + $0x8] sm:$0x1] }
 0x67b   : > { %1161 = vmatpush3.bf16.msra.mxu1 %v654_v60 }
 0x67c   : > { %1294 = vpow2.f32 %v634_v62 }
 0x67d   : > { %1296 = vpow2.f32 %v630_v61 }
 0x684   : > { %v1293_v63 = vpop.eup %1292 }
 0x685   : > { %v639_v0 = vsel %vm212_vm2, %v1293_v63, 0.0 }
 0x686   : > { %v1295_v1 = vpop.eup %1294  ;;  %640 = vadd.xlane.f32.xlu1 %v639_v0 }
 0x687   : > { %v642_v2 = vsel %vm219_vm1, %v1295_v1, 0.0  ;;  %v1297_v3 = vpop.eup %1296 }
 0x688   : > { %643 = vadd.xlane.f32.xlu0 %v642_v2  ;;  %v636_v4 = vsel %vm212_vm2, %v1297_v3, 0.0 }
 0x68c   : > { %637 = vadd.xlane.f32.xlu0 %v636_v4 }
 0x697   : > { %757 = vrot.lane.b32.xlu1 %v1639_v5, %s1426_s5 }
 0x69b   : > { %759 = vrot.lane.b32.xlu1 %v1643_v6, %s1426_s5 }
 0x69f   : > { %755 = vrot.lane.b32.xlu1 %v1643_v6, %s1427_s11 }
 0x6a2   : > { %655 = vrot.lane.b32.xlu0 %v1610_v21, %s1425_s4 }
 0x6a6   : > { %753 = vrot.lane.b32.xlu0 %v1639_v5, %s1427_s11 }
 0x713   : > { %v641_v7 = vpop.xlane.xlu1 %640 }
 0x715   : > { %v644_v8 = vpop.xlane.xlu0 %643 }
 0x716   : > { %1298 = vrcp.f32 %v644_v8 }
 0x717   : > { %1300 = vrcp.f32 %v641_v7  ;;  %v758_v12 = vpop.permute.xlu1 %757 }
 0x718   : > { %v768_v20 = vsel %vm151_vm0, %v758_v12, 0 }
 0x719   : > { %v638_v9 = vpop.xlane.xlu0 %637 }
 0x71a   : > { %1302 = vrcp.f32 %v638_v9 }
 0x71b   : > { %v760_v23 = vpop.permute.xlu1 %759 }
 0x71c   : > { %v771_v24 = vsel %vm151_vm0, %v760_v23, 0 }
 0x71d   : > { %v656_v10 = vpop.permute.xlu0 %655 }
 0x71e   : > { %v665_v11 = vand.u32 %v656_v10, %v1580_v35 }
 0x71f   : > { %v756_v25 = vpop.permute.xlu1 %755 }
 0x720   : > { %1162 = vmatprep.subr.bf16.mxu1 %v665_v11  ;;  %v1299_v14 = vpop.eup %1298 }
 0x721   : > { %1163 = vmatpush3.bf16.msra.mxu1 %v665_v11  ;;  %v1301_v15 = vpop.eup %1300  ;;  %v650_v16 = vmul.f32 %v1299_v14, %v1295_v1  ;;  %v754_v22 = vpop.permute.xlu0 %753 }
 0x722   : > { %1190 = vmatprep.subr.msk.bf16.mxu1 %vm151_vm0, %v758_v12  ;;  %v649_v18 = vmul.f32 %v1301_v15, %v1293_v63 }
 0x723   : > { %v652_v21 = vpack.c.bf16 %v650_v16, %v650_v16 }
 0x724   : > { %v1303_v13 = vpop.eup %1302 }
 0x725   : > { %v648_v17 = vmul.f32 %v1303_v13, %v1297_v3 }
 0x727   : > { %v651_v19 = vpack.c.bf16 %v649_v18, %v648_v17 }
 0x729   : > { %1164 = vmatprep.mubr.msk.bf16.mxu1 %vm212_vm2, %v651_v19 }
 0x72a   : > { %1165 = vmatmul.mubr.msk.bf16.vlgmr.msra.gmra.mrb[8].mxu1 %vm212_vm2, %v652_v21 }
 0x72b   : > { %1169 = vmatpush3.bf16.xpose.msra.mxu1 %v768_v20  ;;  %1172 = vmatprep.mubr.msk.bf16.mxu1 %vm151_vm0, %v754_v22 }
 0x72c   : > { %1191 = vmatprep.subr.msk.bf16.mxu1 %vm151_vm0, %v760_v23 }
 0x733   : > { %1171 = vmatpush3.bf16.xpose.msra.mxu1 %v771_v24 }
 0x73a   : > { %1173 = vmatmul.mubr.msk.bf16.vlgmr.msra.gmra.mrb[12].mxu1 %vm151_vm0, %v756_v25  ;;  %vm937_vm0 = vcmask 257216  }
 0x7fd   : > { %v1166_v26 = vpop.f32.mrb[8].mxu1 }
 0x7fe   : > { %v701_v27 = vpop.f32.mrb[9].mxu1  ;;  %v1084_v57 = vpack.c.bf16 %v1166_v26, %v1166_v26 }
 0x7ff   : > { %v1167_v28 = vpop.f32.mrb[10].mxu1  ;;  %v1082_v61 = vpack.c.bf16 %v701_v27, %v701_v27 }
 0x800   : > { %v704_v29 = vpop.f32.mrb[11].mxu1 }
 0x801   : > { %v1083_v60 = vpack.c.bf16 %v704_v29, %v704_v29 }
 0x80d   : > { %v1174_v31 = vpop.f32.mrb[12].mxu1 }
 0x80e   : > { %v807_v32 = vpop.f32.mrb[13].mxu1  ;;  %v827_v37 = vsel %vm219_vm1, %v1174_v31, -inf }
 0x80f   : > { %v1175_v30 = vpop.f32.mrb[14].mxu1  ;;  %v821_v33 = vsel %vm212_vm2, %v807_v32, -inf }
 0x810   : > { %822 = vmax.xlane.f32.xlu0 %v821_v33  ;;  %v810_v34 = vpop.f32.mrb[15].mxu1 }
 0x811   : > { %v824_v36 = vsel %vm212_vm2, %v810_v34, -inf }
 0x812   : > { %825 = vmax.xlane.f32.xlu1 %v824_v36 }
 0x814   : > { %828 = vmax.xlane.f32.xlu0 %v827_v37 }
 0x89d   : > { %v823_v38 = vpop.xlane.xlu0 %822 }
 0x89e   : > { %v830_v40 = vsub.f32 %v807_v32, %v823_v38 }
 0x89f   : > { %v826_v39 = vpop.xlane.xlu1 %825 }
 0x8a0   : > { %v831_v41 = vsub.f32 %v810_v34, %v826_v39  ;;  %v833_v48 = vmul.f32 1.442695, %v830_v40 }
 0x8a1   : > { %v829_v44 = vpop.xlane.xlu0 %828 }
 0x8a2   : > { %v835_v46 = vmul.f32 1.442695, %v831_v41  ;;  %v832_v47 = vsub.f32 %v1174_v31, %v829_v44 }
 0x8a4   : > { %1304 = vpow2.f32 %v835_v46  ;;  %v837_v49 = vmul.f32 1.442695, %v832_v47 }
 0x8a6   : > { %1306 = vpow2.f32 %v837_v49 }
 0x8a7   : > { %1308 = vpow2.f32 %v833_v48 }
 0x8ae   : > { %v1305_v50 = vpop.eup %1304 }
 0x8af   : > { %v842_v51 = vsel %vm212_vm2, %v1305_v50, 0.0 }
 0x8b0   : > { %v1307_v52 = vpop.eup %1306  ;;  %843 = vadd.xlane.f32.xlu1 %v842_v51 }
 0x8b1   : > { %v845_v53 = vsel %vm219_vm1, %v1307_v52, 0.0  ;;  %v1309_v54 = vpop.eup %1308 }
 0x8b2   : > { %846 = vadd.xlane.f32.xlu0 %v845_v53  ;;  %v839_v55 = vsel %vm212_vm2, %v1309_v54, 0.0 }
 0x8b6   : > { %840 = vadd.xlane.f32.xlu0 %v839_v55 }
 0x8c1   : > { %856 = vrot.lane.b32.xlu1 %v1639_v5, %s1428_s13 }
 0x8c5   : > { %526 = vrot.lane.b32.xlu1 %v1081_v56, %s1429_s14 }
 0x8c9   : > { %729 = vrot.lane.b32.xlu1 %v1084_v57, %s1430_s19 }
 0x8cc   : > { %858 = vrot.lane.b32.xlu0 %v1643_v6, %s1428_s13 }
 0x8cd   : > { %524 = vrot.lane.b32.xlu1 %v1080_v58, %s1429_s14 }
 0x8d0   : > { %522 = vrot.lane.b32.xlu0 %v1079_v59, %s1429_s14 }
 0x8d1   : > { %727 = vrot.lane.b32.xlu1 %v1083_v60, %s1430_s19 }
 0x8d4   : > { %725 = vrot.lane.b32.xlu0 %v1082_v61, %s1430_s19 }
 0x93d   : > { %v844_v42 = vpop.xlane.xlu1 %843 }
 0x93f   : > { %v847_v62 = vpop.xlane.xlu0 %846 }
 0x940   : > { %1310 = vrcp.f32 %v847_v62 }
 0x941   : > { %v857_v63 = vpop.permute.xlu1 %856  ;;  %1312 = vrcp.f32 %v844_v42 }
 0x942   : > { %1176 = vmatprep.subr.bf16.mxu0 %v857_v63 }
 0x943   : > { %v841_v45 = vpop.xlane.xlu0 %840  ;;  %1177 = vmatpush3.bf16.msra.mxu0 %v857_v63 }
 0x944   : > { %1314 = vrcp.f32 %v841_v45 }
 0x945   : > { %v527_v0 = vpop.permute.xlu1 %526 }
 0x946   : > { %v537_v1 = vsel %vm535_vm9, %v527_v0, %v536_v43 }
 0x947   : > { %538 = vst [vmem:[%s1594_s28 + $0x8] sm:$0x1] %v537_v1  ;;  %v859_v2 = vpop.permute.xlu0 %858 }
 0x948   : > { %v868_v3 = vand.u32 %v859_v2, %v1580_v35 }
 0x949   : > { %v730_v4 = vpop.permute.xlu1 %729 }
 0x94a   : > { %1178 = vmatprep.subr.bf16.mxu0 %v868_v3  ;;  %v1311_v5 = vpop.eup %1310 }
 0x94b   : > { %v523_v6 = vpop.permute.xlu0 %522  ;;  %1179 = vmatpush3.bf16.msra.mxu0 %v868_v3  ;;  %v1313_v7 = vpop.eup %1312  ;;  %v853_v10 = vmul.f32 %v1311_v5, %v1307_v52 }
 0x94c   : > { %532 = vst.msk [vmem:[%s1594_s28] sm:$0xf] %vm531_vm11, %v523_v6  ;;  %v852_v15 = vmul.f32 %v1313_v7, %v1305_v50 }
 0x94d   : > { %v525_v8 = vpop.permute.xlu1 %524  ;;  %v855_v17 = vpack.c.bf16 %v853_v10, %v853_v10 }
 0x94e   : > { %v1315_v9 = vpop.eup %1314  ;;  %v739_v35 = vld [vmem:[%s1594_s28 + $0x8] sm:$0x1]  ;;  %533 = vst.msk [vmem:[%s1594_s28 + $0x4] sm:$0xf] %vm531_vm11, %v525_v8 }
 0x94f   : > { %v740_v11 = vsel %vm738_vm12, %v730_v4, %v739_v35  ;;  %v726_v12 = vpop.permute.xlu0 %725  ;;  %v851_v14 = vmul.f32 %v1315_v9, %v1309_v54 }
 0x950   : > { %741 = vst [vmem:[%s1594_s28 + $0x8] sm:$0x1] %v740_v11  ;;  %735 = vst.msk [vmem:[%s1594_s28] sm:$0xf] %vm734_vm13, %v726_v12 }
 0x951   : > { %v728_v13 = vpop.permute.xlu1 %727  ;;  %v854_v16 = vpack.c.bf16 %v852_v15, %v851_v14 }
 0x952   : > { %736 = vst.msk [vmem:[%s1594_s28 + $0x4] sm:$0xf] %vm734_vm13, %v728_v13 }
 0x953   : > { %1180 = vmatprep.mubr.msk.bf16.mxu0 %vm212_vm2, %v854_v16 }
 0x954   : > { %1181 = vmatmul.mubr.msk.bf16.vlgmr.msra.gmra.mrb[12].mxu0 %vm212_vm2, %v855_v17 }
 0x957   : > { %v942_v26 = vld [vmem:[%s1594_s28 + $0x8] sm:$0x1] }
 0xa27   : > { %v1182_v18 = vpop.f32.mrb[12].mxu0 }
 0xa28   : > { %v1087_v19 = vpack.c.bf16 %v1182_v18, %v1182_v18  ;;  %v904_v20 = vpop.f32.mrb[13].mxu0 }
 0xa29   : > { %v1085_v21 = vpack.c.bf16 %v904_v20, %v904_v20  ;;  %v1183_v22 = vpop.f32.mrb[14].mxu0 }
 0xa2a   : > { %932 = vrot.lane.b32.xlu0 %v1087_v19, %s1431_s20  ;;  %v907_v23 = vpop.f32.mrb[15].mxu0 }
 0xa2b   : > { %v1086_v24 = vpack.c.bf16 %v907_v23, %v907_v23  ;;  %928 = vrot.lane.b32.xlu1 %v1085_v21, %s1431_s20 }
 0xa2e   : > { %930 = vrot.lane.b32.xlu0 %v1086_v24, %s1431_s20 }
 0xa9c   : > { %v933_v25 = vpop.permute.xlu0 %932 }
 0xa9d   : > { %v943_v27 = vsel %vm941_vm15, %v933_v25, %v942_v26  ;;  %v929_v28 = vpop.permute.xlu1 %928 }
 0xa9e   : > { %944 = vst [vmem:[%s1594_s28 + $0x8] sm:$0x1] %v943_v27  ;;  %938 = vst.msk [vmem:[%s1594_s28] sm:$0xf] %vm937_vm0, %v929_v28 }
 0xaa0   : > { %v931_v29 = vpop.permute.xlu0 %930 }
 0xaa1   : > { %939 = vst.msk [vmem:[%s1594_s28 + $0x4] sm:$0xf] %vm937_vm0, %v931_v29 }
 0xaa2   : > { %1359 = shalt.err (!%p1356_p2)
}
 0xaa3   : > { %s1360_s28 = scalar_lea.hbm %s1695_s24, 192  ;;  %s1364_s5 = scalar_lea.hbm %s1745_s1, 384 }
 0xaa4   : > { %p1361_p4 = scmp.ne.s32.totalorder %s1695_s24, %s1360_s28  ;;  %p1365_p9 = scmp.lt.u32.totalorder %s1695_s24, %s1745_s1 }
 0xaa5   : > { %p1366_p1 = scmp.lt.u32.totalorder %s1364_s5, %s1360_s28  ;;  %p1368_p6 = scmp.lt.u32.totalorder %s1360_s28, %s1695_s24 }
 0xaa6   : > { %p1362_p5 = pnand %p1361_p4, %p1751_p11 }
 0xaa7   : > { %p1367_p3 = por %p1366_p1, %p1365_p9 }
 0xaa8   : > { %p1363_p7 = pneg %p1362_p5 }
 0xaa9   : > { %p1369_p12 = por %p1368_p6, %p1367_p3 }
 0xaab   : > { %p1370_p13 = pnand %p1369_p12, %p1363_p7 }
 0xaad   : > { %1373 = shalt.err (!%p1370_p13)
}
 0xaae   : > { %s1433_s14 = smov 4  }
 0xaaf   : > { %1198 = dma.vmem_to_hbm [thread:$0]  (%p1751_p11), %s1697_s23, 192, %s1695_s24, %s946_s10, %s1418_s16, %s1418_s16, %s1433_s14  }
 0xab0 PF: > { %s974_s19 = sand.u32 1, %s1400_s6   ;;  %p1752_p8 = scmp.ne.s32.totalorder %s1749_s18, 0 }
 0xab1   : > { %p1753_p10 = scmp.ge.s32.totalorder %s1412_s9, 2  ;;  %s975_s20 = scalar_lea.sflag [#allocation4], %s974_s19 }
 0xab3   : > { %p1205_p0 = pnand %p1753_p10, %p1752_p8 }
 0xab5   : > { %1395 = dma.done.wait (!%p1205_p0), %s975_s20, 192  }
 0xab6   : > { %1397 = vsyncadd (!%p1205_p0), %s975_s20, 4294967104  ;;  %p14_p2 = scmp.ge.s32.totalorder %s1469_s12, 4   ;;  %s1754_s6 = smov %s1404_s7 }
 0xab7   : > { %s1755_s7 = smov %s1408_s8  ;;  %s1756_s8 = smov %s1481_s15 }
 0xab8   : > { %s1757_s9 = smov %s1469_s12  ;;  %16 = sbr.rel (!%p14_p2) target bundleno = 5 (0x5), region = 69 }
 0xabf   :  { %980 = vsyncpa [#allocation3], 1 }
 0xac0   :  { %982 = vsyncpa [#allocation3 + $0x1], 1 }
 0xac1   :  { %983 = vsyncpa [#allocation4], 1 }
 0xac2   :  { %985 = vsyncpa [#allocation4 + $0x1], 1 }

// kernel: _lambda_.46
= control target key start
LH: loop header
LB: loop body
LE: loop exit
PB: predicated region body
PF: predicated region fallthrough
CT: control target
= control target key end

     0   :  { %10 = vsyncpa [#allocation3], 0  ;;  %s662_s0 = inlined_call_operand.hbm [shape: bf16[34,32], index: 0, kind: input, shape index: {}]   ;;  %s663_s1 = inlined_call_operand.hbm [shape: bf16[32,48], index: 1, kind: input, shape index: {}]   ;;  %s664_s2 = inlined_call_operand.hbm [shape: f32[1,48], index: 2, kind: input, shape index: {}]   ;;  %s665_s3 = inlined_call_operand.hbm [shape: f32[1,32], index: 3, kind: input, shape index: {}]   ;;  %s666_s4 = inlined_call_operand.hbm [shape: f32[1,32], index: 4, kind: input, shape index: {}]   ;;  %s667_s5 = inlined_call_operand.hbm [shape: f32[34,48], index: 5, kind: output, shape index: {}]  }
   0x1   :  { %11 = vsyncpa [#allocation6], 0 }
   0x2   :  { %12 = vsyncpa [#allocation9], 0 }
   0x3   :  { %13 = vsyncpa [#allocation4], 0  ;;  %s509_s18 = smov [#allocation5]   ;;  %s510_s20 = smov [#allocation8]  }
   0x4   :  { %s31_s19 = sshll.u32 %s509_s18, 4  ;;  %s54_s21 = sshll.u32 %s510_s20, 4  ;;  %s32_s19 = int_to_ptr.vmem [resolvable:$true] %s31_s19  ;;  %s551_s21 = int_to_ptr.vmem [resolvable:$true] %s54_s21 }
   0x5   :  { %s369_s24 = scalar_lea.hbm %s663_s1, 256 }
   0x6   :  { %p370_p0 = scmp.ne.s32.totalorder %s663_s1, %s369_s24  ;;  %p373_p1 = scmp.lt.u32.totalorder %s369_s24, %s663_s1 }
   0x8   :  { %p375_p2 = pnand %p373_p1, %p370_p0 }
   0xa   :  { %378 = shalt.err (!%p375_p2)
}
   0xb   :  { %s379_s29 = scalar_lea.vmem %s32_s19, 256  ;;  %p384_p4 = scmp.lt.s32.totalorder %s32_s19, %s32_s19 }
   0xc   :  { %p380_p3 = scmp.ne.s32.totalorder %s32_s19, %s379_s29  ;;  %p385_p5 = scmp.lt.s32.totalorder %s379_s29, %s379_s29 }
   0xe   :  { %p386_p6 = por %p385_p5, %p384_p4 }
  0x10   :  { %p387_p7 = pnand %p386_p6, %p380_p3 }
  0x12   :  { %390 = shalt.err (!%p387_p7)
}
  0x13   :  { %s511_s30 = smov 64   ;;  %s512_s6 = smov 4  }
  0x14   :  { %37 = dma.hbm_to_vmem [thread:$0]  %s663_s1, 256, %s32_s19, [#allocation6], %s511_s30, %s511_s30, %s512_s6  }
  0x15   :  { %s391_s11 = scalar_lea.hbm %s665_s3, 16 }
  0x16   :  { %p392_p8 = scmp.ne.s32.totalorder %s665_s3, %s391_s11  ;;  %p395_p9 = scmp.lt.u32.totalorder %s391_s11, %s665_s3 }
  0x18   :  { %p397_p10 = pnand %p395_p9, %p392_p8 }
  0x1a   :  { %400 = shalt.err (!%p397_p10)
}
  0x1b   :  { %s401_s16 = scalar_lea.vmem %s551_s21, 16  ;;  %s405_s1 = scalar_lea.vmem %s551_s21, 32 }
  0x1c   :  { %p402_p11 = scmp.ne.s32.totalorder %s551_s21, %s401_s16  ;;  %p406_p12 = scmp.lt.s32.totalorder %s551_s21, %s551_s21 }
  0x1d   :  { %p407_p13 = scmp.lt.s32.totalorder %s405_s1, %s401_s16 }
  0x1f   :  { %p408_p0 = por %p407_p13, %p406_p12 }
  0x21   :  { %p409_p1 = pnand %p408_p0, %p402_p11 }
  0x23   :  { %412 = shalt.err (!%p409_p1)
}
  0x24   :  { %57 = dma.hbm_to_vmem [thread:$0]  %s665_s3, 16, %s551_s21, [#allocation9]  }
  0x25   :  { %s513_s19 = smov [#allocation2]   ;;  %s514_s22 = smov [#allocation7]  }
  0x26   :  { %s19_s20 = sshll.u32 %s513_s19, 4  ;;  %s44_s23 = sshll.u32 %s514_s22, 4  ;;  %s20_s20 = int_to_ptr.vmem [resolvable:$true] %s19_s20  ;;  %s45_s23 = int_to_ptr.vmem [resolvable:$true] %s44_s23 }
  0x27   :  { %s413_s26 = scalar_lea.hbm %s662_s0, 320 }
  0x28   :  { %p414_p2 = scmp.ne.s32.totalorder %s662_s0, %s413_s26  ;;  %p417_p3 = scmp.lt.u32.totalorder %s413_s26, %s662_s0 }
  0x2a   :  { %p419_p4 = pnand %p417_p3, %p414_p2 }
  0x2c   :  { %422 = shalt.err (!%p419_p4)
}
  0x2d   :  { %s423_s3 = scalar_lea.vmem %s20_s20, 320  ;;  %p428_p6 = scmp.lt.s32.totalorder %s20_s20, %s20_s20 }
  0x2e   :  { %p424_p5 = scmp.ne.s32.totalorder %s20_s20, %s423_s3  ;;  %p429_p7 = scmp.lt.s32.totalorder %s423_s3, %s423_s3 }
  0x30   :  { %p430_p8 = por %p429_p7, %p428_p6 }
  0x32   :  { %p431_p9 = pnand %p430_p8, %p424_p5 }
  0x34   :  { %434 = shalt.err (!%p431_p9)
}
  0x35   :  { %25 = dma.hbm_to_vmem [thread:$0]  %s662_s0, 320, %s20_s20, [#allocation3], %s511_s30, %s511_s30, %s512_s6  }
  0x36   :  { %s435_s11 = scalar_lea.hbm %s664_s2, 16 }
  0x37   :  { %p436_p10 = scmp.ne.s32.totalorder %s664_s2, %s435_s11  ;;  %p439_p11 = scmp.lt.u32.totalorder %s435_s11, %s664_s2 }
  0x39   :  { %p441_p12 = pnand %p439_p11, %p436_p10 }
  0x3b   :  { %444 = shalt.err (!%p441_p12)
}
  0x3c   :  { %s445_s16 = scalar_lea.vmem %s45_s23, 16  ;;  %s449_s1 = scalar_lea.vmem %s45_s23, 32 }
  0x3d   :  { %p446_p13 = scmp.ne.s32.totalorder %s45_s23, %s445_s16  ;;  %p450_p0 = scmp.lt.s32.totalorder %s45_s23, %s45_s23 }
  0x3e   :  { %p451_p1 = scmp.lt.s32.totalorder %s449_s1, %s445_s16 }
  0x40   :  { %p452_p2 = por %p451_p1, %p450_p0 }
  0x42   :  { %p453_p3 = pnand %p452_p2, %p446_p13 }
  0x44   :  { %456 = shalt.err (!%p453_p3)
}
  0x45   :  { %47 = dma.hbm_to_vmem [thread:$0]  %s664_s2, 16, %s45_s23, [#allocation6]  }
  0x46   :  { %s515_s6 = smov [#allocation10]   ;;  %s457_s20 = scalar_lea.hbm %s666_s4, 16 }
  0x47   :  { %s64_s17 = sshll.u32 %s515_s6, 4  ;;  %p458_p4 = scmp.ne.s32.totalorder %s666_s4, %s457_s20  ;;  %s65_s17 = int_to_ptr.vmem [resolvable:$true] %s64_s17 }
  0x48   :  { %p461_p5 = scmp.lt.u32.totalorder %s457_s20, %s666_s4 }
  0x4a   :  { %p463_p6 = pnand %p461_p5, %p458_p4 }
  0x4c   :  { %466 = shalt.err (!%p463_p6)
}
  0x4d   :  { %s467_s27 = scalar_lea.vmem %s65_s17, 16  ;;  %s471_s2 = scalar_lea.vmem %s65_s17, 32 }
  0x4e   :  { %p468_p7 = scmp.ne.s32.totalorder %s65_s17, %s467_s27  ;;  %p472_p8 = scmp.lt.s32.totalorder %s65_s17, %s65_s17 }
  0x4f   :  { %p473_p9 = scmp.lt.s32.totalorder %s471_s2, %s467_s27 }
  0x51   :  { %p474_p10 = por %p473_p9, %p472_p8 }
  0x53   :  { %p475_p11 = pnand %p474_p10, %p468_p7 }
  0x55   :  { %478 = shalt.err (!%p475_p11)
}
  0x56   :  { %67 = dma.hbm_to_vmem [thread:$0]  %s666_s4, 16, %s65_s17, [#allocation9]  }
  0x57   :  { %501 = dma.done.wait [#allocation3], 320  }
  0x58   :  { %502 = vsyncadd [#allocation3], 4294966976 }
  0x59   :  { %503 = dma.done.wait [#allocation6], 272  }
  0x5a   :  { %504 = vsyncadd [#allocation6], 4294967024 }
  0x5b   :  { %505 = dma.done.wait [#allocation9], 32  }
  0x5c   :  { %506 = vsyncadd [#allocation9], 4294967264  ;;  %v319_v0 = vld [vmem:[#allocation2 + $0x8] sm:$0xff]   ;;  %vm94_vm0 = vcmask 261120   ;;  %v312_v1 = vld [vmem:[#allocation2] sm:$0xff]   ;;  %vm107_vm1 = vcmask 254976  }
  0x5d   :  { %v317_v2 = vunpack.c.l.bf16 %v319_v0  ;;  %v318_v3 = vunpack.c.h.bf16 %v319_v0  ;;  %v313_v4 = vunpack.c.l.bf16 %v312_v1  ;;  %v88_v5 = vld [vmem:[#allocation2 + $0x10] sm:$0x1]  ;;  %v314_v6 = vunpack.c.h.bf16 %v312_v1  ;;  %v357_v38 = vld [vmem:[#allocation5] sm:$0xff]   ;;  %v358_v40 = vld [vmem:[#allocation5 + $0x8] sm:$0xff]   ;;  %s518_s4 = smov [#allocation11]  }
  0x5e   :  { %v93_v10 = vunpack.c.l.bf16 %v88_v5  ;;  %v516_v39 = vmov 0.0   ;;  %vm517_vm2 = vmmov 0   ;;  %v303_v58 = vld [vmem:[#allocation8] ss:$0 sm:$0xff]  ;;  %v304_v0 = vld [vmem:[#allocation10] ss:$0 sm:$0xff] }
  0x5f   :  { %v101_v7 = vsel %vm94_vm0, %v317_v2, 0.0  ;;  %v95_v8 = vsel %vm94_vm0, %v313_v4, 0.0  ;;  %v104_v9 = vsel %vm94_vm0, %v318_v3, 0.0  ;;  %v98_v11 = vsel %vm94_vm0, %v314_v6, 0.0  ;;  %341 = vmatprep.subr.bf16.mxu1 %v516_v39  ;;  %325 = vmatprep.subr.bf16.mxu0 %v516_v39  ;;  %s289_s29 = sshll.u32 %s518_s4, 4  ;;  %s290_s29 = int_to_ptr.vmem [resolvable:$true] %s289_s29 }
  0x60   :  { %102 = vadd.xlane.f32.xlu0 %v101_v7  ;;  %96 = vadd.xlane.f32.xlu1 %v95_v8  ;;  %v108_v12 = vsel %vm107_vm1, %v93_v10, 0.0  ;;  %vm277_vm3 = vcmask 392192   ;;  %vm282_vm4 = vcmask 386048   ;;  %s479_s7 = scalar_lea.vmem %s290_s29, 640  ;;  %p484_p13 = scmp.lt.s32.totalorder %s290_s29, %s290_s29 }
  0x61   :  { %343 = vmatpush3.bf16.msra.mxu1 %v357_v38  ;;  %326 = vmatpush3.bf16.msra.mxu0 %v357_v38  ;;  %p480_p12 = scmp.ne.s32.totalorder %s290_s29, %s479_s7  ;;  %p485_p0 = scmp.lt.s32.totalorder %s479_s7, %s479_s7 }
  0x62   :  { %342 = vmatprep.subr.bf16.mxu1 %v516_v39  ;;  %327 = vmatprep.subr.bf16.mxu0 %v516_v39 }
  0x63   :  { %333 = vmatprep.mubr.msk.bf16.mxu1 %vm517_vm2, %v516_v39  ;;  %329 = vmatprep.mubr.msk.bf16.mxu0 %vm517_vm2, %v516_v39  ;;  %p486_p1 = por %p485_p0, %p484_p13 }
  0x64   :  { %105 = vadd.xlane.f32.xlu0 %v104_v9  ;;  %99 = vadd.xlane.f32.xlu1 %v98_v11 }
  0x65   :  { %344 = vmatpush3.bf16.msra.mxu1 %v358_v40  ;;  %328 = vmatpush3.bf16.msra.mxu0 %v358_v40  ;;  %p487_p2 = pnand %p486_p1, %p480_p12 }
  0x68   :  { %109 = vadd.xlane.f32.xlu0 %v108_v12 }
  0xed   :  { %v103_v13 = vpop.xlane.xlu0 %102  ;;  %v97_v14 = vpop.xlane.xlu1 %96 }
  0xee   :  { %v114_v15 = vmul.f32 0.03125, %v103_v13  ;;  %v112_v16 = vmul.f32 0.03125, %v97_v14 }
  0xf0   :  { %v119_v17 = vsub.f32 %v317_v2, %v114_v15  ;;  %v630_v18 = vsub.f32 %v313_v4, %v112_v16 }
  0xf1   :  { %v106_v19 = vpop.xlane.xlu0 %105  ;;  %v100_v20 = vpop.xlane.xlu1 %99 }
  0xf2   :  { %v115_v21 = vmul.f32 0.03125, %v106_v19  ;;  %v124_v22 = vmul.f32 %v119_v17, %v119_v17  ;;  %v113_v23 = vmul.f32 0.03125, %v100_v20  ;;  %v122_v24 = vmul.f32 %v630_v18, %v630_v18 }
  0xf4   :  { %v120_v25 = vsub.f32 %v318_v3, %v115_v21  ;;  %v133_v26 = vsel %vm94_vm0, %v124_v22, 0.0  ;;  %v118_v27 = vsub.f32 %v314_v6, %v113_v23  ;;  %v127_v31 = vsel %vm94_vm0, %v122_v24, 0.0 }
  0xf5   :  { %v110_v28 = vpop.xlane.xlu0 %109  ;;  %134 = vadd.xlane.f32.xlu1 %v133_v26 }
  0xf6   :  { %v116_v29 = vmul.f32 0.03125, %v110_v28  ;;  %v125_v30 = vmul.f32 %v120_v25, %v120_v25  ;;  %v123_v32 = vmul.f32 %v118_v27, %v118_v27 }
  0xf8   :  { %v121_v33 = vsub.f32 %v93_v10, %v116_v29  ;;  %v136_v34 = vsel %vm94_vm0, %v125_v30, 0.0  ;;  %v130_v36 = vsel %vm94_vm0, %v123_v32, 0.0 }
  0xf9   :  { %137 = vadd.xlane.f32.xlu0 %v136_v34  ;;  %128 = vadd.xlane.f32.xlu1 %v127_v31 }
  0xfa   :  { %v126_v35 = vmul.f32 %v121_v33, %v121_v33 }
  0xfc   :  { %v139_v37 = vsel %vm107_vm1, %v126_v35, 0.0 }
  0xfd   :  { %140 = vadd.xlane.f32.xlu1 %v139_v37  ;;  %131 = vadd.xlane.f32.xlu0 %v130_v36 }
 0x182   :  { %v135_v41 = vpop.xlane.xlu1 %134 }
 0x183   :  { %v144_v42 = vmul.f32 0.03125, %v135_v41 }
 0x185   :  { %v149_v43 = vadd.f32 1e-05, %v144_v42 }
 0x186   :  { %v138_v44 = vpop.xlane.xlu0 %137  ;;  %v129_v45 = vpop.xlane.xlu1 %128 }
 0x187   :  { %359 = vrsqrt.f32 %v149_v43  ;;  %v145_v46 = vmul.f32 0.03125, %v138_v44  ;;  %v142_v47 = vmul.f32 0.03125, %v129_v45 }
 0x189   :  { %v150_v48 = vadd.f32 1e-05, %v145_v46  ;;  %v147_v49 = vadd.f32 1e-05, %v142_v47 }
 0x18a   :  { %v132_v50 = vpop.xlane.xlu0 %131  ;;  %v141_v51 = vpop.xlane.xlu1 %140 }
 0x18b   :  { %361 = vrsqrt.f32 %v150_v48  ;;  %v143_v52 = vmul.f32 0.03125, %v132_v50  ;;  %v146_v53 = vmul.f32 0.03125, %v141_v51 }
 0x18c   :  { %363 = vrsqrt.f32 %v147_v49 }
 0x18d   :  { %v148_v54 = vadd.f32 1e-05, %v143_v52  ;;  %v151_v55 = vadd.f32 1e-05, %v146_v53 }
 0x18f   :  { %365 = vrsqrt.f32 %v148_v54 }
 0x190   :  { %367 = vrsqrt.f32 %v151_v55 }
 0x191   :  { %v360_v56 = vpop.eup %359 }
 0x192   :  { %v159_v57 = vmul.f32 %v360_v56, %v119_v17  ;;  %v305_v17 = vld [vmem:[#allocation7] ss:$0 sm:$0xff] }
 0x194   :  { %v171_v62 = vmul.f32 %v303_v58, %v159_v57 }
 0x195   :  { %v362_v59 = vpop.eup %361 }
 0x196   :  { %v364_v60 = vpop.eup %363  ;;  %v160_v61 = vmul.f32 %v362_v59, %v120_v25  ;;  %v183_v5 = vadd.f32 %v304_v0, %v171_v62 }
 0x197   :  { %v157_v63 = vmul.f32 %v364_v60, %v630_v18 }
 0x198   :  { %v172_v1 = vmul.f32 %v303_v58, %v160_v61 }
 0x199   :  { %v366_v2 = vpop.eup %365  ;;  %v169_v7 = vmul.f32 %v303_v58, %v157_v63 }
 0x19a   :  { %v368_v3 = vpop.eup %367  ;;  %v158_v4 = vmul.f32 %v366_v2, %v118_v27  ;;  %v184_v6 = vadd.f32 %v304_v0, %v172_v1 }
 0x19b   :  { %v161_v8 = vmul.f32 %v368_v3, %v121_v33  ;;  %v181_v12 = vadd.f32 %v304_v0, %v169_v7 }
 0x19c   :  { %v187_v9 = vpack.c.bf16 %v184_v6, %v183_v5  ;;  %v170_v10 = vmul.f32 %v303_v58, %v158_v4 }
 0x19d   :  { %v173_v11 = vmul.f32 %v303_v58, %v161_v8 }
 0x19e   :  { %334 = vmatmul.mubr.msk.bf16.vlgmr.msra.gmra.mrb[0].mxu1 %vm94_vm0, %v187_v9  ;;  %v182_v13 = vadd.f32 %v304_v0, %v170_v10 }
 0x19f   :  { %337 = vmatprep.mubr.msk.bf16.mxu1 %vm517_vm2, %v516_v39  ;;  %v185_v15 = vadd.f32 %v304_v0, %v173_v11 }
 0x1a0   :  { %v186_v14 = vpack.c.bf16 %v182_v13, %v181_v12 }
 0x1a1   :  { %v188_v16 = vpack.c.bf16 %v185_v15, %v185_v15 }
 0x1a2   :  { %330 = vmatmul.mubr.msk.bf16.vlgmr.msra.gmra.mrb[0].mxu0 %vm94_vm0, %v186_v14 }
 0x1a6   :  { %338 = vmatmul.mubr.msk.bf16.gmra.mrb[4].mxu1 %vm94_vm0, %v188_v16 }
 0x271   :  { %v263_v18 = vpop.f32.mrb[0].mxu1 }
 0x272   :  { %v264_v19 = vadd.f32 %v305_v17, %v263_v18  ;;  %v335_v20 = vpop.f32.mrb[1].mxu1 }
 0x273   :  { %v266_v21 = vpop.f32.mrb[2].mxu1 }
 0x274   :  { %280 = vst.msk [vmem:[#allocation11 + $0x10] sm:$0xff] %vm277_vm3, %v264_v19  ;;  %v267_v22 = vadd.f32 %v305_v17, %v266_v21  ;;  %v336_v23 = vpop.f32.mrb[3].mxu1 }
 0x275   :  { %v255_v24 = vpop.f32.mrb[0].mxu0 }
 0x276   :  { %281 = vst.msk [vmem:[#allocation11 + $0x18] sm:$0xff] %vm277_vm3, %v267_v22  ;;  %v256_v25 = vadd.f32 %v305_v17, %v255_v24  ;;  %v331_v26 = vpop.f32.mrb[1].mxu0 }
 0x277   :  { %v258_v27 = vpop.f32.mrb[2].mxu0 }
 0x278   :  { %278 = vst.msk [vmem:[#allocation11] sm:$0xff] %vm277_vm3, %v256_v25  ;;  %v259_v28 = vadd.f32 %v305_v17, %v258_v27  ;;  %v332_v29 = vpop.f32.mrb[3].mxu0 }
 0x279   :  { %v271_v30 = vpop.f32.mrb[4].mxu1 }
 0x27a   :  { %279 = vst.msk [vmem:[#allocation11 + $0x8] sm:$0xff] %vm277_vm3, %v259_v28  ;;  %v272_v31 = vadd.f32 %v305_v17, %v271_v30  ;;  %v339_v32 = vpop.f32.mrb[5].mxu1 }
 0x27b   :  { %v274_v33 = vpop.f32.mrb[6].mxu1 }
 0x27c   :  { %283 = vst.msk [vmem:[#allocation11 + $0x20] sm:$0x3] %vm282_vm4, %v272_v31  ;;  %v340_v34 = vpop.f32.mrb[7].mxu1 }
 0x27d   :  { %490 = shalt.err (!%p487_p2)
}
 0x27e   :  { %s491_s8 = scalar_lea.hbm %s667_s5, 640 }
 0x27f   :  { %p492_p3 = scmp.ne.s32.totalorder %s667_s5, %s491_s8  ;;  %p495_p4 = scmp.lt.u32.totalorder %s491_s8, %s667_s5 }
 0x281   :  { %p497_p5 = pnand %p495_p4, %p492_p3 }
 0x283   :  { %500 = shalt.err (!%p497_p5)
}
 0x284   :  { %s519_s13 = smov 128   ;;  %s520_s14 = smov 8  }
 0x285   :  { %295 = dma.vmem_to_hbm [thread:$0]  %s290_s29, 640, %s667_s5, [#allocation4], %s519_s13, %s519_s13, %s520_s14  }
 0x286   :  { %507 = dma.done.wait [#allocation4], 640  }
 0x287   :  { %508 = vsyncadd [#allocation4], 4294966656 }
 0x288   :  { %299 = vsyncpa [#allocation3], 1 }
 0x289   :  { %300 = vsyncpa [#allocation6], 1 }
 0x28a   :  { %301 = vsyncpa [#allocation9], 1 }
 0x28b   :  { %302 = vsyncpa [#allocation4], 1 }

// kernel: _lambda_.40
= control target key start
LH: loop header
LB: loop body
LE: loop exit
PB: predicated region body
PF: predicated region fallthrough
CT: control target
= control target key end

     0   :  { %9 = vsyncpa [#allocation3], 0  ;;  %s629_s0 = inlined_call_operand.hbm [shape: bf16[34,128], index: 0, kind: input, shape index: {}]   ;;  %s630_s1 = inlined_call_operand.hbm [shape: bf16[128,32], index: 1, kind: input, shape index: {}]   ;;  %s631_s2 = inlined_call_operand.hbm [shape: f32[1,32], index: 2, kind: input, shape index: {}]   ;;  %s632_s3 = inlined_call_operand.hbm [shape: bf16[34,32], index: 3, kind: input, shape index: {}]   ;;  %s633_s4 = inlined_call_operand.hbm [shape: bf16[34,32], index: 4, kind: output, shape index: {}]  }
   0x1   :  { %10 = vsyncpa [#allocation6], 0 }
   0x2   :  { %11 = vsyncpa [#allocation9], 0 }
   0x3   :  { %12 = vsyncpa [#allocation4], 0  ;;  %s506_s15 = smov [#allocation5]   ;;  %s507_s17 = smov [#allocation2]  }
   0x4   :  { %s30_s16 = sshll.u32 %s506_s15, 4  ;;  %s18_s18 = sshll.u32 %s507_s17, 4  ;;  %s31_s16 = int_to_ptr.vmem [resolvable:$true] %s30_s16  ;;  %s540_s18 = int_to_ptr.vmem [resolvable:$true] %s18_s18 }
   0x5   :  { %s388_s21 = scalar_lea.hbm %s630_s1, 1024 }
   0x6   :  { %p389_p0 = scmp.ne.s32.totalorder %s630_s1, %s388_s21  ;;  %p392_p1 = scmp.lt.u32.totalorder %s388_s21, %s630_s1 }
   0x8   :  { %p394_p2 = pnand %p392_p1, %p389_p0 }
   0xa   :  { %397 = shalt.err (!%p394_p2)
}
   0xb   :  { %s398_s26 = scalar_lea.vmem %s31_s16, 1024  ;;  %p403_p4 = scmp.lt.s32.totalorder %s31_s16, %s31_s16 }
   0xc   :  { %p399_p3 = scmp.ne.s32.totalorder %s31_s16, %s398_s26  ;;  %p404_p5 = scmp.lt.s32.totalorder %s398_s26, %s398_s26 }
   0xe   :  { %p405_p6 = por %p404_p5, %p403_p4 }
  0x10   :  { %p406_p7 = pnand %p405_p6, %p399_p3 }
  0x12   :  { %409 = shalt.err (!%p406_p7)
}
  0x13   :  { %s508_s27 = smov 64   ;;  %s509_s28 = smov 4  }
  0x14   :  { %36 = dma.hbm_to_vmem [thread:$0]  %s630_s1, 1024, %s31_s16, [#allocation6], %s508_s27, %s508_s27, %s509_s28  }
  0x15   :  { %s410_s7 = scalar_lea.hbm %s629_s0, 320 }
  0x16   :  { %p411_p8 = scmp.ne.s32.totalorder %s629_s0, %s410_s7  ;;  %p414_p9 = scmp.lt.u32.totalorder %s410_s7, %s629_s0 }
  0x18   :  { %p416_p10 = pnand %p414_p9, %p411_p8 }
  0x1a   :  { %419 = shalt.err (!%p416_p10)
}
  0x1b   :  { %s420_s12 = scalar_lea.vmem %s540_s18, 320  ;;  %p425_p12 = scmp.lt.s32.totalorder %s540_s18, %s540_s18 }
  0x1c   :  { %p421_p11 = scmp.ne.s32.totalorder %s540_s18, %s420_s12  ;;  %p426_p13 = scmp.lt.s32.totalorder %s420_s12, %s420_s12 }
  0x1e   :  { %p427_p0 = por %p426_p13, %p425_p12 }
  0x20   :  { %p428_p1 = pnand %p427_p0, %p421_p11 }
  0x22   :  { %431 = shalt.err (!%p428_p1)
}
  0x23   :  { %24 = dma.hbm_to_vmem [thread:$0]  %s629_s0, 320, %s540_s18, [#allocation3], %s508_s27, %s508_s27, %s509_s28  }
  0x24   :  { %s510_s14 = smov [#allocation7]   ;;  %s511_s16 = smov [#allocation8]  }
  0x25   :  { %s43_s15 = sshll.u32 %s510_s14, 4  ;;  %s52_s17 = sshll.u32 %s511_s16, 4  ;;  %s44_s15 = int_to_ptr.vmem [resolvable:$true] %s43_s15  ;;  %s577_s17 = int_to_ptr.vmem [resolvable:$true] %s52_s17 }
  0x26   :  { %s432_s21 = scalar_lea.hbm %s631_s2, 16 }
  0x27   :  { %p433_p2 = scmp.ne.s32.totalorder %s631_s2, %s432_s21  ;;  %p436_p3 = scmp.lt.u32.totalorder %s432_s21, %s631_s2 }
  0x29   :  { %p438_p4 = pnand %p436_p3, %p433_p2 }
  0x2b   :  { %441 = shalt.err (!%p438_p4)
}
  0x2c   :  { %s442_s0 = scalar_lea.vmem %s44_s15, 16  ;;  %s446_s18 = scalar_lea.vmem %s44_s15, 32 }
  0x2d   :  { %p443_p5 = scmp.ne.s32.totalorder %s44_s15, %s442_s0  ;;  %p447_p6 = scmp.lt.s32.totalorder %s44_s15, %s44_s15 }
  0x2e   :  { %p448_p7 = scmp.lt.s32.totalorder %s446_s18, %s442_s0 }
  0x30   :  { %p449_p8 = por %p448_p7, %p447_p6 }
  0x32   :  { %p450_p9 = pnand %p449_p8, %p443_p5 }
  0x34   :  { %453 = shalt.err (!%p450_p9)
}
  0x35   :  { %46 = dma.hbm_to_vmem [thread:$0]  %s631_s2, 16, %s44_s15, [#allocation6]  }
  0x36   :  { %s454_s6 = scalar_lea.hbm %s632_s3, 320 }
  0x37   :  { %p455_p10 = scmp.ne.s32.totalorder %s632_s3, %s454_s6  ;;  %p458_p11 = scmp.lt.u32.totalorder %s454_s6, %s632_s3 }
  0x39   :  { %p460_p12 = pnand %p458_p11, %p455_p10 }
  0x3b   :  { %463 = shalt.err (!%p460_p12)
}
  0x3c   :  { %s464_s11 = scalar_lea.vmem %s577_s17, 320  ;;  %p469_p0 = scmp.lt.s32.totalorder %s577_s17, %s577_s17 }
  0x3d   :  { %p465_p13 = scmp.ne.s32.totalorder %s577_s17, %s464_s11  ;;  %p470_p1 = scmp.lt.s32.totalorder %s464_s11, %s464_s11 }
  0x3f   :  { %p471_p2 = por %p470_p1, %p469_p0 }
  0x41   :  { %p472_p3 = pnand %p471_p2, %p465_p13 }
  0x43   :  { %475 = shalt.err (!%p472_p3)
}
  0x44   :  { %58 = dma.hbm_to_vmem [thread:$0]  %s632_s3, 320, %s577_s17, [#allocation9], %s508_s27, %s508_s27, %s509_s28  }
  0x45   :  { %498 = dma.done.wait [#allocation3], 320  }
  0x46   :  { %499 = vsyncadd [#allocation3], 4294966976 }
  0x47   :  { %500 = dma.done.wait [#allocation6], 1040  }
  0x48   :  { %501 = vsyncadd [#allocation6], 4294966256 }
  0x49   :  { %502 = dma.done.wait [#allocation9], 320  }
  0x4a   :  { %503 = vsyncadd [#allocation9], 4294966976  ;;  %v512_v0 = vmov 0.0   ;;  %vm513_vm0 = vmmov 0   ;;  %v377_v1 = vld [vmem:[#allocation5] sm:$0xff]   ;;  %v378_v2 = vld [vmem:[#allocation5 + $0x8] sm:$0xff]  }
  0x4b   :  { %352 = vmatprep.subr.bf16.mxu1 %v512_v0  ;;  %324 = vmatprep.subr.bf16.mxu0 %v512_v0  ;;  %v379_v3 = vld [vmem:[#allocation5 + $0x10] sm:$0xff]   ;;  %v380_v4 = vld [vmem:[#allocation5 + $0x18] sm:$0xff]   ;;  %v381_v5 = vld [vmem:[#allocation5 + $0x20] sm:$0xff]   ;;  %vm256_vm1 = vcmask 257024   ;;  %s514_s3 = smov [#allocation10]   ;;  %vm261_vm2 = vcmask 253952  }
  0x4c   :  { %344 = vmatprep.mubr.msk.bf16.mxu1 %vm513_vm0, %v512_v0  ;;  %340 = vmatprep.mubr.msk.bf16.mxu0 %vm513_vm0, %v512_v0  ;;  %v382_v6 = vld [vmem:[#allocation5 + $0x28] sm:$0xff]   ;;  %v383_v7 = vld [vmem:[#allocation5 + $0x30] sm:$0xff]   ;;  %v384_v8 = vld [vmem:[#allocation5 + $0x38] sm:$0xff]   ;;  %s268_s1 = sshll.u32 %s514_s3, 4  ;;  %s269_s1 = int_to_ptr.vmem [resolvable:$true] %s268_s1 }
  0x4d   :  { %360 = vmatpush3.bf16.msra.mxu1 %v377_v1  ;;  %325 = vmatpush3.bf16.msra.mxu0 %v377_v1  ;;  %v385_v9 = vld [vmem:[#allocation2 + $0x8] sm:$0xff]   ;;  %v386_v10 = vld [vmem:[#allocation2] sm:$0xff]   ;;  %v387_v11 = vld [vmem:[#allocation2 + $0x10] ss:$0 sps:$4 sm:$0x11]   ;;  %s476_s13 = scalar_lea.vmem %s269_s1, 320  ;;  %p481_p5 = scmp.lt.s32.totalorder %s269_s1, %s269_s1 }
  0x4e   :  { %353 = vmatprep.subr.bf16.mxu1 %v512_v0  ;;  %326 = vmatprep.subr.bf16.mxu0 %v512_v0  ;;  %v312_v12 = vld [vmem:[#allocation8 + $0x8] sm:$0xff]   ;;  %v305_v13 = vld [vmem:[#allocation8] sm:$0xff]   ;;  %v282_v14 = vld [vmem:[#allocation7] ss:$0 sm:$0xff]  ;;  %p477_p4 = scmp.ne.s32.totalorder %s269_s1, %s476_s13  ;;  %p482_p6 = scmp.lt.s32.totalorder %s476_s13, %s476_s13 }
  0x4f   :  { %v310_v15 = vunpack.c.l.bf16 %v312_v12  ;;  %v306_v16 = vunpack.c.l.bf16 %v305_v13  ;;  %v311_v21 = vunpack.c.h.bf16 %v312_v12  ;;  %v307_v24 = vunpack.c.h.bf16 %v305_v13  ;;  %v224_v33 = vld [vmem:[#allocation8 + $0x10] sm:$0x1] }
  0x50   :  { %v229_v40 = vunpack.c.l.bf16 %v224_v33  ;;  %p483_p7 = por %p482_p6, %p481_p5 }
  0x51   :  { %361 = vmatpush3.bf16.msra.mxu1 %v378_v2  ;;  %327 = vmatpush3.bf16.msra.mxu0 %v378_v2 }
  0x52   :  { %354 = vmatprep.subr.bf16.mxu1 %v512_v0  ;;  %328 = vmatprep.subr.bf16.mxu0 %v512_v0  ;;  %p484_p8 = pnand %p483_p7, %p477_p4 }
  0x55   :  { %362 = vmatpush3.bf16.msra.mxu1 %v379_v3  ;;  %329 = vmatpush3.bf16.msra.mxu0 %v379_v3 }
  0x56   :  { %355 = vmatprep.subr.bf16.mxu1 %v512_v0  ;;  %330 = vmatprep.subr.bf16.mxu0 %v512_v0 }
  0x59   :  { %363 = vmatpush3.bf16.msra.mxu1 %v380_v4  ;;  %331 = vmatpush3.bf16.msra.mxu0 %v380_v4 }
  0x5a   :  { %356 = vmatprep.subr.bf16.mxu1 %v512_v0  ;;  %332 = vmatprep.subr.bf16.mxu0 %v512_v0 }
  0x5d   :  { %364 = vmatpush3.bf16.msra.mxu1 %v381_v5  ;;  %333 = vmatpush3.bf16.msra.mxu0 %v381_v5 }
  0x5e   :  { %357 = vmatprep.subr.bf16.mxu1 %v512_v0  ;;  %334 = vmatprep.subr.bf16.mxu0 %v512_v0 }
  0x61   :  { %365 = vmatpush3.bf16.msra.mxu1 %v382_v6  ;;  %335 = vmatpush3.bf16.msra.mxu0 %v382_v6 }
  0x62   :  { %358 = vmatprep.subr.bf16.mxu1 %v512_v0  ;;  %336 = vmatprep.subr.bf16.mxu0 %v512_v0 }
  0x65   :  { %366 = vmatpush3.bf16.msra.mxu1 %v383_v7  ;;  %337 = vmatpush3.bf16.msra.mxu0 %v383_v7 }
  0x66   :  { %359 = vmatprep.subr.bf16.mxu1 %v512_v0  ;;  %338 = vmatprep.subr.bf16.mxu0 %v512_v0 }
  0x69   :  { %367 = vmatpush3.bf16.msra.mxu1 %v384_v8  ;;  %339 = vmatpush3.bf16.msra.mxu0 %v384_v8 }
  0x6c   :  { %345 = vmatmul.mubr.bf16.vlgmr.msra.gmra.mrb[0].mxu1 %v385_v9  ;;  %341 = vmatmul.mubr.bf16.vlgmr.msra.gmra.mrb[0].mxu0 %v386_v10 }
  0x6d   :  { %348 = vmatprep.mubr.msk.bf16.mxu1 %vm513_vm0, %v512_v0 }
  0x74   :  { %349 = vmatmul.mubr.bf16.gmra.mrb[4].mxu1 %v387_v11 }
 0x13f   :  { %v206_v17 = vpop.f32.mrb[0].mxu1  ;;  %v198_v18 = vpop.f32.mrb[0].mxu0 }
 0x140   :  { %v207_v19 = vadd.f32 %v282_v14, %v206_v17  ;;  %v346_v20 = vpop.f32.mrb[1].mxu1  ;;  %v199_v22 = vadd.f32 %v282_v14, %v198_v18  ;;  %v342_v23 = vpop.f32.mrb[1].mxu0 }
 0x141   :  { %v209_v25 = vpop.f32.mrb[2].mxu1  ;;  %v201_v26 = vpop.f32.mrb[2].mxu0 }
 0x142   :  { %v232_v27 = vadd.f32 %v310_v15, %v207_v19  ;;  %v210_v28 = vadd.f32 %v282_v14, %v209_v25  ;;  %v230_v29 = vadd.f32 %v306_v16, %v199_v22  ;;  %v347_v30 = vpop.f32.mrb[3].mxu1  ;;  %v202_v31 = vadd.f32 %v282_v14, %v201_v26  ;;  %v343_v32 = vpop.f32.mrb[3].mxu0 }
 0x144   :  { %v301_v34 = vpack.c.bf16 %v232_v27, %v232_v27  ;;  %v233_v35 = vadd.f32 %v311_v21, %v210_v28  ;;  %v299_v36 = vpack.c.bf16 %v230_v29, %v230_v29  ;;  %v231_v37 = vadd.f32 %v307_v24, %v202_v31 }
 0x146   :  { %259 = vst.msk [vmem:[#allocation10 + $0x8] sm:$0xf] %vm256_vm1, %v301_v34  ;;  %v302_v38 = vpack.c.bf16 %v233_v35, %v233_v35  ;;  %257 = vst.msk [vmem:[#allocation10] sm:$0xf] %vm256_vm1, %v299_v36  ;;  %v300_v39 = vpack.c.bf16 %v231_v37, %v231_v37 }
 0x147   :  { %v214_v41 = vpop.f32.mrb[4].mxu1 }
 0x148   :  { %260 = vst.msk [vmem:[#allocation10 + $0xc] sm:$0xf] %vm256_vm1, %v302_v38  ;;  %258 = vst.msk [vmem:[#allocation10 + $0x4] sm:$0xf] %vm256_vm1, %v300_v39  ;;  %v215_v42 = vadd.f32 %v282_v14, %v214_v41  ;;  %v350_v43 = vpop.f32.mrb[5].mxu1 }
 0x149   :  { %v217_v44 = vpop.f32.mrb[6].mxu1 }
 0x14a   :  { %v234_v45 = vadd.f32 %v229_v40, %v215_v42  ;;  %v351_v46 = vpop.f32.mrb[7].mxu1 }
 0x14c   :  { %v303_v47 = vpack.c.bf16 %v234_v45, %v234_v45 }
 0x14e   :  { %262 = vst.msk [vmem:[#allocation10 + $0x10] sm:$0x1] %vm261_vm2, %v303_v47 }
 0x14f   :  { %487 = shalt.err (!%p484_p8)
}
 0x150   :  { %s488_s16 = scalar_lea.hbm %s633_s4, 320 }
 0x151   :  { %p489_p9 = scmp.ne.s32.totalorder %s633_s4, %s488_s16  ;;  %p492_p10 = scmp.lt.u32.totalorder %s488_s16, %s633_s4 }
 0x153   :  { %p494_p11 = pnand %p492_p10, %p489_p9 }
 0x155   :  { %497 = shalt.err (!%p494_p11)
}
 0x156   :  { %274 = dma.vmem_to_hbm [thread:$0]  %s269_s1, 320, %s633_s4, [#allocation4], %s508_s27, %s508_s27, %s509_s28  }
 0x157   :  { %504 = dma.done.wait [#allocation4], 320  }
 0x158   :  { %505 = vsyncadd [#allocation4], 4294966976 }
 0x159   :  { %278 = vsyncpa [#allocation3], 1 }
 0x15a   :  { %279 = vsyncpa [#allocation6], 1 }
 0x15b   :  { %280 = vsyncpa [#allocation9], 1 }
 0x15c   :  { %281 = vsyncpa [#allocation4], 1 }

// kernel: _lambda_.39
= control target key start
LH: loop header
LB: loop body
LE: loop exit
PB: predicated region body
PF: predicated region fallthrough
CT: control target
= control target key end

     0   :  { %10 = vsyncpa [#allocation3], 0  ;;  %s752_s0 = inlined_call_operand.hbm [shape: bf16[34,32], index: 0, kind: input, shape index: {}]   ;;  %s753_s1 = inlined_call_operand.hbm [shape: bf16[32,128], index: 1, kind: input, shape index: {}]   ;;  %s754_s2 = inlined_call_operand.hbm [shape: f32[1,128], index: 2, kind: input, shape index: {}]   ;;  %s755_s3 = inlined_call_operand.hbm [shape: f32[1,32], index: 3, kind: input, shape index: {}]   ;;  %s756_s4 = inlined_call_operand.hbm [shape: f32[1,32], index: 4, kind: input, shape index: {}]   ;;  %s757_s5 = inlined_call_operand.hbm [shape: bf16[34,128], index: 5, kind: output, shape index: {}]  }
   0x1   :  { %11 = vsyncpa [#allocation6], 0 }
   0x2   :  { %12 = vsyncpa [#allocation9], 0 }
   0x3   :  { %13 = vsyncpa [#allocation4], 0  ;;  %s602_s18 = smov [#allocation5]   ;;  %s603_s20 = smov [#allocation8]  }
   0x4   :  { %s31_s19 = sshll.u32 %s602_s18, 4  ;;  %s54_s21 = sshll.u32 %s603_s20, 4  ;;  %s32_s19 = int_to_ptr.vmem [resolvable:$true] %s31_s19  ;;  %s642_s21 = int_to_ptr.vmem [resolvable:$true] %s54_s21 }
   0x5   :  { %s462_s24 = scalar_lea.hbm %s753_s1, 256 }
   0x6   :  { %p463_p0 = scmp.ne.s32.totalorder %s753_s1, %s462_s24  ;;  %p466_p1 = scmp.lt.u32.totalorder %s462_s24, %s753_s1 }
   0x8   :  { %p468_p2 = pnand %p466_p1, %p463_p0 }
   0xa   :  { %471 = shalt.err (!%p468_p2)
}
   0xb   :  { %s472_s29 = scalar_lea.vmem %s32_s19, 256  ;;  %p477_p4 = scmp.lt.s32.totalorder %s32_s19, %s32_s19 }
   0xc   :  { %p473_p3 = scmp.ne.s32.totalorder %s32_s19, %s472_s29  ;;  %p478_p5 = scmp.lt.s32.totalorder %s472_s29, %s472_s29 }
   0xe   :  { %p479_p6 = por %p478_p5, %p477_p4 }
  0x10   :  { %p480_p7 = pnand %p479_p6, %p473_p3 }
  0x12   :  { %483 = shalt.err (!%p480_p7)
}
  0x13   :  { %s604_s30 = smov 64   ;;  %s605_s6 = smov 4  }
  0x14   :  { %37 = dma.hbm_to_vmem [thread:$0]  %s753_s1, 256, %s32_s19, [#allocation6], %s604_s30, %s604_s30, %s605_s6  }
  0x15   :  { %s484_s11 = scalar_lea.hbm %s755_s3, 16 }
  0x16   :  { %p485_p8 = scmp.ne.s32.totalorder %s755_s3, %s484_s11  ;;  %p488_p9 = scmp.lt.u32.totalorder %s484_s11, %s755_s3 }
  0x18   :  { %p490_p10 = pnand %p488_p9, %p485_p8 }
  0x1a   :  { %493 = shalt.err (!%p490_p10)
}
  0x1b   :  { %s494_s16 = scalar_lea.vmem %s642_s21, 16  ;;  %s498_s1 = scalar_lea.vmem %s642_s21, 32 }
  0x1c   :  { %p495_p11 = scmp.ne.s32.totalorder %s642_s21, %s494_s16  ;;  %p499_p12 = scmp.lt.s32.totalorder %s642_s21, %s642_s21 }
  0x1d   :  { %p500_p13 = scmp.lt.s32.totalorder %s498_s1, %s494_s16 }
  0x1f   :  { %p501_p0 = por %p500_p13, %p499_p12 }
  0x21   :  { %p502_p1 = pnand %p501_p0, %p495_p11 }
  0x23   :  { %505 = shalt.err (!%p502_p1)
}
  0x24   :  { %57 = dma.hbm_to_vmem [thread:$0]  %s755_s3, 16, %s642_s21, [#allocation9]  }
  0x25   :  { %s606_s19 = smov [#allocation2]   ;;  %s607_s22 = smov [#allocation7]  }
  0x26   :  { %s19_s20 = sshll.u32 %s606_s19, 4  ;;  %s44_s23 = sshll.u32 %s607_s22, 4  ;;  %s20_s20 = int_to_ptr.vmem [resolvable:$true] %s19_s20  ;;  %s45_s23 = int_to_ptr.vmem [resolvable:$true] %s44_s23 }
  0x27   :  { %s506_s26 = scalar_lea.hbm %s752_s0, 320 }
  0x28   :  { %p507_p2 = scmp.ne.s32.totalorder %s752_s0, %s506_s26  ;;  %p510_p3 = scmp.lt.u32.totalorder %s506_s26, %s752_s0 }
  0x2a   :  { %p512_p4 = pnand %p510_p3, %p507_p2 }
  0x2c   :  { %515 = shalt.err (!%p512_p4)
}
  0x2d   :  { %s516_s3 = scalar_lea.vmem %s20_s20, 320  ;;  %p521_p6 = scmp.lt.s32.totalorder %s20_s20, %s20_s20 }
  0x2e   :  { %p517_p5 = scmp.ne.s32.totalorder %s20_s20, %s516_s3  ;;  %p522_p7 = scmp.lt.s32.totalorder %s516_s3, %s516_s3 }
  0x30   :  { %p523_p8 = por %p522_p7, %p521_p6 }
  0x32   :  { %p524_p9 = pnand %p523_p8, %p517_p5 }
  0x34   :  { %527 = shalt.err (!%p524_p9)
}
  0x35   :  { %25 = dma.hbm_to_vmem [thread:$0]  %s752_s0, 320, %s20_s20, [#allocation3], %s604_s30, %s604_s30, %s605_s6  }
  0x36   :  { %s528_s11 = scalar_lea.hbm %s754_s2, 16 }
  0x37   :  { %p529_p10 = scmp.ne.s32.totalorder %s754_s2, %s528_s11  ;;  %p532_p11 = scmp.lt.u32.totalorder %s528_s11, %s754_s2 }
  0x39   :  { %p534_p12 = pnand %p532_p11, %p529_p10 }
  0x3b   :  { %537 = shalt.err (!%p534_p12)
}
  0x3c   :  { %s538_s16 = scalar_lea.vmem %s45_s23, 16  ;;  %s542_s1 = scalar_lea.vmem %s45_s23, 32 }
  0x3d   :  { %p539_p13 = scmp.ne.s32.totalorder %s45_s23, %s538_s16  ;;  %p543_p0 = scmp.lt.s32.totalorder %s45_s23, %s45_s23 }
  0x3e   :  { %p544_p1 = scmp.lt.s32.totalorder %s542_s1, %s538_s16 }
  0x40   :  { %p545_p2 = por %p544_p1, %p543_p0 }
  0x42   :  { %p546_p3 = pnand %p545_p2, %p539_p13 }
  0x44   :  { %549 = shalt.err (!%p546_p3)
}
  0x45   :  { %47 = dma.hbm_to_vmem [thread:$0]  %s754_s2, 16, %s45_s23, [#allocation6]  }
  0x46   :  { %s608_s18 = smov [#allocation10]   ;;  %s550_s24 = scalar_lea.hbm %s756_s4, 16 }
  0x47   :  { %s64_s19 = sshll.u32 %s608_s18, 4  ;;  %p551_p4 = scmp.ne.s32.totalorder %s756_s4, %s550_s24  ;;  %s65_s19 = int_to_ptr.vmem [resolvable:$true] %s64_s19 }
  0x48   :  { %p554_p5 = scmp.lt.u32.totalorder %s550_s24, %s756_s4 }
  0x4a   :  { %p556_p6 = pnand %p554_p5, %p551_p4 }
  0x4c   :  { %559 = shalt.err (!%p556_p6)
}
  0x4d   :  { %s560_s29 = scalar_lea.vmem %s65_s19, 16  ;;  %s564_s2 = scalar_lea.vmem %s65_s19, 32 }
  0x4e   :  { %p561_p7 = scmp.ne.s32.totalorder %s65_s19, %s560_s29  ;;  %p565_p8 = scmp.lt.s32.totalorder %s65_s19, %s65_s19 }
  0x4f   :  { %p566_p9 = scmp.lt.s32.totalorder %s564_s2, %s560_s29 }
  0x51   :  { %p567_p10 = por %p566_p9, %p565_p8 }
  0x53   :  { %p568_p11 = pnand %p567_p10, %p561_p7 }
  0x55   :  { %571 = shalt.err (!%p568_p11)
}
  0x56   :  { %67 = dma.hbm_to_vmem [thread:$0]  %s756_s4, 16, %s65_s19, [#allocation9]  }
  0x57   :  { %594 = dma.done.wait [#allocation3], 320  }
  0x58   :  { %595 = vsyncadd [#allocation3], 4294966976 }
  0x59   :  { %596 = dma.done.wait [#allocation6], 272  }
  0x5a   :  { %597 = vsyncadd [#allocation6], 4294967024 }
  0x5b   :  { %598 = dma.done.wait [#allocation9], 32  }
  0x5c   :  { %599 = vsyncadd [#allocation9], 4294967264  ;;  %v403_v0 = vld [vmem:[#allocation2 + $0x8] sm:$0xff]   ;;  %vm94_vm0 = vcmask 261120   ;;  %v386_v1 = vld [vmem:[#allocation2] sm:$0xff]   ;;  %vm107_vm1 = vcmask 254976  }
  0x5d   :  { %v391_v2 = vunpack.c.l.bf16 %v403_v0  ;;  %v392_v3 = vunpack.c.h.bf16 %v403_v0  ;;  %v387_v4 = vunpack.c.l.bf16 %v386_v1  ;;  %v88_v5 = vld [vmem:[#allocation2 + $0x10] sm:$0x1]  ;;  %v388_v6 = vunpack.c.h.bf16 %v386_v1  ;;  %v440_v38 = vld [vmem:[#allocation5] sm:$0xff]   ;;  %v441_v40 = vld [vmem:[#allocation5 + $0x8] sm:$0xff]   ;;  %s611_s4 = smov [#allocation11]  }
  0x5e   :  { %v93_v10 = vunpack.c.l.bf16 %v88_v5  ;;  %v609_v39 = vmov 0.0   ;;  %vm610_vm2 = vmmov 0   ;;  %v367_v58 = vld [vmem:[#allocation8] ss:$0 sm:$0xff]  ;;  %v368_v0 = vld [vmem:[#allocation10] ss:$0 sm:$0xff] }
  0x5f   :  { %v101_v7 = vsel %vm94_vm0, %v391_v2, 0.0  ;;  %v95_v8 = vsel %vm94_vm0, %v387_v4, 0.0  ;;  %v104_v9 = vsel %vm94_vm0, %v392_v3, 0.0  ;;  %v98_v11 = vsel %vm94_vm0, %v388_v6, 0.0  ;;  %426 = vmatprep.subr.bf16.mxu1 %v609_v39  ;;  %410 = vmatprep.subr.bf16.mxu0 %v609_v39  ;;  %s353_s3 = sshll.u32 %s611_s4, 4  ;;  %s354_s3 = int_to_ptr.vmem [resolvable:$true] %s353_s3 }
  0x60   :  { %102 = vadd.xlane.f32.xlu0 %v101_v7  ;;  %96 = vadd.xlane.f32.xlu1 %v95_v8  ;;  %v108_v12 = vsel %vm107_vm1, %v93_v10, 0.0  ;;  %s572_s21 = scalar_lea.vmem %s354_s3, 320  ;;  %p577_p13 = scmp.lt.s32.totalorder %s354_s3, %s354_s3 }
  0x61   :  { %428 = vmatpush3.bf16.msra.mxu1 %v440_v38  ;;  %411 = vmatpush3.bf16.msra.mxu0 %v440_v38  ;;  %p573_p12 = scmp.ne.s32.totalorder %s354_s3, %s572_s21  ;;  %p578_p0 = scmp.lt.s32.totalorder %s572_s21, %s572_s21 }
  0x62   :  { %427 = vmatprep.subr.bf16.mxu1 %v609_v39  ;;  %412 = vmatprep.subr.bf16.mxu0 %v609_v39 }
  0x63   :  { %418 = vmatprep.mubr.msk.bf16.mxu1 %vm610_vm2, %v609_v39  ;;  %414 = vmatprep.mubr.msk.bf16.mxu0 %vm610_vm2, %v609_v39  ;;  %p579_p1 = por %p578_p0, %p577_p13 }
  0x64   :  { %105 = vadd.xlane.f32.xlu0 %v104_v9  ;;  %99 = vadd.xlane.f32.xlu1 %v98_v11 }
  0x65   :  { %429 = vmatpush3.bf16.msra.mxu1 %v441_v40  ;;  %413 = vmatpush3.bf16.msra.mxu0 %v441_v40  ;;  %p580_p2 = pnand %p579_p1, %p573_p12 }
  0x68   :  { %109 = vadd.xlane.f32.xlu0 %v108_v12 }
  0xed   :  { %v103_v13 = vpop.xlane.xlu0 %102  ;;  %v97_v14 = vpop.xlane.xlu1 %96 }
  0xee   :  { %v114_v15 = vmul.f32 0.03125, %v103_v13  ;;  %v112_v16 = vmul.f32 0.03125, %v97_v14 }
  0xf0   :  { %v119_v17 = vsub.f32 %v391_v2, %v114_v15  ;;  %v721_v18 = vsub.f32 %v387_v4, %v112_v16 }
  0xf1   :  { %v106_v19 = vpop.xlane.xlu0 %105  ;;  %v100_v20 = vpop.xlane.xlu1 %99 }
  0xf2   :  { %v115_v21 = vmul.f32 0.03125, %v106_v19  ;;  %v124_v22 = vmul.f32 %v119_v17, %v119_v17  ;;  %v113_v23 = vmul.f32 0.03125, %v100_v20  ;;  %v122_v24 = vmul.f32 %v721_v18, %v721_v18 }
  0xf4   :  { %v120_v25 = vsub.f32 %v392_v3, %v115_v21  ;;  %v133_v26 = vsel %vm94_vm0, %v124_v22, 0.0  ;;  %v118_v27 = vsub.f32 %v388_v6, %v113_v23  ;;  %v127_v31 = vsel %vm94_vm0, %v122_v24, 0.0 }
  0xf5   :  { %v110_v28 = vpop.xlane.xlu0 %109  ;;  %134 = vadd.xlane.f32.xlu1 %v133_v26 }
  0xf6   :  { %v116_v29 = vmul.f32 0.03125, %v110_v28  ;;  %v125_v30 = vmul.f32 %v120_v25, %v120_v25  ;;  %v123_v32 = vmul.f32 %v118_v27, %v118_v27 }
  0xf8   :  { %v121_v33 = vsub.f32 %v93_v10, %v116_v29  ;;  %v136_v34 = vsel %vm94_vm0, %v125_v30, 0.0  ;;  %v130_v36 = vsel %vm94_vm0, %v123_v32, 0.0 }
  0xf9   :  { %137 = vadd.xlane.f32.xlu0 %v136_v34  ;;  %128 = vadd.xlane.f32.xlu1 %v127_v31 }
  0xfa   :  { %v126_v35 = vmul.f32 %v121_v33, %v121_v33 }
  0xfc   :  { %v139_v37 = vsel %vm107_vm1, %v126_v35, 0.0 }
  0xfd   :  { %140 = vadd.xlane.f32.xlu1 %v139_v37  ;;  %131 = vadd.xlane.f32.xlu0 %v130_v36 }
 0x182   :  { %v135_v41 = vpop.xlane.xlu1 %134 }
 0x183   :  { %v144_v42 = vmul.f32 0.03125, %v135_v41 }
 0x185   :  { %v149_v43 = vadd.f32 1e-05, %v144_v42 }
 0x186   :  { %v138_v44 = vpop.xlane.xlu0 %137  ;;  %v129_v45 = vpop.xlane.xlu1 %128 }
 0x187   :  { %442 = vrsqrt.f32 %v149_v43  ;;  %v145_v46 = vmul.f32 0.03125, %v138_v44  ;;  %v142_v47 = vmul.f32 0.03125, %v129_v45 }
 0x189   :  { %v150_v48 = vadd.f32 1e-05, %v145_v46  ;;  %v147_v49 = vadd.f32 1e-05, %v142_v47 }
 0x18a   :  { %v132_v50 = vpop.xlane.xlu0 %131  ;;  %v141_v51 = vpop.xlane.xlu1 %140 }
 0x18b   :  { %444 = vrsqrt.f32 %v150_v48  ;;  %v143_v52 = vmul.f32 0.03125, %v132_v50  ;;  %v146_v53 = vmul.f32 0.03125, %v141_v51 }
 0x18c   :  { %446 = vrsqrt.f32 %v147_v49 }
 0x18d   :  { %v148_v54 = vadd.f32 1e-05, %v143_v52  ;;  %v151_v55 = vadd.f32 1e-05, %v146_v53 }
 0x18f   :  { %448 = vrsqrt.f32 %v148_v54 }
 0x190   :  { %450 = vrsqrt.f32 %v151_v55 }
 0x191   :  { %v443_v56 = vpop.eup %442 }
 0x192   :  { %v159_v57 = vmul.f32 %v443_v56, %v119_v17  ;;  %v369_v17 = vld [vmem:[#allocation7] ss:$0 sm:$0xff] }
 0x194   :  { %v171_v62 = vmul.f32 %v367_v58, %v159_v57 }
 0x195   :  { %v445_v59 = vpop.eup %444 }
 0x196   :  { %v447_v60 = vpop.eup %446  ;;  %v160_v61 = vmul.f32 %v445_v59, %v120_v25  ;;  %v183_v5 = vadd.f32 %v368_v0, %v171_v62 }
 0x197   :  { %v157_v63 = vmul.f32 %v447_v60, %v721_v18 }
 0x198   :  { %v172_v1 = vmul.f32 %v367_v58, %v160_v61 }
 0x199   :  { %v449_v2 = vpop.eup %448  ;;  %v169_v7 = vmul.f32 %v367_v58, %v157_v63 }
 0x19a   :  { %v451_v3 = vpop.eup %450  ;;  %v158_v4 = vmul.f32 %v449_v2, %v118_v27  ;;  %v184_v6 = vadd.f32 %v368_v0, %v172_v1 }
 0x19b   :  { %v161_v8 = vmul.f32 %v451_v3, %v121_v33  ;;  %v181_v12 = vadd.f32 %v368_v0, %v169_v7 }
 0x19c   :  { %v187_v9 = vpack.c.bf16 %v184_v6, %v183_v5  ;;  %v170_v10 = vmul.f32 %v367_v58, %v158_v4 }
 0x19d   :  { %v173_v11 = vmul.f32 %v367_v58, %v161_v8 }
 0x19e   :  { %419 = vmatmul.mubr.msk.bf16.vlgmr.msra.gmra.mrb[0].mxu1 %vm94_vm0, %v187_v9  ;;  %v182_v13 = vadd.f32 %v368_v0, %v170_v10 }
 0x19f   :  { %422 = vmatprep.mubr.msk.bf16.mxu1 %vm610_vm2, %v609_v39  ;;  %v185_v15 = vadd.f32 %v368_v0, %v173_v11 }
 0x1a0   :  { %v186_v14 = vpack.c.bf16 %v182_v13, %v181_v12 }
 0x1a1   :  { %v188_v16 = vpack.c.bf16 %v185_v15, %v185_v15 }
 0x1a2   :  { %415 = vmatmul.mubr.msk.bf16.vlgmr.msra.gmra.mrb[0].mxu0 %vm94_vm0, %v186_v14 }
 0x1a6   :  { %423 = vmatmul.mubr.msk.bf16.gmra.mrb[4].mxu1 %vm94_vm0, %v188_v16 }
 0x271   :  { %v263_v18 = vpop.f32.mrb[0].mxu1 }
 0x272   :  { %v264_v19 = vadd.f32 %v369_v17, %v263_v18  ;;  %v420_v20 = vpop.f32.mrb[1].mxu1 }
 0x273   :  { %v266_v21 = vpop.f32.mrb[2].mxu1 }
 0x274   :  { %v284_v22 = vmul.f32 0.044715, %v264_v19  ;;  %v267_v23 = vadd.f32 %v369_v17, %v266_v21  ;;  %v421_v24 = vpop.f32.mrb[3].mxu1  ;;  %v279_v63 = vmul.f32 0.5, %v264_v19 }
 0x275   :  { %v255_v25 = vpop.f32.mrb[0].mxu0 }
 0x276   :  { %v289_v26 = vmul.f32 %v284_v22, %v264_v19  ;;  %v285_v27 = vmul.f32 0.044715, %v267_v23  ;;  %v256_v28 = vadd.f32 %v369_v17, %v255_v25  ;;  %v416_v29 = vpop.f32.mrb[1].mxu0  ;;  %v280_v0 = vmul.f32 0.5, %v267_v23 }
 0x277   :  { %v258_v30 = vpop.f32.mrb[2].mxu0 }
 0x278   :  { %v294_v31 = vmul.f32 %v289_v26, %v264_v19  ;;  %v290_v32 = vmul.f32 %v285_v27, %v267_v23  ;;  %v282_v33 = vmul.f32 0.044715, %v256_v28  ;;  %v259_v34 = vadd.f32 %v369_v17, %v258_v30  ;;  %v417_v35 = vpop.f32.mrb[3].mxu0 }
 0x279   :  { %v271_v36 = vpop.f32.mrb[4].mxu1  ;;  %v277_v7 = vmul.f32 0.5, %v256_v28 }
 0x27a   :  { %v299_v37 = vadd.f32 %v294_v31, %v264_v19  ;;  %v295_v38 = vmul.f32 %v290_v32, %v267_v23  ;;  %v287_v39 = vmul.f32 %v282_v33, %v256_v28  ;;  %v283_v40 = vmul.f32 0.044715, %v259_v34  ;;  %v424_v41 = vpop.f32.mrb[5].mxu1 }
 0x27b   :  { %v272_v42 = vadd.f32 %v369_v17, %v271_v36  ;;  %v274_v43 = vpop.f32.mrb[6].mxu1  ;;  %v278_v8 = vmul.f32 0.5, %v259_v34 }
 0x27c   :  { %v304_v44 = vmul.f32 0.7978846, %v299_v37  ;;  %v300_v45 = vadd.f32 %v295_v38, %v267_v23  ;;  %v292_v46 = vmul.f32 %v287_v39, %v256_v28  ;;  %v288_v47 = vmul.f32 %v283_v40, %v259_v34  ;;  %v425_v48 = vpop.f32.mrb[7].mxu1 }
 0x27d   :  { %v286_v49 = vmul.f32 0.044715, %v272_v42  ;;  %v281_v14 = vmul.f32 0.5, %v272_v42 }
 0x27e   :  { %452 = vtanh.f32 %v304_v44  ;;  %v305_v50 = vmul.f32 0.7978846, %v300_v45  ;;  %v297_v51 = vadd.f32 %v292_v46, %v256_v28  ;;  %v293_v52 = vmul.f32 %v288_v47, %v259_v34 }
 0x27f   :  { %v291_v53 = vmul.f32 %v286_v49, %v272_v42 }
 0x280   :  { %454 = vtanh.f32 %v305_v50  ;;  %v302_v54 = vmul.f32 0.7978846, %v297_v51  ;;  %v298_v55 = vadd.f32 %v293_v52, %v259_v34 }
 0x281   :  { %v296_v56 = vmul.f32 %v291_v53, %v272_v42 }
 0x282   :  { %456 = vtanh.f32 %v302_v54  ;;  %v303_v57 = vmul.f32 0.7978846, %v298_v55 }
 0x283   :  { %v301_v58 = vadd.f32 %v296_v56, %v272_v42 }
 0x284   :  { %458 = vtanh.f32 %v303_v57 }
 0x285   :  { %v306_v59 = vmul.f32 0.7978846, %v301_v58 }
 0x287   :  { %460 = vtanh.f32 %v306_v59 }
 0x288   :  { %v453_v60 = vpop.eup %452 }
 0x289   :  { %v314_v61 = vadd.f32 1.0, %v453_v60 }
 0x28a   :  { %v455_v62 = vpop.eup %454 }
 0x28b   :  { %v315_v1 = vadd.f32 1.0, %v455_v62  ;;  %v319_v4 = vmul.f32 %v314_v61, %v279_v63 }
 0x28c   :  { %v457_v2 = vpop.eup %456 }
 0x28d   :  { %v312_v3 = vadd.f32 1.0, %v457_v2  ;;  %v320_v5 = vmul.f32 %v315_v1, %v280_v0 }
 0x28e   :  { %v459_v6 = vpop.eup %458 }
 0x28f   :  { %v313_v9 = vadd.f32 1.0, %v459_v6  ;;  %v401_v10 = vpack.c.bf16 %v320_v5, %v319_v4  ;;  %v317_v12 = vmul.f32 %v312_v3, %v277_v7 }
 0x291   :  { %v461_v11 = vpop.eup %460  ;;  %v318_v13 = vmul.f32 %v313_v9, %v278_v8  ;;  %404 = vst [vmem:[#allocation11 + $0x8] sm:$0xff] %v401_v10  }
 0x292   :  { %v316_v15 = vadd.f32 1.0, %v461_v11 }
 0x293   :  { %v396_v16 = vpack.c.bf16 %v318_v13, %v317_v12 }
 0x294   :  { %v321_v17 = vmul.f32 %v316_v15, %v281_v14 }
 0x295   :  { %397 = vst [vmem:[#allocation11] sm:$0xff] %v396_v16  }
 0x296   :  { %v384_v18 = vpack.c.bf16 %v321_v17, %v321_v17 }
 0x298   :  { %347 = vst [vmem:[#allocation11 + $0x10] sm:$0x1] %v384_v18 }
 0x299   :  { %583 = shalt.err (!%p580_p2)
}
 0x29a   :  { %s584_s10 = scalar_lea.hbm %s757_s5, 320 }
 0x29b   :  { %p585_p3 = scmp.ne.s32.totalorder %s757_s5, %s584_s10  ;;  %p588_p4 = scmp.lt.u32.totalorder %s584_s10, %s757_s5 }
 0x29d   :  { %p590_p5 = pnand %p588_p4, %p585_p3 }
 0x29f   :  { %593 = shalt.err (!%p590_p5)
}
 0x2a0   :  { %359 = dma.vmem_to_hbm [thread:$0]  %s354_s3, 320, %s757_s5, [#allocation4], %s604_s30, %s604_s30, %s605_s6  }
 0x2a1   :  { %600 = dma.done.wait [#allocation4], 320  }
 0x2a2   :  { %601 = vsyncadd [#allocation4], 4294966976 }
 0x2a3   :  { %363 = vsyncpa [#allocation3], 1 }
 0x2a4   :  { %364 = vsyncpa [#allocation6], 1 }
 0x2a5   :  { %365 = vsyncpa [#allocation9], 1 }
 0x2a6   :  { %366 = vsyncpa [#allocation4], 1 }

// kernel: _lambda_.47
= control target key start
LH: loop header
LB: loop body
LE: loop exit
PB: predicated region body
PF: predicated region fallthrough
CT: control target
= control target key end

     0   :  { %8 = vsyncpa [#allocation5], 0  ;;  %s426_s0 = inlined_call_operand.hbm [shape: f32[32,48], index: 0, kind: input, shape index: {}]   ;;  %s427_s1 = inlined_call_operand.hbm [shape: f32[32,48], index: 1, kind: input, shape index: {}]   ;;  %s428_s2 = inlined_call_operand.hbm [shape: f32[32,1], index: 2, kind: input, shape index: {}]   ;;  %s429_s3 = inlined_call_operand.hbm [shape: f32[1,1], index: 3, kind: output, shape index: {}]  }
   0x1   :  { %9 = vsyncpa [#allocation8], 0 }
   0x2   :  { %10 = vsyncpa [#allocation6], 0  ;;  %s311_s12 = smov [#allocation7]   ;;  %s312_s14 = smov [#allocation4]  }
   0x3   :  { %s28_s13 = sshll.u32 %s311_s12, 4  ;;  %s16_s15 = sshll.u32 %s312_s14, 4  ;;  %s29_s13 = int_to_ptr.vmem [resolvable:$true] %s28_s13  ;;  %s338_s15 = int_to_ptr.vmem [resolvable:$true] %s16_s15 }
   0x4   :  { %s217_s18 = scalar_lea.hbm %s427_s1, 512 }
   0x5   :  { %p218_p0 = scmp.ne.s32.totalorder %s427_s1, %s217_s18  ;;  %p221_p1 = scmp.lt.u32.totalorder %s217_s18, %s427_s1 }
   0x7   :  { %p223_p2 = pnand %p221_p1, %p218_p0 }
   0x9   :  { %226 = shalt.err (!%p223_p2)
}
   0xa   :  { %s227_s23 = scalar_lea.vmem %s29_s13, 512  ;;  %p232_p4 = scmp.lt.s32.totalorder %s29_s13, %s29_s13 }
   0xb   :  { %p228_p3 = scmp.ne.s32.totalorder %s29_s13, %s227_s23  ;;  %p233_p5 = scmp.lt.s32.totalorder %s227_s23, %s227_s23 }
   0xd   :  { %p234_p6 = por %p233_p5, %p232_p4 }
   0xf   :  { %p235_p7 = pnand %p234_p6, %p228_p3 }
  0x11   :  { %238 = shalt.err (!%p235_p7)
}
  0x12   :  { %s313_s24 = smov 128   ;;  %s314_s25 = smov 8  }
  0x13   :  { %34 = dma.hbm_to_vmem [thread:$0]  %s427_s1, 512, %s29_s13, [#allocation8], %s313_s24, %s313_s24, %s314_s25  }
  0x14   :  { %s239_s30 = scalar_lea.hbm %s426_s0, 512 }
  0x15   :  { %p240_p8 = scmp.ne.s32.totalorder %s426_s0, %s239_s30  ;;  %p243_p9 = scmp.lt.u32.totalorder %s239_s30, %s426_s0 }
  0x17   :  { %p245_p10 = pnand %p243_p9, %p240_p8 }
  0x19   :  { %248 = shalt.err (!%p245_p10)
}
  0x1a   :  { %s249_s8 = scalar_lea.vmem %s338_s15, 512  ;;  %p254_p12 = scmp.lt.s32.totalorder %s338_s15, %s338_s15 }
  0x1b   :  { %p250_p11 = scmp.ne.s32.totalorder %s338_s15, %s249_s8  ;;  %p255_p13 = scmp.lt.s32.totalorder %s249_s8, %s249_s8 }
  0x1d   :  { %p256_p0 = por %p255_p13, %p254_p12 }
  0x1f   :  { %p257_p1 = pnand %p256_p0, %p250_p11 }
  0x21   :  { %260 = shalt.err (!%p257_p1)
}
  0x22   :  { %22 = dma.hbm_to_vmem [thread:$0]  %s426_s0, 512, %s338_s15, [#allocation5], %s313_s24, %s313_s24, %s314_s25  }
  0x23   :  { %s315_s10 = smov [#allocation9]   ;;  %s261_s14 = scalar_lea.hbm %s428_s2, 512 }
  0x24   :  { %s40_s11 = sshll.u32 %s315_s10, 4  ;;  %p262_p2 = scmp.ne.s32.totalorder %s428_s2, %s261_s14  ;;  %s41_s11 = int_to_ptr.vmem [resolvable:$true] %s40_s11 }
  0x25   :  { %p265_p3 = scmp.lt.u32.totalorder %s261_s14, %s428_s2 }
  0x27   :  { %p267_p4 = pnand %p265_p3, %p262_p2 }
  0x29   :  { %270 = shalt.err (!%p267_p4)
}
  0x2a   :  { %s271_s20 = scalar_lea.vmem %s41_s11, 512  ;;  %p276_p6 = scmp.lt.s32.totalorder %s41_s11, %s41_s11 }
  0x2b   :  { %p272_p5 = scmp.ne.s32.totalorder %s41_s11, %s271_s20  ;;  %p277_p7 = scmp.lt.s32.totalorder %s271_s20, %s271_s20 }
  0x2d   :  { %p278_p8 = por %p277_p7, %p276_p6 }
  0x2f   :  { %p279_p9 = pnand %p278_p8, %p272_p5 }
  0x31   :  { %282 = shalt.err (!%p279_p9)
}
  0x32   :  { %46 = dma.hbm_to_vmem [thread:$0]  %s428_s2, 512, %s41_s11, [#allocation8], %s313_s24, %s313_s24, %s314_s25  }
  0x33   :  { %305 = dma.done.wait [#allocation5], 512  }
  0x34   :  { %306 = vsyncadd [#allocation5], 4294966784 }
  0x35   :  { %307 = dma.done.wait [#allocation8], 1024  }
  0x36   :  { %308 = vsyncadd [#allocation8], 4294966272  ;;  %vm60_vm0 = vcmask 7168   ;;  %v316_v0 = vmov 0.0   ;;  %v69_v1 = vld [vmem:[#allocation4] sm:$0xff]  ;;  %v71_v3 = vld [vmem:[#allocation4 + $0x10] sm:$0xff] }
  0x37   :  { %61 = vst.msk [vmem:[#allocation2] sm:$0xff] %vm60_vm0, %v316_v0  ;;  %65 = vst.msk [vmem:[#allocation3] sm:$0xff] %vm60_vm0, %v316_v0  ;;  %v73_v2 = vld [vmem:[#allocation7] sm:$0xff]  ;;  %v75_v5 = vld [vmem:[#allocation7 + $0x10] sm:$0xff]  ;;  %vm85_vm1 = vcmask 392192   ;;  %s317_s22 = smov [#allocation10]  }
  0x38   :  { %62 = vst.msk [vmem:[#allocation2 + $0x8] sm:$0xff] %vm60_vm0, %v316_v0  ;;  %63 = vst.msk [vmem:[#allocation2 + $0x10] sm:$0xff] %vm60_vm0, %v316_v0  ;;  %v77_v4 = vsub.f32 %v69_v1, %v73_v2  ;;  %v70_v6 = vld [vmem:[#allocation4 + $0x8] sm:$0xff]  ;;  %v79_v8 = vsub.f32 %v71_v3, %v75_v5  ;;  %v72_v10 = vld [vmem:[#allocation4 + $0x18] sm:$0xff]  ;;  %s192_s23 = sshll.u32 %s317_s22, 4  ;;  %vm184_vm2 = vcmask 0   ;;  %s193_s23 = int_to_ptr.vmem [resolvable:$true] %s192_s23 }
  0x39   :  { %64 = vst.msk [vmem:[#allocation2 + $0x18] sm:$0xff] %vm60_vm0, %v316_v0  ;;  %66 = vst.msk [vmem:[#allocation3 + $0x8] sm:$0xff] %vm60_vm0, %v316_v0  ;;  %v74_v7 = vld [vmem:[#allocation7 + $0x8] sm:$0xff]  ;;  %v76_v11 = vld [vmem:[#allocation7 + $0x18] sm:$0xff]  ;;  %s283_s26 = scalar_lea.vmem %s193_s23, 16  ;;  %s287_s27 = scalar_lea.vmem %s193_s23, 32 }
  0x3a   :  { %67 = vst.msk [vmem:[#allocation3 + $0x10] sm:$0xff] %vm60_vm0, %v316_v0  ;;  %68 = vst.msk [vmem:[#allocation3 + $0x18] sm:$0xff] %vm60_vm0, %v316_v0  ;;  %v78_v9 = vsub.f32 %v70_v6, %v74_v7  ;;  %v81_v12 = vmul.f32 %v77_v4, %v77_v4  ;;  %v80_v13 = vsub.f32 %v72_v10, %v76_v11  ;;  %v103_v21 = vld [vmem:[#allocation9] sm:$0xff]  ;;  %v104_v23 = vld [vmem:[#allocation9 + $0x8] sm:$0xff]  ;;  %p284_p10 = scmp.ne.s32.totalorder %s193_s23, %s283_s26  ;;  %p288_p11 = scmp.lt.s32.totalorder %s193_s23, %s193_s23 }
  0x3b   :  { %v83_v14 = vmul.f32 %v79_v8, %v79_v8  ;;  %v105_v27 = vld [vmem:[#allocation9 + $0x10] sm:$0xff]  ;;  %v106_v30 = vld [vmem:[#allocation9 + $0x18] sm:$0xff]  ;;  %p289_p12 = scmp.lt.s32.totalorder %s287_s27, %s283_s26 }
  0x3c   :  { %v82_v15 = vmul.f32 %v78_v9, %v78_v9  ;;  %v86_v16 = vsel %vm85_vm1, %v81_v12, 0.0  ;;  %v84_v17 = vmul.f32 %v80_v13, %v80_v13 }
  0x3d   :  { %87 = vadd.xlane.f32.xlu0 %v86_v16  ;;  %v92_v18 = vsel %vm85_vm1, %v83_v14, 0.0  ;;  %p290_p13 = por %p289_p12, %p288_p11 }
  0x3e   :  { %93 = vadd.xlane.f32.xlu1 %v92_v18  ;;  %v89_v19 = vsel %vm85_vm1, %v82_v15, 0.0  ;;  %v95_v20 = vsel %vm85_vm1, %v84_v17, 0.0  ;;  %v124_v22 = vld [vmem:[#allocation3] sm:$0xff] }
  0x3f   :  { %v128_v25 = vadd.f32 %v124_v22, %v103_v21  ;;  %v107_v47 = vld [vmem:[#allocation2] sm:$0xff]  ;;  %v109_v50 = vld [vmem:[#allocation2 + $0x10] sm:$0xff]  ;;  %v108_v57 = vld [vmem:[#allocation2 + $0x8] sm:$0xff]  ;;  %p291_p0 = pnand %p290_p13, %p284_p10 }
  0x40   :  { %v125_v24 = vld [vmem:[#allocation3 + $0x8] sm:$0xff]  ;;  %v110_v60 = vld [vmem:[#allocation2 + $0x18] sm:$0xff] }
  0x41   :  { %90 = vadd.xlane.f32.xlu0 %v89_v19  ;;  %v129_v26 = vadd.f32 %v125_v24, %v104_v23  ;;  %v126_v28 = vld [vmem:[#allocation3 + $0x10] sm:$0xff]  ;;  %132 = vst.msk [vmem:[#allocation3] sm:$0xff] %vm60_vm0, %v128_v25  ;;  %v127_v31 = vld [vmem:[#allocation3 + $0x18] sm:$0xff] }
  0x42   :  { %96 = vadd.xlane.f32.xlu1 %v95_v20  ;;  %v130_v29 = vadd.f32 %v126_v28, %v105_v27  ;;  %v131_v32 = vadd.f32 %v127_v31, %v106_v30 }
  0x43   :  { %133 = vst.msk [vmem:[#allocation3 + $0x8] sm:$0xff] %vm60_vm0, %v129_v26 }
  0x44   :  { %134 = vst.msk [vmem:[#allocation3 + $0x10] sm:$0xff] %vm60_vm0, %v130_v29  ;;  %135 = vst.msk [vmem:[#allocation3 + $0x18] sm:$0xff] %vm60_vm0, %v131_v32 }
  0x48   :  { %v159_v33 = vld [vmem:[#allocation3] sm:$0xff] }
  0x49   :  { %v163_v35 = vsel %vm60_vm0, %v159_v33, 0.0 }
  0x4a   :  { %v160_v34 = vld [vmem:[#allocation3 + $0x8] sm:$0xff] }
  0x4b   :  { %v164_v36 = vsel %vm60_vm0, %v160_v34, 0.0  ;;  %v161_v37 = vld [vmem:[#allocation3 + $0x10] sm:$0xff]  ;;  %v162_v40 = vld [vmem:[#allocation3 + $0x18] sm:$0xff] }
  0x4c   :  { %v165_v38 = vadd.f32 %v164_v36, %v163_v35  ;;  %v166_v39 = vsel %vm60_vm0, %v161_v37, 0.0  ;;  %v168_v42 = vsel %vm60_vm0, %v162_v40, 0.0 }
  0x4e   :  { %v167_v41 = vadd.f32 %v166_v39, %v165_v38 }
  0x50   :  { %v169_v43 = vadd.f32 %v168_v42, %v167_v41 }
  0x52   :  { %170 = vadd.xlane.f32.xlu1 %v169_v43 }
  0xca   :  { %v88_v44 = vpop.xlane.xlu0 %87 }
  0xcb   :  { %v99_v45 = vmul.f32 0.020833334, %v88_v44  ;;  %v94_v46 = vpop.xlane.xlu1 %93 }
  0xcc   :  { %v101_v48 = vmul.f32 0.020833334, %v94_v46 }
  0xcd   :  { %v111_v49 = vmul.f32 %v103_v21, %v99_v45 }
  0xce   :  { %v113_v51 = vmul.f32 %v105_v27, %v101_v48  ;;  %v91_v52 = vpop.xlane.xlu0 %90 }
  0xcf   :  { %v115_v53 = vadd.f32 %v111_v49, %v107_v47  ;;  %v100_v54 = vmul.f32 0.020833334, %v91_v52  ;;  %v97_v55 = vpop.xlane.xlu1 %96 }
  0xd0   :  { %v117_v56 = vadd.f32 %v113_v51, %v109_v50  ;;  %v102_v58 = vmul.f32 0.020833334, %v97_v55 }
  0xd1   :  { %120 = vst.msk [vmem:[#allocation2] sm:$0xff] %vm60_vm0, %v115_v53  ;;  %v112_v59 = vmul.f32 %v104_v23, %v100_v54 }
  0xd2   :  { %122 = vst.msk [vmem:[#allocation2 + $0x10] sm:$0xff] %vm60_vm0, %v117_v56  ;;  %v114_v61 = vmul.f32 %v106_v30, %v102_v58 }
  0xd3   :  { %v116_v62 = vadd.f32 %v112_v59, %v108_v57 }
  0xd4   :  { %v118_v63 = vadd.f32 %v114_v61, %v110_v60 }
  0xd5   :  { %121 = vst.msk [vmem:[#allocation2 + $0x8] sm:$0xff] %vm60_vm0, %v116_v62 }
  0xd6   :  { %123 = vst.msk [vmem:[#allocation2 + $0x18] sm:$0xff] %vm60_vm0, %v118_v63 }
  0xd8   :  { %v139_v0 = vld [vmem:[#allocation2] sm:$0xff] }
  0xd9   :  { %v141_v2 = vld [vmem:[#allocation2 + $0x10] sm:$0xff]  ;;  %v143_v4 = vsel %vm60_vm0, %v139_v0, 0.0 }
  0xda   :  { %v146_v7 = vsel %vm60_vm0, %v141_v2, 0.0 }
  0xdc   :  { %v140_v1 = vld [vmem:[#allocation2 + $0x8] sm:$0xff] }
  0xdd   :  { %v142_v3 = vld [vmem:[#allocation2 + $0x18] sm:$0xff]  ;;  %v144_v5 = vsel %vm60_vm0, %v140_v1, 0.0 }
  0xde   :  { %v145_v6 = vadd.f32 %v144_v5, %v143_v4  ;;  %v148_v8 = vsel %vm60_vm0, %v142_v3, 0.0 }
  0xdf   :  { %v171_v11 = vpop.xlane.xlu1 %170 }
  0xe0   :  { %v147_v9 = vadd.f32 %v146_v7, %v145_v6  ;;  %v172_v12 = vrot.slane %v171_v11, 4 }
  0xe2   :  { %v149_v10 = vadd.f32 %v148_v8, %v147_v9  ;;  %v173_v13 = vadd.f32 %v172_v12, %v171_v11 }
  0xe4   :  { %150 = vadd.xlane.f32.xlu0 %v149_v10  ;;  %v174_v14 = vrot.slane %v173_v13, 2 }
  0xe6   :  { %v175_v18 = vadd.f32 %v174_v14, %v173_v13 }
  0xe8   :  { %v176_v21 = vrot.slane %v175_v18, 1 }
  0xea   :  { %v177_v24 = vadd.f32 %v176_v21, %v175_v18 }
 0x171   :  { %v151_v15 = vpop.xlane.xlu0 %150 }
 0x172   :  { %v152_v16 = vrot.slane %v151_v15, 4 }
 0x174   :  { %v153_v17 = vadd.f32 %v152_v16, %v151_v15 }
 0x176   :  { %v154_v19 = vrot.slane %v153_v17, 2 }
 0x178   :  { %v155_v20 = vadd.f32 %v154_v19, %v153_v17 }
 0x17a   :  { %v156_v22 = vrot.slane %v155_v20, 1 }
 0x17c   :  { %v157_v23 = vadd.f32 %v156_v22, %v155_v20 }
 0x17e   :  { %202 = vpush %v157_v23 }
 0x17f   :  { %204 = vpush %v177_v24 }
 0x1af   :  { %s203_s2 = spop %202 }
 0x1b0   :  { %s205_s21 = spop %204 }
 0x1b1   :  { %v179_v25 = vstv %s205_s21 }
 0x1b2   :  { %215 = vrcp.f32 %v179_v25 }
 0x1bc   :  { %v216_v26 = vpop.eup %215 }
 0x1bd   :  { %206 = vpush %v216_v26 }
 0x1ee   :  { %s207_s24 = spop %206 }
 0x1ef   :  { %s182_s25 = smul.f32 %s207_s24, %s203_s2 }
 0x1f1   :  { %v183_v27 = vstv %s182_s25 }
 0x1f2   :  { %185 = vst.msk [vmem:[#allocation10] sm:$0x1] %vm184_vm2, %v183_v27 }
 0x1f3   :  { %294 = shalt.err (!%p291_p0)
}
 0x1f4   :  { %s295_s30 = scalar_lea.hbm %s429_s3, 16 }
 0x1f5   :  { %p296_p1 = scmp.ne.s32.totalorder %s429_s3, %s295_s30  ;;  %p299_p2 = scmp.lt.u32.totalorder %s295_s30, %s429_s3 }
 0x1f7   :  { %p301_p3 = pnand %p299_p2, %p296_p1 }
 0x1f9   :  { %304 = shalt.err (!%p301_p3)
}
 0x1fa   :  { %195 = dma.vmem_to_hbm [thread:$0]  %s193_s23, 16, %s429_s3, [#allocation6]  }
 0x1fb   :  { %309 = dma.done.wait [#allocation6], 16  }
 0x1fc   :  { %310 = vsyncadd [#allocation6], 4294967280 }
 0x1fd   :  { %199 = vsyncpa [#allocation5], 1 }
 0x1fe   :  { %200 = vsyncpa [#allocation8], 1 }
 0x1ff   :  { %201 = vsyncpa [#allocation6], 1 }

</bundles_post_ra>
